<compile_context>
chip_gen: v7x
topology: tpu7x:2x2x1
jax: 0.10.0
libtpu: 0.0.40
codegen_flags: <defaults>
</compile_context>

<pallas_src>
import functools

import jax
import jax.numpy as jnp
from jax.experimental import pallas as pl
from jax.experimental.pallas import tpu as pltpu

EPS = 1e-5                  # nn.InstanceNorm2d default eps
SOFTGATE_COEFF = 12.0       # SoftGate.COEFF
_IO_DTYPE = jnp.bfloat16    # activations / weights across kernel boundaries


@functools.lru_cache(maxsize=None)
def _vmem_limit_bytes():
    """Generation-aware VMEM budget (~55% of capacity, clamped to [32, 100] MiB)."""
    try:
        cap = int(pltpu.get_tpu_info().vmem_capacity_bytes)
    except Exception:
        cap = 128 * 1024 * 1024
    return int(min(max(0.55 * cap, 32 * 1024 * 1024), 100 * 1024 * 1024))


def _round_up(v, m):
    return (v + m - 1) // m * m


# ----------------------------------------------------------------------------
# Kernel A: fused 3x3 conv (taps folded into K) + InstanceNorm + activation
# ----------------------------------------------------------------------------
def _conv_in_act_kernel(xp_ref, w_ref, g_ref, b_ref, mask_ref, o_ref, taps_ref,
                        *, H, W, act):
    # xp_ref  : (1, Cin, Lp) bf16   zero-padded plane, flattened; Lp = (H+3)*(W+2)
    # w_ref   : (Cout, 9*Cin) bf16  folded 3x3 weights, K index = (dy*3+dx)*Cin + ci
    # g_ref   : (Cout, 1) f32       InstanceNorm gamma (ones when affine=False)
    # b_ref   : (Cout, 1) f32       InstanceNorm beta  (zeros when affine=False)
    # mask_ref: (1, L) f32          1.0 at valid columns ((j % (W+2)) < W) else 0.0
    # o_ref   : (1, Cout, L) bf16   L = H*(W+2); masked-out columns hold garbage
    # taps_ref: (9*Cin, L) bf16     VMEM scratch: folded im2col block
    Wp = W + 2
    L = H * Wp
    cin = xp_ref.shape[1]

    # Fold the nine taps into the matmul K dimension -> one MXU matmul.
    for dy in range(3):
        for dx in range(3):
            k = dy * 3 + dx
            taps_ref[k * cin:(k + 1) * cin, :] = xp_ref[0, :, pl.ds(dy * Wp + dx, L)]

    y = jnp.dot(w_ref[...], taps_ref[...],
                preferred_element_type=jnp.float32)            # (Cout, L) f32

    # InstanceNorm over the H*W valid positions (two-pass: mean, centered var).
    maskf = mask_ref[...]                                      # (1, L)
    inv_n = 1.0 / float(H * W)
    mean = jnp.sum(y * maskf, axis=1, keepdims=True) * inv_n   # (Cout, 1)
    yc = (y - mean) * maskf
    var = jnp.sum(yc * yc, axis=1, keepdims=True) * inv_n
    scale = g_ref[...] * jax.lax.rsqrt(var + EPS)              # gamma folded in
    y = (y - mean) * scale + b_ref[...]

    if act == "relu":
        y = jnp.maximum(y, 0.0)
    elif act == "softgate_exp":                                # SoftGate + lip2d exp
        y = jnp.exp(SOFTGATE_COEFF / (1.0 + jnp.exp(-y)))

    o_ref[0] = y.astype(o_ref.dtype)


def conv_in_norm_act(x_nchw, w_hwio, gamma, beta, act):
    """3x3 conv (stride 1, pad 1, no bias*) + InstanceNorm + activation, NCHW.

    *Conv biases are dropped on purpose: every conv is followed by InstanceNorm
    whose mean subtraction cancels the bias exactly (same forward result).
    """
    N, Cin, H, W = x_nchw.shape
    Cout = w_hwio.shape[-1]
    cin_p = _round_up(Cin, 8)            # keep folded-K scratch stores sublane-aligned
    Wp = W + 2
    Lp = (H + 3) * Wp                    # 1 top + 2 bottom pad rows (1 slack row keeps
    L = H * Wp                           # all nine flat tap slices in bounds)

    x = x_nchw.astype(_IO_DTYPE)
    if cin_p != Cin:
        x = jnp.pad(x, ((0, 0), (0, cin_p - Cin), (0, 0), (0, 0)))
        w_hwio = jnp.pad(w_hwio, ((0, 0), (0, 0), (0, cin_p - Cin), (0, 0)))
    xp = jnp.pad(x, ((0, 0), (0, 0), (1, 2), (1, 1))).reshape(N, cin_p, Lp)
    wmat = jnp.transpose(w_hwio.reshape(9 * cin_p, Cout)).astype(_IO_DTYPE)
    mask = (jnp.arange(L, dtype=jnp.int32) % Wp < W).astype(jnp.float32).reshape(1, L)

    out_ext = pl.pallas_call(
        functools.partial(_conv_in_act_kernel, H=H, W=W, act=act),
        out_shape=jax.ShapeDtypeStruct((N, Cout, L), _IO_DTYPE),
        grid_spec=pltpu.PrefetchScalarGridSpec(
            num_scalar_prefetch=0,
            grid=(N,),
            in_specs=[
                pl.BlockSpec((1, cin_p, Lp), lambda n: (n, 0, 0)),
                pl.BlockSpec((Cout, 9 * cin_p), lambda n: (0, 0)),
                pl.BlockSpec((Cout, 1), lambda n: (0, 0)),
                pl.BlockSpec((Cout, 1), lambda n: (0, 0)),
                pl.BlockSpec((1, L), lambda n: (0, 0)),
            ],
            out_specs=pl.BlockSpec((1, Cout, L), lambda n: (n, 0, 0)),
            scratch_shapes=[pltpu.VMEM((9 * cin_p, L), _IO_DTYPE)],
        ),
        compiler_params=pltpu.CompilerParams(
            dimension_semantics=("parallel",),
            vmem_limit_bytes=_vmem_limit_bytes()),
    )(xp, wmat,
      gamma.reshape(Cout, 1).astype(jnp.float32),
      beta.reshape(Cout, 1).astype(jnp.float32),
      mask)

    # Drop the two wrapped (garbage) columns of each row -> compact NCHW.
    return out_ext.reshape(N, Cout, H, Wp)[:, :, :, :W]


# ----------------------------------------------------------------------------
# Kernel B: LIP pooling   sum_taps(x*w) / sum_taps(w),  k=3, s=2, p=1
# (w = exp(softgate(logit)) already; zero-padded w kills padded taps)
# ----------------------------------------------------------------------------
def _lip_pool_kernel(xp_ref, wp_ref, o_ref, *, H, W):
    # xp_ref/wp_ref: (1, C, Lp) bf16  zero-padded planes, flattened; Lp=(H+3)*(W+2)
    # o_ref        : (1, C, L)  bf16  stride-1 weighted averages (L = H*(W+2));
    #                                 the wrapper decimates to stride 2.
    Wp = W + 2
    L = H * Wp
    num = None
    den = None
    for dy in range(3):
        for dx in range(3):
            s = dy * Wp + dx
            xt = xp_ref[0, :, pl.ds(s, L)].astype(jnp.float32)
            wt = wp_ref[0, :, pl.ds(s, L)].astype(jnp.float32)
            num = xt * wt if num is None else num + xt * wt
            den = wt if den is None else den + wt
    # Valid positions always include >=1 real weight (w >= 1); the guard only
    # protects the wrapped/garbage columns that the wrapper discards.
    den = jnp.maximum(den, 1e-6)
    o_ref[0] = (num * pl.reciprocal(den, approx=True)).astype(o_ref.dtype)


def lip_pool(x_nchw, w_nchw):
    """lip2d(x, logit) with exp already folded into w = exp(softgate(logit)).

    avg_pool(x*w,3,2,1)/avg_pool(w,3,2,1): the 1/9 count factors cancel and the
    zero-padded w removes padded taps, so this is a plain weighted average.
    """
    N, C, H, W = x_nchw.shape
    assert H % 2 == 0 and W % 2 == 0, "even spatial dims expected"
    Ho, Wo = H // 2, W // 2
    Wp = W + 2
    Lp = (H + 3) * Wp
    L = H * Wp

    def prep(a):
        ap = jnp.pad(a.astype(_IO_DTYPE), ((0, 0), (0, 0), (1, 2), (1, 1)))
        return ap.reshape(N, C, Lp)

    xp, wp = prep(x_nchw), prep(w_nchw)

    out_ext = pl.pallas_call(
        functools.partial(_lip_pool_kernel, H=H, W=W),
        out_shape=jax.ShapeDtypeStruct((N, C, L), _IO_DTYPE),
        grid_spec=pltpu.PrefetchScalarGridSpec(
            num_scalar_prefetch=0,
            grid=(N,),
            in_specs=[
                pl.BlockSpec((1, C, Lp), lambda n: (n, 0, 0)),
                pl.BlockSpec((1, C, Lp), lambda n: (n, 0, 0)),
            ],
            out_specs=pl.BlockSpec((1, C, L), lambda n: (n, 0, 0)),
        ),
        compiler_params=pltpu.CompilerParams(
            dimension_semantics=("parallel",),
            vmem_limit_bytes=_vmem_limit_bytes()),
    )(xp, wp)

    # Stride-2 decimation of the small stride-1 result (output pos (r,c) <- (2r,2c)).
    return out_ext.reshape(N, C, H, Wp)[:, :, 0::2, 0:W:2]


# ----------------------------------------------------------------------------
# LIPEncoder parameters + forward
# ----------------------------------------------------------------------------
def init_lip_encoder_params(key, input_nc, ngf, n_2xdown, max_ratio=16):
    """Synthetic parameters mirroring LIPEncoder.__init__ shapes (HWIO weights)."""
    keys = iter(jax.random.split(key, 64))

    def conv_w(k, cin, cout, scale=0.05):
        return scale * jax.random.normal(k, (3, 3, cin, cout), jnp.float32)

    layers = [dict(kind="conv", w=conv_w(next(keys), input_nc, ngf),
                   gamma=jnp.ones((ngf,), jnp.float32),
                   beta=jnp.zeros((ngf,), jnp.float32),
                   act="relu")]
    cur = 1
    for i in range(n_2xdown):
        nxt = min(cur * 2, max_ratio)
        c_in, c_out = ngf * cur, ngf * nxt
        # SimplifiedLIP logit branch: Conv(c_in,c_in,bias=False)+IN(affine)+SoftGate
        layers.append(dict(
            kind="lip", w=conv_w(next(keys), c_in, c_in),
            gamma=1.0 + 0.1 * jax.random.normal(next(keys), (c_in,), jnp.float32),
            beta=0.1 * jax.random.normal(next(keys), (c_in,), jnp.float32),
            act="softgate_exp"))
        # Conv2d(c_in, c_out, 3, pad=1) + InstanceNorm2d(c_out) [+ ReLU if not last]
        layers.append(dict(
            kind="conv", w=conv_w(next(keys), c_in, c_out),
            gamma=jnp.ones((c_out,), jnp.float32),
            beta=jnp.zeros((c_out,), jnp.float32),
            act="relu" if i < n_2xdown - 1 else "none"))
        cur = nxt
    return layers


def lip_encoder_forward(layers, x_nchw):
    y = x_nchw
    for layer in layers:
        if layer["kind"] == "conv":
            y = conv_in_norm_act(y, layer["w"], layer["gamma"], layer["beta"],
                                 layer["act"])
        else:   # SimplifiedLIP: logit conv (+IN affine, SoftGate+exp fused), then lip2d
            wgt = conv_in_norm_act(y, layer["w"], layer["gamma"], layer["beta"],
                                   "softgate_exp")
            y = lip_pool(y, wgt)
    return y
    # NOTE: sw / sh are stored by LIPEncoder but never used in forward.


# ----------------------------------------------------------------------------
# Pure-JAX reference (same bf16 boundaries as the kernel pipeline)
# ----------------------------------------------------------------------------
def _ref_conv_in_norm_act(x, w, gamma, beta, act):
    y = jax.lax.conv_general_dilated(
        x, w, window_strides=(1, 1), padding=((1, 1), (1, 1)),
        dimension_numbers=("NCHW", "HWIO", "NCHW"),
        precision=jax.lax.Precision.HIGHEST)
    mean = jnp.mean(y, axis=(2, 3), keepdims=True)
    var = jnp.mean(jnp.square(y - mean), axis=(2, 3), keepdims=True)
    g = gamma.reshape(1, -1, 1, 1)
    b = beta.reshape(1, -1, 1, 1)
    y = (y - mean) * jax.lax.rsqrt(var + EPS) * g + b
    if act == "relu":
        y = jnp.maximum(y, 0.0)
    elif act == "softgate_exp":
        y = jnp.exp(jax.nn.sigmoid(y) * SOFTGATE_COEFF)
    return y


def _ref_lip_pool(x, w):
    dims, strides = (1, 1, 3, 3), (1, 1, 2, 2)
    pad = ((0, 0), (0, 0), (1, 1), (1, 1))
    num = jax.lax.reduce_window(x * w, 0.0, jax.lax.add, dims, strides, pad)
    den = jax.lax.reduce_window(w, 0.0, jax.lax.add, dims, strides, pad)
    return num / den


def _ref_forward(layers, x_nchw):
    def bf16(a):
        return a.astype(_IO_DTYPE).astype(jnp.float32)

    y = bf16(x_nchw)
    for layer in layers:
        w = bf16(layer["w"])
        if layer["kind"] == "conv":
            y = bf16(_ref_conv_in_norm_act(y, w, layer["gamma"], layer["beta"],
                                           layer["act"]))
        else:
            wgt = bf16(_ref_conv_in_norm_act(y, w, layer["gamma"], layer["beta"],
                                             "softgate_exp"))
            y = bf16(_ref_lip_pool(y, wgt))
    return y


if __name__ == "__main__":
    key = jax.random.PRNGKey(0)
    k_x, k_p = jax.random.split(key)

    # Small shapes consistent with the module: N=2, input_nc=3, 32x32, ngf=8, 2 downs.
    N, input_nc, H, W = 2, 3, 32, 32
    ngf, n_2xdown = 8, 2
    sw = sh = W // (2 ** n_2xdown)   # stored-only attrs in the torch module (unused)

    x_nchw = jax.random.normal(k_x, (N, input_nc, H, W), jnp.float32)
    layers = init_lip_encoder_params(k_p, input_nc, ngf, n_2xdown)

    fwd = jax.jit(lambda xx: lip_encoder_forward(layers, xx))
    out = jax.block_until_ready(fwd(x_nchw))

    c_out = ngf * min(2 ** n_2xdown, 16)
    assert out.shape == (N, c_out, H // 4, W // 4), out.shape
    out_f32 = out.astype(jnp.float32)
    assert bool(jnp.all(jnp.isfinite(out_f32)))

    ref = _ref_forward(layers, x_nchw)
    rel = jnp.linalg.norm(out_f32 - ref) / (jnp.linalg.norm(ref) + 1e-12)
    assert float(rel) < 0.15, f"relative error vs reference too large: {float(rel)}"
    print("KERNEL_OK")
</pallas_src>

<mosaic_0001>
module attributes {stable_mosaic.version = 11 : i64} {
  func.func @_conv_in_act_kernel(%arg0: i32, %arg1: memref<1x8x1190xbf16, #tpu.memory_space<vmem>>, %arg2: memref<8x72xbf16, #tpu.memory_space<vmem>>, %arg3: memref<8x1xf32, #tpu.memory_space<vmem>>, %arg4: memref<8x1xf32, #tpu.memory_space<vmem>>, %arg5: memref<1x1088xf32, #tpu.memory_space<vmem>>, %arg6: memref<1x8x1088xbf16, #tpu.memory_space<vmem>>, %arg7: memref<72x1088xbf16, #tpu.memory_space<vmem>>) attributes {dimension_semantics = [#tpu.dimension_semantics<parallel>], iteration_bounds = array<i64: 2>, scalar_prefetch = 0 : i64, scratch_operands = 1 : i64, tpu.core_type = #tpu.core_type<tc>, window_params = [{transform_indices = @transform_0, window_bounds = array<i64: 1, 8, 1190>}, {pipeline_mode = #tpu.pipeline_mode<synchronous>, transform_indices = @transform_1, window_bounds = array<i64: 8, 72>}, {pipeline_mode = #tpu.pipeline_mode<synchronous>, transform_indices = @transform_2, window_bounds = array<i64: 8, 1>}, {pipeline_mode = #tpu.pipeline_mode<synchronous>, transform_indices = @transform_3, window_bounds = array<i64: 8, 1>}, {pipeline_mode = #tpu.pipeline_mode<synchronous>, transform_indices = @transform_4, window_bounds = array<i64: 1, 1088>}, {transform_indices = @transform_5, window_bounds = array<i64: 1, 8, 1088>}]} {
    %c0 = arith.constant 0 : index
    %c0_0 = arith.constant 0 : index
    %c0_1 = arith.constant 0 : index
    %0 = vector.load %arg1[%c0, %c0_0, %c0_1] : memref<1x8x1190xbf16, #tpu.memory_space<vmem>>, vector<1x8x1088xbf16>
    %1 = vector.shape_cast %0 : vector<1x8x1088xbf16> to vector<8x1088xbf16>
    %c0_2 = arith.constant 0 : index
    %c0_3 = arith.constant 0 : index
    %2 = vector.load %arg7[%c0_2, %c0_3] : memref<72x1088xbf16, #tpu.memory_space<vmem>>, vector<8x1088xbf16>
    tpu.vector_store %arg7[%c0_2, %c0_3], %1 {strides = array<i32>} : memref<72x1088xbf16, #tpu.memory_space<vmem>>, vector<8x1088xbf16>,
    %c0_4 = arith.constant 0 : index
    %c0_5 = arith.constant 0 : index
    %c1 = arith.constant 1 : index
    %3 = vector.load %arg1[%c0_4, %c0_5, %c1] : memref<1x8x1190xbf16, #tpu.memory_space<vmem>>, vector<1x8x1088xbf16>
    %4 = vector.shape_cast %3 : vector<1x8x1088xbf16> to vector<8x1088xbf16>
    %c8 = arith.constant 8 : index
    %c0_6 = arith.constant 0 : index
    %5 = vector.load %arg7[%c8, %c0_6] : memref<72x1088xbf16, #tpu.memory_space<vmem>>, vector<8x1088xbf16>
    tpu.vector_store %arg7[%c8, %c0_6], %4 {strides = array<i32>} : memref<72x1088xbf16, #tpu.memory_space<vmem>>, vector<8x1088xbf16>,
    %c0_7 = arith.constant 0 : index
    %c0_8 = arith.constant 0 : index
    %c2 = arith.constant 2 : index
    %6 = vector.load %arg1[%c0_7, %c0_8, %c2] : memref<1x8x1190xbf16, #tpu.memory_space<vmem>>, vector<1x8x1088xbf16>
    %7 = vector.shape_cast %6 : vector<1x8x1088xbf16> to vector<8x1088xbf16>
    %c16 = arith.constant 16 : index
    %c0_9 = arith.constant 0 : index
    %8 = vector.load %arg7[%c16, %c0_9] : memref<72x1088xbf16, #tpu.memory_space<vmem>>, vector<8x1088xbf16>
    tpu.vector_store %arg7[%c16, %c0_9], %7 {strides = array<i32>} : memref<72x1088xbf16, #tpu.memory_space<vmem>>, vector<8x1088xbf16>,
    %c0_10 = arith.constant 0 : index
    %c0_11 = arith.constant 0 : index
    %c34 = arith.constant 34 : index
    %9 = vector.load %arg1[%c0_10, %c0_11, %c34] : memref<1x8x1190xbf16, #tpu.memory_space<vmem>>, vector<1x8x1088xbf16>
    %10 = vector.shape_cast %9 : vector<1x8x1088xbf16> to vector<8x1088xbf16>
    %c24 = arith.constant 24 : index
    %c0_12 = arith.constant 0 : index
    %11 = vector.load %arg7[%c24, %c0_12] : memref<72x1088xbf16, #tpu.memory_space<vmem>>, vector<8x1088xbf16>
    tpu.vector_store %arg7[%c24, %c0_12], %10 {strides = array<i32>} : memref<72x1088xbf16, #tpu.memory_space<vmem>>, vector<8x1088xbf16>,
    %c0_13 = arith.constant 0 : index
    %c0_14 = arith.constant 0 : index
    %c35 = arith.constant 35 : index
    %12 = vector.load %arg1[%c0_13, %c0_14, %c35] : memref<1x8x1190xbf16, #tpu.memory_space<vmem>>, vector<1x8x1088xbf16>
    %13 = vector.shape_cast %12 : vector<1x8x1088xbf16> to vector<8x1088xbf16>
    %c32 = arith.constant 32 : index
    %c0_15 = arith.constant 0 : index
    %14 = vector.load %arg7[%c32, %c0_15] : memref<72x1088xbf16, #tpu.memory_space<vmem>>, vector<8x1088xbf16>
    tpu.vector_store %arg7[%c32, %c0_15], %13 {strides = array<i32>} : memref<72x1088xbf16, #tpu.memory_space<vmem>>, vector<8x1088xbf16>,
    %c0_16 = arith.constant 0 : index
    %c0_17 = arith.constant 0 : index
    %c36 = arith.constant 36 : index
    %15 = vector.load %arg1[%c0_16, %c0_17, %c36] : memref<1x8x1190xbf16, #tpu.memory_space<vmem>>, vector<1x8x1088xbf16>
    %16 = vector.shape_cast %15 : vector<1x8x1088xbf16> to vector<8x1088xbf16>
    %c40 = arith.constant 40 : index
    %c0_18 = arith.constant 0 : index
    %17 = vector.load %arg7[%c40, %c0_18] : memref<72x1088xbf16, #tpu.memory_space<vmem>>, vector<8x1088xbf16>
    tpu.vector_store %arg7[%c40, %c0_18], %16 {strides = array<i32>} : memref<72x1088xbf16, #tpu.memory_space<vmem>>, vector<8x1088xbf16>,
    %c0_19 = arith.constant 0 : index
    %c0_20 = arith.constant 0 : index
    %c68 = arith.constant 68 : index
    %18 = vector.load %arg1[%c0_19, %c0_20, %c68] : memref<1x8x1190xbf16, #tpu.memory_space<vmem>>, vector<1x8x1088xbf16>
    %19 = vector.shape_cast %18 : vector<1x8x1088xbf16> to vector<8x1088xbf16>
    %c48 = arith.constant 48 : index
    %c0_21 = arith.constant 0 : index
    %20 = vector.load %arg7[%c48, %c0_21] : memref<72x1088xbf16, #tpu.memory_space<vmem>>, vector<8x1088xbf16>
    tpu.vector_store %arg7[%c48, %c0_21], %19 {strides = array<i32>} : memref<72x1088xbf16, #tpu.memory_space<vmem>>, vector<8x1088xbf16>,
    %c0_22 = arith.constant 0 : index
    %c0_23 = arith.constant 0 : index
    %c69 = arith.constant 69 : index
    %21 = vector.load %arg1[%c0_22, %c0_23, %c69] : memref<1x8x1190xbf16, #tpu.memory_space<vmem>>, vector<1x8x1088xbf16>
    %22 = vector.shape_cast %21 : vector<1x8x1088xbf16> to vector<8x1088xbf16>
    %c56 = arith.constant 56 : index
    %c0_24 = arith.constant 0 : index
    %23 = vector.load %arg7[%c56, %c0_24] : memref<72x1088xbf16, #tpu.memory_space<vmem>>, vector<8x1088xbf16>
    tpu.vector_store %arg7[%c56, %c0_24], %22 {strides = array<i32>} : memref<72x1088xbf16, #tpu.memory_space<vmem>>, vector<8x1088xbf16>,
    %c0_25 = arith.constant 0 : index
    %c0_26 = arith.constant 0 : index
    %c70 = arith.constant 70 : index
    %24 = vector.load %arg1[%c0_25, %c0_26, %c70] : memref<1x8x1190xbf16, #tpu.memory_space<vmem>>, vector<1x8x1088xbf16>
    %25 = vector.shape_cast %24 : vector<1x8x1088xbf16> to vector<8x1088xbf16>
    %c64 = arith.constant 64 : index
    %c0_27 = arith.constant 0 : index
    %26 = vector.load %arg7[%c64, %c0_27] : memref<72x1088xbf16, #tpu.memory_space<vmem>>, vector<8x1088xbf16>
    tpu.vector_store %arg7[%c64, %c0_27], %25 {strides = array<i32>} : memref<72x1088xbf16, #tpu.memory_space<vmem>>, vector<8x1088xbf16>,
    %c0_28 = arith.constant 0 : index
    %c0_29 = arith.constant 0 : index
    %27 = vector.load %arg2[%c0_28, %c0_29] : memref<8x72xbf16, #tpu.memory_space<vmem>>, vector<8x72xbf16>
    %c0_30 = arith.constant 0 : index
    %c0_31 = arith.constant 0 : index
    %28 = vector.load %arg7[%c0_30, %c0_31] : memref<72x1088xbf16, #tpu.memory_space<vmem>>, vector<72x1088xbf16>
    %cst = arith.constant dense<0.000000e+00> : vector<8x1088xf32>
    %29 = tpu.matmul %27, %28, %cst {dimension_numbers = #tpu.dot_dimension_numbers<[1], [0], [0], [1], [0, 0, 1, 1], [], []>} : vector<8x72xbf16>, vector<72x1088xbf16>, vector<8x1088xf32> -> vector<8x1088xf32>
    %c0_32 = arith.constant 0 : index
    %c0_33 = arith.constant 0 : index
    %30 = vector.load %arg5[%c0_32, %c0_33] : memref<1x1088xf32, #tpu.memory_space<vmem>>, vector<1x1088xf32>
    %31 = vector.broadcast %30 : vector<1x1088xf32> to vector<8x1088xf32>
    %32 = arith.mulf %29, %31 : vector<8x1088xf32>
    %cst_34 = arith.constant dense<0.000000e+00> : vector<8xf32>
    %33 = vector.multi_reduction <add>, %32, %cst_34 [1] : vector<8x1088xf32> to vector<8xf32>
    %34 = vector.shape_cast %33 : vector<8xf32> to vector<8x1xf32>
    %cst_35 = arith.constant 9.765625E-4 : f32
    %35 = vector.broadcast %cst_35 : f32 to vector<8x1xf32>
    %36 = arith.mulf %34, %35 : vector<8x1xf32>
    %37 = vector.broadcast %36 : vector<8x1xf32> to vector<8x1088xf32>
    %38 = arith.subf %29, %37 : vector<8x1088xf32>
    %39 = vector.broadcast %30 : vector<1x1088xf32> to vector<8x1088xf32>
    %40 = arith.mulf %38, %39 : vector<8x1088xf32>
    %41 = arith.mulf %40, %40 : vector<8x1088xf32>
    %cst_36 = arith.constant dense<0.000000e+00> : vector<8xf32>
    %42 = vector.multi_reduction <add>, %41, %cst_36 [1] : vector<8x1088xf32> to vector<8xf32>
    %43 = vector.shape_cast %42 : vector<8xf32> to vector<8x1xf32>
    %cst_37 = arith.constant 9.765625E-4 : f32
    %44 = vector.broadcast %cst_37 : f32 to vector<8x1xf32>
    %45 = arith.mulf %43, %44 : vector<8x1xf32>
    %c0_38 = arith.constant 0 : index
    %c0_39 = arith.constant 0 : index
    %46 = vector.load %arg3[%c0_38, %c0_39] : memref<8x1xf32, #tpu.memory_space<vmem>>, vector<8x1xf32>
    %cst_40 = arith.constant 9.99999974E-6 : f32
    %47 = vector.broadcast %cst_40 : f32 to vector<8x1xf32>
    %48 = arith.addf %45, %47 : vector<8x1xf32>
    %49 = math.rsqrt %48 : vector<8x1xf32>
    %50 = arith.mulf %46, %49 : vector<8x1xf32>
    %51 = vector.broadcast %36 : vector<8x1xf32> to vector<8x1088xf32>
    %52 = arith.subf %29, %51 : vector<8x1088xf32>
    %53 = vector.broadcast %50 : vector<8x1xf32> to vector<8x1088xf32>
    %54 = arith.mulf %52, %53 : vector<8x1088xf32>
    %c0_41 = arith.constant 0 : index
    %c0_42 = arith.constant 0 : index
    %55 = vector.load %arg4[%c0_41, %c0_42] : memref<8x1xf32, #tpu.memory_space<vmem>>, vector<8x1xf32>
    %56 = vector.broadcast %55 : vector<8x1xf32> to vector<8x1088xf32>
    %57 = arith.addf %54, %56 : vector<8x1088xf32>
    %cst_43 = arith.constant 0.000000e+00 : f32
    %58 = vector.broadcast %cst_43 : f32 to vector<8x1088xf32>
    %59 = arith.maximumf %57, %58 : vector<8x1088xf32>
    %60 = arith.truncf %59 : vector<8x1088xf32> to vector<8x1088xbf16>
    %c0_44 = arith.constant 0 : index
    %c0_45 = arith.constant 0 : index
    %c0_46 = arith.constant 0 : index
    %61 = vector.load %arg6[%c0_44, %c0_45, %c0_46] : memref<1x8x1088xbf16, #tpu.memory_space<vmem>>, vector<1x8x1088xbf16>
    %62 = vector.shape_cast %61 : vector<1x8x1088xbf16> to vector<8x1088xbf16>
    %63 = vector.shape_cast %60 : vector<8x1088xbf16> to vector<1x8x1088xbf16>
    tpu.vector_store %arg6[%c0_44, %c0_45, %c0_46], %63 {strides = array<i32>} : memref<1x8x1088xbf16, #tpu.memory_space<vmem>>, vector<1x8x1088xbf16>,
    return
  }
  func.func @transform_0(%arg0: i32) -> (i32, i32, i32) {
    %c0_i32 = arith.constant 0 : i32
    %c0_i32_0 = arith.constant 0 : i32
    %c0_i32_1 = arith.constant 0 : i32
    return %arg0, %c0_i32, %c0_i32_0 : i32, i32, i32
  }
  func.func @transform_1(%arg0: i32) -> (i32, i32) {
    %c0_i32 = arith.constant 0 : i32
    %c0_i32_0 = arith.constant 0 : i32
    %c0_i32_1 = arith.constant 0 : i32
    return %c0_i32, %c0_i32_0 : i32, i32
  }
  func.func @transform_2(%arg0: i32) -> (i32, i32) {
    %c0_i32 = arith.constant 0 : i32
    %c0_i32_0 = arith.constant 0 : i32
    %c0_i32_1 = arith.constant 0 : i32
    return %c0_i32, %c0_i32_0 : i32, i32
  }
  func.func @transform_3(%arg0: i32) -> (i32, i32) {
    %c0_i32 = arith.constant 0 : i32
    %c0_i32_0 = arith.constant 0 : i32
    %c0_i32_1 = arith.constant 0 : i32
    return %c0_i32, %c0_i32_0 : i32, i32
  }
  func.func @transform_4(%arg0: i32) -> (i32, i32) {
    %c0_i32 = arith.constant 0 : i32
    %c0_i32_0 = arith.constant 0 : i32
    %c0_i32_1 = arith.constant 0 : i32
    return %c0_i32, %c0_i32_0 : i32, i32
  }
  func.func @transform_5(%arg0: i32) -> (i32, i32, i32) {
    %c0_i32 = arith.constant 0 : i32
    %c0_i32_0 = arith.constant 0 : i32
    %c0_i32_1 = arith.constant 0 : i32
    return %arg0, %c0_i32, %c0_i32_0 : i32, i32, i32
  }
}

module attributes {stable_mosaic.version = 11 : i64} {
  func.func @_conv_in_act_kernel(%arg0: i32, %arg1: memref<1x8x1190xbf16, #tpu.memory_space<vmem>>, %arg2: memref<8x72xbf16, #tpu.memory_space<vmem>>, %arg3: memref<8x1xf32, #tpu.memory_space<vmem>>, %arg4: memref<8x1xf32, #tpu.memory_space<vmem>>, %arg5: memref<1x1088xf32, #tpu.memory_space<vmem>>, %arg6: memref<1x8x1088xbf16, #tpu.memory_space<vmem>>, %arg7: memref<72x1088xbf16, #tpu.memory_space<vmem>>) attributes {dimension_semantics = [#tpu.dimension_semantics<parallel>], iteration_bounds = array<i64: 2>, scalar_prefetch = 0 : i64, scratch_operands = 1 : i64, tpu.core_type = #tpu.core_type<tc>, window_params = [{transform_indices = @transform_0, window_bounds = array<i64: 1, 8, 1190>}, {pipeline_mode = #tpu.pipeline_mode<synchronous>, transform_indices = @transform_1, window_bounds = array<i64: 8, 72>}, {pipeline_mode = #tpu.pipeline_mode<synchronous>, transform_indices = @transform_2, window_bounds = array<i64: 8, 1>}, {pipeline_mode = #tpu.pipeline_mode<synchronous>, transform_indices = @transform_3, window_bounds = array<i64: 8, 1>}, {pipeline_mode = #tpu.pipeline_mode<synchronous>, transform_indices = @transform_4, window_bounds = array<i64: 1, 1088>}, {transform_indices = @transform_5, window_bounds = array<i64: 1, 8, 1088>}]} {
    %c0 = arith.constant 0 : index
    %c0_0 = arith.constant 0 : index
    %c0_1 = arith.constant 0 : index
    %0 = vector.load %arg1[%c0, %c0_0, %c0_1] : memref<1x8x1190xbf16, #tpu.memory_space<vmem>>, vector<1x8x1088xbf16>
    %1 = vector.shape_cast %0 : vector<1x8x1088xbf16> to vector<8x1088xbf16>
    %c0_2 = arith.constant 0 : index
    %c0_3 = arith.constant 0 : index
    %2 = vector.load %arg7[%c0_2, %c0_3] : memref<72x1088xbf16, #tpu.memory_space<vmem>>, vector<8x1088xbf16>
    tpu.vector_store %arg7[%c0_2, %c0_3], %1 {strides = array<i32>} : memref<72x1088xbf16, #tpu.memory_space<vmem>>, vector<8x1088xbf16>,
    %c0_4 = arith.constant 0 : index
    %c0_5 = arith.constant 0 : index
    %c1 = arith.constant 1 : index
    %3 = vector.load %arg1[%c0_4, %c0_5, %c1] : memref<1x8x1190xbf16, #tpu.memory_space<vmem>>, vector<1x8x1088xbf16>
    %4 = vector.shape_cast %3 : vector<1x8x1088xbf16> to vector<8x1088xbf16>
    %c8 = arith.constant 8 : index
    %c0_6 = arith.constant 0 : index
    %5 = vector.load %arg7[%c8, %c0_6] : memref<72x1088xbf16, #tpu.memory_space<vmem>>, vector<8x1088xbf16>
    tpu.vector_store %arg7[%c8, %c0_6], %4 {strides = array<i32>} : memref<72x1088xbf16, #tpu.memory_space<vmem>>, vector<8x1088xbf16>,
    %c0_7 = arith.constant 0 : index
    %c0_8 = arith.constant 0 : index
    %c2 = arith.constant 2 : index
    %6 = vector.load %arg1[%c0_7, %c0_8, %c2] : memref<1x8x1190xbf16, #tpu.memory_space<vmem>>, vector<1x8x1088xbf16>
    %7 = vector.shape_cast %6 : vector<1x8x1088xbf16> to vector<8x1088xbf16>
    %c16 = arith.constant 16 : index
    %c0_9 = arith.constant 0 : index
    %8 = vector.load %arg7[%c16, %c0_9] : memref<72x1088xbf16, #tpu.memory_space<vmem>>, vector<8x1088xbf16>
    tpu.vector_store %arg7[%c16, %c0_9], %7 {strides = array<i32>} : memref<72x1088xbf16, #tpu.memory_space<vmem>>, vector<8x1088xbf16>,
    %c0_10 = arith.constant 0 : index
    %c0_11 = arith.constant 0 : index
    %c34 = arith.constant 34 : index
    %9 = vector.load %arg1[%c0_10, %c0_11, %c34] : memref<1x8x1190xbf16, #tpu.memory_space<vmem>>, vector<1x8x1088xbf16>
    %10 = vector.shape_cast %9 : vector<1x8x1088xbf16> to vector<8x1088xbf16>
    %c24 = arith.constant 24 : index
    %c0_12 = arith.constant 0 : index
    %11 = vector.load %arg7[%c24, %c0_12] : memref<72x1088xbf16, #tpu.memory_space<vmem>>, vector<8x1088xbf16>
    tpu.vector_store %arg7[%c24, %c0_12], %10 {strides = array<i32>} : memref<72x1088xbf16, #tpu.memory_space<vmem>>, vector<8x1088xbf16>,
    %c0_13 = arith.constant 0 : index
    %c0_14 = arith.constant 0 : index
    %c35 = arith.constant 35 : index
    %12 = vector.load %arg1[%c0_13, %c0_14, %c35] : memref<1x8x1190xbf16, #tpu.memory_space<vmem>>, vector<1x8x1088xbf16>
    %13 = vector.shape_cast %12 : vector<1x8x1088xbf16> to vector<8x1088xbf16>
    %c32 = arith.constant 32 : index
    %c0_15 = arith.constant 0 : index
    %14 = vector.load %arg7[%c32, %c0_15] : memref<72x1088xbf16, #tpu.memory_space<vmem>>, vector<8x1088xbf16>
    tpu.vector_store %arg7[%c32, %c0_15], %13 {strides = array<i32>} : memref<72x1088xbf16, #tpu.memory_space<vmem>>, vector<8x1088xbf16>,
    %c0_16 = arith.constant 0 : index
    %c0_17 = arith.constant 0 : index
    %c36 = arith.constant 36 : index
    %15 = vector.load %arg1[%c0_16, %c0_17, %c36] : memref<1x8x1190xbf16, #tpu.memory_space<vmem>>, vector<1x8x1088xbf16>
    %16 = vector.shape_cast %15 : vector<1x8x1088xbf16> to vector<8x1088xbf16>
    %c40 = arith.constant 40 : index
    %c0_18 = arith.constant 0 : index
    %17 = vector.load %arg7[%c40, %c0_18] : memref<72x1088xbf16, #tpu.memory_space<vmem>>, vector<8x1088xbf16>
    tpu.vector_store %arg7[%c40, %c0_18], %16 {strides = array<i32>} : memref<72x1088xbf16, #tpu.memory_space<vmem>>, vector<8x1088xbf16>,
    %c0_19 = arith.constant 0 : index
    %c0_20 = arith.constant 0 : index
    %c68 = arith.constant 68 : index
    %18 = vector.load %arg1[%c0_19, %c0_20, %c68] : memref<1x8x1190xbf16, #tpu.memory_space<vmem>>, vector<1x8x1088xbf16>
    %19 = vector.shape_cast %18 : vector<1x8x1088xbf16> to vector<8x1088xbf16>
    %c48 = arith.constant 48 : index
    %c0_21 = arith.constant 0 : index
    %20 = vector.load %arg7[%c48, %c0_21] : memref<72x1088xbf16, #tpu.memory_space<vmem>>, vector<8x1088xbf16>
    tpu.vector_store %arg7[%c48, %c0_21], %19 {strides = array<i32>} : memref<72x1088xbf16, #tpu.memory_space<vmem>>, vector<8x1088xbf16>,
    %c0_22 = arith.constant 0 : index
    %c0_23 = arith.constant 0 : index
    %c69 = arith.constant 69 : index
    %21 = vector.load %arg1[%c0_22, %c0_23, %c69] : memref<1x8x1190xbf16, #tpu.memory_space<vmem>>, vector<1x8x1088xbf16>
    %22 = vector.shape_cast %21 : vector<1x8x1088xbf16> to vector<8x1088xbf16>
    %c56 = arith.constant 56 : index
    %c0_24 = arith.constant 0 : index
    %23 = vector.load %arg7[%c56, %c0_24] : memref<72x1088xbf16, #tpu.memory_space<vmem>>, vector<8x1088xbf16>
    tpu.vector_store %arg7[%c56, %c0_24], %22 {strides = array<i32>} : memref<72x1088xbf16, #tpu.memory_space<vmem>>, vector<8x1088xbf16>,
    %c0_25 = arith.constant 0 : index
    %c0_26 = arith.constant 0 : index
    %c70 = arith.constant 70 : index
    %24 = vector.load %arg1[%c0_25, %c0_26, %c70] : memref<1x8x1190xbf16, #tpu.memory_space<vmem>>, vector<1x8x1088xbf16>
    %25 = vector.shape_cast %24 : vector<1x8x1088xbf16> to vector<8x1088xbf16>
    %c64 = arith.constant 64 : index
    %c0_27 = arith.constant 0 : index
    %26 = vector.load %arg7[%c64, %c0_27] : memref<72x1088xbf16, #tpu.memory_space<vmem>>, vector<8x1088xbf16>
    tpu.vector_store %arg7[%c64, %c0_27], %25 {strides = array<i32>} : memref<72x1088xbf16, #tpu.memory_space<vmem>>, vector<8x1088xbf16>,
    %c0_28 = arith.constant 0 : index
    %c0_29 = arith.constant 0 : index
    %27 = vector.load %arg2[%c0_28, %c0_29] : memref<8x72xbf16, #tpu.memory_space<vmem>>, vector<8x72xbf16>
    %c0_30 = arith.constant 0 : index
    %c0_31 = arith.constant 0 : index
    %28 = vector.load %arg7[%c0_30, %c0_31] : memref<72x1088xbf16, #tpu.memory_space<vmem>>, vector<72x1088xbf16>
    %cst = arith.constant dense<0.000000e+00> : vector<8x1088xf32>
    %29 = tpu.matmul %27, %28, %cst {dimension_numbers = #tpu.dot_dimension_numbers<[1], [0], [0], [1], [0, 0, 1, 1], [], []>} : vector<8x72xbf16>, vector<72x1088xbf16>, vector<8x1088xf32> -> vector<8x1088xf32>
    %c0_32 = arith.constant 0 : index
    %c0_33 = arith.constant 0 : index
    %30 = vector.load %arg5[%c0_32, %c0_33] : memref<1x1088xf32, #tpu.memory_space<vmem>>, vector<1x1088xf32>
    %31 = vector.broadcast %30 : vector<1x1088xf32> to vector<8x1088xf32>
    %32 = arith.mulf %29, %31 : vector<8x1088xf32>
    %cst_34 = arith.constant dense<0.000000e+00> : vector<8xf32>
    %33 = vector.multi_reduction <add>, %32, %cst_34 [1] : vector<8x1088xf32> to vector<8xf32>
    %34 = vector.shape_cast %33 : vector<8xf32> to vector<8x1xf32>
    %cst_35 = arith.constant 9.765625E-4 : f32
    %35 = vector.broadcast %cst_35 : f32 to vector<8x1xf32>
    %36 = arith.mulf %34, %35 : vector<8x1xf32>
    %37 = vector.broadcast %36 : vector<8x1xf32> to vector<8x1088xf32>
    %38 = arith.subf %29, %37 : vector<8x1088xf32>
    %39 = vector.broadcast %30 : vector<1x1088xf32> to vector<8x1088xf32>
    %40 = arith.mulf %38, %39 : vector<8x1088xf32>
    %41 = arith.mulf %40, %40 : vector<8x1088xf32>
    %cst_36 = arith.constant dense<0.000000e+00> : vector<8xf32>
    %42 = vector.multi_reduction <add>, %41, %cst_36 [1] : vector<8x1088xf32> to vector<8xf32>
    %43 = vector.shape_cast %42 : vector<8xf32> to vector<8x1xf32>
    %cst_37 = arith.constant 9.765625E-4 : f32
    %44 = vector.broadcast %cst_37 : f32 to vector<8x1xf32>
    %45 = arith.mulf %43, %44 : vector<8x1xf32>
    %c0_38 = arith.constant 0 : index
    %c0_39 = arith.constant 0 : index
    %46 = vector.load %arg3[%c0_38, %c0_39] : memref<8x1xf32, #tpu.memory_space<vmem>>, vector<8x1xf32>
    %cst_40 = arith.constant 9.99999974E-6 : f32
    %47 = vector.broadcast %cst_40 : f32 to vector<8x1xf32>
    %48 = arith.addf %45, %47 : vector<8x1xf32>
    %49 = math.rsqrt %48 : vector<8x1xf32>
    %50 = arith.mulf %46, %49 : vector<8x1xf32>
    %51 = vector.broadcast %36 : vector<8x1xf32> to vector<8x1088xf32>
    %52 = arith.subf %29, %51 : vector<8x1088xf32>
    %53 = vector.broadcast %50 : vector<8x1xf32> to vector<8x1088xf32>
    %54 = arith.mulf %52, %53 : vector<8x1088xf32>
    %c0_41 = arith.constant 0 : index
    %c0_42 = arith.constant 0 : index
    %55 = vector.load %arg4[%c0_41, %c0_42] : memref<8x1xf32, #tpu.memory_space<vmem>>, vector<8x1xf32>
    %56 = vector.broadcast %55 : vector<8x1xf32> to vector<8x1088xf32>
    %57 = arith.addf %54, %56 : vector<8x1088xf32>
    %cst_43 = arith.constant 0.000000e+00 : f32
    %58 = vector.broadcast %cst_43 : f32 to vector<8x1088xf32>
    %59 = arith.subf %58, %57 : vector<8x1088xf32>
    %60 = math.exp %59 : vector<8x1088xf32>
    %cst_44 = arith.constant 1.000000e+00 : f32
    %61 = vector.broadcast %cst_44 : f32 to vector<8x1088xf32>
    %62 = arith.addf %61, %60 : vector<8x1088xf32>
    %cst_45 = arith.constant 1.200000e+01 : f32
    %63 = vector.broadcast %cst_45 : f32 to vector<8x1088xf32>
    %64 = arith.divf %63, %62 : vector<8x1088xf32>
    %65 = math.exp %64 : vector<8x1088xf32>
    %66 = arith.truncf %65 : vector<8x1088xf32> to vector<8x1088xbf16>
    %c0_46 = arith.constant 0 : index
    %c0_47 = arith.constant 0 : index
    %c0_48 = arith.constant 0 : index
    %67 = vector.load %arg6[%c0_46, %c0_47, %c0_48] : memref<1x8x1088xbf16, #tpu.memory_space<vmem>>, vector<1x8x1088xbf16>
    %68 = vector.shape_cast %67 : vector<1x8x1088xbf16> to vector<8x1088xbf16>
    %69 = vector.shape_cast %66 : vector<8x1088xbf16> to vector<1x8x1088xbf16>
    tpu.vector_store %arg6[%c0_46, %c0_47, %c0_48], %69 {strides = array<i32>} : memref<1x8x1088xbf16, #tpu.memory_space<vmem>>, vector<1x8x1088xbf16>,
    return
  }
  func.func @transform_0(%arg0: i32) -> (i32, i32, i32) {
    %c0_i32 = arith.constant 0 : i32
    %c0_i32_0 = arith.constant 0 : i32
    %c0_i32_1 = arith.constant 0 : i32
    return %arg0, %c0_i32, %c0_i32_0 : i32, i32, i32
  }
  func.func @transform_1(%arg0: i32) -> (i32, i32) {
    %c0_i32 = arith.constant 0 : i32
    %c0_i32_0 = arith.constant 0 : i32
    %c0_i32_1 = arith.constant 0 : i32
    return %c0_i32, %c0_i32_0 : i32, i32
  }
  func.func @transform_2(%arg0: i32) -> (i32, i32) {
    %c0_i32 = arith.constant 0 : i32
    %c0_i32_0 = arith.constant 0 : i32
    %c0_i32_1 = arith.constant 0 : i32
    return %c0_i32, %c0_i32_0 : i32, i32
  }
  func.func @transform_3(%arg0: i32) -> (i32, i32) {
    %c0_i32 = arith.constant 0 : i32
    %c0_i32_0 = arith.constant 0 : i32
    %c0_i32_1 = arith.constant 0 : i32
    return %c0_i32, %c0_i32_0 : i32, i32
  }
  func.func @transform_4(%arg0: i32) -> (i32, i32) {
    %c0_i32 = arith.constant 0 : i32
    %c0_i32_0 = arith.constant 0 : i32
    %c0_i32_1 = arith.constant 0 : i32
    return %c0_i32, %c0_i32_0 : i32, i32
  }
  func.func @transform_5(%arg0: i32) -> (i32, i32, i32) {
    %c0_i32 = arith.constant 0 : i32
    %c0_i32_0 = arith.constant 0 : i32
    %c0_i32_1 = arith.constant 0 : i32
    return %arg0, %c0_i32, %c0_i32_0 : i32, i32, i32
  }
}

module attributes {stable_mosaic.version = 11 : i64} {
  func.func @_lip_pool_kernel(%arg0: i32, %arg1: memref<1x8x1190xbf16, #tpu.memory_space<vmem>>, %arg2: memref<1x8x1190xbf16, #tpu.memory_space<vmem>>, %arg3: memref<1x8x1088xbf16, #tpu.memory_space<vmem>>) attributes {dimension_semantics = [#tpu.dimension_semantics<parallel>], iteration_bounds = array<i64: 2>, scalar_prefetch = 0 : i64, scratch_operands = 0 : i64, tpu.core_type = #tpu.core_type<tc>, window_params = [{transform_indices = @transform_0, window_bounds = array<i64: 1, 8, 1190>}, {transform_indices = @transform_1, window_bounds = array<i64: 1, 8, 1190>}, {transform_indices = @transform_2, window_bounds = array<i64: 1, 8, 1088>}]} {
    %c0 = arith.constant 0 : index
    %c0_0 = arith.constant 0 : index
    %c0_1 = arith.constant 0 : index
    %0 = vector.load %arg1[%c0, %c0_0, %c0_1] : memref<1x8x1190xbf16, #tpu.memory_space<vmem>>, vector<1x8x1088xbf16>
    %1 = vector.shape_cast %0 : vector<1x8x1088xbf16> to vector<8x1088xbf16>
    %2 = arith.extf %1 : vector<8x1088xbf16> to vector<8x1088xf32>
    %c0_2 = arith.constant 0 : index
    %c0_3 = arith.constant 0 : index
    %c0_4 = arith.constant 0 : index
    %3 = vector.load %arg2[%c0_2, %c0_3, %c0_4] : memref<1x8x1190xbf16, #tpu.memory_space<vmem>>, vector<1x8x1088xbf16>
    %4 = vector.shape_cast %3 : vector<1x8x1088xbf16> to vector<8x1088xbf16>
    %5 = arith.extf %4 : vector<8x1088xbf16> to vector<8x1088xf32>
    %6 = arith.mulf %2, %5 : vector<8x1088xf32>
    %c0_5 = arith.constant 0 : index
    %c0_6 = arith.constant 0 : index
    %c1 = arith.constant 1 : index
    %7 = vector.load %arg1[%c0_5, %c0_6, %c1] : memref<1x8x1190xbf16, #tpu.memory_space<vmem>>, vector<1x8x1088xbf16>
    %8 = vector.shape_cast %7 : vector<1x8x1088xbf16> to vector<8x1088xbf16>
    %9 = arith.extf %8 : vector<8x1088xbf16> to vector<8x1088xf32>
    %c0_7 = arith.constant 0 : index
    %c0_8 = arith.constant 0 : index
    %c1_9 = arith.constant 1 : index
    %10 = vector.load %arg2[%c0_7, %c0_8, %c1_9] : memref<1x8x1190xbf16, #tpu.memory_space<vmem>>, vector<1x8x1088xbf16>
    %11 = vector.shape_cast %10 : vector<1x8x1088xbf16> to vector<8x1088xbf16>
    %12 = arith.extf %11 : vector<8x1088xbf16> to vector<8x1088xf32>
    %13 = arith.mulf %9, %12 : vector<8x1088xf32>
    %14 = arith.addf %6, %13 : vector<8x1088xf32>
    %15 = arith.addf %5, %12 : vector<8x1088xf32>
    %c0_10 = arith.constant 0 : index
    %c0_11 = arith.constant 0 : index
    %c2 = arith.constant 2 : index
    %16 = vector.load %arg1[%c0_10, %c0_11, %c2] : memref<1x8x1190xbf16, #tpu.memory_space<vmem>>, vector<1x8x1088xbf16>
    %17 = vector.shape_cast %16 : vector<1x8x1088xbf16> to vector<8x1088xbf16>
    %18 = arith.extf %17 : vector<8x1088xbf16> to vector<8x1088xf32>
    %c0_12 = arith.constant 0 : index
    %c0_13 = arith.constant 0 : index
    %c2_14 = arith.constant 2 : index
    %19 = vector.load %arg2[%c0_12, %c0_13, %c2_14] : memref<1x8x1190xbf16, #tpu.memory_space<vmem>>, vector<1x8x1088xbf16>
    %20 = vector.shape_cast %19 : vector<1x8x1088xbf16> to vector<8x1088xbf16>
    %21 = arith.extf %20 : vector<8x1088xbf16> to vector<8x1088xf32>
    %22 = arith.mulf %18, %21 : vector<8x1088xf32>
    %23 = arith.addf %14, %22 : vector<8x1088xf32>
    %24 = arith.addf %15, %21 : vector<8x1088xf32>
    %c0_15 = arith.constant 0 : index
    %c0_16 = arith.constant 0 : index
    %c34 = arith.constant 34 : index
    %25 = vector.load %arg1[%c0_15, %c0_16, %c34] : memref<1x8x1190xbf16, #tpu.memory_space<vmem>>, vector<1x8x1088xbf16>
    %26 = vector.shape_cast %25 : vector<1x8x1088xbf16> to vector<8x1088xbf16>
    %27 = arith.extf %26 : vector<8x1088xbf16> to vector<8x1088xf32>
    %c0_17 = arith.constant 0 : index
    %c0_18 = arith.constant 0 : index
    %c34_19 = arith.constant 34 : index
    %28 = vector.load %arg2[%c0_17, %c0_18, %c34_19] : memref<1x8x1190xbf16, #tpu.memory_space<vmem>>, vector<1x8x1088xbf16>
    %29 = vector.shape_cast %28 : vector<1x8x1088xbf16> to vector<8x1088xbf16>
    %30 = arith.extf %29 : vector<8x1088xbf16> to vector<8x1088xf32>
    %31 = arith.mulf %27, %30 : vector<8x1088xf32>
    %32 = arith.addf %23, %31 : vector<8x1088xf32>
    %33 = arith.addf %24, %30 : vector<8x1088xf32>
    %c0_20 = arith.constant 0 : index
    %c0_21 = arith.constant 0 : index
    %c35 = arith.constant 35 : index
    %34 = vector.load %arg1[%c0_20, %c0_21, %c35] : memref<1x8x1190xbf16, #tpu.memory_space<vmem>>, vector<1x8x1088xbf16>
    %35 = vector.shape_cast %34 : vector<1x8x1088xbf16> to vector<8x1088xbf16>
    %36 = arith.extf %35 : vector<8x1088xbf16> to vector<8x1088xf32>
    %c0_22 = arith.constant 0 : index
    %c0_23 = arith.constant 0 : index
    %c35_24 = arith.constant 35 : index
    %37 = vector.load %arg2[%c0_22, %c0_23, %c35_24] : memref<1x8x1190xbf16, #tpu.memory_space<vmem>>, vector<1x8x1088xbf16>
    %38 = vector.shape_cast %37 : vector<1x8x1088xbf16> to vector<8x1088xbf16>
    %39 = arith.extf %38 : vector<8x1088xbf16> to vector<8x1088xf32>
    %40 = arith.mulf %36, %39 : vector<8x1088xf32>
    %41 = arith.addf %32, %40 : vector<8x1088xf32>
    %42 = arith.addf %33, %39 : vector<8x1088xf32>
    %c0_25 = arith.constant 0 : index
    %c0_26 = arith.constant 0 : index
    %c36 = arith.constant 36 : index
    %43 = vector.load %arg1[%c0_25, %c0_26, %c36] : memref<1x8x1190xbf16, #tpu.memory_space<vmem>>, vector<1x8x1088xbf16>
    %44 = vector.shape_cast %43 : vector<1x8x1088xbf16> to vector<8x1088xbf16>
    %45 = arith.extf %44 : vector<8x1088xbf16> to vector<8x1088xf32>
    %c0_27 = arith.constant 0 : index
    %c0_28 = arith.constant 0 : index
    %c36_29 = arith.constant 36 : index
    %46 = vector.load %arg2[%c0_27, %c0_28, %c36_29] : memref<1x8x1190xbf16, #tpu.memory_space<vmem>>, vector<1x8x1088xbf16>
    %47 = vector.shape_cast %46 : vector<1x8x1088xbf16> to vector<8x1088xbf16>
    %48 = arith.extf %47 : vector<8x1088xbf16> to vector<8x1088xf32>
    %49 = arith.mulf %45, %48 : vector<8x1088xf32>
    %50 = arith.addf %41, %49 : vector<8x1088xf32>
    %51 = arith.addf %42, %48 : vector<8x1088xf32>
    %c0_30 = arith.constant 0 : index
    %c0_31 = arith.constant 0 : index
    %c68 = arith.constant 68 : index
    %52 = vector.load %arg1[%c0_30, %c0_31, %c68] : memref<1x8x1190xbf16, #tpu.memory_space<vmem>>, vector<1x8x1088xbf16>
    %53 = vector.shape_cast %52 : vector<1x8x1088xbf16> to vector<8x1088xbf16>
    %54 = arith.extf %53 : vector<8x1088xbf16> to vector<8x1088xf32>
    %c0_32 = arith.constant 0 : index
    %c0_33 = arith.constant 0 : index
    %c68_34 = arith.constant 68 : index
    %55 = vector.load %arg2[%c0_32, %c0_33, %c68_34] : memref<1x8x1190xbf16, #tpu.memory_space<vmem>>, vector<1x8x1088xbf16>
    %56 = vector.shape_cast %55 : vector<1x8x1088xbf16> to vector<8x1088xbf16>
    %57 = arith.extf %56 : vector<8x1088xbf16> to vector<8x1088xf32>
    %58 = arith.mulf %54, %57 : vector<8x1088xf32>
    %59 = arith.addf %50, %58 : vector<8x1088xf32>
    %60 = arith.addf %51, %57 : vector<8x1088xf32>
    %c0_35 = arith.constant 0 : index
    %c0_36 = arith.constant 0 : index
    %c69 = arith.constant 69 : index
    %61 = vector.load %arg1[%c0_35, %c0_36, %c69] : memref<1x8x1190xbf16, #tpu.memory_space<vmem>>, vector<1x8x1088xbf16>
    %62 = vector.shape_cast %61 : vector<1x8x1088xbf16> to vector<8x1088xbf16>
    %63 = arith.extf %62 : vector<8x1088xbf16> to vector<8x1088xf32>
    %c0_37 = arith.constant 0 : index
    %c0_38 = arith.constant 0 : index
    %c69_39 = arith.constant 69 : index
    %64 = vector.load %arg2[%c0_37, %c0_38, %c69_39] : memref<1x8x1190xbf16, #tpu.memory_space<vmem>>, vector<1x8x1088xbf16>
    %65 = vector.shape_cast %64 : vector<1x8x1088xbf16> to vector<8x1088xbf16>
    %66 = arith.extf %65 : vector<8x1088xbf16> to vector<8x1088xf32>
    %67 = arith.mulf %63, %66 : vector<8x1088xf32>
    %68 = arith.addf %59, %67 : vector<8x1088xf32>
    %69 = arith.addf %60, %66 : vector<8x1088xf32>
    %c0_40 = arith.constant 0 : index
    %c0_41 = arith.constant 0 : index
    %c70 = arith.constant 70 : index
    %70 = vector.load %arg1[%c0_40, %c0_41, %c70] : memref<1x8x1190xbf16, #tpu.memory_space<vmem>>, vector<1x8x1088xbf16>
    %71 = vector.shape_cast %70 : vector<1x8x1088xbf16> to vector<8x1088xbf16>
    %72 = arith.extf %71 : vector<8x1088xbf16> to vector<8x1088xf32>
    %c0_42 = arith.constant 0 : index
    %c0_43 = arith.constant 0 : index
    %c70_44 = arith.constant 70 : index
    %73 = vector.load %arg2[%c0_42, %c0_43, %c70_44] : memref<1x8x1190xbf16, #tpu.memory_space<vmem>>, vector<1x8x1088xbf16>
    %74 = vector.shape_cast %73 : vector<1x8x1088xbf16> to vector<8x1088xbf16>
    %75 = arith.extf %74 : vector<8x1088xbf16> to vector<8x1088xf32>
    %76 = arith.mulf %72, %75 : vector<8x1088xf32>
    %77 = arith.addf %68, %76 : vector<8x1088xf32>
    %78 = arith.addf %69, %75 : vector<8x1088xf32>
    %cst = arith.constant 9.99999997E-7 : f32
    %79 = vector.broadcast %cst : f32 to vector<8x1088xf32>
    %80 = arith.maximumf %78, %79 : vector<8x1088xf32>
    %81 = tpu.reciprocal %80 {approx = true} : vector<8x1088xf32> -> vector<8x1088xf32>
    %82 = arith.mulf %77, %81 : vector<8x1088xf32>
    %83 = arith.truncf %82 : vector<8x1088xf32> to vector<8x1088xbf16>
    %c0_45 = arith.constant 0 : index
    %c0_46 = arith.constant 0 : index
    %c0_47 = arith.constant 0 : index
    %84 = vector.load %arg3[%c0_45, %c0_46, %c0_47] : memref<1x8x1088xbf16, #tpu.memory_space<vmem>>, vector<1x8x1088xbf16>
    %85 = vector.shape_cast %84 : vector<1x8x1088xbf16> to vector<8x1088xbf16>
    %86 = vector.shape_cast %83 : vector<8x1088xbf16> to vector<1x8x1088xbf16>
    tpu.vector_store %arg3[%c0_45, %c0_46, %c0_47], %86 {strides = array<i32>} : memref<1x8x1088xbf16, #tpu.memory_space<vmem>>, vector<1x8x1088xbf16>,
    return
  }
  func.func @transform_0(%arg0: i32) -> (i32, i32, i32) {
    %c0_i32 = arith.constant 0 : i32
    %c0_i32_0 = arith.constant 0 : i32
    %c0_i32_1 = arith.constant 0 : i32
    return %arg0, %c0_i32, %c0_i32_0 : i32, i32, i32
  }
  func.func @transform_1(%arg0: i32) -> (i32, i32, i32) {
    %c0_i32 = arith.constant 0 : i32
    %c0_i32_0 = arith.constant 0 : i32
    %c0_i32_1 = arith.constant 0 : i32
    return %arg0, %c0_i32, %c0_i32_0 : i32, i32, i32
  }
  func.func @transform_2(%arg0: i32) -> (i32, i32, i32) {
    %c0_i32 = arith.constant 0 : i32
    %c0_i32_0 = arith.constant 0 : i32
    %c0_i32_1 = arith.constant 0 : i32
    return %arg0, %c0_i32, %c0_i32_0 : i32, i32, i32
  }
}

module attributes {stable_mosaic.version = 11 : i64} {
  func.func @_conv_in_act_kernel(%arg0: i32, %arg1: memref<1x8x342xbf16, #tpu.memory_space<vmem>>, %arg2: memref<16x72xbf16, #tpu.memory_space<vmem>>, %arg3: memref<16x1xf32, #tpu.memory_space<vmem>>, %arg4: memref<16x1xf32, #tpu.memory_space<vmem>>, %arg5: memref<1x288xf32, #tpu.memory_space<vmem>>, %arg6: memref<1x16x288xbf16, #tpu.memory_space<vmem>>, %arg7: memref<72x288xbf16, #tpu.memory_space<vmem>>) attributes {dimension_semantics = [#tpu.dimension_semantics<parallel>], iteration_bounds = array<i64: 2>, scalar_prefetch = 0 : i64, scratch_operands = 1 : i64, tpu.core_type = #tpu.core_type<tc>, window_params = [{transform_indices = @transform_0, window_bounds = array<i64: 1, 8, 342>}, {pipeline_mode = #tpu.pipeline_mode<synchronous>, transform_indices = @transform_1, window_bounds = array<i64: 16, 72>}, {pipeline_mode = #tpu.pipeline_mode<synchronous>, transform_indices = @transform_2, window_bounds = array<i64: 16, 1>}, {pipeline_mode = #tpu.pipeline_mode<synchronous>, transform_indices = @transform_3, window_bounds = array<i64: 16, 1>}, {pipeline_mode = #tpu.pipeline_mode<synchronous>, transform_indices = @transform_4, window_bounds = array<i64: 1, 288>}, {transform_indices = @transform_5, window_bounds = array<i64: 1, 16, 288>}]} {
    %c0 = arith.constant 0 : index
    %c0_0 = arith.constant 0 : index
    %c0_1 = arith.constant 0 : index
    %0 = vector.load %arg1[%c0, %c0_0, %c0_1] : memref<1x8x342xbf16, #tpu.memory_space<vmem>>, vector<1x8x288xbf16>
    %1 = vector.shape_cast %0 : vector<1x8x288xbf16> to vector<8x288xbf16>
    %c0_2 = arith.constant 0 : index
    %c0_3 = arith.constant 0 : index
    %2 = vector.load %arg7[%c0_2, %c0_3] : memref<72x288xbf16, #tpu.memory_space<vmem>>, vector<8x288xbf16>
    tpu.vector_store %arg7[%c0_2, %c0_3], %1 {strides = array<i32>} : memref<72x288xbf16, #tpu.memory_space<vmem>>, vector<8x288xbf16>,
    %c0_4 = arith.constant 0 : index
    %c0_5 = arith.constant 0 : index
    %c1 = arith.constant 1 : index
    %3 = vector.load %arg1[%c0_4, %c0_5, %c1] : memref<1x8x342xbf16, #tpu.memory_space<vmem>>, vector<1x8x288xbf16>
    %4 = vector.shape_cast %3 : vector<1x8x288xbf16> to vector<8x288xbf16>
    %c8 = arith.constant 8 : index
    %c0_6 = arith.constant 0 : index
    %5 = vector.load %arg7[%c8, %c0_6] : memref<72x288xbf16, #tpu.memory_space<vmem>>, vector<8x288xbf16>
    tpu.vector_store %arg7[%c8, %c0_6], %4 {strides = array<i32>} : memref<72x288xbf16, #tpu.memory_space<vmem>>, vector<8x288xbf16>,
    %c0_7 = arith.constant 0 : index
    %c0_8 = arith.constant 0 : index
    %c2 = arith.constant 2 : index
    %6 = vector.load %arg1[%c0_7, %c0_8, %c2] : memref<1x8x342xbf16, #tpu.memory_space<vmem>>, vector<1x8x288xbf16>
    %7 = vector.shape_cast %6 : vector<1x8x288xbf16> to vector<8x288xbf16>
    %c16 = arith.constant 16 : index
    %c0_9 = arith.constant 0 : index
    %8 = vector.load %arg7[%c16, %c0_9] : memref<72x288xbf16, #tpu.memory_space<vmem>>, vector<8x288xbf16>
    tpu.vector_store %arg7[%c16, %c0_9], %7 {strides = array<i32>} : memref<72x288xbf16, #tpu.memory_space<vmem>>, vector<8x288xbf16>,
    %c0_10 = arith.constant 0 : index
    %c0_11 = arith.constant 0 : index
    %c18 = arith.constant 18 : index
    %9 = vector.load %arg1[%c0_10, %c0_11, %c18] : memref<1x8x342xbf16, #tpu.memory_space<vmem>>, vector<1x8x288xbf16>
    %10 = vector.shape_cast %9 : vector<1x8x288xbf16> to vector<8x288xbf16>
    %c24 = arith.constant 24 : index
    %c0_12 = arith.constant 0 : index
    %11 = vector.load %arg7[%c24, %c0_12] : memref<72x288xbf16, #tpu.memory_space<vmem>>, vector<8x288xbf16>
    tpu.vector_store %arg7[%c24, %c0_12], %10 {strides = array<i32>} : memref<72x288xbf16, #tpu.memory_space<vmem>>, vector<8x288xbf16>,
    %c0_13 = arith.constant 0 : index
    %c0_14 = arith.constant 0 : index
    %c19 = arith.constant 19 : index
    %12 = vector.load %arg1[%c0_13, %c0_14, %c19] : memref<1x8x342xbf16, #tpu.memory_space<vmem>>, vector<1x8x288xbf16>
    %13 = vector.shape_cast %12 : vector<1x8x288xbf16> to vector<8x288xbf16>
    %c32 = arith.constant 32 : index
    %c0_15 = arith.constant 0 : index
    %14 = vector.load %arg7[%c32, %c0_15] : memref<72x288xbf16, #tpu.memory_space<vmem>>, vector<8x288xbf16>
    tpu.vector_store %arg7[%c32, %c0_15], %13 {strides = array<i32>} : memref<72x288xbf16, #tpu.memory_space<vmem>>, vector<8x288xbf16>,
    %c0_16 = arith.constant 0 : index
    %c0_17 = arith.constant 0 : index
    %c20 = arith.constant 20 : index
    %15 = vector.load %arg1[%c0_16, %c0_17, %c20] : memref<1x8x342xbf16, #tpu.memory_space<vmem>>, vector<1x8x288xbf16>
    %16 = vector.shape_cast %15 : vector<1x8x288xbf16> to vector<8x288xbf16>
    %c40 = arith.constant 40 : index
    %c0_18 = arith.constant 0 : index
    %17 = vector.load %arg7[%c40, %c0_18] : memref<72x288xbf16, #tpu.memory_space<vmem>>, vector<8x288xbf16>
    tpu.vector_store %arg7[%c40, %c0_18], %16 {strides = array<i32>} : memref<72x288xbf16, #tpu.memory_space<vmem>>, vector<8x288xbf16>,
    %c0_19 = arith.constant 0 : index
    %c0_20 = arith.constant 0 : index
    %c36 = arith.constant 36 : index
    %18 = vector.load %arg1[%c0_19, %c0_20, %c36] : memref<1x8x342xbf16, #tpu.memory_space<vmem>>, vector<1x8x288xbf16>
    %19 = vector.shape_cast %18 : vector<1x8x288xbf16> to vector<8x288xbf16>
    %c48 = arith.constant 48 : index
    %c0_21 = arith.constant 0 : index
    %20 = vector.load %arg7[%c48, %c0_21] : memref<72x288xbf16, #tpu.memory_space<vmem>>, vector<8x288xbf16>
    tpu.vector_store %arg7[%c48, %c0_21], %19 {strides = array<i32>} : memref<72x288xbf16, #tpu.memory_space<vmem>>, vector<8x288xbf16>,
    %c0_22 = arith.constant 0 : index
    %c0_23 = arith.constant 0 : index
    %c37 = arith.constant 37 : index
    %21 = vector.load %arg1[%c0_22, %c0_23, %c37] : memref<1x8x342xbf16, #tpu.memory_space<vmem>>, vector<1x8x288xbf16>
    %22 = vector.shape_cast %21 : vector<1x8x288xbf16> to vector<8x288xbf16>
    %c56 = arith.constant 56 : index
    %c0_24 = arith.constant 0 : index
    %23 = vector.load %arg7[%c56, %c0_24] : memref<72x288xbf16, #tpu.memory_space<vmem>>, vector<8x288xbf16>
    tpu.vector_store %arg7[%c56, %c0_24], %22 {strides = array<i32>} : memref<72x288xbf16, #tpu.memory_space<vmem>>, vector<8x288xbf16>,
    %c0_25 = arith.constant 0 : index
    %c0_26 = arith.constant 0 : index
    %c38 = arith.constant 38 : index
    %24 = vector.load %arg1[%c0_25, %c0_26, %c38] : memref<1x8x342xbf16, #tpu.memory_space<vmem>>, vector<1x8x288xbf16>
    %25 = vector.shape_cast %24 : vector<1x8x288xbf16> to vector<8x288xbf16>
    %c64 = arith.constant 64 : index
    %c0_27 = arith.constant 0 : index
    %26 = vector.load %arg7[%c64, %c0_27] : memref<72x288xbf16, #tpu.memory_space<vmem>>, vector<8x288xbf16>
    tpu.vector_store %arg7[%c64, %c0_27], %25 {strides = array<i32>} : memref<72x288xbf16, #tpu.memory_space<vmem>>, vector<8x288xbf16>,
    %c0_28 = arith.constant 0 : index
    %c0_29 = arith.constant 0 : index
    %27 = vector.load %arg2[%c0_28, %c0_29] : memref<16x72xbf16, #tpu.memory_space<vmem>>, vector<16x72xbf16>
    %c0_30 = arith.constant 0 : index
    %c0_31 = arith.constant 0 : index
    %28 = vector.load %arg7[%c0_30, %c0_31] : memref<72x288xbf16, #tpu.memory_space<vmem>>, vector<72x288xbf16>
    %cst = arith.constant dense<0.000000e+00> : vector<16x288xf32>
    %29 = tpu.matmul %27, %28, %cst {dimension_numbers = #tpu.dot_dimension_numbers<[1], [0], [0], [1], [0, 0, 1, 1], [], []>} : vector<16x72xbf16>, vector<72x288xbf16>, vector<16x288xf32> -> vector<16x288xf32>
    %c0_32 = arith.constant 0 : index
    %c0_33 = arith.constant 0 : index
    %30 = vector.load %arg5[%c0_32, %c0_33] : memref<1x288xf32, #tpu.memory_space<vmem>>, vector<1x288xf32>
    %31 = vector.broadcast %30 : vector<1x288xf32> to vector<16x288xf32>
    %32 = arith.mulf %29, %31 : vector<16x288xf32>
    %cst_34 = arith.constant dense<0.000000e+00> : vector<16xf32>
    %33 = vector.multi_reduction <add>, %32, %cst_34 [1] : vector<16x288xf32> to vector<16xf32>
    %34 = vector.shape_cast %33 : vector<16xf32> to vector<16x1xf32>
    %cst_35 = arith.constant 3.906250e-03 : f32
    %35 = vector.broadcast %cst_35 : f32 to vector<16x1xf32>
    %36 = arith.mulf %34, %35 : vector<16x1xf32>
    %37 = vector.broadcast %36 : vector<16x1xf32> to vector<16x288xf32>
    %38 = arith.subf %29, %37 : vector<16x288xf32>
    %39 = vector.broadcast %30 : vector<1x288xf32> to vector<16x288xf32>
    %40 = arith.mulf %38, %39 : vector<16x288xf32>
    %41 = arith.mulf %40, %40 : vector<16x288xf32>
    %cst_36 = arith.constant dense<0.000000e+00> : vector<16xf32>
    %42 = vector.multi_reduction <add>, %41, %cst_36 [1] : vector<16x288xf32> to vector<16xf32>
    %43 = vector.shape_cast %42 : vector<16xf32> to vector<16x1xf32>
    %cst_37 = arith.constant 3.906250e-03 : f32
    %44 = vector.broadcast %cst_37 : f32 to vector<16x1xf32>
    %45 = arith.mulf %43, %44 : vector<16x1xf32>
    %c0_38 = arith.constant 0 : index
    %c0_39 = arith.constant 0 : index
    %46 = vector.load %arg3[%c0_38, %c0_39] : memref<16x1xf32, #tpu.memory_space<vmem>>, vector<16x1xf32>
    %cst_40 = arith.constant 9.99999974E-6 : f32
    %47 = vector.broadcast %cst_40 : f32 to vector<16x1xf32>
    %48 = arith.addf %45, %47 : vector<16x1xf32>
    %49 = math.rsqrt %48 : vector<16x1xf32>
    %50 = arith.mulf %46, %49 : vector<16x1xf32>
    %51 = vector.broadcast %36 : vector<16x1xf32> to vector<16x288xf32>
    %52 = arith.subf %29, %51 : vector<16x288xf32>
    %53 = vector.broadcast %50 : vector<16x1xf32> to vector<16x288xf32>
    %54 = arith.mulf %52, %53 : vector<16x288xf32>
    %c0_41 = arith.constant 0 : index
    %c0_42 = arith.constant 0 : index
    %55 = vector.load %arg4[%c0_41, %c0_42] : memref<16x1xf32, #tpu.memory_space<vmem>>, vector<16x1xf32>
    %56 = vector.broadcast %55 : vector<16x1xf32> to vector<16x288xf32>
    %57 = arith.addf %54, %56 : vector<16x288xf32>
    %cst_43 = arith.constant 0.000000e+00 : f32
    %58 = vector.broadcast %cst_43 : f32 to vector<16x288xf32>
    %59 = arith.maximumf %57, %58 : vector<16x288xf32>
    %60 = arith.truncf %59 : vector<16x288xf32> to vector<16x288xbf16>
    %c0_44 = arith.constant 0 : index
    %c0_45 = arith.constant 0 : index
    %c0_46 = arith.constant 0 : index
    %61 = vector.load %arg6[%c0_44, %c0_45, %c0_46] : memref<1x16x288xbf16, #tpu.memory_space<vmem>>, vector<1x16x288xbf16>
    %62 = vector.shape_cast %61 : vector<1x16x288xbf16> to vector<16x288xbf16>
    %63 = vector.shape_cast %60 : vector<16x288xbf16> to vector<1x16x288xbf16>
    tpu.vector_store %arg6[%c0_44, %c0_45, %c0_46], %63 {strides = array<i32>} : memref<1x16x288xbf16, #tpu.memory_space<vmem>>, vector<1x16x288xbf16>,
    return
  }
  func.func @transform_0(%arg0: i32) -> (i32, i32, i32) {
    %c0_i32 = arith.constant 0 : i32
    %c0_i32_0 = arith.constant 0 : i32
    %c0_i32_1 = arith.constant 0 : i32
    return %arg0, %c0_i32, %c0_i32_0 : i32, i32, i32
  }
  func.func @transform_1(%arg0: i32) -> (i32, i32) {
    %c0_i32 = arith.constant 0 : i32
    %c0_i32_0 = arith.constant 0 : i32
    %c0_i32_1 = arith.constant 0 : i32
    return %c0_i32, %c0_i32_0 : i32, i32
  }
  func.func @transform_2(%arg0: i32) -> (i32, i32) {
    %c0_i32 = arith.constant 0 : i32
    %c0_i32_0 = arith.constant 0 : i32
    %c0_i32_1 = arith.constant 0 : i32
    return %c0_i32, %c0_i32_0 : i32, i32
  }
  func.func @transform_3(%arg0: i32) -> (i32, i32) {
    %c0_i32 = arith.constant 0 : i32
    %c0_i32_0 = arith.constant 0 : i32
    %c0_i32_1 = arith.constant 0 : i32
    return %c0_i32, %c0_i32_0 : i32, i32
  }
  func.func @transform_4(%arg0: i32) -> (i32, i32) {
    %c0_i32 = arith.constant 0 : i32
    %c0_i32_0 = arith.constant 0 : i32
    %c0_i32_1 = arith.constant 0 : i32
    return %c0_i32, %c0_i32_0 : i32, i32
  }
  func.func @transform_5(%arg0: i32) -> (i32, i32, i32) {
    %c0_i32 = arith.constant 0 : i32
    %c0_i32_0 = arith.constant 0 : i32
    %c0_i32_1 = arith.constant 0 : i32
    return %arg0, %c0_i32, %c0_i32_0 : i32, i32, i32
  }
}

module attributes {stable_mosaic.version = 11 : i64} {
  func.func @_conv_in_act_kernel(%arg0: i32, %arg1: memref<1x16x342xbf16, #tpu.memory_space<vmem>>, %arg2: memref<16x144xbf16, #tpu.memory_space<vmem>>, %arg3: memref<16x1xf32, #tpu.memory_space<vmem>>, %arg4: memref<16x1xf32, #tpu.memory_space<vmem>>, %arg5: memref<1x288xf32, #tpu.memory_space<vmem>>, %arg6: memref<1x16x288xbf16, #tpu.memory_space<vmem>>, %arg7: memref<144x288xbf16, #tpu.memory_space<vmem>>) attributes {dimension_semantics = [#tpu.dimension_semantics<parallel>], iteration_bounds = array<i64: 2>, scalar_prefetch = 0 : i64, scratch_operands = 1 : i64, tpu.core_type = #tpu.core_type<tc>, window_params = [{transform_indices = @transform_0, window_bounds = array<i64: 1, 16, 342>}, {pipeline_mode = #tpu.pipeline_mode<synchronous>, transform_indices = @transform_1, window_bounds = array<i64: 16, 144>}, {pipeline_mode = #tpu.pipeline_mode<synchronous>, transform_indices = @transform_2, window_bounds = array<i64: 16, 1>}, {pipeline_mode = #tpu.pipeline_mode<synchronous>, transform_indices = @transform_3, window_bounds = array<i64: 16, 1>}, {pipeline_mode = #tpu.pipeline_mode<synchronous>, transform_indices = @transform_4, window_bounds = array<i64: 1, 288>}, {transform_indices = @transform_5, window_bounds = array<i64: 1, 16, 288>}]} {
    %c0 = arith.constant 0 : index
    %c0_0 = arith.constant 0 : index
    %c0_1 = arith.constant 0 : index
    %0 = vector.load %arg1[%c0, %c0_0, %c0_1] : memref<1x16x342xbf16, #tpu.memory_space<vmem>>, vector<1x16x288xbf16>
    %1 = vector.shape_cast %0 : vector<1x16x288xbf16> to vector<16x288xbf16>
    %c0_2 = arith.constant 0 : index
    %c0_3 = arith.constant 0 : index
    %2 = vector.load %arg7[%c0_2, %c0_3] : memref<144x288xbf16, #tpu.memory_space<vmem>>, vector<16x288xbf16>
    tpu.vector_store %arg7[%c0_2, %c0_3], %1 {strides = array<i32>} : memref<144x288xbf16, #tpu.memory_space<vmem>>, vector<16x288xbf16>,
    %c0_4 = arith.constant 0 : index
    %c0_5 = arith.constant 0 : index
    %c1 = arith.constant 1 : index
    %3 = vector.load %arg1[%c0_4, %c0_5, %c1] : memref<1x16x342xbf16, #tpu.memory_space<vmem>>, vector<1x16x288xbf16>
    %4 = vector.shape_cast %3 : vector<1x16x288xbf16> to vector<16x288xbf16>
    %c16 = arith.constant 16 : index
    %c0_6 = arith.constant 0 : index
    %5 = vector.load %arg7[%c16, %c0_6] : memref<144x288xbf16, #tpu.memory_space<vmem>>, vector<16x288xbf16>
    tpu.vector_store %arg7[%c16, %c0_6], %4 {strides = array<i32>} : memref<144x288xbf16, #tpu.memory_space<vmem>>, vector<16x288xbf16>,
    %c0_7 = arith.constant 0 : index
    %c0_8 = arith.constant 0 : index
    %c2 = arith.constant 2 : index
    %6 = vector.load %arg1[%c0_7, %c0_8, %c2] : memref<1x16x342xbf16, #tpu.memory_space<vmem>>, vector<1x16x288xbf16>
    %7 = vector.shape_cast %6 : vector<1x16x288xbf16> to vector<16x288xbf16>
    %c32 = arith.constant 32 : index
    %c0_9 = arith.constant 0 : index
    %8 = vector.load %arg7[%c32, %c0_9] : memref<144x288xbf16, #tpu.memory_space<vmem>>, vector<16x288xbf16>
    tpu.vector_store %arg7[%c32, %c0_9], %7 {strides = array<i32>} : memref<144x288xbf16, #tpu.memory_space<vmem>>, vector<16x288xbf16>,
    %c0_10 = arith.constant 0 : index
    %c0_11 = arith.constant 0 : index
    %c18 = arith.constant 18 : index
    %9 = vector.load %arg1[%c0_10, %c0_11, %c18] : memref<1x16x342xbf16, #tpu.memory_space<vmem>>, vector<1x16x288xbf16>
    %10 = vector.shape_cast %9 : vector<1x16x288xbf16> to vector<16x288xbf16>
    %c48 = arith.constant 48 : index
    %c0_12 = arith.constant 0 : index
    %11 = vector.load %arg7[%c48, %c0_12] : memref<144x288xbf16, #tpu.memory_space<vmem>>, vector<16x288xbf16>
    tpu.vector_store %arg7[%c48, %c0_12], %10 {strides = array<i32>} : memref<144x288xbf16, #tpu.memory_space<vmem>>, vector<16x288xbf16>,
    %c0_13 = arith.constant 0 : index
    %c0_14 = arith.constant 0 : index
    %c19 = arith.constant 19 : index
    %12 = vector.load %arg1[%c0_13, %c0_14, %c19] : memref<1x16x342xbf16, #tpu.memory_space<vmem>>, vector<1x16x288xbf16>
    %13 = vector.shape_cast %12 : vector<1x16x288xbf16> to vector<16x288xbf16>
    %c64 = arith.constant 64 : index
    %c0_15 = arith.constant 0 : index
    %14 = vector.load %arg7[%c64, %c0_15] : memref<144x288xbf16, #tpu.memory_space<vmem>>, vector<16x288xbf16>
    tpu.vector_store %arg7[%c64, %c0_15], %13 {strides = array<i32>} : memref<144x288xbf16, #tpu.memory_space<vmem>>, vector<16x288xbf16>,
    %c0_16 = arith.constant 0 : index
    %c0_17 = arith.constant 0 : index
    %c20 = arith.constant 20 : index
    %15 = vector.load %arg1[%c0_16, %c0_17, %c20] : memref<1x16x342xbf16, #tpu.memory_space<vmem>>, vector<1x16x288xbf16>
    %16 = vector.shape_cast %15 : vector<1x16x288xbf16> to vector<16x288xbf16>
    %c80 = arith.constant 80 : index
    %c0_18 = arith.constant 0 : index
    %17 = vector.load %arg7[%c80, %c0_18] : memref<144x288xbf16, #tpu.memory_space<vmem>>, vector<16x288xbf16>
    tpu.vector_store %arg7[%c80, %c0_18], %16 {strides = array<i32>} : memref<144x288xbf16, #tpu.memory_space<vmem>>, vector<16x288xbf16>,
    %c0_19 = arith.constant 0 : index
    %c0_20 = arith.constant 0 : index
    %c36 = arith.constant 36 : index
    %18 = vector.load %arg1[%c0_19, %c0_20, %c36] : memref<1x16x342xbf16, #tpu.memory_space<vmem>>, vector<1x16x288xbf16>
    %19 = vector.shape_cast %18 : vector<1x16x288xbf16> to vector<16x288xbf16>
    %c96 = arith.constant 96 : index
    %c0_21 = arith.constant 0 : index
    %20 = vector.load %arg7[%c96, %c0_21] : memref<144x288xbf16, #tpu.memory_space<vmem>>, vector<16x288xbf16>
    tpu.vector_store %arg7[%c96, %c0_21], %19 {strides = array<i32>} : memref<144x288xbf16, #tpu.memory_space<vmem>>, vector<16x288xbf16>,
    %c0_22 = arith.constant 0 : index
    %c0_23 = arith.constant 0 : index
    %c37 = arith.constant 37 : index
    %21 = vector.load %arg1[%c0_22, %c0_23, %c37] : memref<1x16x342xbf16, #tpu.memory_space<vmem>>, vector<1x16x288xbf16>
    %22 = vector.shape_cast %21 : vector<1x16x288xbf16> to vector<16x288xbf16>
    %c112 = arith.constant 112 : index
    %c0_24 = arith.constant 0 : index
    %23 = vector.load %arg7[%c112, %c0_24] : memref<144x288xbf16, #tpu.memory_space<vmem>>, vector<16x288xbf16>
    tpu.vector_store %arg7[%c112, %c0_24], %22 {strides = array<i32>} : memref<144x288xbf16, #tpu.memory_space<vmem>>, vector<16x288xbf16>,
    %c0_25 = arith.constant 0 : index
    %c0_26 = arith.constant 0 : index
    %c38 = arith.constant 38 : index
    %24 = vector.load %arg1[%c0_25, %c0_26, %c38] : memref<1x16x342xbf16, #tpu.memory_space<vmem>>, vector<1x16x288xbf16>
    %25 = vector.shape_cast %24 : vector<1x16x288xbf16> to vector<16x288xbf16>
    %c128 = arith.constant 128 : index
    %c0_27 = arith.constant 0 : index
    %26 = vector.load %arg7[%c128, %c0_27] : memref<144x288xbf16, #tpu.memory_space<vmem>>, vector<16x288xbf16>
    tpu.vector_store %arg7[%c128, %c0_27], %25 {strides = array<i32>} : memref<144x288xbf16, #tpu.memory_space<vmem>>, vector<16x288xbf16>,
    %c0_28 = arith.constant 0 : index
    %c0_29 = arith.constant 0 : index
    %27 = vector.load %arg2[%c0_28, %c0_29] : memref<16x144xbf16, #tpu.memory_space<vmem>>, vector<16x144xbf16>
    %c0_30 = arith.constant 0 : index
    %c0_31 = arith.constant 0 : index
    %28 = vector.load %arg7[%c0_30, %c0_31] : memref<144x288xbf16, #tpu.memory_space<vmem>>, vector<144x288xbf16>
    %cst = arith.constant dense<0.000000e+00> : vector<16x288xf32>
    %29 = tpu.matmul %27, %28, %cst {dimension_numbers = #tpu.dot_dimension_numbers<[1], [0], [0], [1], [0, 0, 1, 1], [], []>} : vector<16x144xbf16>, vector<144x288xbf16>, vector<16x288xf32> -> vector<16x288xf32>
    %c0_32 = arith.constant 0 : index
    %c0_33 = arith.constant 0 : index
    %30 = vector.load %arg5[%c0_32, %c0_33] : memref<1x288xf32, #tpu.memory_space<vmem>>, vector<1x288xf32>
    %31 = vector.broadcast %30 : vector<1x288xf32> to vector<16x288xf32>
    %32 = arith.mulf %29, %31 : vector<16x288xf32>
    %cst_34 = arith.constant dense<0.000000e+00> : vector<16xf32>
    %33 = vector.multi_reduction <add>, %32, %cst_34 [1] : vector<16x288xf32> to vector<16xf32>
    %34 = vector.shape_cast %33 : vector<16xf32> to vector<16x1xf32>
    %cst_35 = arith.constant 3.906250e-03 : f32
    %35 = vector.broadcast %cst_35 : f32 to vector<16x1xf32>
    %36 = arith.mulf %34, %35 : vector<16x1xf32>
    %37 = vector.broadcast %36 : vector<16x1xf32> to vector<16x288xf32>
    %38 = arith.subf %29, %37 : vector<16x288xf32>
    %39 = vector.broadcast %30 : vector<1x288xf32> to vector<16x288xf32>
    %40 = arith.mulf %38, %39 : vector<16x288xf32>
    %41 = arith.mulf %40, %40 : vector<16x288xf32>
    %cst_36 = arith.constant dense<0.000000e+00> : vector<16xf32>
    %42 = vector.multi_reduction <add>, %41, %cst_36 [1] : vector<16x288xf32> to vector<16xf32>
    %43 = vector.shape_cast %42 : vector<16xf32> to vector<16x1xf32>
    %cst_37 = arith.constant 3.906250e-03 : f32
    %44 = vector.broadcast %cst_37 : f32 to vector<16x1xf32>
    %45 = arith.mulf %43, %44 : vector<16x1xf32>
    %c0_38 = arith.constant 0 : index
    %c0_39 = arith.constant 0 : index
    %46 = vector.load %arg3[%c0_38, %c0_39] : memref<16x1xf32, #tpu.memory_space<vmem>>, vector<16x1xf32>
    %cst_40 = arith.constant 9.99999974E-6 : f32
    %47 = vector.broadcast %cst_40 : f32 to vector<16x1xf32>
    %48 = arith.addf %45, %47 : vector<16x1xf32>
    %49 = math.rsqrt %48 : vector<16x1xf32>
    %50 = arith.mulf %46, %49 : vector<16x1xf32>
    %51 = vector.broadcast %36 : vector<16x1xf32> to vector<16x288xf32>
    %52 = arith.subf %29, %51 : vector<16x288xf32>
    %53 = vector.broadcast %50 : vector<16x1xf32> to vector<16x288xf32>
    %54 = arith.mulf %52, %53 : vector<16x288xf32>
    %c0_41 = arith.constant 0 : index
    %c0_42 = arith.constant 0 : index
    %55 = vector.load %arg4[%c0_41, %c0_42] : memref<16x1xf32, #tpu.memory_space<vmem>>, vector<16x1xf32>
    %56 = vector.broadcast %55 : vector<16x1xf32> to vector<16x288xf32>
    %57 = arith.addf %54, %56 : vector<16x288xf32>
    %cst_43 = arith.constant 0.000000e+00 : f32
    %58 = vector.broadcast %cst_43 : f32 to vector<16x288xf32>
    %59 = arith.subf %58, %57 : vector<16x288xf32>
    %60 = math.exp %59 : vector<16x288xf32>
    %cst_44 = arith.constant 1.000000e+00 : f32
    %61 = vector.broadcast %cst_44 : f32 to vector<16x288xf32>
    %62 = arith.addf %61, %60 : vector<16x288xf32>
    %cst_45 = arith.constant 1.200000e+01 : f32
    %63 = vector.broadcast %cst_45 : f32 to vector<16x288xf32>
    %64 = arith.divf %63, %62 : vector<16x288xf32>
    %65 = math.exp %64 : vector<16x288xf32>
    %66 = arith.truncf %65 : vector<16x288xf32> to vector<16x288xbf16>
    %c0_46 = arith.constant 0 : index
    %c0_47 = arith.constant 0 : index
    %c0_48 = arith.constant 0 : index
    %67 = vector.load %arg6[%c0_46, %c0_47, %c0_48] : memref<1x16x288xbf16, #tpu.memory_space<vmem>>, vector<1x16x288xbf16>
    %68 = vector.shape_cast %67 : vector<1x16x288xbf16> to vector<16x288xbf16>
    %69 = vector.shape_cast %66 : vector<16x288xbf16> to vector<1x16x288xbf16>
    tpu.vector_store %arg6[%c0_46, %c0_47, %c0_48], %69 {strides = array<i32>} : memref<1x16x288xbf16, #tpu.memory_space<vmem>>, vector<1x16x288xbf16>,
    return
  }
  func.func @transform_0(%arg0: i32) -> (i32, i32, i32) {
    %c0_i32 = arith.constant 0 : i32
    %c0_i32_0 = arith.constant 0 : i32
    %c0_i32_1 = arith.constant 0 : i32
    return %arg0, %c0_i32, %c0_i32_0 : i32, i32, i32
  }
  func.func @transform_1(%arg0: i32) -> (i32, i32) {
    %c0_i32 = arith.constant 0 : i32
    %c0_i32_0 = arith.constant 0 : i32
    %c0_i32_1 = arith.constant 0 : i32
    return %c0_i32, %c0_i32_0 : i32, i32
  }
  func.func @transform_2(%arg0: i32) -> (i32, i32) {
    %c0_i32 = arith.constant 0 : i32
    %c0_i32_0 = arith.constant 0 : i32
    %c0_i32_1 = arith.constant 0 : i32
    return %c0_i32, %c0_i32_0 : i32, i32
  }
  func.func @transform_3(%arg0: i32) -> (i32, i32) {
    %c0_i32 = arith.constant 0 : i32
    %c0_i32_0 = arith.constant 0 : i32
    %c0_i32_1 = arith.constant 0 : i32
    return %c0_i32, %c0_i32_0 : i32, i32
  }
  func.func @transform_4(%arg0: i32) -> (i32, i32) {
    %c0_i32 = arith.constant 0 : i32
    %c0_i32_0 = arith.constant 0 : i32
    %c0_i32_1 = arith.constant 0 : i32
    return %c0_i32, %c0_i32_0 : i32, i32
  }
  func.func @transform_5(%arg0: i32) -> (i32, i32, i32) {
    %c0_i32 = arith.constant 0 : i32
    %c0_i32_0 = arith.constant 0 : i32
    %c0_i32_1 = arith.constant 0 : i32
    return %arg0, %c0_i32, %c0_i32_0 : i32, i32, i32
  }
}

module attributes {stable_mosaic.version = 11 : i64} {
  func.func @_lip_pool_kernel(%arg0: i32, %arg1: memref<1x16x342xbf16, #tpu.memory_space<vmem>>, %arg2: memref<1x16x342xbf16, #tpu.memory_space<vmem>>, %arg3: memref<1x16x288xbf16, #tpu.memory_space<vmem>>) attributes {dimension_semantics = [#tpu.dimension_semantics<parallel>], iteration_bounds = array<i64: 2>, scalar_prefetch = 0 : i64, scratch_operands = 0 : i64, tpu.core_type = #tpu.core_type<tc>, window_params = [{transform_indices = @transform_0, window_bounds = array<i64: 1, 16, 342>}, {transform_indices = @transform_1, window_bounds = array<i64: 1, 16, 342>}, {transform_indices = @transform_2, window_bounds = array<i64: 1, 16, 288>}]} {
    %c0 = arith.constant 0 : index
    %c0_0 = arith.constant 0 : index
    %c0_1 = arith.constant 0 : index
    %0 = vector.load %arg1[%c0, %c0_0, %c0_1] : memref<1x16x342xbf16, #tpu.memory_space<vmem>>, vector<1x16x288xbf16>
    %1 = vector.shape_cast %0 : vector<1x16x288xbf16> to vector<16x288xbf16>
    %2 = arith.extf %1 : vector<16x288xbf16> to vector<16x288xf32>
    %c0_2 = arith.constant 0 : index
    %c0_3 = arith.constant 0 : index
    %c0_4 = arith.constant 0 : index
    %3 = vector.load %arg2[%c0_2, %c0_3, %c0_4] : memref<1x16x342xbf16, #tpu.memory_space<vmem>>, vector<1x16x288xbf16>
    %4 = vector.shape_cast %3 : vector<1x16x288xbf16> to vector<16x288xbf16>
    %5 = arith.extf %4 : vector<16x288xbf16> to vector<16x288xf32>
    %6 = arith.mulf %2, %5 : vector<16x288xf32>
    %c0_5 = arith.constant 0 : index
    %c0_6 = arith.constant 0 : index
    %c1 = arith.constant 1 : index
    %7 = vector.load %arg1[%c0_5, %c0_6, %c1] : memref<1x16x342xbf16, #tpu.memory_space<vmem>>, vector<1x16x288xbf16>
    %8 = vector.shape_cast %7 : vector<1x16x288xbf16> to vector<16x288xbf16>
    %9 = arith.extf %8 : vector<16x288xbf16> to vector<16x288xf32>
    %c0_7 = arith.constant 0 : index
    %c0_8 = arith.constant 0 : index
    %c1_9 = arith.constant 1 : index
    %10 = vector.load %arg2[%c0_7, %c0_8, %c1_9] : memref<1x16x342xbf16, #tpu.memory_space<vmem>>, vector<1x16x288xbf16>
    %11 = vector.shape_cast %10 : vector<1x16x288xbf16> to vector<16x288xbf16>
    %12 = arith.extf %11 : vector<16x288xbf16> to vector<16x288xf32>
    %13 = arith.mulf %9, %12 : vector<16x288xf32>
    %14 = arith.addf %6, %13 : vector<16x288xf32>
    %15 = arith.addf %5, %12 : vector<16x288xf32>
    %c0_10 = arith.constant 0 : index
    %c0_11 = arith.constant 0 : index
    %c2 = arith.constant 2 : index
    %16 = vector.load %arg1[%c0_10, %c0_11, %c2] : memref<1x16x342xbf16, #tpu.memory_space<vmem>>, vector<1x16x288xbf16>
    %17 = vector.shape_cast %16 : vector<1x16x288xbf16> to vector<16x288xbf16>
    %18 = arith.extf %17 : vector<16x288xbf16> to vector<16x288xf32>
    %c0_12 = arith.constant 0 : index
    %c0_13 = arith.constant 0 : index
    %c2_14 = arith.constant 2 : index
    %19 = vector.load %arg2[%c0_12, %c0_13, %c2_14] : memref<1x16x342xbf16, #tpu.memory_space<vmem>>, vector<1x16x288xbf16>
    %20 = vector.shape_cast %19 : vector<1x16x288xbf16> to vector<16x288xbf16>
    %21 = arith.extf %20 : vector<16x288xbf16> to vector<16x288xf32>
    %22 = arith.mulf %18, %21 : vector<16x288xf32>
    %23 = arith.addf %14, %22 : vector<16x288xf32>
    %24 = arith.addf %15, %21 : vector<16x288xf32>
    %c0_15 = arith.constant 0 : index
    %c0_16 = arith.constant 0 : index
    %c18 = arith.constant 18 : index
    %25 = vector.load %arg1[%c0_15, %c0_16, %c18] : memref<1x16x342xbf16, #tpu.memory_space<vmem>>, vector<1x16x288xbf16>
    %26 = vector.shape_cast %25 : vector<1x16x288xbf16> to vector<16x288xbf16>
    %27 = arith.extf %26 : vector<16x288xbf16> to vector<16x288xf32>
    %c0_17 = arith.constant 0 : index
    %c0_18 = arith.constant 0 : index
    %c18_19 = arith.constant 18 : index
    %28 = vector.load %arg2[%c0_17, %c0_18, %c18_19] : memref<1x16x342xbf16, #tpu.memory_space<vmem>>, vector<1x16x288xbf16>
    %29 = vector.shape_cast %28 : vector<1x16x288xbf16> to vector<16x288xbf16>
    %30 = arith.extf %29 : vector<16x288xbf16> to vector<16x288xf32>
    %31 = arith.mulf %27, %30 : vector<16x288xf32>
    %32 = arith.addf %23, %31 : vector<16x288xf32>
    %33 = arith.addf %24, %30 : vector<16x288xf32>
    %c0_20 = arith.constant 0 : index
    %c0_21 = arith.constant 0 : index
    %c19 = arith.constant 19 : index
    %34 = vector.load %arg1[%c0_20, %c0_21, %c19] : memref<1x16x342xbf16, #tpu.memory_space<vmem>>, vector<1x16x288xbf16>
    %35 = vector.shape_cast %34 : vector<1x16x288xbf16> to vector<16x288xbf16>
    %36 = arith.extf %35 : vector<16x288xbf16> to vector<16x288xf32>
    %c0_22 = arith.constant 0 : index
    %c0_23 = arith.constant 0 : index
    %c19_24 = arith.constant 19 : index
    %37 = vector.load %arg2[%c0_22, %c0_23, %c19_24] : memref<1x16x342xbf16, #tpu.memory_space<vmem>>, vector<1x16x288xbf16>
    %38 = vector.shape_cast %37 : vector<1x16x288xbf16> to vector<16x288xbf16>
    %39 = arith.extf %38 : vector<16x288xbf16> to vector<16x288xf32>
    %40 = arith.mulf %36, %39 : vector<16x288xf32>
    %41 = arith.addf %32, %40 : vector<16x288xf32>
    %42 = arith.addf %33, %39 : vector<16x288xf32>
    %c0_25 = arith.constant 0 : index
    %c0_26 = arith.constant 0 : index
    %c20 = arith.constant 20 : index
    %43 = vector.load %arg1[%c0_25, %c0_26, %c20] : memref<1x16x342xbf16, #tpu.memory_space<vmem>>, vector<1x16x288xbf16>
    %44 = vector.shape_cast %43 : vector<1x16x288xbf16> to vector<16x288xbf16>
    %45 = arith.extf %44 : vector<16x288xbf16> to vector<16x288xf32>
    %c0_27 = arith.constant 0 : index
    %c0_28 = arith.constant 0 : index
    %c20_29 = arith.constant 20 : index
    %46 = vector.load %arg2[%c0_27, %c0_28, %c20_29] : memref<1x16x342xbf16, #tpu.memory_space<vmem>>, vector<1x16x288xbf16>
    %47 = vector.shape_cast %46 : vector<1x16x288xbf16> to vector<16x288xbf16>
    %48 = arith.extf %47 : vector<16x288xbf16> to vector<16x288xf32>
    %49 = arith.mulf %45, %48 : vector<16x288xf32>
    %50 = arith.addf %41, %49 : vector<16x288xf32>
    %51 = arith.addf %42, %48 : vector<16x288xf32>
    %c0_30 = arith.constant 0 : index
    %c0_31 = arith.constant 0 : index
    %c36 = arith.constant 36 : index
    %52 = vector.load %arg1[%c0_30, %c0_31, %c36] : memref<1x16x342xbf16, #tpu.memory_space<vmem>>, vector<1x16x288xbf16>
    %53 = vector.shape_cast %52 : vector<1x16x288xbf16> to vector<16x288xbf16>
    %54 = arith.extf %53 : vector<16x288xbf16> to vector<16x288xf32>
    %c0_32 = arith.constant 0 : index
    %c0_33 = arith.constant 0 : index
    %c36_34 = arith.constant 36 : index
    %55 = vector.load %arg2[%c0_32, %c0_33, %c36_34] : memref<1x16x342xbf16, #tpu.memory_space<vmem>>, vector<1x16x288xbf16>
    %56 = vector.shape_cast %55 : vector<1x16x288xbf16> to vector<16x288xbf16>
    %57 = arith.extf %56 : vector<16x288xbf16> to vector<16x288xf32>
    %58 = arith.mulf %54, %57 : vector<16x288xf32>
    %59 = arith.addf %50, %58 : vector<16x288xf32>
    %60 = arith.addf %51, %57 : vector<16x288xf32>
    %c0_35 = arith.constant 0 : index
    %c0_36 = arith.constant 0 : index
    %c37 = arith.constant 37 : index
    %61 = vector.load %arg1[%c0_35, %c0_36, %c37] : memref<1x16x342xbf16, #tpu.memory_space<vmem>>, vector<1x16x288xbf16>
    %62 = vector.shape_cast %61 : vector<1x16x288xbf16> to vector<16x288xbf16>
    %63 = arith.extf %62 : vector<16x288xbf16> to vector<16x288xf32>
    %c0_37 = arith.constant 0 : index
    %c0_38 = arith.constant 0 : index
    %c37_39 = arith.constant 37 : index
    %64 = vector.load %arg2[%c0_37, %c0_38, %c37_39] : memref<1x16x342xbf16, #tpu.memory_space<vmem>>, vector<1x16x288xbf16>
    %65 = vector.shape_cast %64 : vector<1x16x288xbf16> to vector<16x288xbf16>
    %66 = arith.extf %65 : vector<16x288xbf16> to vector<16x288xf32>
    %67 = arith.mulf %63, %66 : vector<16x288xf32>
    %68 = arith.addf %59, %67 : vector<16x288xf32>
    %69 = arith.addf %60, %66 : vector<16x288xf32>
    %c0_40 = arith.constant 0 : index
    %c0_41 = arith.constant 0 : index
    %c38 = arith.constant 38 : index
    %70 = vector.load %arg1[%c0_40, %c0_41, %c38] : memref<1x16x342xbf16, #tpu.memory_space<vmem>>, vector<1x16x288xbf16>
    %71 = vector.shape_cast %70 : vector<1x16x288xbf16> to vector<16x288xbf16>
    %72 = arith.extf %71 : vector<16x288xbf16> to vector<16x288xf32>
    %c0_42 = arith.constant 0 : index
    %c0_43 = arith.constant 0 : index
    %c38_44 = arith.constant 38 : index
    %73 = vector.load %arg2[%c0_42, %c0_43, %c38_44] : memref<1x16x342xbf16, #tpu.memory_space<vmem>>, vector<1x16x288xbf16>
    %74 = vector.shape_cast %73 : vector<1x16x288xbf16> to vector<16x288xbf16>
    %75 = arith.extf %74 : vector<16x288xbf16> to vector<16x288xf32>
    %76 = arith.mulf %72, %75 : vector<16x288xf32>
    %77 = arith.addf %68, %76 : vector<16x288xf32>
    %78 = arith.addf %69, %75 : vector<16x288xf32>
    %cst = arith.constant 9.99999997E-7 : f32
    %79 = vector.broadcast %cst : f32 to vector<16x288xf32>
    %80 = arith.maximumf %78, %79 : vector<16x288xf32>
    %81 = tpu.reciprocal %80 {approx = true} : vector<16x288xf32> -> vector<16x288xf32>
    %82 = arith.mulf %77, %81 : vector<16x288xf32>
    %83 = arith.truncf %82 : vector<16x288xf32> to vector<16x288xbf16>
    %c0_45 = arith.constant 0 : index
    %c0_46 = arith.constant 0 : index
    %c0_47 = arith.constant 0 : index
    %84 = vector.load %arg3[%c0_45, %c0_46, %c0_47] : memref<1x16x288xbf16, #tpu.memory_space<vmem>>, vector<1x16x288xbf16>
    %85 = vector.shape_cast %84 : vector<1x16x288xbf16> to vector<16x288xbf16>
    %86 = vector.shape_cast %83 : vector<16x288xbf16> to vector<1x16x288xbf16>
    tpu.vector_store %arg3[%c0_45, %c0_46, %c0_47], %86 {strides = array<i32>} : memref<1x16x288xbf16, #tpu.memory_space<vmem>>, vector<1x16x288xbf16>,
    return
  }
  func.func @transform_0(%arg0: i32) -> (i32, i32, i32) {
    %c0_i32 = arith.constant 0 : i32
    %c0_i32_0 = arith.constant 0 : i32
    %c0_i32_1 = arith.constant 0 : i32
    return %arg0, %c0_i32, %c0_i32_0 : i32, i32, i32
  }
  func.func @transform_1(%arg0: i32) -> (i32, i32, i32) {
    %c0_i32 = arith.constant 0 : i32
    %c0_i32_0 = arith.constant 0 : i32
    %c0_i32_1 = arith.constant 0 : i32
    return %arg0, %c0_i32, %c0_i32_0 : i32, i32, i32
  }
  func.func @transform_2(%arg0: i32) -> (i32, i32, i32) {
    %c0_i32 = arith.constant 0 : i32
    %c0_i32_0 = arith.constant 0 : i32
    %c0_i32_1 = arith.constant 0 : i32
    return %arg0, %c0_i32, %c0_i32_0 : i32, i32, i32
  }
}

module attributes {stable_mosaic.version = 11 : i64} {
  func.func @_conv_in_act_kernel(%arg0: i32, %arg1: memref<1x16x110xbf16, #tpu.memory_space<vmem>>, %arg2: memref<32x144xbf16, #tpu.memory_space<vmem>>, %arg3: memref<32x1xf32, #tpu.memory_space<vmem>>, %arg4: memref<32x1xf32, #tpu.memory_space<vmem>>, %arg5: memref<1x80xf32, #tpu.memory_space<vmem>>, %arg6: memref<1x32x80xbf16, #tpu.memory_space<vmem>>, %arg7: memref<144x80xbf16, #tpu.memory_space<vmem>>) attributes {dimension_semantics = [#tpu.dimension_semantics<parallel>], iteration_bounds = array<i64: 2>, scalar_prefetch = 0 : i64, scratch_operands = 1 : i64, tpu.core_type = #tpu.core_type<tc>, window_params = [{transform_indices = @transform_0, window_bounds = array<i64: 1, 16, 110>}, {pipeline_mode = #tpu.pipeline_mode<synchronous>, transform_indices = @transform_1, window_bounds = array<i64: 32, 144>}, {pipeline_mode = #tpu.pipeline_mode<synchronous>, transform_indices = @transform_2, window_bounds = array<i64: 32, 1>}, {pipeline_mode = #tpu.pipeline_mode<synchronous>, transform_indices = @transform_3, window_bounds = array<i64: 32, 1>}, {pipeline_mode = #tpu.pipeline_mode<synchronous>, transform_indices = @transform_4, window_bounds = array<i64: 1, 80>}, {transform_indices = @transform_5, window_bounds = array<i64: 1, 32, 80>}]} {
    %c0 = arith.constant 0 : index
    %c0_0 = arith.constant 0 : index
    %c0_1 = arith.constant 0 : index
    %0 = vector.load %arg1[%c0, %c0_0, %c0_1] : memref<1x16x110xbf16, #tpu.memory_space<vmem>>, vector<1x16x80xbf16>
    %1 = vector.shape_cast %0 : vector<1x16x80xbf16> to vector<16x80xbf16>
    %c0_2 = arith.constant 0 : index
    %c0_3 = arith.constant 0 : index
    %2 = vector.load %arg7[%c0_2, %c0_3] : memref<144x80xbf16, #tpu.memory_space<vmem>>, vector<16x80xbf16>
    tpu.vector_store %arg7[%c0_2, %c0_3], %1 {strides = array<i32>} : memref<144x80xbf16, #tpu.memory_space<vmem>>, vector<16x80xbf16>,
    %c0_4 = arith.constant 0 : index
    %c0_5 = arith.constant 0 : index
    %c1 = arith.constant 1 : index
    %3 = vector.load %arg1[%c0_4, %c0_5, %c1] : memref<1x16x110xbf16, #tpu.memory_space<vmem>>, vector<1x16x80xbf16>
    %4 = vector.shape_cast %3 : vector<1x16x80xbf16> to vector<16x80xbf16>
    %c16 = arith.constant 16 : index
    %c0_6 = arith.constant 0 : index
    %5 = vector.load %arg7[%c16, %c0_6] : memref<144x80xbf16, #tpu.memory_space<vmem>>, vector<16x80xbf16>
    tpu.vector_store %arg7[%c16, %c0_6], %4 {strides = array<i32>} : memref<144x80xbf16, #tpu.memory_space<vmem>>, vector<16x80xbf16>,
    %c0_7 = arith.constant 0 : index
    %c0_8 = arith.constant 0 : index
    %c2 = arith.constant 2 : index
    %6 = vector.load %arg1[%c0_7, %c0_8, %c2] : memref<1x16x110xbf16, #tpu.memory_space<vmem>>, vector<1x16x80xbf16>
    %7 = vector.shape_cast %6 : vector<1x16x80xbf16> to vector<16x80xbf16>
    %c32 = arith.constant 32 : index
    %c0_9 = arith.constant 0 : index
    %8 = vector.load %arg7[%c32, %c0_9] : memref<144x80xbf16, #tpu.memory_space<vmem>>, vector<16x80xbf16>
    tpu.vector_store %arg7[%c32, %c0_9], %7 {strides = array<i32>} : memref<144x80xbf16, #tpu.memory_space<vmem>>, vector<16x80xbf16>,
    %c0_10 = arith.constant 0 : index
    %c0_11 = arith.constant 0 : index
    %c10 = arith.constant 10 : index
    %9 = vector.load %arg1[%c0_10, %c0_11, %c10] : memref<1x16x110xbf16, #tpu.memory_space<vmem>>, vector<1x16x80xbf16>
    %10 = vector.shape_cast %9 : vector<1x16x80xbf16> to vector<16x80xbf16>
    %c48 = arith.constant 48 : index
    %c0_12 = arith.constant 0 : index
    %11 = vector.load %arg7[%c48, %c0_12] : memref<144x80xbf16, #tpu.memory_space<vmem>>, vector<16x80xbf16>
    tpu.vector_store %arg7[%c48, %c0_12], %10 {strides = array<i32>} : memref<144x80xbf16, #tpu.memory_space<vmem>>, vector<16x80xbf16>,
    %c0_13 = arith.constant 0 : index
    %c0_14 = arith.constant 0 : index
    %c11 = arith.constant 11 : index
    %12 = vector.load %arg1[%c0_13, %c0_14, %c11] : memref<1x16x110xbf16, #tpu.memory_space<vmem>>, vector<1x16x80xbf16>
    %13 = vector.shape_cast %12 : vector<1x16x80xbf16> to vector<16x80xbf16>
    %c64 = arith.constant 64 : index
    %c0_15 = arith.constant 0 : index
    %14 = vector.load %arg7[%c64, %c0_15] : memref<144x80xbf16, #tpu.memory_space<vmem>>, vector<16x80xbf16>
    tpu.vector_store %arg7[%c64, %c0_15], %13 {strides = array<i32>} : memref<144x80xbf16, #tpu.memory_space<vmem>>, vector<16x80xbf16>,
    %c0_16 = arith.constant 0 : index
    %c0_17 = arith.constant 0 : index
    %c12 = arith.constant 12 : index
    %15 = vector.load %arg1[%c0_16, %c0_17, %c12] : memref<1x16x110xbf16, #tpu.memory_space<vmem>>, vector<1x16x80xbf16>
    %16 = vector.shape_cast %15 : vector<1x16x80xbf16> to vector<16x80xbf16>
    %c80 = arith.constant 80 : index
    %c0_18 = arith.constant 0 : index
    %17 = vector.load %arg7[%c80, %c0_18] : memref<144x80xbf16, #tpu.memory_space<vmem>>, vector<16x80xbf16>
    tpu.vector_store %arg7[%c80, %c0_18], %16 {strides = array<i32>} : memref<144x80xbf16, #tpu.memory_space<vmem>>, vector<16x80xbf16>,
    %c0_19 = arith.constant 0 : index
    %c0_20 = arith.constant 0 : index
    %c20 = arith.constant 20 : index
    %18 = vector.load %arg1[%c0_19, %c0_20, %c20] : memref<1x16x110xbf16, #tpu.memory_space<vmem>>, vector<1x16x80xbf16>
    %19 = vector.shape_cast %18 : vector<1x16x80xbf16> to vector<16x80xbf16>
    %c96 = arith.constant 96 : index
    %c0_21 = arith.constant 0 : index
    %20 = vector.load %arg7[%c96, %c0_21] : memref<144x80xbf16, #tpu.memory_space<vmem>>, vector<16x80xbf16>
    tpu.vector_store %arg7[%c96, %c0_21], %19 {strides = array<i32>} : memref<144x80xbf16, #tpu.memory_space<vmem>>, vector<16x80xbf16>,
    %c0_22 = arith.constant 0 : index
    %c0_23 = arith.constant 0 : index
    %c21 = arith.constant 21 : index
    %21 = vector.load %arg1[%c0_22, %c0_23, %c21] : memref<1x16x110xbf16, #tpu.memory_space<vmem>>, vector<1x16x80xbf16>
    %22 = vector.shape_cast %21 : vector<1x16x80xbf16> to vector<16x80xbf16>
    %c112 = arith.constant 112 : index
    %c0_24 = arith.constant 0 : index
    %23 = vector.load %arg7[%c112, %c0_24] : memref<144x80xbf16, #tpu.memory_space<vmem>>, vector<16x80xbf16>
    tpu.vector_store %arg7[%c112, %c0_24], %22 {strides = array<i32>} : memref<144x80xbf16, #tpu.memory_space<vmem>>, vector<16x80xbf16>,
    %c0_25 = arith.constant 0 : index
    %c0_26 = arith.constant 0 : index
    %c22 = arith.constant 22 : index
    %24 = vector.load %arg1[%c0_25, %c0_26, %c22] : memref<1x16x110xbf16, #tpu.memory_space<vmem>>, vector<1x16x80xbf16>
    %25 = vector.shape_cast %24 : vector<1x16x80xbf16> to vector<16x80xbf16>
    %c128 = arith.constant 128 : index
    %c0_27 = arith.constant 0 : index
    %26 = vector.load %arg7[%c128, %c0_27] : memref<144x80xbf16, #tpu.memory_space<vmem>>, vector<16x80xbf16>
    tpu.vector_store %arg7[%c128, %c0_27], %25 {strides = array<i32>} : memref<144x80xbf16, #tpu.memory_space<vmem>>, vector<16x80xbf16>,
    %c0_28 = arith.constant 0 : index
    %c0_29 = arith.constant 0 : index
    %27 = vector.load %arg2[%c0_28, %c0_29] : memref<32x144xbf16, #tpu.memory_space<vmem>>, vector<32x144xbf16>
    %c0_30 = arith.constant 0 : index
    %c0_31 = arith.constant 0 : index
    %28 = vector.load %arg7[%c0_30, %c0_31] : memref<144x80xbf16, #tpu.memory_space<vmem>>, vector<144x80xbf16>
    %cst = arith.constant dense<0.000000e+00> : vector<32x80xf32>
    %29 = tpu.matmul %27, %28, %cst {dimension_numbers = #tpu.dot_dimension_numbers<[1], [0], [0], [1], [0, 0, 1, 1], [], []>} : vector<32x144xbf16>, vector<144x80xbf16>, vector<32x80xf32> -> vector<32x80xf32>
    %c0_32 = arith.constant 0 : index
    %c0_33 = arith.constant 0 : index
    %30 = vector.load %arg5[%c0_32, %c0_33] : memref<1x80xf32, #tpu.memory_space<vmem>>, vector<1x80xf32>
    %31 = vector.broadcast %30 : vector<1x80xf32> to vector<32x80xf32>
    %32 = arith.mulf %29, %31 : vector<32x80xf32>
    %cst_34 = arith.constant dense<0.000000e+00> : vector<32xf32>
    %33 = vector.multi_reduction <add>, %32, %cst_34 [1] : vector<32x80xf32> to vector<32xf32>
    %34 = vector.shape_cast %33 : vector<32xf32> to vector<32x1xf32>
    %cst_35 = arith.constant 1.562500e-02 : f32
    %35 = vector.broadcast %cst_35 : f32 to vector<32x1xf32>
    %36 = arith.mulf %34, %35 : vector<32x1xf32>
    %37 = vector.broadcast %36 : vector<32x1xf32> to vector<32x80xf32>
    %38 = arith.subf %29, %37 : vector<32x80xf32>
    %39 = vector.broadcast %30 : vector<1x80xf32> to vector<32x80xf32>
    %40 = arith.mulf %38, %39 : vector<32x80xf32>
    %41 = arith.mulf %40, %40 : vector<32x80xf32>
    %cst_36 = arith.constant dense<0.000000e+00> : vector<32xf32>
    %42 = vector.multi_reduction <add>, %41, %cst_36 [1] : vector<32x80xf32> to vector<32xf32>
    %43 = vector.shape_cast %42 : vector<32xf32> to vector<32x1xf32>
    %cst_37 = arith.constant 1.562500e-02 : f32
    %44 = vector.broadcast %cst_37 : f32 to vector<32x1xf32>
    %45 = arith.mulf %43, %44 : vector<32x1xf32>
    %c0_38 = arith.constant 0 : index
    %c0_39 = arith.constant 0 : index
    %46 = vector.load %arg3[%c0_38, %c0_39] : memref<32x1xf32, #tpu.memory_space<vmem>>, vector<32x1xf32>
    %cst_40 = arith.constant 9.99999974E-6 : f32
    %47 = vector.broadcast %cst_40 : f32 to vector<32x1xf32>
    %48 = arith.addf %45, %47 : vector<32x1xf32>
    %49 = math.rsqrt %48 : vector<32x1xf32>
    %50 = arith.mulf %46, %49 : vector<32x1xf32>
    %51 = vector.broadcast %36 : vector<32x1xf32> to vector<32x80xf32>
    %52 = arith.subf %29, %51 : vector<32x80xf32>
    %53 = vector.broadcast %50 : vector<32x1xf32> to vector<32x80xf32>
    %54 = arith.mulf %52, %53 : vector<32x80xf32>
    %c0_41 = arith.constant 0 : index
    %c0_42 = arith.constant 0 : index
    %55 = vector.load %arg4[%c0_41, %c0_42] : memref<32x1xf32, #tpu.memory_space<vmem>>, vector<32x1xf32>
    %56 = vector.broadcast %55 : vector<32x1xf32> to vector<32x80xf32>
    %57 = arith.addf %54, %56 : vector<32x80xf32>
    %58 = arith.truncf %57 : vector<32x80xf32> to vector<32x80xbf16>
    %c0_43 = arith.constant 0 : index
    %c0_44 = arith.constant 0 : index
    %c0_45 = arith.constant 0 : index
    %59 = vector.load %arg6[%c0_43, %c0_44, %c0_45] : memref<1x32x80xbf16, #tpu.memory_space<vmem>>, vector<1x32x80xbf16>
    %60 = vector.shape_cast %59 : vector<1x32x80xbf16> to vector<32x80xbf16>
    %61 = vector.shape_cast %58 : vector<32x80xbf16> to vector<1x32x80xbf16>
    tpu.vector_store %arg6[%c0_43, %c0_44, %c0_45], %61 {strides = array<i32>} : memref<1x32x80xbf16, #tpu.memory_space<vmem>>, vector<1x32x80xbf16>,
    return
  }
  func.func @transform_0(%arg0: i32) -> (i32, i32, i32) {
    %c0_i32 = arith.constant 0 : i32
    %c0_i32_0 = arith.constant 0 : i32
    %c0_i32_1 = arith.constant 0 : i32
    return %arg0, %c0_i32, %c0_i32_0 : i32, i32, i32
  }
  func.func @transform_1(%arg0: i32) -> (i32, i32) {
    %c0_i32 = arith.constant 0 : i32
    %c0_i32_0 = arith.constant 0 : i32
    %c0_i32_1 = arith.constant 0 : i32
    return %c0_i32, %c0_i32_0 : i32, i32
  }
  func.func @transform_2(%arg0: i32) -> (i32, i32) {
    %c0_i32 = arith.constant 0 : i32
    %c0_i32_0 = arith.constant 0 : i32
    %c0_i32_1 = arith.constant 0 : i32
    return %c0_i32, %c0_i32_0 : i32, i32
  }
  func.func @transform_3(%arg0: i32) -> (i32, i32) {
    %c0_i32 = arith.constant 0 : i32
    %c0_i32_0 = arith.constant 0 : i32
    %c0_i32_1 = arith.constant 0 : i32
    return %c0_i32, %c0_i32_0 : i32, i32
  }
  func.func @transform_4(%arg0: i32) -> (i32, i32) {
    %c0_i32 = arith.constant 0 : i32
    %c0_i32_0 = arith.constant 0 : i32
    %c0_i32_1 = arith.constant 0 : i32
    return %c0_i32, %c0_i32_0 : i32, i32
  }
  func.func @transform_5(%arg0: i32) -> (i32, i32, i32) {
    %c0_i32 = arith.constant 0 : i32
    %c0_i32_0 = arith.constant 0 : i32
    %c0_i32_1 = arith.constant 0 : i32
    return %arg0, %c0_i32, %c0_i32_0 : i32, i32, i32
  }
}

</mosaic_0001>

<bundles_post_ra>
// kernel: _lambda_.9
= control target key start
LH: loop header
LB: loop body
LE: loop exit
PB: predicated region body
PF: predicated region fallthrough
CT: control target
= control target key end

     0   :  { %7 = vsyncpa [#allocation3], 0  ;;  %s2607_s0 = inlined_call_operand.hbm [shape: bf16[2,8,1190], index: 0, kind: input, shape index: {}]   ;;  %s2608_s1 = inlined_call_operand.hbm [shape: bf16[2,8,1190], index: 1, kind: input, shape index: {}]   ;;  %s2609_s2 = inlined_call_operand.hbm [shape: bf16[2,8,1088], index: 2, kind: output, shape index: {}]  }
   0x1   :  { %9 = vsyncpa [#allocation3 + $0x1], 0 }
   0x2   :  { %10 = vsyncpa [#allocation6], 0 }
   0x3   :  { %12 = vsyncpa [#allocation6 + $0x1], 0 }
   0x4   :  { %13 = vsyncpa [#allocation4], 0 }
   0x5   :  { %15 = vsyncpa [#allocation4 + $0x1], 0  ;;  %s1609_s9 = smov 0   ;;  %s1611_s10 = smov 0  }
   0x6   :  { %s1613_s11 = smov 0   ;;  %s1615_s12 = smov 0  }
   0x7 LB: > { %s1630_s13 = sadd.s32 4294967295, %s1581_s12   ;;  %s1173_s14 = sadd.s32 4294967294, %s1581_s12   ;;  %s1581_s12 = sphi %s1615_s12, %s2668_s12   ;;  %s1577_s11 = sphi %s1613_s11, %s2667_s11   ;;  %s1573_s10 = sphi %s1611_s10, %s2666_s10   ;;  %s1569_s9 = sphi %s1609_s9, %s2665_s9  }
   0x8   : > { %s1634_s15 = sadd.s32 1, %s1581_s12   ;;  %s28_s16 = sadd.s32 1, %s1577_s11 }
   0x9   : > { %s25_s17 = ssub.s32 %s1581_s12, %s1634_s15  ;;  %p35_p0 = scmp.ne.s32.totalorder %s1577_s11, %s1573_s10 }
   0xa   : > { %p26_p1 = scmp.eq.s32.totalorder %s25_s17, 0  ;;  %p36_p2 = scmp.eq.s32.totalorder %s1581_s12, 0 }
   0xb   : > { %p41_p3 = scmp.ne.s32.totalorder %s1573_s10, %s1569_s9  ;;  %p42_p4 = scmp.eq.s32.totalorder %s1630_s13, 0 }
   0xc   : > { %s1646_s18 = scalar_select %p26_p1, %s1577_s11, %s28_s16  }
   0xd   : > { %p37_p5 = por %p36_p2, %p35_p0  ;;  %p1648_p6 = por %p42_p4, %p41_p3 }
   0xe   : > { %p91_p7 = scmp.eq.s32.totalorder %s1630_s13, 1  ;;  %p97_p8 = scmp.eq.s32.totalorder %s1173_s14, 1 }
   0xf   : > { %s2628_s19 = scalar_select %p1648_p6, 1, 0 }
  0x10   : > { %p1216_p10 = scmp.lt.s32.totalorder %s1581_s12, 2  ;;  %p1655_p11 = por %p91_p7, %p35_p0 }
  0x11   : > { %p1659_p12 = por %p97_p8, %p41_p3  ;;  %s1664_s22 = sand.u32 1, %s1577_s11  }
  0x12   : > { %s2629_s20 = scalar_select %p1655_p11, 1, 0 }
  0x13   : > { %s2630_s21 = scalar_select %p1659_p12, 1, 0 }
  0x14   : > { %s1193_s23 = smul.u32 640, %s1581_s12  ;;  %p1675_p13 = pnand %p1216_p10, %p37_p5 }
  0x15   : > { %s1192_s24 = smul.u32 40, %s1664_s22  ;;  %s118_s3 = scalar_lea.sflag [#allocation3], %s1664_s22 }
  0x16   : > { %s1673_s27 = scalar_lea.hbm %s2607_s0, %s1193_s23  ;;  %p1453_p3 = pneg %p1675_p13 }
  0x17   : > { %s121_s29 = scalar_lea.vmem [#allocation2], %s1192_s24  ;;  %s1451_s4 = scalar_lea.hbm %s1673_s27, 640 }
  0x18   : > { %s129_s30 = sshll.u32 %s121_s29, 4  ;;  %p1452_p2 = scmp.ne.s32.totalorder %s1673_s27, %s1451_s4  ;;  %s1682_s30 = int_to_ptr.vmem [resolvable:$true] %s129_s30 }
  0x19   : > { %s1456_s7 = scalar_lea.hbm %s2607_s0, 1280  ;;  %p1457_p7 = scmp.lt.u32.totalorder %s1673_s27, %s2607_s0 }
  0x1a   : > { %p1454_p4 = pnand %p1453_p3, %p1452_p2  ;;  %p1458_p8 = scmp.lt.u32.totalorder %s1456_s7, %s1451_s4 }
  0x1b   : > { %p1460_p9 = scmp.lt.u32.totalorder %s1451_s4, %s1673_s27 }
  0x1c   : > { %p1455_p5 = pneg %p1454_p4  ;;  %p1459_p10 = por %p1458_p8, %p1457_p7 }
  0x1e   : > { %p1461_p0 = por %p1460_p9, %p1459_p10 }
  0x20   : > { %p1462_p1 = pnand %p1461_p0, %p1455_p5 }
  0x22   : > { %1465 = shalt.err (!%p1462_p1)
}
  0x23   : > { %s1466_s16 = scalar_lea.vmem %s1682_s30, 640  ;;  %s1583_s17 = smov [#allocation2]  }
  0x24   : > { %p1467_p2 = scmp.ne.s32.totalorder %s1682_s30, %s1466_s16  ;;  %s1471_s25 = sshll.u32 %s1583_s17, 4  ;;  %s1472_s25 = int_to_ptr.vmem [resolvable:$false] %s1471_s25 }
  0x25   : > { %s1473_s26 = scalar_lea.vmem %s1472_s25, 1280  ;;  %p1474_p11 = scmp.lt.s32.totalorder %s1682_s30, %s1472_s25 }
  0x26   : > { %p1469_p4 = pnand %p1467_p2, %p1453_p3  ;;  %p1475_p7 = scmp.lt.s32.totalorder %s1473_s26, %s1466_s16 }
  0x28   : > { %p1470_p12 = pneg %p1469_p4  ;;  %p1476_p8 = por %p1475_p7, %p1474_p11 }
  0x2a   : > { %p1477_p9 = pnand %p1476_p8, %p1470_p12 }
  0x2c   : > { %1480 = shalt.err (!%p1477_p9)
}
  0x2d   : > { %1208 = dma.hbm_to_vmem [thread:$0]  (!%p1675_p13), %s1673_s27, 640, %s1682_s30, %s118_s3  }
  0x2e   : > { %p2632_p0 = scmp.lt.s32.totalorder %s1581_s12, 3  ;;  %p2633_p1 = scmp.ge.s32.totalorder %s1581_s12, 1 }
  0x2f   : > { %s1724_s6 = scalar_lea.hbm %s2608_s1, %s1193_s23  ;;  %s140_s7 = scalar_lea.vmem [#allocation5], %s1192_s24 }
  0x30   : > { %p1715_p5 = pnand %p2633_p1, %p2632_p0  ;;  %s148_s8 = sshll.u32 %s140_s7, 4  ;;  %s149_s8 = int_to_ptr.vmem [resolvable:$true] %s148_s8 }
  0x31   : > { %s137_s27 = scalar_lea.sflag [#allocation6], %s1664_s22  ;;  %s1481_s30 = scalar_lea.hbm %s1724_s6, 640 }
  0x32   : > { %s2634_s29 = scalar_select %p1715_p5, 1, 0 }
  0x33   : > { %p1482_p11 = scmp.ne.s32.totalorder %s1724_s6, %s1481_s30  ;;  %s1486_s23 = scalar_lea.hbm %s2608_s1, 1280 }
  0x34   : > { %p1487_p2 = scmp.lt.u32.totalorder %s1724_s6, %s2608_s1  ;;  %p1488_p4 = scmp.lt.u32.totalorder %s1486_s23, %s1481_s30 }
  0x35   : > { %p1484_p12 = pnand %p1482_p11, %p1453_p3  ;;  %p1490_p8 = scmp.lt.u32.totalorder %s1481_s30, %s1724_s6 }
  0x36   : > { %p1489_p7 = por %p1488_p4, %p1487_p2 }
  0x37   : > { %p1485_p10 = pneg %p1484_p12 }
  0x38   : > { %p1491_p9 = por %p1490_p8, %p1489_p7 }
  0x3a   : > { %p1492_p0 = pnand %p1491_p9, %p1485_p10 }
  0x3c   : > { %1495 = shalt.err (!%p1492_p0)
}
  0x3d   : > { %s1496_s22 = scalar_lea.vmem %s149_s8, 640  ;;  %s1584_s24 = smov [#allocation5]  }
  0x3e   : > { %p1497_p1 = scmp.ne.s32.totalorder %s149_s8, %s1496_s22  ;;  %s1501_s25 = sshll.u32 %s1584_s24, 4  ;;  %s1502_s25 = int_to_ptr.vmem [resolvable:$false] %s1501_s25 }
  0x3f   : > { %s1503_s26 = scalar_lea.vmem %s1502_s25, 1280  ;;  %p1504_p6 = scmp.lt.s32.totalorder %s149_s8, %s1502_s25 }
  0x40   : > { %p1499_p11 = pnand %p1497_p1, %p1453_p3  ;;  %p1505_p5 = scmp.lt.s32.totalorder %s1503_s26, %s1496_s22 }
  0x42   : > { %p1500_p12 = pneg %p1499_p11  ;;  %p1506_p2 = por %p1505_p5, %p1504_p6 }
  0x44   : > { %p1507_p4 = pnand %p1506_p2, %p1500_p12 }
  0x46   : > { %1510 = shalt.err (!%p1507_p4)
}
  0x47   : > { %1211 = dma.hbm_to_vmem [thread:$0]  (!%p1675_p13), %s1724_s6, 640, %s149_s8, %s137_s27  }
  0x48   : > { %p2635_p10 = scmp.ne.s32.totalorder %s2634_s29, 0 }
  0x4a   : > { %157 = sbr.rel (%p2635_p10) target bundleno = 458 (0x1ca), region = 28 }
  0x51   : > { %s1751_s4 = sand.u32 1, %s1573_s10   ;;  %p2636_p6 = scmp.ne.s32.totalorder %s2628_s19, 0 }
  0x52   : > { %s1196_s5 = smul.u32 40, %s1751_s4  ;;  %s160_s7 = scalar_lea.sflag [#allocation3], %s1751_s4 }
  0x54   : > { %s1755_s30 = scalar_lea.vmem [#allocation2], %s1196_s5 }
  0x55   : > { %1556 = dma.done.wait (%p2636_p6), %s160_s7, 640  }
  0x56   : > { %1558 = vsyncadd (%p2636_p6), %s160_s7, 4294966656  ;;  %s169_s28 = scalar_lea.sflag [#allocation6], %s1751_s4  ;;  %s1762_s29 = scalar_lea.vmem [#allocation5], %s1196_s5 }
  0x57   : > { %1560 = dma.done.wait (%p2636_p6), %s169_s28, 640  }
  0x58   : > { %1562 = vsyncadd (%p2636_p6), %s169_s28, 4294966656  ;;  %v199_v0 = vld [vmem:[%s1755_s30 + $0x8] sm:$0xff]  ;;  %v213_v1 = vld [vmem:[%s1762_s29 + $0x8] sm:$0xff]  ;;  %s1585_s19 = smov 127   ;;  %s1586_s6 = smov 126   ;;  %vm360_vm0 = vcmask 1031168  }
  0x59   : > { %v198_v2 = vld [vmem:[%s1755_s30] sm:$0xff]  ;;  %v205_v3 = vunpack.c.l.bf16 %v199_v0  ;;  %v1771_v4 = vunpack.c.l.bf16 %v213_v1  ;;  %v212_v6 = vld [vmem:[%s1762_s29] sm:$0xff]  ;;  %v206_v7 = vunpack.c.h.bf16 %v199_v0  ;;  %v1776_v9 = vunpack.c.h.bf16 %v213_v1  ;;  %v201_v22 = vld [vmem:[%s1755_s30 + $0x18] sm:$0xff]  ;;  %s1587_s8 = smov 94   ;;  %s1588_s27 = smov 93  }
  0x5a   : > { %v203_v5 = vunpack.c.l.bf16 %v198_v2  ;;  %v1774_v8 = vunpack.c.l.bf16 %v212_v6  ;;  %v204_v10 = vunpack.c.h.bf16 %v198_v2  ;;  %v1778_v11 = vunpack.c.h.bf16 %v212_v6  ;;  %v200_v12 = vld [vmem:[%s1755_s30 + $0x10] sm:$0xff]  ;;  %v214_v13 = vld [vmem:[%s1762_s29 + $0x10] sm:$0xff]  ;;  %v215_v23 = vld [vmem:[%s1762_s29 + $0x18] sm:$0xff]  ;;  %s1589_s3 = smov 92   ;;  %s1590_s14 = smov 60  }
  0x5b   : > { %v1783_v14 = vmul.f32 %v1771_v4, %v205_v3  ;;  %v1791_v16 = vmul.f32 %v1776_v9, %v206_v7  ;;  %v208_v17 = vunpack.c.h.bf16 %v200_v12  ;;  %v1793_v18 = vunpack.c.h.bf16 %v214_v13  ;;  %v202_v30 = vld [vmem:[%s1755_s30 + $0x20] sm:$0xf]  ;;  %v216_v31 = vld [vmem:[%s1762_s29 + $0x20] sm:$0xf]  ;;  %s1591_s23 = smov 59   ;;  %s1592_s16 = smov 58  }
  0x5c   : > { %v1786_v15 = vmul.f32 %v1774_v8, %v203_v5  ;;  %v1798_v19 = vmul.f32 %v1778_v11, %v204_v10  ;;  %v207_v20 = vunpack.c.l.bf16 %v200_v12  ;;  %v1800_v21 = vunpack.c.l.bf16 %v214_v13  ;;  %v698_v57 = vld [vmem:[%s1755_s30 + $0x20] sm:$0xff]  ;;  %v701_v58 = vld [vmem:[%s1762_s29 + $0x20] sm:$0xff]  ;;  %s1197_s17 = smul.u32 36, %s1751_s4  ;;  %s1066_s30 = scalar_lea.sflag [#allocation4], %s1751_s4 }
  0x5d   : > { %248 = vrot.lane.b32.xlu1 %v1783_v14, %s1585_s19  ;;  %2637 = vst [vmem:[#allocation11_spill] sm:$0xff] %v1791_v16  ;;  %v1807_v24 = vmul.f32 %v1793_v18, %v208_v17  ;;  %v210_v25 = vunpack.c.h.bf16 %v201_v22  ;;  %v1809_v26 = vunpack.c.h.bf16 %v215_v23  ;;  %v209_v28 = vunpack.c.l.bf16 %v201_v22  ;;  %s1198_s24 = smul.u32 576, %s1630_s13  ;;  %p2662_p3 = scmp.ne.s32.totalorder %s2629_s20, 0 }
  0x5e   : > { %244 = vrot.lane.b32.xlu0 %v1786_v15, %s1585_s19  ;;  %2638 = vst [vmem:[#allocation12_spill] sm:$0xff] %v1798_v19  ;;  %v1814_v27 = vmul.f32 %v1800_v21, %v207_v20  ;;  %v1816_v29 = vunpack.c.l.bf16 %v215_v23  ;;  %v211_v34 = vunpack.c.l.bf16 %v202_v30  ;;  %v1830_v35 = vunpack.c.l.bf16 %v216_v31  ;;  %s2534_s22 = scalar_lea.vmem [#allocation7], %s1197_s17  ;;  %s1593_s13 = smov [#allocation7]  }
  0x5f   : > { %v1823_v32 = vmul.f32 %v1809_v26, %v210_v25  ;;  %v1836_v36 = vpack.i.bf16 %v1778_v11, %v1774_v8  ;;  %v1847_v38 = vpack.i.bf16 %v1793_v18, %v1800_v21  ;;  %v1853_v39 = vpack.i.bf16 %v1776_v9, %v1771_v4  ;;  %s1080_s25 = sshll.u32 %s2534_s22, 4  ;;  %s2562_s7 = scalar_lea.hbm %s2609_s2, %s1198_s24  ;;  %s2564_s25 = int_to_ptr.vmem [resolvable:$true] %s1080_s25 }
  0x60   : > { %v1828_v33 = vmul.f32 %v1816_v29, %v209_v28  ;;  %v1841_v37 = vmul.f32 %v1830_v35, %v211_v34  ;;  %v1861_v40 = vpack.i.bf16 %v1809_v26, %v1816_v29  ;;  %v700_v61 = vunpack.c.h.bf16 %v698_v57  ;;  %s1511_s28 = scalar_lea.vmem %s2564_s25, 576  ;;  %s1515_s29 = sshll.u32 %s1593_s13, 4  ;;  %s1516_s29 = int_to_ptr.vmem [resolvable:$false] %s1515_s29 }
  0x61   : > { %250 = vrot.lane.b32.xlu1 %v1791_v16, %s1585_s19  ;;  %v703_v62 = vunpack.c.h.bf16 %v701_v58  ;;  %v699_v63 = vunpack.c.l.bf16 %v698_v57  ;;  %v702_v0 = vunpack.c.l.bf16 %v701_v58  ;;  %vm262_vm1 = vcmask 1039360   ;;  %p1512_p13 = scmp.ne.s32.totalorder %s2564_s25, %s1511_s28  ;;  %p1518_p8 = scmp.lt.s32.totalorder %s2564_s25, %s1516_s29 }
  0x62   : > { %246 = vrot.lane.b32.xlu0 %v1798_v19, %s1585_s19  ;;  %vm449_vm2 = vcmask 769024   ;;  %vm538_vm3 = vcmask 760832   ;;  %vm627_vm4 = vcmask 752640   ;;  %vm728_vm5 = vcmask 490496  }
  0x63   : > { %v1979_v6 = vmul.f32 %v703_v62, %v700_v61  ;;  %v1983_v7 = vmul.f32 %v702_v0, %v699_v63  ;;  %v2019_v58 = vpack.i.bf16 %v703_v62, %v702_v0  ;;  %vm825_vm6 = vcmask 482304   ;;  %p1513_p5 = pnand %p1512_p13, %p2662_p3 }
  0x64   : > { %vm920_vm7 = vcmask 474112   ;;  %vm1063_vm8 = vcmask 519168  }
  0x65   : > { %254 = vrot.lane.b32.xlu1 %v1807_v24, %s1585_s19  ;;  %2640 = vst [vmem:[#allocation14_spill] sm:$0xff] %v1979_v6  ;;  %2641 = vst [vmem:[#allocation15_spill] sm:$0xff] %v1983_v7  ;;  %p1514_p7 = pneg %p1513_p5 }
  0x66   : > { %252 = vrot.lane.b32.xlu0 %v1814_v27, %s1585_s19 }
  0x69   : > { %258 = vrot.lane.b32.xlu1 %v1823_v32, %s1585_s19 }
  0x6a   : > { %256 = vrot.lane.b32.xlu0 %v1828_v33, %s1585_s19 }
  0x6d   : > { %1259 = vrot.lane.b32.xlu1 %v1836_v36, %s1585_s19 }
  0x6e   : > { %260 = vrot.lane.b32.xlu0 %v1841_v37, %s1585_s19 }
  0x71   : > { %1269 = vrot.lane.b32.xlu1 %v1847_v38, %s1585_s19 }
  0x72   : > { %1264 = vrot.lane.b32.xlu0 %v1853_v39, %s1585_s19 }
  0x75   : > { %314 = vrot.lane.b32.xlu1 %v1830_v35, %s1585_s19 }
  0x76   : > { %1274 = vrot.lane.b32.xlu0 %v1861_v40, %s1585_s19  ;;  %s1517_s19 = scalar_lea.vmem %s1516_s29, 1152 }
  0x77   : > { %p1519_p9 = scmp.lt.s32.totalorder %s1517_s19, %s1511_s28 }
  0x79   : > { %344 = vrot.lane.b32.xlu1 %v1798_v19, %s1586_s6  ;;  %p1520_p0 = por %p1519_p9, %p1518_p8 }
  0x7a   : > { %342 = vrot.lane.b32.xlu0 %v1786_v15, %s1586_s6 }
  0x7b   : > { %p1521_p1 = pnand %p1520_p0, %p1514_p7 }
  0x7d   : > { %348 = vrot.lane.b32.xlu1 %v1791_v16, %s1586_s6 }
  0x7e   : > { %346 = vrot.lane.b32.xlu0 %v1783_v14, %s1586_s6 }
  0x81   : > { %352 = vrot.lane.b32.xlu1 %v1807_v24, %s1586_s6 }
  0x82   : > { %350 = vrot.lane.b32.xlu0 %v1814_v27, %s1586_s6 }
  0x85   : > { %356 = vrot.lane.b32.xlu1 %v1823_v32, %s1586_s6 }
  0x86   : > { %354 = vrot.lane.b32.xlu0 %v1828_v33, %s1586_s6 }
  0x89   : > { %1279 = vrot.lane.b32.xlu1 %v1836_v36, %s1586_s6 }
  0x8a   : > { %358 = vrot.lane.b32.xlu0 %v1841_v37, %s1586_s6 }
  0x8d   : > { %1289 = vrot.lane.b32.xlu1 %v1847_v38, %s1586_s6 }
  0x8e   : > { %1284 = vrot.lane.b32.xlu0 %v1853_v39, %s1586_s6 }
  0x91   : > { %403 = vrot.lane.b32.xlu1 %v1830_v35, %s1586_s6 }
  0x92   : > { %1294 = vrot.lane.b32.xlu0 %v1861_v40, %s1586_s6 }
  0x95   : > { %433 = vrot.lane.b32.xlu1 %v1798_v19, %s1587_s8 }
  0x96   : > { %431 = vrot.lane.b32.xlu0 %v1786_v15, %s1587_s8 }
  0x99   : > { %437 = vrot.lane.b32.xlu1 %v1791_v16, %s1587_s8 }
  0x9a   : > { %435 = vrot.lane.b32.xlu0 %v1783_v14, %s1587_s8 }
  0x9d   : > { %441 = vrot.lane.b32.xlu1 %v1807_v24, %s1587_s8 }
  0x9e   : > { %439 = vrot.lane.b32.xlu0 %v1814_v27, %s1587_s8 }
  0xa1   : > { %445 = vrot.lane.b32.xlu1 %v1823_v32, %s1587_s8 }
  0xa2   : > { %443 = vrot.lane.b32.xlu0 %v1828_v33, %s1587_s8 }
  0xa5   : > { %1299 = vrot.lane.b32.xlu1 %v1836_v36, %s1587_s8 }
  0xa6   : > { %447 = vrot.lane.b32.xlu0 %v1841_v37, %s1587_s8 }
  0xa9   : > { %1309 = vrot.lane.b32.xlu1 %v1847_v38, %s1587_s8 }
  0xaa   : > { %1304 = vrot.lane.b32.xlu0 %v1853_v39, %s1587_s8 }
  0xad   : > { %492 = vrot.lane.b32.xlu1 %v1830_v35, %s1587_s8 }
  0xae   : > { %1314 = vrot.lane.b32.xlu0 %v1861_v40, %s1587_s8 }
  0xb1   : > { %522 = vrot.lane.b32.xlu1 %v1798_v19, %s1588_s27 }
  0xb2   : > { %520 = vrot.lane.b32.xlu0 %v1786_v15, %s1588_s27 }
  0xb5   : > { %526 = vrot.lane.b32.xlu1 %v1791_v16, %s1588_s27 }
  0xb6   : > { %524 = vrot.lane.b32.xlu0 %v1783_v14, %s1588_s27 }
  0xb9   : > { %530 = vrot.lane.b32.xlu1 %v1807_v24, %s1588_s27 }
  0xba   : > { %528 = vrot.lane.b32.xlu0 %v1814_v27, %s1588_s27 }
  0xbd   : > { %534 = vrot.lane.b32.xlu1 %v1823_v32, %s1588_s27 }
  0xbe   : > { %532 = vrot.lane.b32.xlu0 %v1828_v33, %s1588_s27 }
  0xc1   : > { %1319 = vrot.lane.b32.xlu1 %v1836_v36, %s1588_s27 }
  0xc2   : > { %536 = vrot.lane.b32.xlu0 %v1841_v37, %s1588_s27 }
  0xc5   : > { %1329 = vrot.lane.b32.xlu1 %v1847_v38, %s1588_s27 }
  0xc6   : > { %1324 = vrot.lane.b32.xlu0 %v1853_v39, %s1588_s27 }
  0xc9   : > { %581 = vrot.lane.b32.xlu1 %v1830_v35, %s1588_s27 }
  0xca   : > { %1334 = vrot.lane.b32.xlu0 %v1861_v40, %s1588_s27 }
  0xcd   : > { %611 = vrot.lane.b32.xlu1 %v1798_v19, %s1589_s3 }
  0xce   : > { %609 = vrot.lane.b32.xlu0 %v1786_v15, %s1589_s3 }
  0xcf   : > { %v1911_v41 = vpop.permute.xlu1 %248 }
  0xd0   : > { %v1913_v42 = vpop.permute.xlu0 %244 }
  0xd1   : > { %615 = vrot.lane.b32.xlu1 %v1791_v16, %s1589_s3 }
  0xd2   : > { %613 = vrot.lane.b32.xlu0 %v1783_v14, %s1589_s3 }
  0xd3   : > { %v1917_v43 = vpop.permute.xlu1 %250 }
  0xd4   : > { %v1919_v44 = vpop.permute.xlu0 %246 }
  0xd5   : > { %619 = vrot.lane.b32.xlu1 %v1807_v24, %s1589_s3 }
  0xd6   : > { %617 = vrot.lane.b32.xlu0 %v1814_v27, %s1589_s3 }
  0xd7   : > { %v1923_v45 = vpop.permute.xlu1 %254 }
  0xd8   : > { %v1925_v46 = vpop.permute.xlu0 %252 }
  0xd9   : > { %623 = vrot.lane.b32.xlu1 %v1823_v32, %s1589_s3 }
  0xda   : > { %621 = vrot.lane.b32.xlu0 %v1828_v33, %s1589_s3 }
  0xdb   : > { %v1929_v47 = vpop.permute.xlu1 %258 }
  0xdc   : > { %v1931_v48 = vpop.permute.xlu0 %256 }
  0xdd   : > { %1339 = vrot.lane.b32.xlu1 %v1836_v36, %s1589_s3 }
  0xde   : > { %625 = vrot.lane.b32.xlu0 %v1841_v37, %s1589_s3 }
  0xdf   : > { %v1935_v49 = vpop.permute.xlu1 %1259 }
  0xe0   : > { %v1937_v50 = vpop.permute.xlu0 %260 }
  0xe1   : > { %1349 = vrot.lane.b32.xlu1 %v1847_v38, %s1589_s3 }
  0xe2   : > { %1344 = vrot.lane.b32.xlu0 %v1853_v39, %s1589_s3 }
  0xe3   : > { %v1941_v51 = vpop.permute.xlu1 %1269 }
  0xe4   : > { %v1943_v52 = vpop.permute.xlu0 %1264 }
  0xe5   : > { %670 = vrot.lane.b32.xlu1 %v1830_v35, %s1589_s3 }
  0xe6   : > { %1354 = vrot.lane.b32.xlu0 %v1861_v40, %s1589_s3 }
  0xe7   : > { %v1947_v53 = vpop.permute.xlu1 %314 }
  0xe8   : > { %v1949_v54 = vpop.permute.xlu0 %1274 }
  0xe9   : > { %710 = vrot.lane.b32.xlu1 %v1798_v19, %s1590_s14 }
  0xea   : > { %708 = vrot.lane.b32.xlu0 %v1786_v15, %s1590_s14 }
  0xeb   : > { %v1955_v55 = vpop.permute.xlu1 %344 }
  0xec   : > { %v1957_v56 = vpop.permute.xlu0 %342 }
  0xed   : > { %714 = vrot.lane.b32.xlu1 %v1791_v16, %s1590_s14 }
  0xee   : > { %712 = vrot.lane.b32.xlu0 %v1783_v14, %s1590_s14 }
  0xef   : > { %v349_v59 = vpop.permute.xlu1 %348 }
  0xf0   : > { %v1965_v60 = vpop.permute.xlu0 %346 }
  0xf1   : > { %2639 = vst [vmem:[#allocation13_spill] sm:$0xff] %v1965_v60  ;;  %718 = vrot.lane.b32.xlu1 %v1807_v24, %s1590_s14 }
  0xf2   : > { %716 = vrot.lane.b32.xlu0 %v1814_v27, %s1590_s14 }
  0xf3   : > { %v353_v1 = vpop.permute.xlu1 %352 }
  0xf4   : > { %v351_v2 = vpop.permute.xlu0 %350 }
  0xf5   : > { %v1972_v3 = vsel %vm360_vm0, %v349_v59, %v351_v2  ;;  %v1975_v5 = vsel %vm360_vm0, %v351_v2, %v353_v1  ;;  %722 = vrot.lane.b32.xlu1 %v1823_v32, %s1590_s14 }
  0xf6   : > { %720 = vrot.lane.b32.xlu0 %v1828_v33, %s1590_s14 }
  0xf7   : > { %v357_v10 = vpop.permute.xlu1 %356 }
  0xf8   : > { %v355_v12 = vpop.permute.xlu0 %354 }
  0xf9   : > { %v1986_v13 = vsel %vm360_vm0, %v353_v1, %v355_v12  ;;  %v1989_v17 = vsel %vm360_vm0, %v355_v12, %v357_v10  ;;  %726 = vrot.lane.b32.xlu1 %v1979_v6, %s1590_s14  ;;  %v265_v12 = vsel %vm262_vm1, %v1911_v41, %v1917_v43 }
  0xfa   : > { %724 = vrot.lane.b32.xlu0 %v1983_v7, %s1590_s14  ;;  %v363_v7 = vsel %vm360_vm0, %v1965_v60, %v349_v59  ;;  %v267_v59 = vsel %vm262_vm1, %v1925_v46, %v1923_v45 }
  0xfb   : > { %v1995_v20 = vpop.permute.xlu1 %1279 }
  0xfc   : > { %v1997_v22 = vpop.permute.xlu0 %358  ;;  %v2615_v31 = vunpack.i.h.bf16 %v1995_v20 }
  0xfd   : > { %v2001_v23 = vsel %vm360_vm0, %v357_v10, %v1997_v22  ;;  %1364 = vrot.lane.b32.xlu1 %v1853_v39, %s1590_s14 }
  0xfe   : > { %1359 = vrot.lane.b32.xlu0 %v1836_v36, %s1590_s14 }
  0xff   : > { %v2007_v25 = vpop.permute.xlu1 %1289 }
 0x100   : > { %v2614_v28 = vunpack.i.l.bf16 %v2007_v25  ;;  %v2010_v30 = vpop.permute.xlu0 %1284  ;;  %v2624_v62 = vunpack.i.h.bf16 %v2007_v25 }
 0x101   : > { %v2613_v34 = vunpack.i.h.bf16 %v2010_v30  ;;  %v2612_v57 = vunpack.i.l.bf16 %v2010_v30  ;;  %1374 = vrot.lane.b32.xlu1 %v1861_v40, %s1590_s14 }
 0x102   : > { %1369 = vrot.lane.b32.xlu0 %v1847_v38, %s1590_s14 }
 0x103   : > { %v2026_v61 = vsel %vm360_vm0, %v2613_v34, %v2614_v28  ;;  %v2033_v63 = vsel %vm360_vm0, %v2615_v31, %v2612_v57  ;;  %v2035_v1 = vpop.permute.xlu1 %403  ;;  %v266_v31 = vsel %vm262_vm1, %v1917_v43, %v1925_v46  ;;  %v2081_v43 = vsel %vm262_vm1, %v1919_v44, %v1911_v41 }
 0x104   : > { %v2037_v2 = vpop.permute.xlu0 %1294 }
 0x105   : > { %v2622_v0 = vunpack.i.h.bf16 %v2037_v2  ;;  %v2623_v10 = vunpack.i.l.bf16 %v2037_v2  ;;  %1384 = vrot.lane.b32.xlu1 %v1836_v36, %s1591_s23 }
 0x106   : > { %1379 = vrot.lane.b32.xlu0 %v2019_v58, %s1590_s14 }
 0x107   : > { %v2053_v57 = vsel %vm360_vm0, %v2622_v0, %v2035_v1  ;;  %v2060_v34 = vsel %vm360_vm0, %v2624_v62, %v2623_v10  ;;  %v434_v28 = vpop.permute.xlu1 %433  ;;  %v282_v0 = vadd.f32 %v265_v12, %v1783_v14  ;;  %v263_v10 = vsel %vm262_vm1, %v1913_v42, %v1919_v44 }
 0x108   : > { %2642 = vst [vmem:[#allocation16_spill] sm:$0xff] %v2053_v57  ;;  %v432_v6 = vpop.permute.xlu0 %431  ;;  %v268_v12 = vsel %vm262_vm1, %v1923_v45, %v1931_v48  ;;  %v269_v42 = vsel %vm262_vm1, %v1931_v48, %v1929_v47  ;;  %v1261_v44 = vunpack.i.l.bf16 %v1935_v49  ;;  %v1272_v57 = vunpack.i.h.bf16 %v1941_v51 }
 0x109   : > { %v2068_v19 = vsel %vm449_vm2, %v432_v6, %v434_v28  ;;  %1394 = vrot.lane.b32.xlu1 %v1847_v38, %s1591_s23  ;;  %v283_v6 = vadd.f32 %v266_v31, %v1791_v16  ;;  %v380_v60 = vadd.f32 %v363_v7, %v282_v0  ;;  %v284_v45 = vadd.f32 %v267_v59, %v1814_v27 }
 0x10a   : > { %2643 = vst [vmem:[#allocation17_spill] sm:$0xff] %v2068_v19  ;;  %1389 = vrot.lane.b32.xlu0 %v1853_v39, %s1591_s23  ;;  %v1262_v19 = vunpack.i.h.bf16 %v1935_v49  ;;  %v1271_v48 = vunpack.i.l.bf16 %v1941_v51  ;;  %v1267_v16 = vunpack.i.h.bf16 %v1943_v52  ;;  %v2110_v49 = vadd.f32 %v263_v10, %v1786_v15 }
 0x10b   : > { %v438_v62 = vpop.permute.xlu1 %437  ;;  %v286_v0 = vadd.f32 %v269_v42, %v1828_v33  ;;  %v270_v51 = vsel %vm262_vm1, %v1929_v47, %v1937_v50  ;;  %v381_v59 = vadd.f32 %v1972_v3, %v283_v6  ;;  %v1277_v6 = vunpack.i.h.bf16 %v1949_v54 }
 0x10c   : > { %v436_v41 = vpop.permute.xlu0 %435  ;;  %v319_v47 = vsel %vm262_vm1, %v1267_v16, %v1271_v48 }
 0x10d   : > { %v2097_v46 = vsel %vm449_vm2, %v434_v28, %v436_v41  ;;  %v452_v31 = vsel %vm449_vm2, %v436_v41, %v438_v62  ;;  %1404 = vrot.lane.b32.xlu1 %v2019_v58, %s1591_s23  ;;  %v285_v28 = vadd.f32 %v268_v12, %v1807_v24  ;;  %v1266_v41 = vunpack.i.l.bf16 %v1943_v52 }
 0x10e   : > { %2644 = vst [vmem:[#allocation18_spill] sm:$0xff] %v2097_v46  ;;  %v2105_v7 = vadd.f32 %v452_v31, %v380_v60  ;;  %1399 = vrot.lane.b32.xlu0 %v1861_v40, %s1591_s23  ;;  %v288_v60 = vadd.f32 %v1937_v50, %v1841_v37  ;;  %v382_v31 = vadd.f32 %v1975_v5, %v284_v45  ;;  %v1281_v37 = vunpack.i.l.bf16 %v1995_v20 }
 0x10f   : > { %v442_v46 = vpop.permute.xlu1 %441  ;;  %v320_v12 = vsel %vm262_vm1, %v1271_v48, %v1272_v57  ;;  %v287_v5 = vadd.f32 %v270_v51, %v1823_v32  ;;  %v318_v48 = vsel %vm262_vm1, %v1266_v41, %v1267_v16  ;;  %v336_v51 = vadd.f32 %v319_v47, %v1776_v9 }
 0x110   : > { %2645 = vst [vmem:[#allocation19_spill] sm:$0xff] %v2105_v7  ;;  %v440_v10 = vpop.permute.xlu0 %439  ;;  %v316_v7 = vsel %vm262_vm1, %v1261_v44, %v1262_v19  ;;  %v1276_v44 = vunpack.i.l.bf16 %v1949_v54  ;;  %v2646_v16 = vunpack.i.h.bf16 %v1995_v20  ;;  %v335_v9 = vadd.f32 %v318_v48, %v1771_v4 }
 0x111   : > { %v453_v42 = vsel %vm449_vm2, %v438_v62, %v440_v10  ;;  %v454_v52 = vsel %vm449_vm2, %v440_v10, %v442_v46  ;;  %1414 = vrot.lane.b32.xlu1 %v1853_v39, %s1592_s16  ;;  %v317_v62 = vsel %vm262_vm1, %v1262_v19, %v1266_v41  ;;  %v333_v45 = vadd.f32 %v316_v7, %v1774_v8 }
 0x112   : > { %v2130_v50 = vadd.f32 %v453_v42, %v381_v59  ;;  %v2132_v3 = vadd.f32 %v454_v52, %v382_v31  ;;  %1409 = vrot.lane.b32.xlu0 %v1836_v36, %s1592_s16  ;;  %v383_v59 = vadd.f32 %v1986_v13, %v285_v28  ;;  %v384_v31 = vadd.f32 %v1989_v17, %v286_v0 }
 0x113   : > { %v446_v39 = vpop.permute.xlu1 %445  ;;  %v337_v36 = vadd.f32 %v320_v12, %v1800_v21  ;;  %v334_v8 = vadd.f32 %v317_v62, %v1778_v11  ;;  %v405_v54 = vsel %vm360_vm0, %v1281_v37, %v2646_v16  ;;  %v323_v21 = vsel %vm262_vm1, %v1277_v6, %v1947_v53 }
 0x114   : > { %v444_v10 = vpop.permute.xlu0 %443  ;;  %v386_v11 = vadd.f32 %v1997_v22, %v288_v60  ;;  %v322_v20 = vsel %vm262_vm1, %v1276_v44, %v1277_v6  ;;  %v385_v7 = vadd.f32 %v2001_v23, %v287_v5  ;;  %v422_v12 = vadd.f32 %v405_v54, %v333_v45 }
 0x115   : > { %v455_v19 = vsel %vm449_vm2, %v442_v46, %v444_v10  ;;  %v456_v42 = vsel %vm449_vm2, %v444_v10, %v446_v39  ;;  %1424 = vrot.lane.b32.xlu1 %v1861_v40, %s1592_s16  ;;  %v321_v40 = vsel %vm262_vm1, %v1272_v57, %v1276_v44  ;;  %v2648_v4 = vunpack.i.l.bf16 %v2007_v25 }
 0x116   : > { %v2154_v13 = vadd.f32 %v455_v19, %v383_v59  ;;  %v2156_v17 = vadd.f32 %v456_v42, %v384_v31  ;;  %1419 = vrot.lane.b32.xlu0 %v1847_v38, %s1592_s16  ;;  %v2647_v38 = vunpack.i.h.bf16 %v2007_v25  ;;  %v341_v22 = vadd.f32 %v1947_v53, %v1830_v35 }
 0x117   : > { %v1300_v46 = vpop.permute.xlu1 %1299  ;;  %v2649_v23 = vunpack.i.h.bf16 %v2010_v30  ;;  %v2650_v60 = vunpack.i.l.bf16 %v2010_v30  ;;  %v340_v62 = vadd.f32 %v323_v21, %v1809_v26  ;;  %v338_v6 = vadd.f32 %v321_v40, %v1793_v18 }
 0x118   : > { %v1302_v28 = vunpack.i.h.bf16 %v1300_v46  ;;  %v1301_v0 = vunpack.i.l.bf16 %v1300_v46  ;;  %v448_v41 = vpop.permute.xlu0 %447  ;;  %v409_v52 = vsel %vm360_vm0, %v2648_v4, %v2647_v38  ;;  %v339_v44 = vadd.f32 %v322_v20, %v1816_v29  ;;  %v2655_v38 = vld [vmem:[#allocation11_spill] sm:$0xff]  ;;  %v2656_v4 = vld [vmem:[#allocation13_spill] sm:$0xff] }
 0x119   : > { %v457_v47 = vsel %vm449_vm2, %v446_v39, %v448_v41  ;;  %v2173_v57 = vadd.f32 %v448_v41, %v386_v11  ;;  %805 = vrot.lane.b32.xlu1 %v1786_v15, %s1591_s23  ;;  %v407_v37 = vsel %vm360_vm0, %v2650_v60, %v2649_v23  ;;  %v361_v30 = vsel %vm360_vm0, %v1957_v56, %v1955_v55  ;;  %v2654_v41 = vld [vmem:[#allocation16_spill] sm:$0xff] }
 0x11a   : > { %v494_v25 = vsel %vm449_vm2, %v1301_v0, %v1302_v28  ;;  %v2185_v5 = vadd.f32 %v457_v47, %v385_v7  ;;  %1429 = vrot.lane.b32.xlu0 %v2019_v58, %s1592_s16  ;;  %v426_v39 = vadd.f32 %v409_v52, %v337_v36  ;;  %v423_v31 = vadd.f32 %v2033_v63, %v334_v8  ;;  %v2653_v63 = vld [vmem:[#allocation12_spill] sm:$0xff] }
 0x11b   : > { %v2192_v35 = vadd.f32 %v494_v25, %v422_v12  ;;  %v1310_v53 = vpop.permute.xlu1 %1309  ;;  %v424_v58 = vadd.f32 %v407_v37, %v335_v9  ;;  %v425_v18 = vadd.f32 %v2026_v61, %v336_v51  ;;  %v430_v29 = vadd.f32 %v2035_v1, %v341_v22 }
 0x11c   : > { %v1312_v45 = vunpack.i.h.bf16 %v1310_v53  ;;  %v1311_v48 = vunpack.i.l.bf16 %v1310_v53  ;;  %v1305_v59 = vpop.permute.xlu0 %1304  ;;  %v2651_v19 = vunpack.i.h.bf16 %v2037_v2  ;;  %v2652_v56 = vunpack.i.l.bf16 %v2037_v2 }
 0x11d   : > { %v1307_v10 = vunpack.i.h.bf16 %v1305_v59  ;;  %v1306_v26 = vunpack.i.l.bf16 %v1305_v59  ;;  %809 = vrot.lane.b32.xlu1 %v1783_v14, %s1591_s23  ;;  %v281_v11 = vadd.f32 %v2081_v43, %v2653_v63  ;;  %v378_v7 = vadd.f32 %v361_v30, %v2110_v49  ;;  %v2657_v49 = vld [vmem:[#allocation17_spill] sm:$0xff]  ;;  %v2658_v30 = vld [vmem:[#allocation18_spill] sm:$0xff] }
 0x11e   : > { %v411_v36 = vsel %vm360_vm0, %v2652_v56, %v2651_v19  ;;  %v498_v42 = vsel %vm449_vm2, %v1311_v48, %v1312_v45  ;;  %807 = vrot.lane.b32.xlu0 %v2653_v63, %s1591_s23  ;;  %v429_v12 = vadd.f32 %v2654_v41, %v340_v62  ;;  %v362_v43 = vsel %vm360_vm0, %v1955_v55, %v2656_v4 }
 0x11f   : > { %v2210_v8 = vadd.f32 %v498_v42, %v426_v39  ;;  %v497_v16 = vsel %vm449_vm2, %v1307_v10, %v1311_v48  ;;  %v495_v54 = vsel %vm449_vm2, %v1302_v28, %v1306_v26  ;;  %v496_v61 = vsel %vm449_vm2, %v1306_v26, %v1307_v10  ;;  %v493_v1 = vpop.permute.xlu1 %492  ;;  %v2660_v10 = vld [vmem:[#allocation19_spill] sm:$0xff] }
 0x120   : > { %v2215_v51 = vadd.f32 %v495_v54, %v423_v31  ;;  %v2217_v9 = vadd.f32 %v496_v61, %v424_v58  ;;  %v2219_v2 = vadd.f32 %v497_v16, %v425_v18  ;;  %v2221_v21 = vadd.f32 %v493_v1, %v430_v29  ;;  %v1315_v40 = vpop.permute.xlu0 %1314  ;;  %v2659_v31 = vld [vmem:[#allocation15_spill] sm:$0xff]  ;;  %v2661_v16 = vld [vmem:[#allocation14_spill] sm:$0xff] }
 0x121   : > { %v1317_v46 = vunpack.i.h.bf16 %v1315_v40  ;;  %v1316_v20 = vunpack.i.l.bf16 %v1315_v40  ;;  %813 = vrot.lane.b32.xlu1 %v1814_v27, %s1591_s23  ;;  %v427_v28 = vadd.f32 %v2060_v34, %v338_v6  ;;  %v428_v0 = vadd.f32 %v411_v36, %v339_v44 }
 0x122   : > { %811 = vrot.lane.b32.xlu0 %v2655_v38, %s1591_s23  ;;  %v467_v60 = vadd.f32 %v2657_v49, %v378_v7  ;;  %v379_v55 = vadd.f32 %v362_v43, %v281_v11 }
 0x123   : > { %v501_v52 = vsel %vm449_vm2, %v1317_v46, %v493_v1  ;;  %v499_v47 = vsel %vm449_vm2, %v1312_v45, %v1316_v20  ;;  %v500_v22 = vsel %vm449_vm2, %v1316_v20, %v1317_v46  ;;  %v523_v23 = vpop.permute.xlu1 %522 }
 0x124   : > { %v2239_v34 = vadd.f32 %v499_v47, %v427_v28  ;;  %v2241_v37 = vadd.f32 %v500_v22, %v428_v0  ;;  %v2243_v25 = vadd.f32 %v501_v52, %v429_v12  ;;  %v521_v62 = vpop.permute.xlu0 %520  ;;  %v468_v39 = vadd.f32 %v2658_v30, %v379_v55 }
 0x125   : > { %v539_v6 = vsel %vm538_vm3, %v521_v62, %v523_v23  ;;  %817 = vrot.lane.b32.xlu1 %v1828_v33, %s1591_s23 }
 0x126   : > { %v2248_v44 = vadd.f32 %v539_v6, %v467_v60  ;;  %815 = vrot.lane.b32.xlu0 %v1807_v24, %s1591_s23 }
 0x127   : > { %v527_v53 = vpop.permute.xlu1 %526 }
 0x128   : > { %v525_v45 = vpop.permute.xlu0 %524 }
 0x129   : > { %v540_v48 = vsel %vm538_vm3, %v523_v23, %v525_v45  ;;  %v541_v59 = vsel %vm538_vm3, %v525_v45, %v527_v53  ;;  %821 = vrot.lane.b32.xlu1 %v2659_v31, %s1591_s23 }
 0x12a   : > { %v2257_v58 = vadd.f32 %v540_v48, %v468_v39  ;;  %v2260_v26 = vadd.f32 %v541_v59, %v2660_v10  ;;  %819 = vrot.lane.b32.xlu0 %v1823_v32, %s1591_s23 }
 0x12b   : > { %v531_v18 = vpop.permute.xlu1 %530 }
 0x12c   : > { %v529_v29 = vpop.permute.xlu0 %528 }
 0x12d   : > { %v542_v19 = vsel %vm538_vm3, %v527_v53, %v529_v29  ;;  %v543_v56 = vsel %vm538_vm3, %v529_v29, %v531_v18  ;;  %900 = vrot.lane.b32.xlu1 %v1786_v15, %s1592_s16 }
 0x12e   : > { %v2269_v36 = vadd.f32 %v542_v19, %v2130_v50  ;;  %v2272_v42 = vadd.f32 %v543_v56, %v2132_v3  ;;  %823 = vrot.lane.b32.xlu0 %v2661_v16, %s1591_s23 }
 0x12f   : > { %v535_v54 = vpop.permute.xlu1 %534 }
 0x130   : > { %v533_v61 = vpop.permute.xlu0 %532 }
 0x131   : > { %v544_v1 = vsel %vm538_vm3, %v531_v18, %v533_v61  ;;  %v545_v40 = vsel %vm538_vm3, %v533_v61, %v535_v54  ;;  %904 = vrot.lane.b32.xlu1 %v1783_v14, %s1592_s16 }
 0x132   : > { %v2281_v15 = vadd.f32 %v544_v1, %v2154_v13  ;;  %v2284_v50 = vadd.f32 %v545_v40, %v2156_v17  ;;  %902 = vrot.lane.b32.xlu0 %v2653_v63, %s1592_s16 }
 0x133   : > { %v1320_v3 = vpop.permute.xlu1 %1319 }
 0x134   : > { %v1322_v11 = vunpack.i.h.bf16 %v1320_v3  ;;  %v1321_v46 = vunpack.i.l.bf16 %v1320_v3  ;;  %v537_v20 = vpop.permute.xlu0 %536 }
 0x135   : > { %v546_v7 = vsel %vm538_vm3, %v535_v54, %v537_v20  ;;  %v2290_v28 = vadd.f32 %v537_v20, %v2173_v57  ;;  %908 = vrot.lane.b32.xlu1 %v1814_v27, %s1592_s16 }
 0x136   : > { %v583_v14 = vsel %vm538_vm3, %v1321_v46, %v1322_v11  ;;  %v563_v13 = vadd.f32 %v546_v7, %v2185_v5  ;;  %906 = vrot.lane.b32.xlu0 %v2655_v38, %s1592_s16 }
 0x137   : > { %v2299_v17 = vadd.f32 %v583_v14, %v2192_v35  ;;  %v1330_v63 = vpop.permute.xlu1 %1329 }
 0x138   : > { %v1332_v0 = vunpack.i.h.bf16 %v1330_v63  ;;  %v1331_v41 = vunpack.i.l.bf16 %v1330_v63  ;;  %v1325_v12 = vpop.permute.xlu0 %1324 }
 0x139   : > { %v1327_v4 = vunpack.i.h.bf16 %v1325_v12  ;;  %v1326_v57 = vunpack.i.l.bf16 %v1325_v12  ;;  %912 = vrot.lane.b32.xlu1 %v1828_v33, %s1592_s16 }
 0x13a   : > { %v587_v27 = vsel %vm538_vm3, %v1331_v41, %v1332_v0  ;;  %910 = vrot.lane.b32.xlu0 %v1807_v24, %s1592_s16 }
 0x13b   : > { %v604_v5 = vadd.f32 %v587_v27, %v2210_v8  ;;  %v586_v38 = vsel %vm538_vm3, %v1327_v4, %v1331_v41  ;;  %v584_v35 = vsel %vm538_vm3, %v1322_v11, %v1326_v57  ;;  %v585_v43 = vsel %vm538_vm3, %v1326_v57, %v1327_v4  ;;  %v582_v52 = vpop.permute.xlu1 %581 }
 0x13c   : > { %v2311_v47 = vadd.f32 %v584_v35, %v2215_v51  ;;  %v2314_v22 = vadd.f32 %v585_v43, %v2217_v9  ;;  %v2317_v33 = vadd.f32 %v586_v38, %v2219_v2  ;;  %v608_v24 = vadd.f32 %v582_v52, %v2221_v21  ;;  %v1335_v23 = vpop.permute.xlu0 %1334 }
 0x13d   : > { %v1337_v8 = vunpack.i.h.bf16 %v1335_v23  ;;  %v1336_v49 = vunpack.i.l.bf16 %v1335_v23  ;;  %916 = vrot.lane.b32.xlu1 %v2659_v31, %s1592_s16 }
 0x13e   : > { %914 = vrot.lane.b32.xlu0 %v1823_v32, %s1592_s16 }
 0x13f   : > { %v590_v51 = vsel %vm538_vm3, %v1337_v8, %v582_v52  ;;  %v588_v9 = vsel %vm538_vm3, %v1332_v0, %v1336_v49  ;;  %v589_v60 = vsel %vm538_vm3, %v1336_v49, %v1337_v8  ;;  %v612_v2 = vpop.permute.xlu1 %611 }
 0x140   : > { %v605_v62 = vadd.f32 %v588_v9, %v2239_v34  ;;  %v606_v21 = vadd.f32 %v589_v60, %v2241_v37  ;;  %v607_v6 = vadd.f32 %v590_v51, %v2243_v25  ;;  %v610_v55 = vpop.permute.xlu0 %609 }
 0x141   : > { %v628_v53 = vsel %vm627_vm4, %v610_v55, %v612_v2 }
 0x142   : > { %v645_v30 = vadd.f32 %v628_v53, %v2248_v44  ;;  %918 = vrot.lane.b32.xlu0 %v2661_v16, %s1592_s16 }
 0x143   : > { %v616_v32 = vpop.permute.xlu1 %615 }
 0x144   : > { %v614_v39 = vpop.permute.xlu0 %613 }
 0x145   : > { %v629_v45 = vsel %vm627_vm4, %v612_v2, %v614_v39  ;;  %v630_v48 = vsel %vm627_vm4, %v614_v39, %v616_v32 }
 0x146   : > { %v646_v34 = vadd.f32 %v629_v45, %v2257_v58  ;;  %v647_v37 = vadd.f32 %v630_v48, %v2260_v26 }
 0x147   : > { %v620_v59 = vpop.permute.xlu1 %619 }
 0x148   : > { %v618_v25 = vpop.permute.xlu0 %617 }
 0x149   : > { %v631_v31 = vsel %vm627_vm4, %v616_v32, %v618_v25  ;;  %v632_v10 = vsel %vm627_vm4, %v618_v25, %v620_v59 }
 0x14a   : > { %v648_v44 = vadd.f32 %v631_v31, %v2269_v36  ;;  %v649_v18 = vadd.f32 %v632_v10, %v2272_v42 }
 0x14b   : > { %v624_v29 = vpop.permute.xlu1 %623 }
 0x14c   : > { %v622_v19 = vpop.permute.xlu0 %621 }
 0x14d   : > { %v633_v56 = vsel %vm627_vm4, %v620_v59, %v622_v19  ;;  %v634_v16 = vsel %vm627_vm4, %v622_v19, %v624_v29 }
 0x14e   : > { %v650_v58 = vadd.f32 %v633_v56, %v2281_v15  ;;  %v651_v26 = vadd.f32 %v634_v16, %v2284_v50 }
 0x14f   : > { %v2346_v54 = vpop.permute.xlu1 %1339 }
 0x150   : > { %v626_v61 = vpop.permute.xlu0 %625 }
 0x151   : > { %v635_v1 = vsel %vm627_vm4, %v624_v29, %v626_v61  ;;  %v653_v40 = vadd.f32 %v626_v61, %v2290_v28  ;;  %v1342_v61 = vunpack.i.h.bf16 %v2346_v54 }
 0x152   : > { %v652_v36 = vadd.f32 %v635_v1, %v563_v13  ;;  %v1341_v1 = vunpack.i.l.bf16 %v2346_v54 }
 0x153   : > { %v2350_v3 = vpop.permute.xlu1 %1349 }
 0x154   : > { %v1352_v42 = vunpack.i.h.bf16 %v2350_v3  ;;  %v1351_v11 = vunpack.i.l.bf16 %v2350_v3  ;;  %v2354_v46 = vpop.permute.xlu0 %1344 }
 0x156   : > { %v676_v15 = vsel %vm627_vm4, %v1351_v11, %v1352_v42 }
 0x157   : > { %v2359_v50 = vadd.f32 %v676_v15, %v604_v5  ;;  %v671_v20 = vpop.permute.xlu1 %670 }
 0x158   : > { %v2361_v7 = vadd.f32 %v671_v20, %v608_v24  ;;  %v1355_v14 = vpop.permute.xlu0 %1354 }
 0x159   : > { %v1357_v28 = vunpack.i.h.bf16 %v1355_v14  ;;  %v1356_v13 = vunpack.i.l.bf16 %v1355_v14 }
 0x15b   : > { %v679_v63 = vsel %vm627_vm4, %v1357_v28, %v671_v20  ;;  %v677_v0 = vsel %vm627_vm4, %v1352_v42, %v1356_v13  ;;  %v678_v41 = vsel %vm627_vm4, %v1356_v13, %v1357_v28  ;;  %v711_v12 = vpop.permute.xlu1 %710  ;;  %v672_v28 = vsel %vm627_vm4, %v1341_v1, %v1342_v61 }
 0x15c   : > { %v2366_v4 = vadd.f32 %v677_v0, %v605_v62  ;;  %v2368_v57 = vadd.f32 %v678_v41, %v606_v21  ;;  %v2370_v27 = vadd.f32 %v679_v63, %v607_v6  ;;  %v709_v5 = vpop.permute.xlu0 %708  ;;  %v689_v3 = vadd.f32 %v672_v28, %v2299_v17 }
 0x15d   : > { %v729_v38 = vsel %vm728_vm5, %v709_v5, %v711_v12 }
 0x15e   : > { %v2373_v35 = vadd.f32 %v729_v38, %v645_v30 }
 0x15f   : > { %v715_v43 = vpop.permute.xlu1 %714 }
 0x160   : > { %v713_v52 = vpop.permute.xlu0 %712 }
 0x161   : > { %v730_v24 = vsel %vm728_vm5, %v711_v12, %v713_v52  ;;  %v731_v23 = vsel %vm728_vm5, %v713_v52, %v715_v43 }
 0x162   : > { %v2377_v8 = vadd.f32 %v730_v24, %v646_v34  ;;  %v2379_v49 = vadd.f32 %v731_v23, %v647_v37 }
 0x163   : > { %v719_v51 = vpop.permute.xlu1 %718 }
 0x164   : > { %v717_v9 = vpop.permute.xlu0 %716 }
 0x165   : > { %v732_v60 = vsel %vm728_vm5, %v715_v43, %v717_v9  ;;  %v733_v2 = vsel %vm728_vm5, %v717_v9, %v719_v51 }
 0x166   : > { %v2383_v62 = vadd.f32 %v732_v60, %v648_v44  ;;  %v2385_v21 = vadd.f32 %v733_v2, %v649_v18 }
 0x167   : > { %v723_v6 = vpop.permute.xlu1 %722 }
 0x168   : > { %v721_v55 = vpop.permute.xlu0 %720 }
 0x169   : > { %v734_v53 = vsel %vm728_vm5, %v719_v51, %v721_v55  ;;  %v735_v30 = vsel %vm728_vm5, %v721_v55, %v723_v6 }
 0x16a   : > { %v2389_v32 = vadd.f32 %v734_v53, %v650_v58  ;;  %v2391_v39 = vadd.f32 %v735_v30, %v651_v26 }
 0x16b   : > { %v727_v45 = vpop.permute.xlu1 %726 }
 0x16c   : > { %v725_v48 = vpop.permute.xlu0 %724 }
 0x16d   : > { %v736_v34 = vsel %vm728_vm5, %v723_v6, %v725_v48  ;;  %v737_v37 = vsel %vm728_vm5, %v725_v48, %v727_v45 }
 0x16e   : > { %v2395_v59 = vadd.f32 %v736_v34, %v652_v36  ;;  %v2397_v25 = vadd.f32 %v737_v37, %v653_v40  ;;  %v1347_v40 = vunpack.i.h.bf16 %v2354_v46  ;;  %v1346_v36 = vunpack.i.l.bf16 %v2354_v46 }
 0x16f   : > { %v1365_v31 = vpop.permute.xlu1 %1364 }
 0x170   : > { %v1360_v10 = vpop.permute.xlu0 %1359  ;;  %v1367_v20 = vunpack.i.h.bf16 %v1365_v31  ;;  %v1366_v14 = vunpack.i.l.bf16 %v1365_v31  ;;  %v674_v13 = vsel %vm627_vm4, %v1346_v36, %v1347_v40  ;;  %v675_v54 = vsel %vm627_vm4, %v1347_v40, %v1351_v11 }
 0x171   : > { %v1362_v63 = vunpack.i.h.bf16 %v1360_v10  ;;  %v1361_v0 = vunpack.i.l.bf16 %v1360_v10  ;;  %v673_v12 = vsel %vm627_vm4, %v1342_v61, %v1346_v36  ;;  %v691_v23 = vadd.f32 %v674_v13, %v2314_v22 }
 0x172   : > { %v780_v43 = vsel %vm728_vm5, %v1366_v14, %v1367_v20  ;;  %v690_v11 = vadd.f32 %v673_v12, %v2311_v47  ;;  %v692_v60 = vadd.f32 %v675_v54, %v2317_v33 }
 0x173   : > { %v2399_v44 = vpop.permute.xlu1 %1374  ;;  %v778_v2 = vsel %vm728_vm5, %v1361_v0, %v1362_v63  ;;  %v798_v55 = vadd.f32 %v780_v43, %v691_v23  ;;  %v779_v53 = vsel %vm728_vm5, %v1362_v63, %v1366_v14 }
 0x174   : > { %v1370_v18 = vpop.permute.xlu0 %1369  ;;  %v1377_v46 = vunpack.i.h.bf16 %v2399_v44  ;;  %v1376_v5 = vunpack.i.l.bf16 %v2399_v44  ;;  %v796_v33 = vadd.f32 %v778_v2, %v689_v3  ;;  %v797_v44 = vadd.f32 %v779_v53, %v690_v11 }
 0x175   : > { %v1372_v52 = vunpack.i.h.bf16 %v1370_v18  ;;  %v1371_v24 = vunpack.i.l.bf16 %v1370_v18 }
 0x176   : > { %v784_v30 = vsel %vm728_vm5, %v1376_v5, %v1377_v46 }
 0x177   : > { %v1385_v29 = vpop.permute.xlu1 %1384  ;;  %v781_v48 = vsel %vm728_vm5, %v1367_v20, %v1371_v24  ;;  %v782_v17 = vsel %vm728_vm5, %v1371_v24, %v1372_v52  ;;  %v802_v18 = vadd.f32 %v784_v30, %v2368_v57 }
 0x178   : > { %v2401_v19 = vpop.permute.xlu0 %1379  ;;  %v1387_v51 = vunpack.i.h.bf16 %v1385_v29  ;;  %v1386_v9 = vunpack.i.l.bf16 %v1385_v29  ;;  %v783_v29 = vsel %vm728_vm5, %v1372_v52, %v1376_v5  ;;  %v799_v40 = vadd.f32 %v781_v48, %v692_v60 }
 0x179   : > { %v800_v36 = vadd.f32 %v782_v17, %v2359_v50  ;;  %v1382_v28 = vunpack.i.h.bf16 %v2401_v19  ;;  %v1381_v57 = vunpack.i.l.bf16 %v2401_v19  ;;  %v801_v12 = vadd.f32 %v783_v29, %v2366_v4 }
 0x17a   : > { %v873_v37 = vsel %vm825_vm6, %v1386_v9, %v1387_v51 }
 0x17b   : > { %v2403_v56 = vpop.permute.xlu1 %1394  ;;  %v785_v9 = vsel %vm728_vm5, %v1377_v46, %v1381_v57  ;;  %v786_v60 = vsel %vm728_vm5, %v1381_v57, %v1382_v28 }
 0x17c   : > { %v2405_v16 = vpop.permute.xlu0 %1389  ;;  %v1396_v61 = vunpack.i.l.bf16 %v2403_v56  ;;  %v1397_v63 = vunpack.i.h.bf16 %v2403_v56  ;;  %v803_v29 = vadd.f32 %v785_v9, %v2370_v27 }
 0x17d   : > { %v1391_v22 = vunpack.i.l.bf16 %v2405_v16  ;;  %v1392_v31 = vunpack.i.h.bf16 %v2405_v16  ;;  %v891_v16 = vadd.f32 %v873_v37, %v796_v33 }
 0x17e   : > { %v877_v2 = vsel %vm825_vm6, %v1396_v61, %v1397_v63 }
 0x17f   : > { %v2407_v58 = vpop.permute.xlu1 %1404  ;;  %v875_v0 = vsel %vm825_vm6, %v1391_v22, %v1392_v31  ;;  %v895_v37 = vadd.f32 %v877_v2, %v800_v36 }
 0x180   : > { %v2409_v26 = vpop.permute.xlu0 %1399  ;;  %v893_v3 = vadd.f32 %v875_v0, %v798_v55  ;;  %v1406_v53 = vunpack.i.l.bf16 %v2407_v58 }
 0x181   : > { %v1401_v43 = vunpack.i.l.bf16 %v2409_v26  ;;  %v1402_v19 = vunpack.i.h.bf16 %v2409_v26 }
 0x183   : > { %v2415_v42 = vpop.permute.xlu1 %1414  ;;  %v879_v46 = vsel %vm825_vm6, %v1401_v43, %v1402_v19 }
 0x184   : > { %v1410_v15 = vpop.permute.xlu0 %1409  ;;  %v1416_v10 = vunpack.i.l.bf16 %v2415_v42  ;;  %v1417_v20 = vunpack.i.h.bf16 %v2415_v42  ;;  %v876_v42 = vsel %vm825_vm6, %v1392_v31, %v1396_v61  ;;  %v880_v61 = vsel %vm825_vm6, %v1402_v19, %v1406_v53 }
 0x185   : > { %v1412_v47 = vunpack.i.h.bf16 %v1410_v15  ;;  %v1411_v34 = vunpack.i.l.bf16 %v1410_v15  ;;  %v874_v15 = vsel %vm825_vm6, %v1387_v51, %v1391_v22  ;;  %v894_v30 = vadd.f32 %v876_v42, %v799_v40 }
 0x186   : > { %v892_v5 = vadd.f32 %v874_v15, %v797_v44  ;;  %v970_v24 = vsel %vm920_vm7, %v1416_v10, %v1417_v20  ;;  %v878_v22 = vsel %vm825_vm6, %v1397_v63, %v1401_v43  ;;  %v897_v15 = vadd.f32 %v879_v46, %v802_v18 }
 0x187   : > { %v2419_v41 = vpop.permute.xlu1 %1424  ;;  %v968_v13 = vsel %vm920_vm7, %v1411_v34, %v1412_v47  ;;  %v969_v54 = vsel %vm920_vm7, %v1412_v47, %v1416_v10  ;;  %v896_v40 = vadd.f32 %v878_v22, %v801_v12  ;;  %v898_v27 = vadd.f32 %v880_v61, %v803_v29 }
 0x188   : > { %v2427_v38 = vpop.permute.xlu0 %1419  ;;  %v986_v56 = vadd.f32 %v968_v13, %v891_v16  ;;  %v987_v4 = vadd.f32 %v969_v54, %v892_v5  ;;  %v1426_v11 = vunpack.i.l.bf16 %v2419_v41  ;;  %v1427_v48 = vunpack.i.h.bf16 %v2419_v41 }
 0x189   : > { %v1421_v50 = vunpack.i.l.bf16 %v2427_v38  ;;  %v1422_v23 = vunpack.i.h.bf16 %v2427_v38  ;;  %v988_v38 = vadd.f32 %v970_v24, %v893_v3  ;;  %v1407_v41 = vunpack.i.h.bf16 %v2407_v58 }
 0x18a   : > { %v995_v55 = vmax.f32 %v986_v56, 1e-06  ;;  %v996_v31 = vmax.f32 %v987_v4, 1e-06  ;;  %v974_v16 = vsel %vm920_vm7, %v1426_v11, %v1427_v48 }
 0x18b   : > { %v2435_v6 = vpop.permute.xlu1 %805  ;;  %v971_v26 = vsel %vm920_vm7, %v1417_v20, %v1421_v50  ;;  %v972_v47 = vsel %vm920_vm7, %v1421_v50, %v1422_v23  ;;  %v973_v10 = vsel %vm920_vm7, %v1422_v23, %v1426_v11  ;;  %v997_v20 = vmax.f32 %v988_v38, 1e-06 }
 0x18c   : > { %v2440_v45 = vpop.permute.xlu0 %1429  ;;  %v989_v44 = vadd.f32 %v971_v26, %v894_v30  ;;  %v990_v28 = vadd.f32 %v972_v47, %v895_v37  ;;  %1433 = vrcp.f32 %v995_v55  ;;  %v991_v36 = vadd.f32 %v973_v10, %v896_v40 }
 0x18d   : > { %v1431_v34 = vunpack.i.l.bf16 %v2440_v45  ;;  %v1432_v13 = vunpack.i.h.bf16 %v2440_v45  ;;  %1435 = vrcp.f32 %v996_v31  ;;  %v881_v54 = vsel %vm825_vm6, %v1406_v53, %v1407_v41 }
 0x18e   : > { %v998_v58 = vmax.f32 %v989_v44, 1e-06  ;;  %v992_v18 = vadd.f32 %v974_v16, %v897_v15  ;;  %v804_v50 = vadd.f32 %v786_v60, %v2361_v7  ;;  %v999_v12 = vmax.f32 %v990_v28, 1e-06 }
 0x18f   : > { %v2450_v1 = vpop.permute.xlu1 %809  ;;  %v975_v63 = vsel %vm920_vm7, %v1427_v48, %v1431_v34  ;;  %1437 = vrcp.f32 %v997_v20  ;;  %v1000_v43 = vmax.f32 %v991_v36, 1e-06  ;;  %v976_v19 = vsel %vm920_vm7, %v1431_v34, %v1432_v13 }
 0x190   : > { %v2455_v14 = vpop.permute.xlu0 %807  ;;  %v993_v42 = vadd.f32 %v975_v63, %v898_v27  ;;  %v899_v24 = vadd.f32 %v881_v54, %v804_v50  ;;  %1439 = vrcp.f32 %v998_v58  ;;  %v1001_v23 = vmax.f32 %v992_v18, 1e-06 }
 0x191   : > { %v826_v56 = vsel %vm825_vm6, %v2435_v6, %v2455_v14  ;;  %v827_v7 = vsel %vm825_vm6, %v2455_v14, %v2450_v1  ;;  %1441 = vrcp.f32 %v999_v12 }
 0x192   : > { %v994_v9 = vadd.f32 %v976_v19, %v899_v24  ;;  %v1002_v3 = vmax.f32 %v993_v42, 1e-06  ;;  %1443 = vrcp.f32 %v1000_v43  ;;  %v844_v11 = vadd.f32 %v826_v56, %v2373_v35 }
 0x193   : > { %v2467_v52 = vpop.permute.xlu1 %813  ;;  %v845_v60 = vadd.f32 %v827_v7, %v2377_v8  ;;  %1445 = vrcp.f32 %v1001_v23 }
 0x194   : > { %v2472_v51 = vpop.permute.xlu0 %811  ;;  %v1003_v8 = vmax.f32 %v994_v9, 1e-06  ;;  %1447 = vrcp.f32 %v1002_v3 }
 0x195   : > { %v828_v53 = vsel %vm825_vm6, %v2450_v1, %v2472_v51  ;;  %v829_v6 = vsel %vm825_vm6, %v2472_v51, %v2467_v52 }
 0x196   : > { %v1434_v30 = vpop.eup %1433  ;;  %v846_v46 = vadd.f32 %v828_v53, %v2379_v49  ;;  %v847_v1 = vadd.f32 %v829_v6, %v2383_v62  ;;  %1449 = vrcp.f32 %v1003_v8 }
 0x197   : > { %v2482_v17 = vpop.permute.xlu1 %817  ;;  %v1436_v38 = vpop.eup %1435 }
 0x198   : > { %v2487_v33 = vpop.permute.xlu0 %815 }
 0x199   : > { %v830_v34 = vsel %vm825_vm6, %v2467_v52, %v2487_v33  ;;  %v831_v37 = vsel %vm825_vm6, %v2487_v33, %v2482_v17  ;;  %v1438_v44 = vpop.eup %1437 }
 0x19a   : > { %v1440_v62 = vpop.eup %1439  ;;  %v848_v40 = vadd.f32 %v830_v34, %v2385_v21  ;;  %v849_v15 = vadd.f32 %v831_v37, %v2389_v32 }
 0x19b   : > { %v2494_v57 = vpop.permute.xlu1 %821  ;;  %v1442_v16 = vpop.eup %1441 }
 0x19c   : > { %v2498_v0 = vpop.permute.xlu0 %819  ;;  %v1444_v13 = vpop.eup %1443 }
 0x19d   : > { %v832_v28 = vsel %vm825_vm6, %v2482_v17, %v2498_v0  ;;  %v833_v36 = vsel %vm825_vm6, %v2498_v0, %v2494_v57  ;;  %v1446_v18 = vpop.eup %1445 }
 0x19e   : > { %v850_v50 = vadd.f32 %v832_v28, %v2391_v39  ;;  %v851_v12 = vadd.f32 %v833_v36, %v2395_v59  ;;  %v1448_v0 = vpop.eup %1447 }
 0x19f   : > { %v901_v5 = vpop.permute.xlu1 %900 }
 0x1a0   : > { %v2503_v45 = vpop.permute.xlu0 %823 }
 0x1a1   : > { %v834_v43 = vsel %vm825_vm6, %v2494_v57, %v2503_v45 }
 0x1a2   : > { %v852_v59 = vadd.f32 %v834_v43, %v2397_v25 }
 0x1a3   : > { %v905_v4 = vpop.permute.xlu1 %904 }
 0x1a4   : > { %v903_v2 = vpop.permute.xlu0 %902 }
 0x1a5   : > { %v921_v14 = vsel %vm920_vm7, %v901_v5, %v903_v2  ;;  %v922_v26 = vsel %vm920_vm7, %v903_v2, %v905_v4 }
 0x1a6   : > { %v939_v22 = vadd.f32 %v921_v14, %v844_v11  ;;  %v940_v35 = vadd.f32 %v922_v26, %v845_v60 }
 0x1a7   : > { %v909_v48 = vpop.permute.xlu1 %908 }
 0x1a8   : > { %v1013_v55 = vmul.f32 %v1434_v30, %v939_v22  ;;  %v1014_v47 = vmul.f32 %v1436_v38, %v940_v35  ;;  %v907_v51 = vpop.permute.xlu0 %906 }
 0x1a9   : > { %v923_v31 = vsel %vm920_vm7, %v905_v4, %v907_v51  ;;  %v924_v10 = vsel %vm920_vm7, %v907_v51, %v909_v48  ;;  %v1450_v4 = vpop.eup %1449 }
 0x1aa   : > { %v1187_v29 = vpack.c.bf16 %v1014_v47, %v1013_v55  ;;  %v941_v49 = vadd.f32 %v923_v31, %v846_v46  ;;  %v942_v41 = vadd.f32 %v924_v10, %v847_v1 }
 0x1ab   : > { %v913_v61 = vpop.permute.xlu1 %912 }
 0x1ac   : > { %1059 = vst [vmem:[%s2534_s22] sm:$0xff] %v1187_v29  ;;  %v1015_v52 = vmul.f32 %v1438_v44, %v941_v49  ;;  %v1016_v33 = vmul.f32 %v1440_v62, %v942_v41  ;;  %v911_v20 = vpop.permute.xlu0 %910 }
 0x1ad   : > { %v925_v21 = vsel %vm920_vm7, %v909_v48, %v911_v20  ;;  %v926_v32 = vsel %vm920_vm7, %v911_v20, %v913_v61 }
 0x1ae   : > { %v1188_v63 = vpack.c.bf16 %v1016_v33, %v1015_v52  ;;  %v943_v27 = vadd.f32 %v925_v21, %v848_v40  ;;  %v944_v58 = vadd.f32 %v926_v32, %v849_v15 }
 0x1af   : > { %v917_v54 = vpop.permute.xlu1 %916 }
 0x1b0   : > { %1060 = vst [vmem:[%s2534_s22 + $0x8] sm:$0xff] %v1188_v63  ;;  %v1017_v17 = vmul.f32 %v1442_v16, %v943_v27  ;;  %v1018_v42 = vmul.f32 %v1444_v13, %v944_v58  ;;  %v915_v5 = vpop.permute.xlu0 %914 }
 0x1b1   : > { %v927_v19 = vsel %vm920_vm7, %v913_v61, %v915_v5  ;;  %v928_v24 = vsel %vm920_vm7, %v915_v5, %v917_v54 }
 0x1b2   : > { %v1189_v56 = vpack.c.bf16 %v1018_v42, %v1017_v17  ;;  %v945_v39 = vadd.f32 %v927_v19, %v850_v50  ;;  %v946_v7 = vadd.f32 %v928_v24, %v851_v12 }
 0x1b4   : > { %1061 = vst [vmem:[%s2534_s22 + $0x10] sm:$0xff] %v1189_v56  ;;  %v1019_v23 = vmul.f32 %v1446_v18, %v945_v39  ;;  %v1020_v9 = vmul.f32 %v1448_v0, %v946_v7  ;;  %v919_v3 = vpop.permute.xlu0 %918 }
 0x1b5   : > { %v929_v57 = vsel %vm920_vm7, %v917_v54, %v919_v3 }
 0x1b6   : > { %v1190_v45 = vpack.c.bf16 %v1020_v9, %v1019_v23  ;;  %v947_v11 = vadd.f32 %v929_v57, %v852_v59 }
 0x1b8   : > { %1062 = vst [vmem:[%s2534_s22 + $0x18] sm:$0xff] %v1190_v45  ;;  %v1021_v60 = vmul.f32 %v1450_v4, %v947_v11 }
 0x1ba   : > { %v1191_v2 = vpack.c.bf16 %v1021_v60, %v1021_v60 }
 0x1bc   : > { %1064 = vst.msk [vmem:[%s2534_s22 + $0x20] sm:$0xf] %vm1063_vm8, %v1191_v2 }
 0x1bd   : > { %1524 = shalt.err (!%p1521_p1)
}
 0x1be   : > { %s1525_s4 = scalar_lea.hbm %s2562_s7, 576  ;;  %s1529_s27 = scalar_lea.hbm %s2609_s2, 1152 }
 0x1bf   : > { %p1526_p11 = scmp.ne.s32.totalorder %s2562_s7, %s1525_s4  ;;  %p1530_p4 = scmp.lt.u32.totalorder %s2562_s7, %s2609_s2 }
 0x1c0   : > { %p1531_p10 = scmp.lt.u32.totalorder %s1529_s27, %s1525_s4  ;;  %p1533_p13 = scmp.lt.u32.totalorder %s1525_s4, %s2562_s7 }
 0x1c1   : > { %p1527_p12 = pnand %p1526_p11, %p2662_p3 }
 0x1c2   : > { %p1532_p6 = por %p1531_p10, %p1530_p4 }
 0x1c3   : > { %p1528_p2 = pneg %p1527_p12 }
 0x1c4   : > { %p1534_p5 = por %p1533_p13, %p1532_p6 }
 0x1c6   : > { %p1535_p7 = pnand %p1534_p5, %p1528_p2 }
 0x1c8   : > { %1538 = shalt.err (!%p1535_p7)
}
 0x1c9   : > { %1203 = dma.vmem_to_hbm [thread:$0]  (%p2662_p3), %s2564_s25, 576, %s2562_s7, %s1066_s30  }
 0x1ca PF: > { %s1092_s23 = sand.u32 1, %s1569_s9   ;;  %p2663_p8 = scmp.ne.s32.totalorder %s2630_s21, 0 }
 0x1cb   : > { %p2664_p9 = scmp.ge.s32.totalorder %s1581_s12, 2  ;;  %s1093_s16 = scalar_lea.sflag [#allocation4], %s1092_s23 }
 0x1cd   : > { %p1213_p0 = pnand %p2664_p9, %p2663_p8 }
 0x1cf   : > { %1564 = dma.done.wait (!%p1213_p0), %s1093_s16, 576  }
 0x1d0   : > { %1566 = vsyncadd (!%p1213_p0), %s1093_s16, 4294966720  ;;  %p18_p1 = scmp.ge.s32.totalorder %s1634_s15, 4   ;;  %s2665_s9 = smov %s1573_s10 }
 0x1d1   : > { %s2666_s10 = smov %s1577_s11  ;;  %s2667_s11 = smov %s1646_s18 }
 0x1d2   : > { %s2668_s12 = smov %s1634_s15  ;;  %20 = sbr.rel (!%p18_p1) target bundleno = 7 (0x7), region = 86 }
 0x1d9   :  { %1098 = vsyncpa [#allocation3], 1 }
 0x1da   :  { %1100 = vsyncpa [#allocation3 + $0x1], 1 }
 0x1db   :  { %1101 = vsyncpa [#allocation6], 1 }
 0x1dc   :  { %1103 = vsyncpa [#allocation6 + $0x1], 1 }
 0x1dd   :  { %1104 = vsyncpa [#allocation4], 1 }
 0x1de   :  { %1106 = vsyncpa [#allocation4 + $0x1], 1 }

// kernel: _lambda_.7
= control target key start
LH: loop header
LB: loop body
LE: loop exit
PB: predicated region body
PF: predicated region fallthrough
CT: control target
= control target key end

     0   :  { %10 = vsyncpa [#allocation4], 0  ;;  %s2562_s0 = inlined_call_operand.hbm [shape: bf16[2,8,1190], index: 0, kind: input, shape index: {}]   ;;  %s2563_s1 = inlined_call_operand.hbm [shape: bf16[8,72], index: 1, kind: input, shape index: {}]   ;;  %s2564_s2 = inlined_call_operand.hbm [shape: f32[8,1], index: 2, kind: input, shape index: {}]   ;;  %s2565_s3 = inlined_call_operand.hbm [shape: f32[8,1], index: 3, kind: input, shape index: {}]   ;;  %s2566_s4 = inlined_call_operand.hbm [shape: f32[1,1088], index: 4, kind: input, shape index: {}]   ;;  %s2567_s5 = inlined_call_operand.hbm [shape: bf16[2,8,1088], index: 5, kind: output, shape index: {}]  }
   0x1   :  { %12 = vsyncpa [#allocation4 + $0x1], 0 }
   0x2   :  { %13 = vsyncpa [#allocation7], 0 }
   0x3   :  { %14 = vsyncpa [#allocation10], 0 }
   0x4   :  { %15 = vsyncpa [#allocation5], 0 }
   0x5   :  { %17 = vsyncpa [#allocation5 + $0x1], 0  ;;  %s1943_s18 = smov 0   ;;  %s1945_s19 = smov 0  }
   0x6   :  { %s1947_s20 = smov 0   ;;  %s1949_s21 = smov 0  }
   0x7 LB: > { %s1896_s22 = smov [#allocation6]   ;;  %s1964_s24 = sadd.s32 4294967295, %s1894_s21   ;;  %s1894_s21 = sphi %s1949_s21, %s2590_s21   ;;  %s1890_s20 = sphi %s1947_s20, %s2589_s20   ;;  %s1886_s19 = sphi %s1945_s19, %s2588_s19   ;;  %s1882_s18 = sphi %s1943_s18, %s2587_s18  }
   0x8   : > { %s177_s23 = sshll.u32 %s1896_s22, 4  ;;  %p1466_p0 = scmp.ge.s32.totalorder %s1894_s21, 1  ;;  %s1969_s23 = int_to_ptr.vmem [resolvable:$true] %s177_s23 }
   0x9   : > { %p2568_p1 = scmp.eq.s32.totalorder %s1964_s24, 0  ;;  %p164_p2 = scmp.lt.s32.totalorder %s1894_s21, 3 }
   0xa   : > { %s1897_s26 = smov [#allocation9]   ;;  %s1898_s28 = smov [#allocation8]  }
   0xb   : > { %p1971_p3 = pnand %p1466_p0, %p164_p2  ;;  %s199_s27 = sshll.u32 %s1897_s26, 4  ;;  %s1978_s27 = int_to_ptr.vmem [resolvable:$true] %s199_s27 }
   0xc   : > { %s188_s29 = sshll.u32 %s1898_s28, 4  ;;  %s1899_s6 = smov [#allocation11]   ;;  %s1986_s29 = int_to_ptr.vmem [resolvable:$true] %s188_s29 }
   0xd   : > { %s2571_s25 = scalar_select %p1971_p3, 1, 0 }
   0xe   : > { %p1591_p5 = pneg %p1971_p3  ;;  %s1988_s7 = sshll.u32 %s1899_s6, 4  ;;  %s211_s7 = int_to_ptr.vmem [resolvable:$true] %s1988_s7 }
   0xf   : > { %s1678_s10 = scalar_lea.hbm %s2563_s1, 64 }
  0x10   : > { %p1982_p6 = pnand %p1591_p5, %p2568_p1  ;;  %p1679_p7 = scmp.ne.s32.totalorder %s2563_s1, %s1678_s10 }
  0x11   : > { %p1685_p11 = scmp.lt.u32.totalorder %s1678_s10, %s2563_s1 }
  0x12   : > { %p1998_p8 = pneg %p1982_p6 }
  0x14   : > { %p1681_p9 = pnand %p1998_p8, %p1679_p7 }
  0x16   : > { %p1682_p10 = pneg %p1681_p9 }
  0x18   : > { %p1687_p12 = pnand %p1685_p11, %p1682_p10 }
  0x1a   : > { %1690 = shalt.err (!%p1687_p12)
}
  0x1b   : > { %s1691_s16 = scalar_lea.vmem %s1969_s23, 64  ;;  %p1699_p5 = scmp.lt.s32.totalorder %s1969_s23, %s1969_s23 }
  0x1c   : > { %p1692_p13 = scmp.ne.s32.totalorder %s1969_s23, %s1691_s16  ;;  %p1700_p4 = scmp.lt.s32.totalorder %s1691_s16, %s1691_s16 }
  0x1e   : > { %p1694_p0 = pnand %p1692_p13, %p1998_p8  ;;  %p1701_p7 = por %p1700_p4, %p1699_p5 }
  0x20   : > { %p1695_p2 = pneg %p1694_p0 }
  0x22   : > { %p1702_p9 = pnand %p1701_p7, %p1695_p2 }
  0x24   : > { %1705 = shalt.err (!%p1702_p9)
}
  0x25   : > { %1594 = dma.hbm_to_vmem [thread:$0]  (!%p1982_p6), %s2563_s1, 64, %s1969_s23, [#allocation7]  }
  0x26   : > { %s1706_s6 = scalar_lea.hbm %s2565_s3, 128 }
  0x27   : > { %p1707_p10 = scmp.ne.s32.totalorder %s2565_s3, %s1706_s6  ;;  %p1713_p12 = scmp.lt.u32.totalorder %s1706_s6, %s2565_s3 }
  0x29   : > { %p1709_p4 = pnand %p1707_p10, %p1998_p8 }
  0x2b   : > { %p1710_p11 = pneg %p1709_p4 }
  0x2d   : > { %p1715_p13 = pnand %p1713_p12, %p1710_p11 }
  0x2f   : > { %1718 = shalt.err (!%p1715_p13)
}
  0x30   : > { %s1719_s23 = scalar_lea.vmem %s1978_s27, 128  ;;  %p1727_p7 = scmp.lt.s32.totalorder %s1978_s27, %s1978_s27 }
  0x31   : > { %p1720_p0 = scmp.ne.s32.totalorder %s1978_s27, %s1719_s23  ;;  %p1728_p9 = scmp.lt.s32.totalorder %s1719_s23, %s1719_s23 }
  0x33   : > { %p1722_p2 = pnand %p1720_p0, %p1998_p8  ;;  %p1729_p10 = por %p1728_p9, %p1727_p7 }
  0x35   : > { %p1723_p5 = pneg %p1722_p2 }
  0x37   : > { %p1730_p4 = pnand %p1729_p10, %p1723_p5 }
  0x39   : > { %1733 = shalt.err (!%p1730_p4)
}
  0x3a   : > { %1600 = dma.hbm_to_vmem [thread:$0]  (!%p1982_p6), %s2565_s3, 128, %s1978_s27, [#allocation10]  }
  0x3b   : > { %s1734_s17 = scalar_lea.hbm %s2564_s2, 128 }
  0x3c   : > { %p1735_p11 = scmp.ne.s32.totalorder %s2564_s2, %s1734_s17  ;;  %p1741_p0 = scmp.lt.u32.totalorder %s1734_s17, %s2564_s2 }
  0x3e   : > { %p1737_p12 = pnand %p1735_p11, %p1998_p8 }
  0x40   : > { %p1738_p13 = pneg %p1737_p12 }
  0x42   : > { %p1743_p2 = pnand %p1741_p0, %p1738_p13 }
  0x44   : > { %1746 = shalt.err (!%p1743_p2)
}
  0x45   : > { %s1747_s27 = scalar_lea.vmem %s1986_s29, 128  ;;  %p1755_p10 = scmp.lt.s32.totalorder %s1986_s29, %s1986_s29 }
  0x46   : > { %p1748_p5 = scmp.ne.s32.totalorder %s1986_s29, %s1747_s27  ;;  %p1756_p4 = scmp.lt.s32.totalorder %s1747_s27, %s1747_s27 }
  0x48   : > { %p1750_p7 = pnand %p1748_p5, %p1998_p8  ;;  %p1757_p11 = por %p1756_p4, %p1755_p10 }
  0x4a   : > { %p1751_p9 = pneg %p1750_p7 }
  0x4c   : > { %p1758_p12 = pnand %p1757_p11, %p1751_p9 }
  0x4e   : > { %1761 = shalt.err (!%p1758_p12)
}
  0x4f   : > { %1597 = dma.hbm_to_vmem [thread:$0]  (!%p1982_p6), %s2564_s2, 128, %s1986_s29, [#allocation7]  }
  0x50   : > { %s1762_s23 = scalar_lea.hbm %s2566_s4, 144 }
  0x51   : > { %p1763_p13 = scmp.ne.s32.totalorder %s2566_s4, %s1762_s23  ;;  %p1769_p5 = scmp.lt.u32.totalorder %s1762_s23, %s2566_s4 }
  0x53   : > { %p1765_p0 = pnand %p1763_p13, %p1998_p8 }
  0x55   : > { %p1766_p2 = pneg %p1765_p0 }
  0x57   : > { %p1771_p7 = pnand %p1769_p5, %p1766_p2 }
  0x59   : > { %1774 = shalt.err (!%p1771_p7)
}
  0x5a   : > { %s1775_s17 = scalar_lea.vmem %s211_s7, 144  ;;  %s1782_s29 = scalar_lea.vmem %s211_s7, 160 }
  0x5b   : > { %p1776_p9 = scmp.ne.s32.totalorder %s211_s7, %s1775_s17  ;;  %p1783_p11 = scmp.lt.s32.totalorder %s211_s7, %s211_s7 }
  0x5c   : > { %p1784_p12 = scmp.lt.s32.totalorder %s1782_s29, %s1775_s17 }
  0x5d   : > { %p1778_p10 = pnand %p1776_p9, %p1998_p8 }
  0x5e   : > { %p1785_p1 = por %p1784_p12, %p1783_p11 }
  0x5f   : > { %p1779_p4 = pneg %p1778_p10 }
  0x61   : > { %p1786_p3 = pnand %p1785_p1, %p1779_p4 }
  0x63   : > { %1789 = shalt.err (!%p1786_p3)
}
  0x64   : > { %1603 = dma.hbm_to_vmem [thread:$0]  (!%p1982_p6), %s2566_s4, 144, %s211_s7, [#allocation10]  }
  0x65   : > { %s1465_s13 = sadd.s32 4294967294, %s1894_s21   ;;  %s2086_s30 = sadd.s32 1, %s1894_s21  }
  0x66   : > { %s27_s28 = ssub.s32 %s1894_s21, %s2086_s30  ;;  %s30_s6 = sadd.s32 1, %s1890_s20 }
  0x67   : > { %p28_p1 = scmp.eq.s32.totalorder %s27_s28, 0  ;;  %p37_p3 = scmp.ne.s32.totalorder %s1890_s20, %s1886_s19 }
  0x68   : > { %p38_p8 = scmp.eq.s32.totalorder %s1894_s21, 0  ;;  %p43_p13 = scmp.ne.s32.totalorder %s1886_s19, %s1882_s18 }
  0x69   : > { %s2097_s27 = scalar_select %p28_p1, %s1890_s20, %s30_s6  }
  0x6a   : > { %p39_p0 = por %p38_p8, %p37_p3  ;;  %p2574_p2 = scmp.eq.s32.totalorder %s1964_s24, 0 }
  0x6b   : > { %p151_p6 = scmp.eq.s32.totalorder %s1964_s24, 1  ;;  %p157_p7 = scmp.eq.s32.totalorder %s1465_s13, 1 }
  0x6c   : > { %p2101_p5 = por %p2574_p2, %p43_p13  ;;  %p1616_p9 = scmp.lt.s32.totalorder %s1894_s21, 2 }
  0x6d   : > { %s221_s7 = sand.u32 1, %s1890_s20   ;;  %p2108_p10 = por %p151_p6, %p37_p3 }
  0x6e   : > { %p2112_p4 = por %p157_p7, %p43_p13  ;;  %s1566_s11 = smul.u32 40, %s221_s7 }
  0x6f   : > { %s2576_s9 = scalar_select %p2108_p10, 1, 0 }
  0x70   : > { %s2577_s10 = scalar_select %p2112_p4, 1, 0 }
  0x71   : > { %s1567_s23 = smul.u32 640, %s1894_s21  ;;  %p2117_p11 = pnand %p1616_p9, %p39_p0 }
  0x72   : > { %s225_s17 = scalar_lea.vmem [#allocation3], %s1566_s11  ;;  %s222_s22 = scalar_lea.sflag [#allocation4], %s221_s7 }
  0x73   : > { %s2124_s16 = scalar_lea.hbm %s2562_s0, %s1567_s23  ;;  %s233_s29 = sshll.u32 %s225_s17, 4  ;;  %s2126_s29 = int_to_ptr.vmem [resolvable:$true] %s233_s29 }
  0x74   : > { %s1790_s26 = scalar_lea.hbm %s2124_s16, 640  ;;  %p1792_p1 = pneg %p2117_p11 }
  0x75   : > { %p1791_p12 = scmp.ne.s32.totalorder %s2124_s16, %s1790_s26  ;;  %s1795_s6 = scalar_lea.hbm %s2562_s0, 1280 }
  0x76   : > { %p1796_p13 = scmp.lt.u32.totalorder %s2124_s16, %s2562_s0  ;;  %p1797_p0 = scmp.lt.u32.totalorder %s1795_s6, %s1790_s26 }
  0x77   : > { %p1793_p3 = pnand %p1792_p1, %p1791_p12  ;;  %p1799_p6 = scmp.lt.u32.totalorder %s1790_s26, %s2124_s16 }
  0x78   : > { %p1798_p2 = por %p1797_p0, %p1796_p13 }
  0x79   : > { %p1794_p8 = pneg %p1793_p3 }
  0x7a   : > { %p1800_p7 = por %p1799_p6, %p1798_p2 }
  0x7c   : > { %p1801_p9 = pnand %p1800_p7, %p1794_p8 }
  0x7e   : > { %1804 = shalt.err (!%p1801_p9)
}
  0x7f   : > { %s1805_s7 = scalar_lea.vmem %s2126_s29, 640  ;;  %s1900_s11 = smov [#allocation3]  }
  0x80   : > { %p1806_p12 = scmp.ne.s32.totalorder %s2126_s29, %s1805_s7  ;;  %s1810_s15 = sshll.u32 %s1900_s11, 4  ;;  %s1811_s15 = int_to_ptr.vmem [resolvable:$false] %s1810_s15 }
  0x81   : > { %s1812_s17 = scalar_lea.vmem %s1811_s15, 1280  ;;  %p1813_p10 = scmp.lt.s32.totalorder %s2126_s29, %s1811_s15 }
  0x82   : > { %p1808_p3 = pnand %p1806_p12, %p1792_p1  ;;  %p1814_p13 = scmp.lt.s32.totalorder %s1812_s17, %s1805_s7 }
  0x84   : > { %p1809_p4 = pneg %p1808_p3  ;;  %p1815_p0 = por %p1814_p13, %p1813_p10 }
  0x86   : > { %p1816_p2 = pnand %p1815_p0, %p1809_p4 }
  0x88   : > { %1819 = shalt.err (!%p1816_p2)
}
  0x89   : > { %1607 = dma.hbm_to_vmem [thread:$0]  (!%p2117_p11), %s2124_s16, 640, %s2126_s29, %s222_s22  }
  0x8a   : > { %p2579_p8 = scmp.ne.s32.totalorder %s2571_s25, 0 }
  0x8b   : > { %s2156_s26 = sand.u32 (!%p2579_p8), 1, %s1886_s19  }
  0x8c   : > { %242 = sbr.rel (%p2579_p8) target bundleno = 1059 (0x423), region = 40  ;;  %s245_s28 = scalar_lea.sflag (!%p2579_p8), [#allocation4], %s2156_s26 }
  0x8d   : > { %s1568_s13 = smul.u32 (!%p2579_p8), 40, %s2156_s26 }
  0x8f   : > { %s2160_s6 = scalar_lea.vmem (!%p2579_p8), [#allocation3], %s1568_s13 }
  0x93   : > { %1865 = dma.done.wait (%p2101_p5), %s245_s28, 640  }
  0x94   : > { %1867 = vsyncadd (%p2101_p5), %s245_s28, 4294966656  ;;  %p2580_p10 = scmp.eq.s32.totalorder %s1964_s24, 0 }
  0x96   : > { %1869 = dma.done.wait (%p2580_p10), [#allocation7], 192   ;;  %p2581_p4 = pmov %p2580_p10 }
  0x98   : > { %1871 = vsyncadd (%p2581_p4), [#allocation7], 4294967104  ;;  %p2582_p11 = pmov %p2581_p4 }
  0x99   : > { %p2583_p1 = pmov %p2581_p4 }
  0x9a   : > { %1873 = dma.done.wait (%p2582_p11), [#allocation10], 272  }
  0x9b   : > { %1875 = vsyncadd (%p2583_p1), [#allocation10], 4294967024  ;;  %v2175_v0 = vld [vmem:[%s2160_s6] sm:$0xff]  ;;  %v2178_v1 = vld [vmem:[%s2160_s6 + $0x8] sm:$0xff]  ;;  %s1901_s25 = smov 126   ;;  %s1902_s8 = smov 127  }
  0x9c   : > { %v2181_v2 = vld [vmem:[%s2160_s6 + $0x18] sm:$0xff]  ;;  %358 = vrot.lane.b32.xlu1 %v2175_v0, %s1901_s25  ;;  %313 = vrot.lane.b32.xlu0 %v2175_v0, %s1902_s8  ;;  %v2188_v3 = vld [vmem:[%s2160_s6 + $0x10] sm:$0xff]  ;;  %s1903_s12 = smov 94   ;;  %s1904_s16 = smov 93   ;;  %v1908_v4 = vmov 0   ;;  %vm301_vm0 = vcmask 519168  }
  0x9d   : > { %s1905_s29 = smov 92   ;;  %s1906_s22 = smov 60   ;;  %976 = vmatprep.mubr.bf16.mxu0 %v1908_v4  ;;  %1017 = vmatprep.mubr.bf16.mxu1 %v1908_v4  ;;  %v296_v5 = vld [vmem:[%s2160_s6 + $0x20] sm:$0xf]  ;;  %vm328_vm1 = vcmask 1043456   ;;  %vm374_vm2 = vcmask 1031168  }
  0x9e   : > { %s1907_s23 = smov 59   ;;  %1669 = vset.pattern.permute.xlu0 %v1908_v4  ;;  %1670 = vset.pattern.permute.xlu1 %v1908_v4  ;;  %s1909_s14 = smov 58   ;;  %302 = vst.msk [vmem:[#allocation2 + $0x20] sm:$0xf] %vm301_vm0, %v296_v5  ;;  %v352_v6 = vld [vmem:[%s2160_s6 + $0x20] sm:$0xf] }
  0x9f   : > { %v307_v7 = vld [vmem:[%s2160_s6 + $0x20] sm:$0xf]  ;;  %vm330_vm3 = vcmask 1039360   ;;  %vm418_vm4 = vcmask 769024   ;;  %vm462_vm5 = vcmask 760832   ;;  %vm506_vm6 = vcmask 752640  }
  0xa0   : > { %360 = vrot.lane.b32.xlu1 %v2178_v1, %s1901_s25  ;;  %315 = vrot.lane.b32.xlu0 %v2178_v1, %s1902_s8  ;;  %v440_v8 = vld [vmem:[%s2160_s6 + $0x20] sm:$0xf]  ;;  %vm550_vm7 = vcmask 490496   ;;  %vm595_vm8 = vcmask 482304   ;;  %vm640_vm9 = vcmask 474112   ;;  %vm912_vm10 = vcmask 588800  }
  0xa1   : > { %v396_v9 = vld [vmem:[%s2160_s6 + $0x20] sm:$0xf]  ;;  %vm1911_vm11 = vmmov 0   ;;  %vm1213_vm12 = vcmask 523264   ;;  %s1569_s7 = smul.u32 36, %s2156_s26  ;;  %p2584_p6 = scmp.ne.s32.totalorder %s2576_s9, 0 }
  0xa2   : > { %v528_v10 = vld [vmem:[%s2160_s6 + $0x20] sm:$0xff]  ;;  %s1570_s11 = smul.u32 576, %s1964_s24 }
  0xa3   : > { %v484_v11 = vld [vmem:[%s2160_s6 + $0x20] sm:$0xf]  ;;  %s290_s15 = scalar_lea.vmem [#allocation12], %s1569_s7  ;;  %s1343_s6 = scalar_lea.sflag [#allocation5], %s2156_s26 }
  0xa4   : > { %404 = vrot.lane.b32.xlu1 %v2178_v1, %s1903_s12  ;;  %402 = vrot.lane.b32.xlu0 %v2175_v0, %s1903_s12  ;;  %s1357_s17 = sshll.u32 %s290_s15, 4  ;;  %s2517_s24 = scalar_lea.hbm %s2567_s5, %s1570_s11  ;;  %s2519_s17 = int_to_ptr.vmem [resolvable:$true] %s1357_s17 }
  0xa8   : > { %448 = vrot.lane.b32.xlu1 %v2178_v1, %s1904_s16  ;;  %446 = vrot.lane.b32.xlu0 %v2175_v0, %s1904_s16 }
  0xac   : > { %492 = vrot.lane.b32.xlu1 %v2178_v1, %s1905_s29  ;;  %490 = vrot.lane.b32.xlu0 %v2175_v0, %s1905_s29 }
  0xb0   : > { %536 = vrot.lane.b32.xlu1 %v2178_v1, %s1906_s22  ;;  %534 = vrot.lane.b32.xlu0 %v2175_v0, %s1906_s22 }
  0xb4   : > { %581 = vrot.lane.b32.xlu1 %v2178_v1, %s1907_s23  ;;  %579 = vrot.lane.b32.xlu0 %v2175_v0, %s1907_s23 }
  0xb8   : > { %626 = vrot.lane.b32.xlu1 %v2178_v1, %s1909_s14  ;;  %624 = vrot.lane.b32.xlu0 %v2175_v0, %s1909_s14 }
  0xbc   : > { %319 = vrot.lane.b32.xlu1 %v2181_v2, %s1902_s8  ;;  %317 = vrot.lane.b32.xlu0 %v2188_v3, %s1902_s8 }
  0xc0   : > { %406 = vrot.lane.b32.xlu1 %v2188_v3, %s1903_s12  ;;  %362 = vrot.lane.b32.xlu0 %v2188_v3, %s1901_s25 }
  0xc4   : > { %408 = vrot.lane.b32.xlu1 %v2181_v2, %s1903_s12  ;;  %364 = vrot.lane.b32.xlu0 %v2181_v2, %s1901_s25 }
  0xc8   : > { %494 = vrot.lane.b32.xlu1 %v2188_v3, %s1905_s29  ;;  %450 = vrot.lane.b32.xlu0 %v2188_v3, %s1904_s16 }
  0xcc   : > { %496 = vrot.lane.b32.xlu1 %v2181_v2, %s1905_s29  ;;  %452 = vrot.lane.b32.xlu0 %v2181_v2, %s1904_s16 }
  0xd0   : > { %583 = vrot.lane.b32.xlu1 %v2188_v3, %s1907_s23  ;;  %538 = vrot.lane.b32.xlu0 %v2188_v3, %s1906_s22 }
  0xd4   : > { %585 = vrot.lane.b32.xlu1 %v2181_v2, %s1907_s23  ;;  %540 = vrot.lane.b32.xlu0 %v2181_v2, %s1906_s22 }
  0xd8   : > { %630 = vrot.lane.b32.xlu1 %v2181_v2, %s1909_s14  ;;  %628 = vrot.lane.b32.xlu0 %v2188_v3, %s1909_s14 }
  0xdc   : > { %366 = vrot.lane.b32.xlu1 %v352_v6, %s1901_s25  ;;  %321 = vrot.lane.b32.xlu0 %v307_v7, %s1902_s8  ;;  %s1820_s25 = scalar_lea.vmem %s2519_s17, 576  ;;  %s1912_s8 = smov [#allocation12]  }
  0xdd   : > { %p1821_p5 = scmp.ne.s32.totalorder %s2519_s17, %s1820_s25 }
  0xdf   : > { %p1822_p7 = pnand %p1821_p5, %p2584_p6 }
  0xe0   : > { %454 = vrot.lane.b32.xlu1 %v440_v8, %s1904_s16  ;;  %410 = vrot.lane.b32.xlu0 %v396_v9, %s1903_s12  ;;  %s1824_s12 = sshll.u32 %s1912_s8, 4  ;;  %s1825_s12 = int_to_ptr.vmem [resolvable:$false] %s1824_s12 }
  0xe1   : > { %p1823_p9 = pneg %p1822_p7  ;;  %s1826_s16 = scalar_lea.vmem %s1825_s12, 1152 }
  0xe2   : > { %p1827_p12 = scmp.lt.s32.totalorder %s2519_s17, %s1825_s12  ;;  %p1828_p3 = scmp.lt.s32.totalorder %s1826_s16, %s1820_s25 }
  0xe4   : > { %542 = vrot.lane.b32.xlu1 %v528_v10, %s1906_s22  ;;  %498 = vrot.lane.b32.xlu0 %v484_v11, %s1905_s29  ;;  %p1829_p13 = por %p1828_p3, %p1827_p12 }
  0xe6   : > { %p1830_p0 = pnand %p1829_p13, %p1823_p9 }
  0xe8   : > { %632 = vrot.lane.b32.xlu1 %v528_v10, %s1909_s14  ;;  %587 = vrot.lane.b32.xlu0 %v528_v10, %s1907_s23 }
 0x10e   : > { %v359_v12 = vpop.permute.xlu1 %358  ;;  %v314_v13 = vpop.permute.xlu0 %313 }
 0x10f   : > { %v368_v14 = vrot.slane %v359_v12, 4  ;;  %v323_v17 = vrot.slane %v314_v13, 4 }
 0x112   : > { %v2270_v15 = vpop.permute.xlu1 %360  ;;  %v2272_v16 = vpop.permute.xlu0 %315 }
 0x113   : > { %v369_v18 = vrot.slane %v2270_v15, 4  ;;  %v324_v19 = vrot.slane %v2272_v16, 4 }
 0x115   : > { %v373_v20 = vsel %vm328_vm1, %v368_v14, %v369_v18  ;;  %v329_v21 = vsel %vm328_vm1, %v323_v17, %v324_v19 }
 0x116   : > { %v375_v22 = vsel %vm374_vm2, %v359_v12, %v373_v20  ;;  %v331_v23 = vsel %vm330_vm3, %v314_v13, %v329_v21  ;;  %v2284_v24 = vpop.permute.xlu1 %404  ;;  %v403_v25 = vpop.permute.xlu0 %402 }
 0x117   : > { %v413_v26 = vrot.slane %v2284_v24, 4  ;;  %v412_v27 = vrot.slane %v403_v25, 4  ;;  %v1479_v28 = vcombine.high %v2175_v0, %v331_v23  ;;  %v1478_v29 = vcombine.low %v2175_v0, %v331_v23 }
 0x119   : > { %v417_v30 = vsel %vm328_vm1, %v412_v27, %v413_v26  ;;  %944 = vmatprep.subr.bf16.mxu0 %v1479_v28  ;;  %v2342_v27 = vld [vmem:[#allocation6] sm:$0xf] }
 0x11a   : > { %v419_v31 = vsel %vm418_vm4, %v403_v25, %v417_v30  ;;  %v2293_v32 = vpop.permute.xlu1 %448  ;;  %v447_v33 = vpop.permute.xlu0 %446  ;;  %945 = vmatpush1.bf16.msra.mxu0 %v1478_v29 }
 0x11b   : > { %v457_v34 = vrot.slane %v2293_v32, 4  ;;  %v456_v35 = vrot.slane %v447_v33, 4  ;;  %v1488_v36 = vcombine.high %v375_v22, %v419_v31  ;;  %v1487_v37 = vcombine.low %v375_v22, %v419_v31 }
 0x11d   : > { %v461_v38 = vsel %vm328_vm1, %v456_v35, %v457_v34  ;;  %946 = vmatprep.subr.bf16.mxu0 %v1488_v36 }
 0x11e   : > { %v463_v39 = vsel %vm462_vm5, %v447_v33, %v461_v38  ;;  %v2300_v40 = vpop.permute.xlu1 %492  ;;  %v491_v41 = vpop.permute.xlu0 %490  ;;  %947 = vmatpush1.bf16.msra.mxu0 %v1487_v37 }
 0x11f   : > { %v501_v42 = vrot.slane %v2300_v40, 4  ;;  %v500_v43 = vrot.slane %v491_v41, 4 }
 0x121   : > { %v505_v44 = vsel %vm328_vm1, %v500_v43, %v501_v42 }
 0x122   : > { %v507_v45 = vsel %vm506_vm6, %v491_v41, %v505_v44  ;;  %v2307_v46 = vpop.permute.xlu1 %536  ;;  %v535_v47 = vpop.permute.xlu0 %534 }
 0x123   : > { %v545_v48 = vrot.slane %v2307_v46, 4  ;;  %v544_v49 = vrot.slane %v535_v47, 4  ;;  %v1497_v50 = vcombine.high %v463_v39, %v507_v45  ;;  %v1496_v51 = vcombine.low %v463_v39, %v507_v45 }
 0x125   : > { %v549_v52 = vsel %vm328_vm1, %v544_v49, %v545_v48  ;;  %948 = vmatprep.subr.bf16.mxu0 %v1497_v50 }
 0x126   : > { %v551_v53 = vsel %vm550_vm7, %v535_v47, %v549_v52  ;;  %v2314_v54 = vpop.permute.xlu1 %581  ;;  %v580_v55 = vpop.permute.xlu0 %579  ;;  %949 = vmatpush1.bf16.msra.mxu0 %v1496_v51 }
 0x127   : > { %v590_v56 = vrot.slane %v2314_v54, 4  ;;  %v589_v57 = vrot.slane %v580_v55, 4 }
 0x129   : > { %v594_v58 = vsel %vm328_vm1, %v589_v57, %v590_v56 }
 0x12a   : > { %v596_v59 = vsel %vm595_vm8, %v580_v55, %v594_v58  ;;  %v2321_v60 = vpop.permute.xlu1 %626  ;;  %v625_v61 = vpop.permute.xlu0 %624 }
 0x12b   : > { %v635_v62 = vrot.slane %v2321_v60, 4  ;;  %v634_v63 = vrot.slane %v625_v61, 4  ;;  %v1506_v0 = vcombine.high %v551_v53, %v596_v59  ;;  %v1505_v5 = vcombine.low %v551_v53, %v596_v59 }
 0x12d   : > { %v639_v6 = vsel %vm328_vm1, %v634_v63, %v635_v62  ;;  %950 = vmatprep.subr.bf16.mxu0 %v1506_v0 }
 0x12e   : > { %v641_v7 = vsel %vm640_vm9, %v625_v61, %v639_v6  ;;  %v2328_v8 = vpop.permute.xlu1 %319  ;;  %v318_v9 = vpop.permute.xlu0 %317  ;;  %951 = vmatpush1.bf16.msra.mxu0 %v1505_v5 }
 0x12f   : > { %v326_v10 = vrot.slane %v2328_v8, 4  ;;  %v325_v11 = vrot.slane %v318_v9, 4  ;;  %v1515_v12 = vcombine.high %v641_v7, %v641_v7  ;;  %v1514_v13 = vcombine.low %v641_v7, %v641_v7 }
 0x131   : > { %v332_v14 = vsel %vm328_vm1, %v324_v19, %v325_v11  ;;  %v334_v17 = vsel %vm328_vm1, %v325_v11, %v326_v10  ;;  %1523 = vmatprep.subr.msk.bf16.mxu0 %vm328_vm1, %v1515_v12  ;;  %v918_v20 = vsel %vm328_vm1, %v1514_v13, 0 }
 0x132   : > { %v333_v21 = vsel %vm330_vm3, %v2272_v16, %v332_v14  ;;  %v335_v22 = vsel %vm330_vm3, %v318_v9, %v334_v17  ;;  %v407_v23 = vpop.permute.xlu1 %406  ;;  %v363_v25 = vpop.permute.xlu0 %362  ;;  %953 = vmatpush1.bf16.msra.mxu0 %v918_v20 }
 0x133   : > { %v414_v19 = vrot.slane %v407_v23, 4  ;;  %v370_v28 = vrot.slane %v363_v25, 4  ;;  %v1481_v29 = vcombine.high %v2178_v1, %v333_v21  ;;  %v1482_v30 = vcombine.low %v2188_v3, %v335_v22 }
 0x134   : > { %v1483_v31 = vcombine.high %v2188_v3, %v335_v22  ;;  %v1480_v33 = vcombine.low %v2178_v1, %v333_v21 }
 0x135   : > { %v420_v16 = vsel %vm328_vm1, %v413_v26, %v414_v19  ;;  %v376_v35 = vsel %vm328_vm1, %v369_v18, %v370_v28  ;;  %985 = vmatprep.subr.bf16.mxu1 %v1481_v29  ;;  %1524 = vmatmul.mubr.msk.bf16.vlgmr.msra.gmra.mrb[0].mxu0 %vm912_vm10, %v2342_v27 }
 0x136   : > { %v421_v36 = vsel %vm418_vm4, %v2284_v24, %v420_v16  ;;  %v377_v3 = vsel %vm374_vm2, %v2270_v15, %v376_v35  ;;  %v2360_v37 = vpop.permute.xlu1 %408  ;;  %v2362_v1 = vpop.permute.xlu0 %364  ;;  %1026 = vmatprep.subr.bf16.mxu0 %v1483_v31  ;;  %986 = vmatpush1.bf16.msra.mxu1 %v1480_v33 }
 0x137   : > { %v415_v26 = vrot.slane %v2360_v37, 4  ;;  %v371_v18 = vrot.slane %v2362_v1, 4  ;;  %1027 = vmatpush1.bf16.msra.mxu0 %v1482_v30  ;;  %v1490_v38 = vcombine.high %v377_v3, %v421_v36  ;;  %v1489_v39 = vcombine.low %v377_v3, %v421_v36  ;;  %1058 = vmatprep.mubr.bf16.mxu0 %v1908_v4 }
 0x139   : > { %v422_v24 = vsel %vm328_vm1, %v414_v19, %v415_v26  ;;  %v378_v15 = vsel %vm328_vm1, %v370_v28, %v371_v18  ;;  %987 = vmatprep.subr.bf16.mxu1 %v1490_v38 }
 0x13a   : > { %v423_v41 = vsel %vm418_vm4, %v407_v23, %v422_v24  ;;  %v379_v43 = vsel %vm374_vm2, %v363_v25, %v378_v15  ;;  %v495_v44 = vpop.permute.xlu1 %494  ;;  %v451_v45 = vpop.permute.xlu0 %450  ;;  %988 = vmatpush1.bf16.msra.mxu1 %v1489_v39 }
 0x13b   : > { %v502_v47 = vrot.slane %v495_v44, 4  ;;  %v458_v49 = vrot.slane %v451_v45, 4  ;;  %v1491_v50 = vcombine.low %v379_v43, %v423_v41  ;;  %v1492_v51 = vcombine.high %v379_v43, %v423_v41 }
 0x13d   : > { %v508_v52 = vsel %vm328_vm1, %v501_v42, %v502_v47  ;;  %v464_v53 = vsel %vm328_vm1, %v457_v34, %v458_v49  ;;  %1028 = vmatprep.subr.bf16.mxu0 %v1492_v51 }
 0x13e   : > { %v509_v55 = vsel %vm506_vm6, %v2300_v40, %v508_v52  ;;  %v465_v57 = vsel %vm462_vm5, %v2293_v32, %v464_v53  ;;  %v2385_v58 = vpop.permute.xlu1 %496  ;;  %v2387_v59 = vpop.permute.xlu0 %452  ;;  %1029 = vmatpush1.bf16.msra.mxu0 %v1491_v50 }
 0x13f   : > { %v503_v61 = vrot.slane %v2385_v58, 4  ;;  %v459_v42 = vrot.slane %v2387_v59, 4  ;;  %v1499_v63 = vcombine.high %v465_v57, %v509_v55  ;;  %v1498_v0 = vcombine.low %v465_v57, %v509_v55 }
 0x141   : > { %v510_v34 = vsel %vm328_vm1, %v502_v47, %v503_v61  ;;  %v466_v40 = vsel %vm328_vm1, %v458_v49, %v459_v42  ;;  %989 = vmatprep.subr.bf16.mxu1 %v1499_v63 }
 0x142   : > { %v511_v32 = vsel %vm506_vm6, %v495_v44, %v510_v34  ;;  %v467_v5 = vsel %vm462_vm5, %v451_v45, %v466_v40  ;;  %v584_v6 = vpop.permute.xlu1 %583  ;;  %v539_v7 = vpop.permute.xlu0 %538  ;;  %990 = vmatpush1.bf16.msra.mxu1 %v1498_v0  ;;  %v1910_v34 = vmov 0.0  }
 0x143   : > { %v591_v9 = vrot.slane %v584_v6, 4  ;;  %v546_v11 = vrot.slane %v539_v7, 4  ;;  %v1500_v12 = vcombine.low %v467_v5, %v511_v32  ;;  %v1501_v13 = vcombine.high %v467_v5, %v511_v32 }
 0x145   : > { %v597_v14 = vsel %vm328_vm1, %v590_v56, %v591_v9  ;;  %v552_v17 = vsel %vm328_vm1, %v545_v48, %v546_v11  ;;  %1030 = vmatprep.subr.bf16.mxu0 %v1501_v13 }
 0x146   : > { %v598_v20 = vsel %vm595_vm8, %v2314_v54, %v597_v14  ;;  %v553_v21 = vsel %vm550_vm7, %v2307_v46, %v552_v17  ;;  %v2409_v22 = vpop.permute.xlu1 %585  ;;  %v2411_v23 = vpop.permute.xlu0 %540  ;;  %1031 = vmatpush1.bf16.msra.mxu0 %v1500_v12 }
 0x147   : > { %v592_v25 = vrot.slane %v2409_v22, 4  ;;  %v547_v56 = vrot.slane %v2411_v23, 4  ;;  %v1508_v19 = vcombine.high %v553_v21, %v598_v20  ;;  %v1507_v28 = vcombine.low %v553_v21, %v598_v20 }
 0x149   : > { %v599_v48 = vsel %vm328_vm1, %v591_v9, %v592_v25  ;;  %v554_v54 = vsel %vm328_vm1, %v546_v11, %v547_v56  ;;  %991 = vmatprep.subr.bf16.mxu1 %v1508_v19 }
 0x14a   : > { %v600_v46 = vsel %vm595_vm8, %v584_v6, %v599_v48  ;;  %v555_v29 = vsel %vm550_vm7, %v539_v7, %v554_v54  ;;  %v2423_v30 = vpop.permute.xlu1 %630  ;;  %v629_v31 = vpop.permute.xlu0 %628  ;;  %992 = vmatpush1.bf16.msra.mxu1 %v1507_v28 }
 0x14b   : > { %v637_v33 = vrot.slane %v2423_v30, 4  ;;  %v636_v16 = vrot.slane %v629_v31, 4  ;;  %v1509_v35 = vcombine.low %v555_v29, %v600_v46  ;;  %v1510_v36 = vcombine.high %v555_v29, %v600_v46 }
 0x14d   : > { %v642_v3 = vsel %vm328_vm1, %v635_v62, %v636_v16  ;;  %v644_v38 = vsel %vm328_vm1, %v636_v16, %v637_v33  ;;  %1032 = vmatprep.subr.bf16.mxu0 %v1510_v36 }
 0x14e   : > { %v643_v39 = vsel %vm640_vm9, %v2321_v60, %v642_v3  ;;  %v645_v24 = vsel %vm640_vm9, %v629_v31, %v644_v38  ;;  %v367_v15 = vpop.permute.xlu1 %366  ;;  %v322_v41 = vpop.permute.xlu0 %321  ;;  %1033 = vmatpush1.bf16.msra.mxu0 %v1509_v35  ;;  %v1152_v3 = vlaneseq }
 0x14f   : > { %v372_v43 = vrot.slane %v367_v15, 4  ;;  %391 = vst.msk [vmem:[#allocation2 + $0x68] sm:$0xf] %vm301_vm0, %v367_v15  ;;  %v327_v44 = vrot.slane %v322_v41, 4  ;;  %347 = vst.msk [vmem:[#allocation2 + $0x44] sm:$0xf] %vm301_vm0, %v322_v41  ;;  %v1517_v62 = vcombine.high %v643_v39, %v643_v39  ;;  %v1519_v45 = vcombine.high %v645_v24, %v645_v24 }
 0x150   : > { %v1516_v47 = vcombine.low %v643_v39, %v643_v39  ;;  %v1518_v49 = vcombine.low %v645_v24, %v645_v24  ;;  %v1153_v38 = vshrl.u32 %v1152_v3, 7  ;;  %v1148_v24 = vld [vmem:[#allocation11] sm:$0xff] }
 0x151   : > { %v380_v50 = vsel %vm328_vm1, %v371_v18, %v372_v43  ;;  %v336_v60 = vsel %vm328_vm1, %v326_v10, %v327_v44  ;;  %1525 = vmatprep.subr.msk.bf16.mxu1 %vm328_vm1, %v1517_v62  ;;  %1527 = vmatprep.subr.msk.bf16.mxu0 %vm328_vm1, %v1519_v45 }
 0x152   : > { %v381_v51 = vsel %vm374_vm2, %v2362_v1, %v380_v50  ;;  %v337_v52 = vsel %vm330_vm3, %v2328_v8, %v336_v60  ;;  %v455_v53 = vpop.permute.xlu1 %454  ;;  %v411_v55 = vpop.permute.xlu0 %410  ;;  %v924_v57 = vsel %vm328_vm1, %v1516_v47, 0  ;;  %v930_v18 = vsel %vm328_vm1, %v1518_v49, 0 }
 0x153   : > { %v460_v63 = vrot.slane %v455_v53, 4  ;;  %479 = vst.msk [vmem:[#allocation2 + $0xb0] sm:$0xf] %vm301_vm0, %v455_v53  ;;  %v416_v10 = vrot.slane %v411_v55, 4  ;;  %435 = vst.msk [vmem:[#allocation2 + $0x8c] sm:$0xf] %vm301_vm0, %v411_v55  ;;  %994 = vmatpush1.bf16.msra.mxu1 %v924_v57  ;;  %1035 = vmatpush1.bf16.msra.mxu0 %v930_v18  ;;  %v1484_v0 = vcombine.low %v2181_v2, %v337_v52 }
 0x154   : > { %v1485_v1 = vcombine.high %v2181_v2, %v337_v52  ;;  %1552 = vmatprep.subr.bf16.mxu0 %v1910_v34  ;;  %v1154_v39 = vsub.s32 0, %v1153_v38  ;;  %v1158_v15 = vsub.s32 1, %v1153_v38  ;;  %v1166_v52 = vsub.s32 3, %v1153_v38 }
 0x155   : > { %v468_v8 = vsel %vm328_vm1, %v459_v42, %v460_v63  ;;  %v424_v40 = vsel %vm328_vm1, %v415_v26, %v416_v10  ;;  %v1170_v53 = vsub.s32 4, %v1153_v38  ;;  %v1174_v57 = vsub.s32 5, %v1153_v38 }
 0x156   : > { %1067 = vmatprep.subr.bf16.mxu1 %v1485_v1  ;;  %v469_v32 = vsel %vm462_vm5, %v2387_v59, %v468_v8  ;;  %v425_v5 = vsel %vm418_vm4, %v2360_v37, %v424_v40  ;;  %v543_v6 = vpop.permute.xlu1 %542  ;;  %v499_v2 = vpop.permute.xlu0 %498  ;;  %1526 = vmatmul.mubr.msk.bf16.vlgmr.msra.gmra.mrb[0].mxu1 %vm912_vm10, %v2342_v27  ;;  %v1671_v42 = vld [vmem:[#allocation2 + $0x20] ss:$36 sps:$4 sm:$0xff]   ;;  %v1155_v41 = vrot.slane %v1148_v24, %v1154_v39 }
 0x157   : > { %1528 = vmatmul.mubr.msk.bf16.vlgmr.msra.gmra.mrb[4].mxu0 %vm912_vm10, %v2342_v27  ;;  %v548_v7 = vrot.slane %v543_v6, 4  ;;  %v504_v9 = vrot.slane %v499_v2, 4  ;;  %523 = vst.msk [vmem:[#allocation2 + $0xd4] sm:$0xf] %vm301_vm0, %v499_v2  ;;  %1068 = vmatpush1.bf16.msra.mxu1 %v1484_v0  ;;  %v1493_v26 = vcombine.low %v381_v51, %v425_v5  ;;  %v1494_v11 = vcombine.high %v381_v51, %v425_v5 }
 0x158   : > { %1099 = vmatprep.mubr.bf16.mxu1 %v1908_v4  ;;  %1553 = vmatpush3.bf16.msra.mxu0 %v1671_v42  ;;  %v1159_v43 = vrot.slane %v1148_v24, %v1158_v15  ;;  %v1162_v51 = vsub.s32 2, %v1153_v38  ;;  %v1171_v18 = vrot.slane %v1148_v24, %v1170_v53  ;;  %v1175_v8 = vrot.slane %v1148_v24, %v1174_v57 }
 0x159   : > { %1562 = vmatprep.mubr.msk.bf16.mxu0 %vm1911_vm11, %v1910_v34  ;;  %v556_v37 = vsel %vm328_vm1, %v547_v56, %v548_v7  ;;  %v558_v59 = vsel %vm550_vm7, %v543_v6, %v548_v7  ;;  %v512_v12 = vsel %vm328_vm1, %v503_v61, %v504_v9  ;;  %1069 = vmatprep.subr.bf16.mxu1 %v1494_v11 }
 0x15a   : > { %1554 = vmatprep.subr.bf16.mxu0 %v1910_v34  ;;  %v557_v4 = vsel %vm550_vm7, %v2411_v23, %v556_v37  ;;  %568 = vst.msk [vmem:[#allocation2 + $0xf8] sm:$0xf] %vm301_vm0, %v558_v59  ;;  %v513_v13 = vsel %vm506_vm6, %v2385_v58, %v512_v12  ;;  %v633_v14 = vpop.permute.xlu1 %632  ;;  %v588_v17 = vpop.permute.xlu0 %587  ;;  %v1672_v20 = vld [vmem:[#allocation2 + $0x68] ss:$36 sps:$4 sm:$0xff]   ;;  %v1163_v55 = vrot.slane %v1148_v24, %v1162_v51  ;;  %v1178_v59 = vsub.s32 6, %v1153_v38 }
 0x15b   : > { %v638_v21 = vrot.slane %v633_v14, 4  ;;  %v593_v56 = vrot.slane %v588_v17, 4  ;;  %1070 = vmatpush1.bf16.msra.mxu1 %v1493_v26  ;;  %v1502_v19 = vcombine.low %v469_v32, %v513_v13  ;;  %v1503_v28 = vcombine.high %v469_v32, %v513_v13 }
 0x15c   : > { %1555 = vmatpush3.bf16.msra.mxu0 %v1672_v20  ;;  %v1182_v12 = vsub.s32 7, %v1153_v38 }
 0x15d   : > { %v646_v61 = vsel %vm328_vm1, %v637_v33, %v638_v21  ;;  %v648_v23 = vsel %vm640_vm9, %v633_v14, %v638_v21  ;;  %v601_v48 = vsel %vm328_vm1, %v592_v25, %v593_v56  ;;  %v603_v58 = vsel %vm595_vm8, %v588_v17, %v593_v56  ;;  %1071 = vmatprep.subr.bf16.mxu1 %v1503_v28  ;;  %v1532_v21 = vld [vmem:[#allocation11 + $0x8] ss:$0 sm:$0xff] }
 0x15e   : > { %v647_v54 = vsel %vm640_vm9, %v2423_v30, %v646_v61  ;;  %658 = vst.msk [vmem:[#allocation2 + $0x140] sm:$0xf] %vm301_vm0, %v648_v23  ;;  %v602_v46 = vsel %vm595_vm8, %v2409_v22, %v601_v48  ;;  %613 = vst.msk [vmem:[#allocation2 + $0x11c] sm:$0xf] %vm301_vm0, %v603_v58  ;;  %1556 = vmatprep.subr.bf16.mxu0 %v1910_v34  ;;  %v1673_v29 = vld [vmem:[#allocation2 + $0xb0] ss:$36 sps:$4 sm:$0xff]   ;;  %v1183_v13 = vrot.slane %v1148_v24, %v1182_v12 }
 0x15f   : > { %1072 = vmatpush1.bf16.msra.mxu1 %v1502_v19  ;;  %v1511_v31 = vcombine.low %v557_v4, %v602_v46  ;;  %v1512_v33 = vcombine.high %v557_v4, %v602_v46  ;;  %v1521_v25 = vcombine.high %v647_v54, %v647_v54  ;;  %v1520_v16 = vcombine.low %v647_v54, %v647_v54 }
 0x160   : > { %1557 = vmatpush3.bf16.msra.mxu0 %v1673_v29  ;;  %v1179_v4 = vrot.slane %v1148_v24, %v1178_v59 }
 0x161   : > { %1073 = vmatprep.subr.bf16.mxu1 %v1512_v33  ;;  %1558 = vmatprep.subr.bf16.mxu0 %v1910_v34  ;;  %v936_v22 = vsel %vm328_vm1, %v1520_v16, 0 }
 0x163   : > { %1074 = vmatpush1.bf16.msra.mxu1 %v1511_v31 }
 0x164   : > { %1529 = vmatprep.subr.msk.bf16.mxu1 %vm328_vm1, %v1521_v25 }
 0x165   : > { %v1674_v30 = vld [vmem:[#allocation2 + $0xf8] ss:$36 sps:$4 sm:$0xff]   ;;  %v1675_v35 = vld [vmem:[#allocation2 + $0x140] ss:$0 sps:$4 sm:$0xff]  }
 0x166   : > { %1559 = vmatpush3.bf16.msra.mxu0 %v1674_v30  ;;  %v942_v36 = vsel %vm328_vm1, %v1675_v35, 0 }
 0x167   : > { %1076 = vmatpush1.bf16.msra.mxu1 %v936_v22  ;;  %1560 = vmatprep.subr.bf16.mxu0 %v1910_v34 }
 0x16a   : > { %1530 = vmatmul.mubr.msk.bf16.vlgmr.msra.gmra.mrb[4].mxu1 %vm912_vm10, %v2342_v27  ;;  %1561 = vmatpush3.bf16.msra.mxu0 %v942_v36 }
 0x16d   : > { %1563 = vmatmul.mubr.msk.bf16.vlgmr.msra.gmra.mrb[8].mxu0 %vm912_vm10, %v2342_v27  ;;  %v1167_v27 = vrot.slane %v1148_v24, %v1166_v52 }
 0x208   : > { %v978_v44 = vpop.f32.mrb[0].mxu0 }
 0x209   : > { %v1197_v62 = vmul.f32 %v1155_v41, %v978_v44  ;;  %v980_v45 = vpop.f32.mrb[1].mxu0 }
 0x20a   : > { %v1198_v47 = vmul.f32 %v1159_v43, %v980_v45  ;;  %v982_v49 = vpop.f32.mrb[2].mxu0 }
 0x20b   : > { %v983_v50 = vpop.f32.mrb[3].mxu0 }
 0x20c   : > { %v1206_v60 = vadd.f32 %v1198_v47, %v1197_v62 }
 0x229   : > { %v1019_v63 = vpop.f32.mrb[0].mxu1 }
 0x22a   : > { %v1060_v10 = vpop.f32.mrb[4].mxu0  ;;  %v1199_v0 = vmul.f32 %v1163_v55, %v1019_v63  ;;  %v1021_v1 = vpop.f32.mrb[1].mxu1 }
 0x22b   : > { %v1062_v34 = vpop.f32.mrb[5].mxu0  ;;  %v1200_v40 = vmul.f32 %v1167_v27, %v1021_v1  ;;  %v1023_v32 = vpop.f32.mrb[2].mxu1  ;;  %v1201_v2 = vmul.f32 %v1171_v18, %v1060_v10 }
 0x22c   : > { %v1064_v5 = vpop.f32.mrb[6].mxu0  ;;  %v1207_v6 = vadd.f32 %v1206_v60, %v1199_v0  ;;  %v1024_v42 = vpop.f32.mrb[3].mxu1  ;;  %v1202_v26 = vmul.f32 %v1175_v8, %v1062_v34 }
 0x22d   : > { %v1065_v7 = vpop.f32.mrb[7].mxu0 }
 0x22e   : > { %v1208_v9 = vadd.f32 %v1207_v6, %v1200_v40 }
 0x230   : > { %v1209_v11 = vadd.f32 %v1208_v9, %v1201_v2 }
 0x232   : > { %v1210_v37 = vadd.f32 %v1209_v11, %v1202_v26  ;;  %v1258_v11 = vld [vmem:[#allocation8] sm:$0xff] }
 0x23d   : > { %v1101_v14 = vpop.f32.mrb[4].mxu1 }
 0x23e   : > { %v1203_v17 = vmul.f32 %v1179_v4, %v1101_v14  ;;  %v1103_v20 = vpop.f32.mrb[5].mxu1 }
 0x23f   : > { %v1204_v56 = vmul.f32 %v1183_v13, %v1103_v20  ;;  %v1105_v19 = vpop.f32.mrb[6].mxu1 }
 0x240   : > { %v1211_v28 = vadd.f32 %v1210_v37, %v1203_v17  ;;  %v1106_v61 = vpop.f32.mrb[7].mxu1  ;;  %v1142_v23 = vpop.f32.mrb[8].mxu0 }
 0x241   : > { %v1205_v48 = vmul.f32 %v1532_v21, %v1142_v23  ;;  %v1564_v58 = vpop.f32.mrb[9].mxu0 }
 0x242   : > { %v1212_v54 = vadd.f32 %v1211_v28, %v1204_v56  ;;  %v1145_v46 = vpop.f32.mrb[10].mxu0 }
 0x243   : > { %v1565_v29 = vpop.f32.mrb[11].mxu0  ;;  %v1214_v31 = vsel %vm1213_vm12, %v1205_v48, 0.0 }
 0x244   : > { %v1215_v33 = vadd.f32 %v1214_v31, %v1212_v54 }
 0x246   : > { %1216 = vadd.xlane.f32.xlu0 %v1215_v33 }
 0x2d3   : > { %v1217_v25 = vpop.xlane.xlu0 %1216 }
 0x2d4   : > { %v1218_v16 = vmul.f32 0.0009765625, %v1217_v25 }
 0x2d6   : > { %v1219_v30 = vsub.f32 %v978_v44, %v1218_v16  ;;  %v1220_v22 = vsub.f32 %v980_v45, %v1218_v16  ;;  %v1221_v35 = vsub.f32 %v1019_v63, %v1218_v16  ;;  %v1222_v36 = vsub.f32 %v1021_v1, %v1218_v16 }
 0x2d7   : > { %v1223_v3 = vsub.f32 %v1060_v10, %v1218_v16  ;;  %v1224_v15 = vsub.f32 %v1062_v34, %v1218_v16  ;;  %v1225_v50 = vsub.f32 %v1101_v14, %v1218_v16  ;;  %v1227_v53 = vsub.f32 %v1142_v23, %v1218_v16 }
 0x2d8   : > { %v1228_v38 = vmul.f32 %v1219_v30, %v1155_v41  ;;  %v1229_v39 = vmul.f32 %v1220_v22, %v1159_v43  ;;  %v1230_v24 = vmul.f32 %v1221_v35, %v1163_v55  ;;  %v1231_v62 = vmul.f32 %v1222_v36, %v1167_v27 }
 0x2d9   : > { %v1232_v60 = vmul.f32 %v1223_v3, %v1171_v18  ;;  %v1226_v57 = vsub.f32 %v1103_v20, %v1218_v16  ;;  %v1233_v0 = vmul.f32 %v1224_v15, %v1175_v8  ;;  %v1234_v45 = vmul.f32 %v1225_v50, %v1179_v4  ;;  %v1276_v8 = vld [vmem:[#allocation9] sm:$0xff] }
 0x2da   : > { %v1237_v47 = vmul.f32 %v1228_v38, %v1228_v38  ;;  %v1238_v49 = vmul.f32 %v1229_v39, %v1229_v39  ;;  %v1239_v51 = vmul.f32 %v1230_v24, %v1230_v24  ;;  %v1240_v40 = vmul.f32 %v1231_v62, %v1231_v62 }
 0x2db   : > { %v1241_v63 = vmul.f32 %v1232_v60, %v1232_v60  ;;  %v1236_v10 = vmul.f32 %v1532_v21, %v1227_v53  ;;  %v1235_v41 = vmul.f32 %v1226_v57, %v1183_v13  ;;  %v1242_v43 = vmul.f32 %v1233_v0, %v1233_v0 }
 0x2dc   : > { %v1246_v52 = vadd.f32 %v1238_v49, %v1237_v47  ;;  %v1243_v34 = vmul.f32 %v1234_v45, %v1234_v45 }
 0x2dd   : > { %v1245_v32 = vmul.f32 %v1236_v10, %v1236_v10  ;;  %v1244_v5 = vmul.f32 %v1235_v41, %v1235_v41 }
 0x2de   : > { %v1247_v44 = vadd.f32 %v1246_v52, %v1239_v51 }
 0x2df   : > { %v1253_v2 = vsel %vm1213_vm12, %v1245_v32, 0.0 }
 0x2e0   : > { %v1248_v1 = vadd.f32 %v1247_v44, %v1240_v40 }
 0x2e2   : > { %v1249_v55 = vadd.f32 %v1248_v1, %v1241_v63 }
 0x2e4   : > { %v1250_v27 = vadd.f32 %v1249_v55, %v1242_v43 }
 0x2e6   : > { %v1251_v18 = vadd.f32 %v1250_v27, %v1243_v34 }
 0x2e8   : > { %v1252_v6 = vadd.f32 %v1251_v18, %v1244_v5 }
 0x2ea   : > { %v1254_v42 = vadd.f32 %v1253_v2, %v1252_v6 }
 0x2ec   : > { %1255 = vadd.xlane.f32.xlu1 %v1254_v42 }
 0x2fd   : > { %1279 = vperm.xlu1 %1670, %v1276_v8  }
 0x379   : > { %v1256_v7 = vpop.xlane.xlu1 %1255 }
 0x37a   : > { %v1257_v9 = vmul.f32 0.0009765625, %v1256_v7 }
 0x37c   : > { %v1259_v26 = vadd.f32 1e-05, %v1257_v9 }
 0x37d   : > { %v1280_v4 = vpop.permute.xlu1 %1279 }
 0x37e   : > { %1676 = vrsqrt.f32 %v1259_v26 }
 0x388   : > { %v1677_v37 = vpop.eup %1676 }
 0x389   : > { %v1261_v59 = vmul.f32 %v1677_v37, %v1258_v11 }
 0x38b   : > { %1264 = vperm.xlu0 %1669, %v1261_v59  }
 0x40a   : > { %v1265_v12 = vpop.permute.xlu0 %1264 }
 0x40b   : > { %v1267_v13 = vmul.f32 %v1265_v12, %v1219_v30  ;;  %v1268_v14 = vmul.f32 %v1265_v12, %v1220_v22  ;;  %v1269_v17 = vmul.f32 %v1265_v12, %v1221_v35  ;;  %v1270_v20 = vmul.f32 %v1265_v12, %v1222_v36 }
 0x40c   : > { %v1271_v21 = vmul.f32 %v1265_v12, %v1223_v3  ;;  %v1272_v56 = vmul.f32 %v1265_v12, %v1224_v15  ;;  %v1273_v19 = vmul.f32 %v1265_v12, %v1225_v50  ;;  %v1274_v28 = vmul.f32 %v1265_v12, %v1226_v57 }
 0x40d   : > { %v1275_v61 = vmul.f32 %v1265_v12, %v1227_v53  ;;  %v1282_v23 = vadd.f32 %v1280_v4, %v1267_v13  ;;  %v1283_v48 = vadd.f32 %v1280_v4, %v1268_v14  ;;  %v1284_v58 = vadd.f32 %v1280_v4, %v1269_v17 }
 0x40e   : > { %v1285_v54 = vadd.f32 %v1280_v4, %v1270_v20  ;;  %v1286_v46 = vadd.f32 %v1280_v4, %v1271_v21  ;;  %v1287_v29 = vadd.f32 %v1280_v4, %v1272_v56  ;;  %v1288_v31 = vadd.f32 %v1280_v4, %v1273_v19 }
 0x40f   : > { %v1289_v33 = vadd.f32 %v1280_v4, %v1274_v28  ;;  %v1290_v25 = vadd.f32 %v1280_v4, %v1275_v61  ;;  %v1291_v16 = vmax.f32 %v1282_v23, 0.0  ;;  %v1292_v30 = vmax.f32 %v1283_v48, 0.0 }
 0x410   : > { %v1293_v22 = vmax.f32 %v1284_v58, 0.0  ;;  %v1294_v35 = vmax.f32 %v1285_v54, 0.0  ;;  %v1295_v36 = vmax.f32 %v1286_v46, 0.0  ;;  %v1296_v3 = vmax.f32 %v1287_v29, 0.0 }
 0x411   : > { %v1297_v38 = vmax.f32 %v1288_v31, 0.0  ;;  %v1298_v39 = vmax.f32 %v1289_v33, 0.0  ;;  %v1299_v24 = vmax.f32 %v1290_v25, 0.0  ;;  %v1541_v15 = vpack.c.bf16 %v1292_v30, %v1291_v16 }
 0x412   : > { %v1542_v62 = vpack.c.bf16 %v1294_v35, %v1293_v22  ;;  %v1543_v47 = vpack.c.bf16 %v1296_v3, %v1295_v36 }
 0x413   : > { %v1544_v49 = vpack.c.bf16 %v1298_v39, %v1297_v38  ;;  %v1545_v50 = vpack.c.bf16 %v1299_v24, %v1299_v24  ;;  %1337 = vst [vmem:[%s290_s15] sm:$0xff] %v1541_v15 }
 0x414   : > { %1338 = vst [vmem:[%s290_s15 + $0x8] sm:$0xff] %v1542_v62  ;;  %1339 = vst [vmem:[%s290_s15 + $0x10] sm:$0xff] %v1543_v47 }
 0x415   : > { %1340 = vst [vmem:[%s290_s15 + $0x18] sm:$0xff] %v1544_v49  ;;  %1341 = vst.msk [vmem:[%s290_s15 + $0x20] sm:$0xf] %vm301_vm0, %v1545_v50 }
 0x416   : > { %1833 = shalt.err (!%p1830_p0)
}
 0x417   : > { %s1834_s26 = scalar_lea.hbm %s2517_s24, 576  ;;  %s1838_s23 = scalar_lea.hbm %s2567_s5, 1152 }
 0x418   : > { %p1835_p2 = scmp.ne.s32.totalorder %s2517_s24, %s1834_s26  ;;  %p1839_p4 = scmp.lt.u32.totalorder %s2517_s24, %s2567_s5 }
 0x419   : > { %p1840_p11 = scmp.lt.u32.totalorder %s1838_s23, %s1834_s26  ;;  %p1842_p5 = scmp.lt.u32.totalorder %s1834_s26, %s2517_s24 }
 0x41a   : > { %p1836_p8 = pnand %p1835_p2, %p2584_p6 }
 0x41b   : > { %p1841_p1 = por %p1840_p11, %p1839_p4 }
 0x41c   : > { %p1837_p10 = pneg %p1836_p8 }
 0x41d   : > { %p1843_p7 = por %p1842_p5, %p1841_p1 }
 0x41f   : > { %p1844_p9 = pnand %p1843_p7, %p1837_p10 }
 0x421   : > { %1847 = shalt.err (!%p1844_p9)
}
 0x422   : > { %1589 = dma.vmem_to_hbm [thread:$0]  (%p2584_p6), %s2519_s17, 576, %s2517_s24, %s1343_s6  }
 0x423 PF: > { %s1369_s11 = sand.u32 1, %s1882_s18   ;;  %p2585_p12 = scmp.ne.s32.totalorder %s2577_s10, 0 }
 0x424   : > { %p2586_p3 = scmp.ge.s32.totalorder %s1894_s21, 2  ;;  %s1370_s15 = scalar_lea.sflag [#allocation5], %s1369_s11 }
 0x426   : > { %p1609_p13 = pnand %p2586_p3, %p2585_p12 }
 0x428   : > { %1877 = dma.done.wait (!%p1609_p13), %s1370_s15, 576  }
 0x429   : > { %1879 = vsyncadd (!%p1609_p13), %s1370_s15, 4294966720  ;;  %p20_p0 = scmp.ge.s32.totalorder %s2086_s30, 4   ;;  %s2587_s18 = smov %s1886_s19 }
 0x42a   : > { %s2588_s19 = smov %s1890_s20  ;;  %s2589_s20 = smov %s2097_s27 }
 0x42b   : > { %s2590_s21 = smov %s2086_s30  ;;  %22 = sbr.rel (!%p20_p0) target bundleno = 7 (0x7), region = 101 }
 0x432   :  { %1375 = vsyncpa [#allocation4], 1 }
 0x433   :  { %1377 = vsyncpa [#allocation4 + $0x1], 1 }
 0x434   :  { %1378 = vsyncpa [#allocation7], 1 }
 0x435   :  { %1379 = vsyncpa [#allocation10], 1 }
 0x436   :  { %1380 = vsyncpa [#allocation5], 1 }
 0x437   :  { %1382 = vsyncpa [#allocation5 + $0x1], 1 }

// kernel: _lambda_.8
= control target key start
LH: loop header
LB: loop body
LE: loop exit
PB: predicated region body
PF: predicated region fallthrough
CT: control target
= control target key end

     0   :  { %10 = vsyncpa [#allocation4], 0  ;;  %s2679_s0 = inlined_call_operand.hbm [shape: bf16[2,8,1190], index: 0, kind: input, shape index: {}]   ;;  %s2680_s1 = inlined_call_operand.hbm [shape: bf16[8,72], index: 1, kind: input, shape index: {}]   ;;  %s2681_s2 = inlined_call_operand.hbm [shape: f32[8,1], index: 2, kind: input, shape index: {}]   ;;  %s2682_s3 = inlined_call_operand.hbm [shape: f32[8,1], index: 3, kind: input, shape index: {}]   ;;  %s2683_s4 = inlined_call_operand.hbm [shape: f32[1,1088], index: 4, kind: input, shape index: {}]   ;;  %s2684_s5 = inlined_call_operand.hbm [shape: bf16[2,8,1088], index: 5, kind: output, shape index: {}]  }
   0x1   :  { %12 = vsyncpa [#allocation4 + $0x1], 0 }
   0x2   :  { %13 = vsyncpa [#allocation7], 0 }
   0x3   :  { %14 = vsyncpa [#allocation10], 0 }
   0x4   :  { %15 = vsyncpa [#allocation5], 0 }
   0x5   :  { %17 = vsyncpa [#allocation5 + $0x1], 0  ;;  %s2060_s18 = smov 0   ;;  %s2062_s19 = smov 0  }
   0x6   :  { %s2064_s20 = smov 0   ;;  %s2066_s21 = smov 0  }
   0x7 LB: > { %s2013_s22 = smov [#allocation6]   ;;  %s2081_s24 = sadd.s32 4294967295, %s2011_s21   ;;  %s2011_s21 = sphi %s2066_s21, %s2707_s21   ;;  %s2007_s20 = sphi %s2064_s20, %s2706_s20   ;;  %s2003_s19 = sphi %s2062_s19, %s2705_s19   ;;  %s1999_s18 = sphi %s2060_s18, %s2704_s18  }
   0x8   : > { %s177_s23 = sshll.u32 %s2013_s22, 4  ;;  %p1529_p0 = scmp.ge.s32.totalorder %s2011_s21, 1  ;;  %s2086_s23 = int_to_ptr.vmem [resolvable:$true] %s177_s23 }
   0x9   : > { %p2685_p1 = scmp.eq.s32.totalorder %s2081_s24, 0  ;;  %p164_p2 = scmp.lt.s32.totalorder %s2011_s21, 3 }
   0xa   : > { %s2014_s26 = smov [#allocation9]   ;;  %s2015_s28 = smov [#allocation8]  }
   0xb   : > { %p2088_p3 = pnand %p1529_p0, %p164_p2  ;;  %s199_s27 = sshll.u32 %s2014_s26, 4  ;;  %s2095_s27 = int_to_ptr.vmem [resolvable:$true] %s199_s27 }
   0xc   : > { %s188_s29 = sshll.u32 %s2015_s28, 4  ;;  %s2016_s6 = smov [#allocation11]   ;;  %s2103_s29 = int_to_ptr.vmem [resolvable:$true] %s188_s29 }
   0xd   : > { %s2688_s25 = scalar_select %p2088_p3, 1, 0 }
   0xe   : > { %p1654_p5 = pneg %p2088_p3  ;;  %s2105_s7 = sshll.u32 %s2016_s6, 4  ;;  %s211_s7 = int_to_ptr.vmem [resolvable:$true] %s2105_s7 }
   0xf   : > { %s1795_s10 = scalar_lea.hbm %s2680_s1, 64 }
  0x10   : > { %p2099_p6 = pnand %p1654_p5, %p2685_p1  ;;  %p1796_p7 = scmp.ne.s32.totalorder %s2680_s1, %s1795_s10 }
  0x11   : > { %p1802_p11 = scmp.lt.u32.totalorder %s1795_s10, %s2680_s1 }
  0x12   : > { %p2115_p8 = pneg %p2099_p6 }
  0x14   : > { %p1798_p9 = pnand %p2115_p8, %p1796_p7 }
  0x16   : > { %p1799_p10 = pneg %p1798_p9 }
  0x18   : > { %p1804_p12 = pnand %p1802_p11, %p1799_p10 }
  0x1a   : > { %1807 = shalt.err (!%p1804_p12)
}
  0x1b   : > { %s1808_s16 = scalar_lea.vmem %s2086_s23, 64  ;;  %p1816_p5 = scmp.lt.s32.totalorder %s2086_s23, %s2086_s23 }
  0x1c   : > { %p1809_p13 = scmp.ne.s32.totalorder %s2086_s23, %s1808_s16  ;;  %p1817_p4 = scmp.lt.s32.totalorder %s1808_s16, %s1808_s16 }
  0x1e   : > { %p1811_p0 = pnand %p1809_p13, %p2115_p8  ;;  %p1818_p7 = por %p1817_p4, %p1816_p5 }
  0x20   : > { %p1812_p2 = pneg %p1811_p0 }
  0x22   : > { %p1819_p9 = pnand %p1818_p7, %p1812_p2 }
  0x24   : > { %1822 = shalt.err (!%p1819_p9)
}
  0x25   : > { %1657 = dma.hbm_to_vmem [thread:$0]  (!%p2099_p6), %s2680_s1, 64, %s2086_s23, [#allocation7]  }
  0x26   : > { %s1823_s6 = scalar_lea.hbm %s2682_s3, 128 }
  0x27   : > { %p1824_p10 = scmp.ne.s32.totalorder %s2682_s3, %s1823_s6  ;;  %p1830_p12 = scmp.lt.u32.totalorder %s1823_s6, %s2682_s3 }
  0x29   : > { %p1826_p4 = pnand %p1824_p10, %p2115_p8 }
  0x2b   : > { %p1827_p11 = pneg %p1826_p4 }
  0x2d   : > { %p1832_p13 = pnand %p1830_p12, %p1827_p11 }
  0x2f   : > { %1835 = shalt.err (!%p1832_p13)
}
  0x30   : > { %s1836_s23 = scalar_lea.vmem %s2095_s27, 128  ;;  %p1844_p7 = scmp.lt.s32.totalorder %s2095_s27, %s2095_s27 }
  0x31   : > { %p1837_p0 = scmp.ne.s32.totalorder %s2095_s27, %s1836_s23  ;;  %p1845_p9 = scmp.lt.s32.totalorder %s1836_s23, %s1836_s23 }
  0x33   : > { %p1839_p2 = pnand %p1837_p0, %p2115_p8  ;;  %p1846_p10 = por %p1845_p9, %p1844_p7 }
  0x35   : > { %p1840_p5 = pneg %p1839_p2 }
  0x37   : > { %p1847_p4 = pnand %p1846_p10, %p1840_p5 }
  0x39   : > { %1850 = shalt.err (!%p1847_p4)
}
  0x3a   : > { %1663 = dma.hbm_to_vmem [thread:$0]  (!%p2099_p6), %s2682_s3, 128, %s2095_s27, [#allocation10]  }
  0x3b   : > { %s1851_s17 = scalar_lea.hbm %s2681_s2, 128 }
  0x3c   : > { %p1852_p11 = scmp.ne.s32.totalorder %s2681_s2, %s1851_s17  ;;  %p1858_p0 = scmp.lt.u32.totalorder %s1851_s17, %s2681_s2 }
  0x3e   : > { %p1854_p12 = pnand %p1852_p11, %p2115_p8 }
  0x40   : > { %p1855_p13 = pneg %p1854_p12 }
  0x42   : > { %p1860_p2 = pnand %p1858_p0, %p1855_p13 }
  0x44   : > { %1863 = shalt.err (!%p1860_p2)
}
  0x45   : > { %s1864_s27 = scalar_lea.vmem %s2103_s29, 128  ;;  %p1872_p10 = scmp.lt.s32.totalorder %s2103_s29, %s2103_s29 }
  0x46   : > { %p1865_p5 = scmp.ne.s32.totalorder %s2103_s29, %s1864_s27  ;;  %p1873_p4 = scmp.lt.s32.totalorder %s1864_s27, %s1864_s27 }
  0x48   : > { %p1867_p7 = pnand %p1865_p5, %p2115_p8  ;;  %p1874_p11 = por %p1873_p4, %p1872_p10 }
  0x4a   : > { %p1868_p9 = pneg %p1867_p7 }
  0x4c   : > { %p1875_p12 = pnand %p1874_p11, %p1868_p9 }
  0x4e   : > { %1878 = shalt.err (!%p1875_p12)
}
  0x4f   : > { %1660 = dma.hbm_to_vmem [thread:$0]  (!%p2099_p6), %s2681_s2, 128, %s2103_s29, [#allocation7]  }
  0x50   : > { %s1879_s23 = scalar_lea.hbm %s2683_s4, 144 }
  0x51   : > { %p1880_p13 = scmp.ne.s32.totalorder %s2683_s4, %s1879_s23  ;;  %p1886_p5 = scmp.lt.u32.totalorder %s1879_s23, %s2683_s4 }
  0x53   : > { %p1882_p0 = pnand %p1880_p13, %p2115_p8 }
  0x55   : > { %p1883_p2 = pneg %p1882_p0 }
  0x57   : > { %p1888_p7 = pnand %p1886_p5, %p1883_p2 }
  0x59   : > { %1891 = shalt.err (!%p1888_p7)
}
  0x5a   : > { %s1892_s17 = scalar_lea.vmem %s211_s7, 144  ;;  %s1899_s29 = scalar_lea.vmem %s211_s7, 160 }
  0x5b   : > { %p1893_p9 = scmp.ne.s32.totalorder %s211_s7, %s1892_s17  ;;  %p1900_p11 = scmp.lt.s32.totalorder %s211_s7, %s211_s7 }
  0x5c   : > { %p1901_p12 = scmp.lt.s32.totalorder %s1899_s29, %s1892_s17 }
  0x5d   : > { %p1895_p10 = pnand %p1893_p9, %p2115_p8 }
  0x5e   : > { %p1902_p1 = por %p1901_p12, %p1900_p11 }
  0x5f   : > { %p1896_p4 = pneg %p1895_p10 }
  0x61   : > { %p1903_p3 = pnand %p1902_p1, %p1896_p4 }
  0x63   : > { %1906 = shalt.err (!%p1903_p3)
}
  0x64   : > { %1666 = dma.hbm_to_vmem [thread:$0]  (!%p2099_p6), %s2683_s4, 144, %s211_s7, [#allocation10]  }
  0x65   : > { %s1528_s13 = sadd.s32 4294967294, %s2011_s21   ;;  %s2203_s30 = sadd.s32 1, %s2011_s21  }
  0x66   : > { %s27_s28 = ssub.s32 %s2011_s21, %s2203_s30  ;;  %s30_s6 = sadd.s32 1, %s2007_s20 }
  0x67   : > { %p28_p1 = scmp.eq.s32.totalorder %s27_s28, 0  ;;  %p37_p3 = scmp.ne.s32.totalorder %s2007_s20, %s2003_s19 }
  0x68   : > { %p38_p8 = scmp.eq.s32.totalorder %s2011_s21, 0  ;;  %p43_p13 = scmp.ne.s32.totalorder %s2003_s19, %s1999_s18 }
  0x69   : > { %s2214_s27 = scalar_select %p28_p1, %s2007_s20, %s30_s6  }
  0x6a   : > { %p39_p0 = por %p38_p8, %p37_p3  ;;  %p2691_p2 = scmp.eq.s32.totalorder %s2081_s24, 0 }
  0x6b   : > { %p151_p6 = scmp.eq.s32.totalorder %s2081_s24, 1  ;;  %p157_p7 = scmp.eq.s32.totalorder %s1528_s13, 1 }
  0x6c   : > { %p2218_p5 = por %p2691_p2, %p43_p13  ;;  %p1679_p9 = scmp.lt.s32.totalorder %s2011_s21, 2 }
  0x6d   : > { %s221_s7 = sand.u32 1, %s2007_s20   ;;  %p2225_p10 = por %p151_p6, %p37_p3 }
  0x6e   : > { %p2229_p4 = por %p157_p7, %p43_p13  ;;  %s1629_s11 = smul.u32 40, %s221_s7 }
  0x6f   : > { %s2693_s9 = scalar_select %p2225_p10, 1, 0 }
  0x70   : > { %s2694_s10 = scalar_select %p2229_p4, 1, 0 }
  0x71   : > { %s1630_s23 = smul.u32 640, %s2011_s21  ;;  %p2234_p11 = pnand %p1679_p9, %p39_p0 }
  0x72   : > { %s225_s17 = scalar_lea.vmem [#allocation3], %s1629_s11  ;;  %s222_s22 = scalar_lea.sflag [#allocation4], %s221_s7 }
  0x73   : > { %s2241_s16 = scalar_lea.hbm %s2679_s0, %s1630_s23  ;;  %s233_s29 = sshll.u32 %s225_s17, 4  ;;  %s2243_s29 = int_to_ptr.vmem [resolvable:$true] %s233_s29 }
  0x74   : > { %s1907_s26 = scalar_lea.hbm %s2241_s16, 640  ;;  %p1909_p1 = pneg %p2234_p11 }
  0x75   : > { %p1908_p12 = scmp.ne.s32.totalorder %s2241_s16, %s1907_s26  ;;  %s1912_s6 = scalar_lea.hbm %s2679_s0, 1280 }
  0x76   : > { %p1913_p13 = scmp.lt.u32.totalorder %s2241_s16, %s2679_s0  ;;  %p1914_p0 = scmp.lt.u32.totalorder %s1912_s6, %s1907_s26 }
  0x77   : > { %p1910_p3 = pnand %p1909_p1, %p1908_p12  ;;  %p1916_p6 = scmp.lt.u32.totalorder %s1907_s26, %s2241_s16 }
  0x78   : > { %p1915_p2 = por %p1914_p0, %p1913_p13 }
  0x79   : > { %p1911_p8 = pneg %p1910_p3 }
  0x7a   : > { %p1917_p7 = por %p1916_p6, %p1915_p2 }
  0x7c   : > { %p1918_p9 = pnand %p1917_p7, %p1911_p8 }
  0x7e   : > { %1921 = shalt.err (!%p1918_p9)
}
  0x7f   : > { %s1922_s7 = scalar_lea.vmem %s2243_s29, 640  ;;  %s2017_s11 = smov [#allocation3]  }
  0x80   : > { %p1923_p12 = scmp.ne.s32.totalorder %s2243_s29, %s1922_s7  ;;  %s1927_s15 = sshll.u32 %s2017_s11, 4  ;;  %s1928_s15 = int_to_ptr.vmem [resolvable:$false] %s1927_s15 }
  0x81   : > { %s1929_s17 = scalar_lea.vmem %s1928_s15, 1280  ;;  %p1930_p10 = scmp.lt.s32.totalorder %s2243_s29, %s1928_s15 }
  0x82   : > { %p1925_p3 = pnand %p1923_p12, %p1909_p1  ;;  %p1931_p13 = scmp.lt.s32.totalorder %s1929_s17, %s1922_s7 }
  0x84   : > { %p1926_p4 = pneg %p1925_p3  ;;  %p1932_p0 = por %p1931_p13, %p1930_p10 }
  0x86   : > { %p1933_p2 = pnand %p1932_p0, %p1926_p4 }
  0x88   : > { %1936 = shalt.err (!%p1933_p2)
}
  0x89   : > { %1670 = dma.hbm_to_vmem [thread:$0]  (!%p2234_p11), %s2241_s16, 640, %s2243_s29, %s222_s22  }
  0x8a   : > { %p2696_p8 = scmp.ne.s32.totalorder %s2688_s25, 0 }
  0x8b   : > { %s2273_s26 = sand.u32 (!%p2696_p8), 1, %s2003_s19  }
  0x8c   : > { %242 = sbr.rel (%p2696_p8) target bundleno = 1106 (0x452), region = 40  ;;  %s245_s28 = scalar_lea.sflag (!%p2696_p8), [#allocation4], %s2273_s26 }
  0x8d   : > { %s1631_s13 = smul.u32 (!%p2696_p8), 40, %s2273_s26 }
  0x8f   : > { %s2277_s6 = scalar_lea.vmem (!%p2696_p8), [#allocation3], %s1631_s13 }
  0x93   : > { %1982 = dma.done.wait (%p2218_p5), %s245_s28, 640  }
  0x94   : > { %1984 = vsyncadd (%p2218_p5), %s245_s28, 4294966656  ;;  %p2697_p10 = scmp.eq.s32.totalorder %s2081_s24, 0 }
  0x96   : > { %1986 = dma.done.wait (%p2697_p10), [#allocation7], 192   ;;  %p2698_p4 = pmov %p2697_p10 }
  0x98   : > { %1988 = vsyncadd (%p2698_p4), [#allocation7], 4294967104  ;;  %p2699_p11 = pmov %p2698_p4 }
  0x99   : > { %p2700_p1 = pmov %p2698_p4 }
  0x9a   : > { %1990 = dma.done.wait (%p2699_p11), [#allocation10], 272  }
  0x9b   : > { %1992 = vsyncadd (%p2700_p1), [#allocation10], 4294967024  ;;  %v2292_v0 = vld [vmem:[%s2277_s6] sm:$0xff]  ;;  %v2295_v1 = vld [vmem:[%s2277_s6 + $0x8] sm:$0xff]  ;;  %s2018_s25 = smov 126   ;;  %s2019_s8 = smov 127  }
  0x9c   : > { %v2298_v2 = vld [vmem:[%s2277_s6 + $0x18] sm:$0xff]  ;;  %358 = vrot.lane.b32.xlu1 %v2292_v0, %s2018_s25  ;;  %313 = vrot.lane.b32.xlu0 %v2292_v0, %s2019_s8  ;;  %v2305_v3 = vld [vmem:[%s2277_s6 + $0x10] sm:$0xff]  ;;  %s2020_s12 = smov 94   ;;  %s2021_s16 = smov 93   ;;  %v2025_v4 = vmov 0   ;;  %vm301_vm0 = vcmask 519168  }
  0x9d   : > { %s2022_s29 = smov 92   ;;  %s2023_s22 = smov 60   ;;  %976 = vmatprep.mubr.bf16.mxu0 %v2025_v4  ;;  %1017 = vmatprep.mubr.bf16.mxu1 %v2025_v4  ;;  %v296_v5 = vld [vmem:[%s2277_s6 + $0x20] sm:$0xf]  ;;  %vm328_vm1 = vcmask 1043456   ;;  %vm374_vm2 = vcmask 1031168  }
  0x9e   : > { %s2024_s23 = smov 59   ;;  %1732 = vset.pattern.permute.xlu0 %v2025_v4  ;;  %1733 = vset.pattern.permute.xlu1 %v2025_v4  ;;  %s2026_s14 = smov 58   ;;  %302 = vst.msk [vmem:[#allocation2 + $0x20] sm:$0xf] %vm301_vm0, %v296_v5  ;;  %v352_v6 = vld [vmem:[%s2277_s6 + $0x20] sm:$0xf] }
  0x9f   : > { %v307_v7 = vld [vmem:[%s2277_s6 + $0x20] sm:$0xf]  ;;  %vm330_vm3 = vcmask 1039360   ;;  %vm418_vm4 = vcmask 769024   ;;  %vm462_vm5 = vcmask 760832   ;;  %vm506_vm6 = vcmask 752640  }
  0xa0   : > { %360 = vrot.lane.b32.xlu1 %v2295_v1, %s2018_s25  ;;  %315 = vrot.lane.b32.xlu0 %v2295_v1, %s2019_s8  ;;  %v440_v8 = vld [vmem:[%s2277_s6 + $0x20] sm:$0xf]  ;;  %vm550_vm7 = vcmask 490496   ;;  %vm595_vm8 = vcmask 482304   ;;  %vm640_vm9 = vcmask 474112   ;;  %vm912_vm10 = vcmask 588800  }
  0xa1   : > { %v396_v9 = vld [vmem:[%s2277_s6 + $0x20] sm:$0xf]  ;;  %vm2028_vm11 = vmmov 0   ;;  %vm1213_vm12 = vcmask 523264   ;;  %s1632_s7 = smul.u32 36, %s2273_s26  ;;  %p2701_p6 = scmp.ne.s32.totalorder %s2693_s9, 0 }
  0xa2   : > { %v528_v10 = vld [vmem:[%s2277_s6 + $0x20] sm:$0xff]  ;;  %s1633_s15 = smul.u32 576, %s2081_s24  ;;  %s1406_s24 = scalar_lea.sflag [#allocation5], %s2273_s26 }
  0xa3   : > { %v484_v11 = vld [vmem:[%s2277_s6 + $0x20] sm:$0xf]  ;;  %s290_s11 = scalar_lea.vmem [#allocation12], %s1632_s7 }
  0xa4   : > { %404 = vrot.lane.b32.xlu1 %v2295_v1, %s2020_s12  ;;  %402 = vrot.lane.b32.xlu0 %v2292_v0, %s2020_s12  ;;  %s1420_s17 = sshll.u32 %s290_s11, 4  ;;  %s2634_s6 = scalar_lea.hbm %s2684_s5, %s1633_s15  ;;  %s2636_s17 = int_to_ptr.vmem [resolvable:$true] %s1420_s17 }
  0xa8   : > { %448 = vrot.lane.b32.xlu1 %v2295_v1, %s2021_s16  ;;  %446 = vrot.lane.b32.xlu0 %v2292_v0, %s2021_s16 }
  0xac   : > { %492 = vrot.lane.b32.xlu1 %v2295_v1, %s2022_s29  ;;  %490 = vrot.lane.b32.xlu0 %v2292_v0, %s2022_s29 }
  0xb0   : > { %536 = vrot.lane.b32.xlu1 %v2295_v1, %s2023_s22  ;;  %534 = vrot.lane.b32.xlu0 %v2292_v0, %s2023_s22 }
  0xb4   : > { %581 = vrot.lane.b32.xlu1 %v2295_v1, %s2024_s23  ;;  %579 = vrot.lane.b32.xlu0 %v2292_v0, %s2024_s23 }
  0xb8   : > { %626 = vrot.lane.b32.xlu1 %v2295_v1, %s2026_s14  ;;  %624 = vrot.lane.b32.xlu0 %v2292_v0, %s2026_s14 }
  0xbc   : > { %319 = vrot.lane.b32.xlu1 %v2298_v2, %s2019_s8  ;;  %317 = vrot.lane.b32.xlu0 %v2305_v3, %s2019_s8 }
  0xc0   : > { %406 = vrot.lane.b32.xlu1 %v2305_v3, %s2020_s12  ;;  %362 = vrot.lane.b32.xlu0 %v2305_v3, %s2018_s25 }
  0xc4   : > { %408 = vrot.lane.b32.xlu1 %v2298_v2, %s2020_s12  ;;  %364 = vrot.lane.b32.xlu0 %v2298_v2, %s2018_s25 }
  0xc8   : > { %494 = vrot.lane.b32.xlu1 %v2305_v3, %s2022_s29  ;;  %450 = vrot.lane.b32.xlu0 %v2305_v3, %s2021_s16 }
  0xcc   : > { %496 = vrot.lane.b32.xlu1 %v2298_v2, %s2022_s29  ;;  %452 = vrot.lane.b32.xlu0 %v2298_v2, %s2021_s16 }
  0xd0   : > { %583 = vrot.lane.b32.xlu1 %v2305_v3, %s2024_s23  ;;  %538 = vrot.lane.b32.xlu0 %v2305_v3, %s2023_s22 }
  0xd4   : > { %585 = vrot.lane.b32.xlu1 %v2298_v2, %s2024_s23  ;;  %540 = vrot.lane.b32.xlu0 %v2298_v2, %s2023_s22 }
  0xd8   : > { %630 = vrot.lane.b32.xlu1 %v2298_v2, %s2026_s14  ;;  %628 = vrot.lane.b32.xlu0 %v2305_v3, %s2026_s14 }
  0xdc   : > { %366 = vrot.lane.b32.xlu1 %v352_v6, %s2018_s25  ;;  %321 = vrot.lane.b32.xlu0 %v307_v7, %s2019_s8  ;;  %s1937_s25 = scalar_lea.vmem %s2636_s17, 576  ;;  %s2029_s8 = smov [#allocation12]  }
  0xdd   : > { %p1938_p5 = scmp.ne.s32.totalorder %s2636_s17, %s1937_s25 }
  0xdf   : > { %p1939_p7 = pnand %p1938_p5, %p2701_p6 }
  0xe0   : > { %454 = vrot.lane.b32.xlu1 %v440_v8, %s2021_s16  ;;  %410 = vrot.lane.b32.xlu0 %v396_v9, %s2020_s12  ;;  %s1941_s12 = sshll.u32 %s2029_s8, 4  ;;  %s1942_s12 = int_to_ptr.vmem [resolvable:$false] %s1941_s12 }
  0xe1   : > { %p1940_p9 = pneg %p1939_p7  ;;  %s1943_s16 = scalar_lea.vmem %s1942_s12, 1152 }
  0xe2   : > { %p1944_p12 = scmp.lt.s32.totalorder %s2636_s17, %s1942_s12  ;;  %p1945_p3 = scmp.lt.s32.totalorder %s1943_s16, %s1937_s25 }
  0xe4   : > { %542 = vrot.lane.b32.xlu1 %v528_v10, %s2023_s22  ;;  %498 = vrot.lane.b32.xlu0 %v484_v11, %s2022_s29  ;;  %p1946_p13 = por %p1945_p3, %p1944_p12 }
  0xe6   : > { %p1947_p0 = pnand %p1946_p13, %p1940_p9 }
  0xe8   : > { %632 = vrot.lane.b32.xlu1 %v528_v10, %s2026_s14  ;;  %587 = vrot.lane.b32.xlu0 %v528_v10, %s2024_s23 }
 0x10e   : > { %v359_v12 = vpop.permute.xlu1 %358  ;;  %v314_v13 = vpop.permute.xlu0 %313 }
 0x10f   : > { %v368_v14 = vrot.slane %v359_v12, 4  ;;  %v323_v17 = vrot.slane %v314_v13, 4 }
 0x112   : > { %v2387_v15 = vpop.permute.xlu1 %360  ;;  %v2389_v16 = vpop.permute.xlu0 %315 }
 0x113   : > { %v369_v18 = vrot.slane %v2387_v15, 4  ;;  %v324_v19 = vrot.slane %v2389_v16, 4 }
 0x115   : > { %v373_v20 = vsel %vm328_vm1, %v368_v14, %v369_v18  ;;  %v329_v21 = vsel %vm328_vm1, %v323_v17, %v324_v19 }
 0x116   : > { %v375_v22 = vsel %vm374_vm2, %v359_v12, %v373_v20  ;;  %v331_v23 = vsel %vm330_vm3, %v314_v13, %v329_v21  ;;  %v2401_v24 = vpop.permute.xlu1 %404  ;;  %v403_v25 = vpop.permute.xlu0 %402 }
 0x117   : > { %v413_v26 = vrot.slane %v2401_v24, 4  ;;  %v412_v27 = vrot.slane %v403_v25, 4  ;;  %v1542_v28 = vcombine.high %v2292_v0, %v331_v23  ;;  %v1541_v29 = vcombine.low %v2292_v0, %v331_v23 }
 0x119   : > { %v417_v30 = vsel %vm328_vm1, %v412_v27, %v413_v26  ;;  %944 = vmatprep.subr.bf16.mxu0 %v1542_v28  ;;  %v2459_v27 = vld [vmem:[#allocation6] sm:$0xf] }
 0x11a   : > { %v419_v31 = vsel %vm418_vm4, %v403_v25, %v417_v30  ;;  %v2410_v32 = vpop.permute.xlu1 %448  ;;  %v447_v33 = vpop.permute.xlu0 %446  ;;  %945 = vmatpush1.bf16.msra.mxu0 %v1541_v29 }
 0x11b   : > { %v457_v34 = vrot.slane %v2410_v32, 4  ;;  %v456_v35 = vrot.slane %v447_v33, 4  ;;  %v1551_v36 = vcombine.high %v375_v22, %v419_v31  ;;  %v1550_v37 = vcombine.low %v375_v22, %v419_v31 }
 0x11d   : > { %v461_v38 = vsel %vm328_vm1, %v456_v35, %v457_v34  ;;  %946 = vmatprep.subr.bf16.mxu0 %v1551_v36 }
 0x11e   : > { %v463_v39 = vsel %vm462_vm5, %v447_v33, %v461_v38  ;;  %v2417_v40 = vpop.permute.xlu1 %492  ;;  %v491_v41 = vpop.permute.xlu0 %490  ;;  %947 = vmatpush1.bf16.msra.mxu0 %v1550_v37 }
 0x11f   : > { %v501_v42 = vrot.slane %v2417_v40, 4  ;;  %v500_v43 = vrot.slane %v491_v41, 4 }
 0x121   : > { %v505_v44 = vsel %vm328_vm1, %v500_v43, %v501_v42 }
 0x122   : > { %v507_v45 = vsel %vm506_vm6, %v491_v41, %v505_v44  ;;  %v2424_v46 = vpop.permute.xlu1 %536  ;;  %v535_v47 = vpop.permute.xlu0 %534 }
 0x123   : > { %v545_v48 = vrot.slane %v2424_v46, 4  ;;  %v544_v49 = vrot.slane %v535_v47, 4  ;;  %v1560_v50 = vcombine.high %v463_v39, %v507_v45  ;;  %v1559_v51 = vcombine.low %v463_v39, %v507_v45 }
 0x125   : > { %v549_v52 = vsel %vm328_vm1, %v544_v49, %v545_v48  ;;  %948 = vmatprep.subr.bf16.mxu0 %v1560_v50 }
 0x126   : > { %v551_v53 = vsel %vm550_vm7, %v535_v47, %v549_v52  ;;  %v2431_v54 = vpop.permute.xlu1 %581  ;;  %v580_v55 = vpop.permute.xlu0 %579  ;;  %949 = vmatpush1.bf16.msra.mxu0 %v1559_v51 }
 0x127   : > { %v590_v56 = vrot.slane %v2431_v54, 4  ;;  %v589_v57 = vrot.slane %v580_v55, 4 }
 0x129   : > { %v594_v58 = vsel %vm328_vm1, %v589_v57, %v590_v56 }
 0x12a   : > { %v596_v59 = vsel %vm595_vm8, %v580_v55, %v594_v58  ;;  %v2438_v60 = vpop.permute.xlu1 %626  ;;  %v625_v61 = vpop.permute.xlu0 %624 }
 0x12b   : > { %v635_v62 = vrot.slane %v2438_v60, 4  ;;  %v634_v63 = vrot.slane %v625_v61, 4  ;;  %v1569_v0 = vcombine.high %v551_v53, %v596_v59  ;;  %v1568_v5 = vcombine.low %v551_v53, %v596_v59 }
 0x12d   : > { %v639_v6 = vsel %vm328_vm1, %v634_v63, %v635_v62  ;;  %950 = vmatprep.subr.bf16.mxu0 %v1569_v0 }
 0x12e   : > { %v641_v7 = vsel %vm640_vm9, %v625_v61, %v639_v6  ;;  %v2445_v8 = vpop.permute.xlu1 %319  ;;  %v318_v9 = vpop.permute.xlu0 %317  ;;  %951 = vmatpush1.bf16.msra.mxu0 %v1568_v5 }
 0x12f   : > { %v326_v10 = vrot.slane %v2445_v8, 4  ;;  %v325_v11 = vrot.slane %v318_v9, 4  ;;  %v1578_v12 = vcombine.high %v641_v7, %v641_v7  ;;  %v1577_v13 = vcombine.low %v641_v7, %v641_v7 }
 0x131   : > { %v332_v14 = vsel %vm328_vm1, %v324_v19, %v325_v11  ;;  %v334_v17 = vsel %vm328_vm1, %v325_v11, %v326_v10  ;;  %1586 = vmatprep.subr.msk.bf16.mxu0 %vm328_vm1, %v1578_v12  ;;  %v918_v20 = vsel %vm328_vm1, %v1577_v13, 0 }
 0x132   : > { %v333_v21 = vsel %vm330_vm3, %v2389_v16, %v332_v14  ;;  %v335_v22 = vsel %vm330_vm3, %v318_v9, %v334_v17  ;;  %v407_v23 = vpop.permute.xlu1 %406  ;;  %v363_v25 = vpop.permute.xlu0 %362  ;;  %953 = vmatpush1.bf16.msra.mxu0 %v918_v20 }
 0x133   : > { %v414_v19 = vrot.slane %v407_v23, 4  ;;  %v370_v28 = vrot.slane %v363_v25, 4  ;;  %v1544_v29 = vcombine.high %v2295_v1, %v333_v21  ;;  %v1545_v30 = vcombine.low %v2305_v3, %v335_v22 }
 0x134   : > { %v1546_v31 = vcombine.high %v2305_v3, %v335_v22  ;;  %v1543_v33 = vcombine.low %v2295_v1, %v333_v21 }
 0x135   : > { %v420_v16 = vsel %vm328_vm1, %v413_v26, %v414_v19  ;;  %v376_v35 = vsel %vm328_vm1, %v369_v18, %v370_v28  ;;  %985 = vmatprep.subr.bf16.mxu1 %v1544_v29  ;;  %1587 = vmatmul.mubr.msk.bf16.vlgmr.msra.gmra.mrb[0].mxu0 %vm912_vm10, %v2459_v27 }
 0x136   : > { %v421_v36 = vsel %vm418_vm4, %v2401_v24, %v420_v16  ;;  %v377_v3 = vsel %vm374_vm2, %v2387_v15, %v376_v35  ;;  %v2477_v37 = vpop.permute.xlu1 %408  ;;  %v2479_v1 = vpop.permute.xlu0 %364  ;;  %1026 = vmatprep.subr.bf16.mxu0 %v1546_v31  ;;  %986 = vmatpush1.bf16.msra.mxu1 %v1543_v33 }
 0x137   : > { %v415_v26 = vrot.slane %v2477_v37, 4  ;;  %v371_v18 = vrot.slane %v2479_v1, 4  ;;  %1027 = vmatpush1.bf16.msra.mxu0 %v1545_v30  ;;  %v1553_v38 = vcombine.high %v377_v3, %v421_v36  ;;  %v1552_v39 = vcombine.low %v377_v3, %v421_v36  ;;  %1058 = vmatprep.mubr.bf16.mxu0 %v2025_v4 }
 0x139   : > { %v422_v24 = vsel %vm328_vm1, %v414_v19, %v415_v26  ;;  %v378_v15 = vsel %vm328_vm1, %v370_v28, %v371_v18  ;;  %987 = vmatprep.subr.bf16.mxu1 %v1553_v38 }
 0x13a   : > { %v423_v41 = vsel %vm418_vm4, %v407_v23, %v422_v24  ;;  %v379_v43 = vsel %vm374_vm2, %v363_v25, %v378_v15  ;;  %v495_v44 = vpop.permute.xlu1 %494  ;;  %v451_v45 = vpop.permute.xlu0 %450  ;;  %988 = vmatpush1.bf16.msra.mxu1 %v1552_v39 }
 0x13b   : > { %v502_v47 = vrot.slane %v495_v44, 4  ;;  %v458_v49 = vrot.slane %v451_v45, 4  ;;  %v1554_v50 = vcombine.low %v379_v43, %v423_v41  ;;  %v1555_v51 = vcombine.high %v379_v43, %v423_v41 }
 0x13d   : > { %v508_v52 = vsel %vm328_vm1, %v501_v42, %v502_v47  ;;  %v464_v53 = vsel %vm328_vm1, %v457_v34, %v458_v49  ;;  %1028 = vmatprep.subr.bf16.mxu0 %v1555_v51 }
 0x13e   : > { %v509_v55 = vsel %vm506_vm6, %v2417_v40, %v508_v52  ;;  %v465_v57 = vsel %vm462_vm5, %v2410_v32, %v464_v53  ;;  %v2502_v58 = vpop.permute.xlu1 %496  ;;  %v2504_v59 = vpop.permute.xlu0 %452  ;;  %1029 = vmatpush1.bf16.msra.mxu0 %v1554_v50 }
 0x13f   : > { %v503_v61 = vrot.slane %v2502_v58, 4  ;;  %v459_v42 = vrot.slane %v2504_v59, 4  ;;  %v1562_v63 = vcombine.high %v465_v57, %v509_v55  ;;  %v1561_v0 = vcombine.low %v465_v57, %v509_v55 }
 0x141   : > { %v510_v34 = vsel %vm328_vm1, %v502_v47, %v503_v61  ;;  %v466_v40 = vsel %vm328_vm1, %v458_v49, %v459_v42  ;;  %989 = vmatprep.subr.bf16.mxu1 %v1562_v63 }
 0x142   : > { %v511_v32 = vsel %vm506_vm6, %v495_v44, %v510_v34  ;;  %v467_v5 = vsel %vm462_vm5, %v451_v45, %v466_v40  ;;  %v584_v6 = vpop.permute.xlu1 %583  ;;  %v539_v7 = vpop.permute.xlu0 %538  ;;  %990 = vmatpush1.bf16.msra.mxu1 %v1561_v0  ;;  %v2027_v34 = vmov 0.0  }
 0x143   : > { %v591_v9 = vrot.slane %v584_v6, 4  ;;  %v546_v11 = vrot.slane %v539_v7, 4  ;;  %v1563_v12 = vcombine.low %v467_v5, %v511_v32  ;;  %v1564_v13 = vcombine.high %v467_v5, %v511_v32 }
 0x145   : > { %v597_v14 = vsel %vm328_vm1, %v590_v56, %v591_v9  ;;  %v552_v17 = vsel %vm328_vm1, %v545_v48, %v546_v11  ;;  %1030 = vmatprep.subr.bf16.mxu0 %v1564_v13 }
 0x146   : > { %v598_v20 = vsel %vm595_vm8, %v2431_v54, %v597_v14  ;;  %v553_v21 = vsel %vm550_vm7, %v2424_v46, %v552_v17  ;;  %v2526_v22 = vpop.permute.xlu1 %585  ;;  %v2528_v23 = vpop.permute.xlu0 %540  ;;  %1031 = vmatpush1.bf16.msra.mxu0 %v1563_v12 }
 0x147   : > { %v592_v25 = vrot.slane %v2526_v22, 4  ;;  %v547_v56 = vrot.slane %v2528_v23, 4  ;;  %v1571_v19 = vcombine.high %v553_v21, %v598_v20  ;;  %v1570_v28 = vcombine.low %v553_v21, %v598_v20 }
 0x149   : > { %v599_v48 = vsel %vm328_vm1, %v591_v9, %v592_v25  ;;  %v554_v54 = vsel %vm328_vm1, %v546_v11, %v547_v56  ;;  %991 = vmatprep.subr.bf16.mxu1 %v1571_v19 }
 0x14a   : > { %v600_v46 = vsel %vm595_vm8, %v584_v6, %v599_v48  ;;  %v555_v29 = vsel %vm550_vm7, %v539_v7, %v554_v54  ;;  %v2540_v30 = vpop.permute.xlu1 %630  ;;  %v629_v31 = vpop.permute.xlu0 %628  ;;  %992 = vmatpush1.bf16.msra.mxu1 %v1570_v28 }
 0x14b   : > { %v637_v33 = vrot.slane %v2540_v30, 4  ;;  %v636_v16 = vrot.slane %v629_v31, 4  ;;  %v1572_v35 = vcombine.low %v555_v29, %v600_v46  ;;  %v1573_v36 = vcombine.high %v555_v29, %v600_v46 }
 0x14d   : > { %v642_v3 = vsel %vm328_vm1, %v635_v62, %v636_v16  ;;  %v644_v38 = vsel %vm328_vm1, %v636_v16, %v637_v33  ;;  %1032 = vmatprep.subr.bf16.mxu0 %v1573_v36 }
 0x14e   : > { %v643_v39 = vsel %vm640_vm9, %v2438_v60, %v642_v3  ;;  %v645_v24 = vsel %vm640_vm9, %v629_v31, %v644_v38  ;;  %v367_v15 = vpop.permute.xlu1 %366  ;;  %v322_v41 = vpop.permute.xlu0 %321  ;;  %1033 = vmatpush1.bf16.msra.mxu0 %v1572_v35  ;;  %v1152_v3 = vlaneseq }
 0x14f   : > { %v372_v43 = vrot.slane %v367_v15, 4  ;;  %391 = vst.msk [vmem:[#allocation2 + $0x68] sm:$0xf] %vm301_vm0, %v367_v15  ;;  %v327_v44 = vrot.slane %v322_v41, 4  ;;  %347 = vst.msk [vmem:[#allocation2 + $0x44] sm:$0xf] %vm301_vm0, %v322_v41  ;;  %v1580_v62 = vcombine.high %v643_v39, %v643_v39  ;;  %v1582_v45 = vcombine.high %v645_v24, %v645_v24 }
 0x150   : > { %v1579_v47 = vcombine.low %v643_v39, %v643_v39  ;;  %v1581_v49 = vcombine.low %v645_v24, %v645_v24  ;;  %v1153_v38 = vshrl.u32 %v1152_v3, 7  ;;  %v1148_v24 = vld [vmem:[#allocation11] sm:$0xff] }
 0x151   : > { %v380_v50 = vsel %vm328_vm1, %v371_v18, %v372_v43  ;;  %v336_v60 = vsel %vm328_vm1, %v326_v10, %v327_v44  ;;  %1588 = vmatprep.subr.msk.bf16.mxu1 %vm328_vm1, %v1580_v62  ;;  %1590 = vmatprep.subr.msk.bf16.mxu0 %vm328_vm1, %v1582_v45 }
 0x152   : > { %v381_v51 = vsel %vm374_vm2, %v2479_v1, %v380_v50  ;;  %v337_v52 = vsel %vm330_vm3, %v2445_v8, %v336_v60  ;;  %v455_v53 = vpop.permute.xlu1 %454  ;;  %v411_v55 = vpop.permute.xlu0 %410  ;;  %v924_v57 = vsel %vm328_vm1, %v1579_v47, 0  ;;  %v930_v18 = vsel %vm328_vm1, %v1581_v49, 0 }
 0x153   : > { %v460_v63 = vrot.slane %v455_v53, 4  ;;  %479 = vst.msk [vmem:[#allocation2 + $0xb0] sm:$0xf] %vm301_vm0, %v455_v53  ;;  %v416_v10 = vrot.slane %v411_v55, 4  ;;  %435 = vst.msk [vmem:[#allocation2 + $0x8c] sm:$0xf] %vm301_vm0, %v411_v55  ;;  %994 = vmatpush1.bf16.msra.mxu1 %v924_v57  ;;  %1035 = vmatpush1.bf16.msra.mxu0 %v930_v18  ;;  %v1547_v0 = vcombine.low %v2298_v2, %v337_v52 }
 0x154   : > { %v1548_v1 = vcombine.high %v2298_v2, %v337_v52  ;;  %1615 = vmatprep.subr.bf16.mxu0 %v2027_v34  ;;  %v1154_v39 = vsub.s32 0, %v1153_v38  ;;  %v1158_v15 = vsub.s32 1, %v1153_v38  ;;  %v1166_v52 = vsub.s32 3, %v1153_v38 }
 0x155   : > { %v468_v8 = vsel %vm328_vm1, %v459_v42, %v460_v63  ;;  %v424_v40 = vsel %vm328_vm1, %v415_v26, %v416_v10  ;;  %v1170_v53 = vsub.s32 4, %v1153_v38  ;;  %v1174_v57 = vsub.s32 5, %v1153_v38 }
 0x156   : > { %1067 = vmatprep.subr.bf16.mxu1 %v1548_v1  ;;  %v469_v32 = vsel %vm462_vm5, %v2504_v59, %v468_v8  ;;  %v425_v5 = vsel %vm418_vm4, %v2477_v37, %v424_v40  ;;  %v543_v6 = vpop.permute.xlu1 %542  ;;  %v499_v2 = vpop.permute.xlu0 %498  ;;  %1589 = vmatmul.mubr.msk.bf16.vlgmr.msra.gmra.mrb[0].mxu1 %vm912_vm10, %v2459_v27  ;;  %v1734_v42 = vld [vmem:[#allocation2 + $0x20] ss:$36 sps:$4 sm:$0xff]   ;;  %v1155_v41 = vrot.slane %v1148_v24, %v1154_v39 }
 0x157   : > { %1591 = vmatmul.mubr.msk.bf16.vlgmr.msra.gmra.mrb[4].mxu0 %vm912_vm10, %v2459_v27  ;;  %v548_v7 = vrot.slane %v543_v6, 4  ;;  %v504_v9 = vrot.slane %v499_v2, 4  ;;  %523 = vst.msk [vmem:[#allocation2 + $0xd4] sm:$0xf] %vm301_vm0, %v499_v2  ;;  %1068 = vmatpush1.bf16.msra.mxu1 %v1547_v0  ;;  %v1556_v26 = vcombine.low %v381_v51, %v425_v5  ;;  %v1557_v11 = vcombine.high %v381_v51, %v425_v5 }
 0x158   : > { %1099 = vmatprep.mubr.bf16.mxu1 %v2025_v4  ;;  %1616 = vmatpush3.bf16.msra.mxu0 %v1734_v42  ;;  %v1159_v43 = vrot.slane %v1148_v24, %v1158_v15  ;;  %v1162_v51 = vsub.s32 2, %v1153_v38  ;;  %v1171_v18 = vrot.slane %v1148_v24, %v1170_v53  ;;  %v1175_v8 = vrot.slane %v1148_v24, %v1174_v57 }
 0x159   : > { %1625 = vmatprep.mubr.msk.bf16.mxu0 %vm2028_vm11, %v2027_v34  ;;  %v556_v37 = vsel %vm328_vm1, %v547_v56, %v548_v7  ;;  %v558_v59 = vsel %vm550_vm7, %v543_v6, %v548_v7  ;;  %v512_v12 = vsel %vm328_vm1, %v503_v61, %v504_v9  ;;  %1069 = vmatprep.subr.bf16.mxu1 %v1557_v11 }
 0x15a   : > { %1617 = vmatprep.subr.bf16.mxu0 %v2027_v34  ;;  %v557_v4 = vsel %vm550_vm7, %v2528_v23, %v556_v37  ;;  %568 = vst.msk [vmem:[#allocation2 + $0xf8] sm:$0xf] %vm301_vm0, %v558_v59  ;;  %v513_v13 = vsel %vm506_vm6, %v2502_v58, %v512_v12  ;;  %v633_v14 = vpop.permute.xlu1 %632  ;;  %v588_v17 = vpop.permute.xlu0 %587  ;;  %v1735_v20 = vld [vmem:[#allocation2 + $0x68] ss:$36 sps:$4 sm:$0xff]   ;;  %v1163_v55 = vrot.slane %v1148_v24, %v1162_v51  ;;  %v1178_v59 = vsub.s32 6, %v1153_v38 }
 0x15b   : > { %v638_v21 = vrot.slane %v633_v14, 4  ;;  %v593_v56 = vrot.slane %v588_v17, 4  ;;  %1070 = vmatpush1.bf16.msra.mxu1 %v1556_v26  ;;  %v1565_v19 = vcombine.low %v469_v32, %v513_v13  ;;  %v1566_v28 = vcombine.high %v469_v32, %v513_v13 }
 0x15c   : > { %1618 = vmatpush3.bf16.msra.mxu0 %v1735_v20  ;;  %v1182_v12 = vsub.s32 7, %v1153_v38 }
 0x15d   : > { %v646_v61 = vsel %vm328_vm1, %v637_v33, %v638_v21  ;;  %v648_v23 = vsel %vm640_vm9, %v633_v14, %v638_v21  ;;  %v601_v48 = vsel %vm328_vm1, %v592_v25, %v593_v56  ;;  %v603_v58 = vsel %vm595_vm8, %v588_v17, %v593_v56  ;;  %1071 = vmatprep.subr.bf16.mxu1 %v1566_v28  ;;  %v1595_v21 = vld [vmem:[#allocation11 + $0x8] ss:$0 sm:$0xff] }
 0x15e   : > { %v647_v54 = vsel %vm640_vm9, %v2540_v30, %v646_v61  ;;  %658 = vst.msk [vmem:[#allocation2 + $0x140] sm:$0xf] %vm301_vm0, %v648_v23  ;;  %v602_v46 = vsel %vm595_vm8, %v2526_v22, %v601_v48  ;;  %613 = vst.msk [vmem:[#allocation2 + $0x11c] sm:$0xf] %vm301_vm0, %v603_v58  ;;  %1619 = vmatprep.subr.bf16.mxu0 %v2027_v34  ;;  %v1736_v29 = vld [vmem:[#allocation2 + $0xb0] ss:$36 sps:$4 sm:$0xff]   ;;  %v1183_v13 = vrot.slane %v1148_v24, %v1182_v12 }
 0x15f   : > { %1072 = vmatpush1.bf16.msra.mxu1 %v1565_v19  ;;  %v1574_v31 = vcombine.low %v557_v4, %v602_v46  ;;  %v1575_v33 = vcombine.high %v557_v4, %v602_v46  ;;  %v1584_v25 = vcombine.high %v647_v54, %v647_v54  ;;  %v1583_v16 = vcombine.low %v647_v54, %v647_v54 }
 0x160   : > { %1620 = vmatpush3.bf16.msra.mxu0 %v1736_v29  ;;  %v1179_v4 = vrot.slane %v1148_v24, %v1178_v59 }
 0x161   : > { %1073 = vmatprep.subr.bf16.mxu1 %v1575_v33  ;;  %1621 = vmatprep.subr.bf16.mxu0 %v2027_v34  ;;  %v936_v22 = vsel %vm328_vm1, %v1583_v16, 0 }
 0x163   : > { %1074 = vmatpush1.bf16.msra.mxu1 %v1574_v31 }
 0x164   : > { %1592 = vmatprep.subr.msk.bf16.mxu1 %vm328_vm1, %v1584_v25 }
 0x165   : > { %v1737_v30 = vld [vmem:[#allocation2 + $0xf8] ss:$36 sps:$4 sm:$0xff]   ;;  %v1738_v35 = vld [vmem:[#allocation2 + $0x140] ss:$0 sps:$4 sm:$0xff]  }
 0x166   : > { %1622 = vmatpush3.bf16.msra.mxu0 %v1737_v30  ;;  %v942_v36 = vsel %vm328_vm1, %v1738_v35, 0 }
 0x167   : > { %1076 = vmatpush1.bf16.msra.mxu1 %v936_v22  ;;  %1623 = vmatprep.subr.bf16.mxu0 %v2027_v34 }
 0x16a   : > { %1593 = vmatmul.mubr.msk.bf16.vlgmr.msra.gmra.mrb[4].mxu1 %vm912_vm10, %v2459_v27  ;;  %1624 = vmatpush3.bf16.msra.mxu0 %v942_v36 }
 0x16d   : > { %1626 = vmatmul.mubr.msk.bf16.vlgmr.msra.gmra.mrb[8].mxu0 %vm912_vm10, %v2459_v27  ;;  %v1167_v27 = vrot.slane %v1148_v24, %v1166_v52 }
 0x208   : > { %v978_v44 = vpop.f32.mrb[0].mxu0 }
 0x209   : > { %v1197_v62 = vmul.f32 %v1155_v41, %v978_v44  ;;  %v980_v45 = vpop.f32.mrb[1].mxu0 }
 0x20a   : > { %v1198_v47 = vmul.f32 %v1159_v43, %v980_v45  ;;  %v982_v49 = vpop.f32.mrb[2].mxu0 }
 0x20b   : > { %v983_v50 = vpop.f32.mrb[3].mxu0 }
 0x20c   : > { %v1206_v60 = vadd.f32 %v1198_v47, %v1197_v62 }
 0x229   : > { %v1019_v63 = vpop.f32.mrb[0].mxu1 }
 0x22a   : > { %v1060_v10 = vpop.f32.mrb[4].mxu0  ;;  %v1199_v0 = vmul.f32 %v1163_v55, %v1019_v63  ;;  %v1021_v1 = vpop.f32.mrb[1].mxu1 }
 0x22b   : > { %v1062_v34 = vpop.f32.mrb[5].mxu0  ;;  %v1200_v40 = vmul.f32 %v1167_v27, %v1021_v1  ;;  %v1023_v32 = vpop.f32.mrb[2].mxu1  ;;  %v1201_v2 = vmul.f32 %v1171_v18, %v1060_v10 }
 0x22c   : > { %v1064_v5 = vpop.f32.mrb[6].mxu0  ;;  %v1207_v6 = vadd.f32 %v1206_v60, %v1199_v0  ;;  %v1024_v42 = vpop.f32.mrb[3].mxu1  ;;  %v1202_v26 = vmul.f32 %v1175_v8, %v1062_v34 }
 0x22d   : > { %v1065_v7 = vpop.f32.mrb[7].mxu0 }
 0x22e   : > { %v1208_v9 = vadd.f32 %v1207_v6, %v1200_v40 }
 0x230   : > { %v1209_v11 = vadd.f32 %v1208_v9, %v1201_v2 }
 0x232   : > { %v1210_v37 = vadd.f32 %v1209_v11, %v1202_v26  ;;  %v1258_v11 = vld [vmem:[#allocation8] sm:$0xff] }
 0x23d   : > { %v1101_v14 = vpop.f32.mrb[4].mxu1 }
 0x23e   : > { %v1203_v17 = vmul.f32 %v1179_v4, %v1101_v14  ;;  %v1103_v20 = vpop.f32.mrb[5].mxu1 }
 0x23f   : > { %v1204_v56 = vmul.f32 %v1183_v13, %v1103_v20  ;;  %v1105_v19 = vpop.f32.mrb[6].mxu1 }
 0x240   : > { %v1211_v28 = vadd.f32 %v1210_v37, %v1203_v17  ;;  %v1106_v61 = vpop.f32.mrb[7].mxu1  ;;  %v1142_v23 = vpop.f32.mrb[8].mxu0 }
 0x241   : > { %v1205_v48 = vmul.f32 %v1595_v21, %v1142_v23  ;;  %v1627_v58 = vpop.f32.mrb[9].mxu0 }
 0x242   : > { %v1212_v54 = vadd.f32 %v1211_v28, %v1204_v56  ;;  %v1145_v46 = vpop.f32.mrb[10].mxu0 }
 0x243   : > { %v1628_v29 = vpop.f32.mrb[11].mxu0  ;;  %v1214_v31 = vsel %vm1213_vm12, %v1205_v48, 0.0 }
 0x244   : > { %v1215_v33 = vadd.f32 %v1214_v31, %v1212_v54 }
 0x246   : > { %1216 = vadd.xlane.f32.xlu0 %v1215_v33 }
 0x2d3   : > { %v1217_v25 = vpop.xlane.xlu0 %1216 }
 0x2d4   : > { %v1218_v16 = vmul.f32 0.0009765625, %v1217_v25 }
 0x2d6   : > { %v1219_v30 = vsub.f32 %v978_v44, %v1218_v16  ;;  %v1220_v22 = vsub.f32 %v980_v45, %v1218_v16  ;;  %v1221_v35 = vsub.f32 %v1019_v63, %v1218_v16  ;;  %v1222_v36 = vsub.f32 %v1021_v1, %v1218_v16 }
 0x2d7   : > { %v1223_v3 = vsub.f32 %v1060_v10, %v1218_v16  ;;  %v1224_v15 = vsub.f32 %v1062_v34, %v1218_v16  ;;  %v1225_v50 = vsub.f32 %v1101_v14, %v1218_v16  ;;  %v1227_v53 = vsub.f32 %v1142_v23, %v1218_v16 }
 0x2d8   : > { %v1228_v38 = vmul.f32 %v1219_v30, %v1155_v41  ;;  %v1229_v39 = vmul.f32 %v1220_v22, %v1159_v43  ;;  %v1230_v24 = vmul.f32 %v1221_v35, %v1163_v55  ;;  %v1231_v62 = vmul.f32 %v1222_v36, %v1167_v27 }
 0x2d9   : > { %v1232_v60 = vmul.f32 %v1223_v3, %v1171_v18  ;;  %v1226_v57 = vsub.f32 %v1103_v20, %v1218_v16  ;;  %v1233_v0 = vmul.f32 %v1224_v15, %v1175_v8  ;;  %v1234_v45 = vmul.f32 %v1225_v50, %v1179_v4  ;;  %v1276_v8 = vld [vmem:[#allocation9] sm:$0xff] }
 0x2da   : > { %v1237_v47 = vmul.f32 %v1228_v38, %v1228_v38  ;;  %v1238_v49 = vmul.f32 %v1229_v39, %v1229_v39  ;;  %v1239_v51 = vmul.f32 %v1230_v24, %v1230_v24  ;;  %v1240_v40 = vmul.f32 %v1231_v62, %v1231_v62 }
 0x2db   : > { %v1241_v63 = vmul.f32 %v1232_v60, %v1232_v60  ;;  %v1236_v10 = vmul.f32 %v1595_v21, %v1227_v53  ;;  %v1235_v41 = vmul.f32 %v1226_v57, %v1183_v13  ;;  %v1242_v43 = vmul.f32 %v1233_v0, %v1233_v0 }
 0x2dc   : > { %v1246_v52 = vadd.f32 %v1238_v49, %v1237_v47  ;;  %v1243_v34 = vmul.f32 %v1234_v45, %v1234_v45 }
 0x2dd   : > { %v1245_v32 = vmul.f32 %v1236_v10, %v1236_v10  ;;  %v1244_v5 = vmul.f32 %v1235_v41, %v1235_v41 }
 0x2de   : > { %v1247_v44 = vadd.f32 %v1246_v52, %v1239_v51 }
 0x2df   : > { %v1253_v2 = vsel %vm1213_vm12, %v1245_v32, 0.0 }
 0x2e0   : > { %v1248_v1 = vadd.f32 %v1247_v44, %v1240_v40 }
 0x2e2   : > { %v1249_v55 = vadd.f32 %v1248_v1, %v1241_v63 }
 0x2e4   : > { %v1250_v27 = vadd.f32 %v1249_v55, %v1242_v43 }
 0x2e6   : > { %v1251_v6 = vadd.f32 %v1250_v27, %v1243_v34 }
 0x2e8   : > { %v1252_v18 = vadd.f32 %v1251_v6, %v1244_v5 }
 0x2ea   : > { %v1254_v42 = vadd.f32 %v1253_v2, %v1252_v18 }
 0x2ec   : > { %1255 = vadd.xlane.f32.xlu1 %v1254_v42 }
 0x2fd   : > { %1279 = vperm.xlu1 %1733, %v1276_v8  }
 0x379   : > { %v1256_v7 = vpop.xlane.xlu1 %1255 }
 0x37a   : > { %v1257_v9 = vmul.f32 0.0009765625, %v1256_v7 }
 0x37c   : > { %v1259_v26 = vadd.f32 1e-05, %v1257_v9 }
 0x37d   : > { %v1280_v4 = vpop.permute.xlu1 %1279 }
 0x37e   : > { %1739 = vrsqrt.f32 %v1259_v26 }
 0x388   : > { %v1740_v37 = vpop.eup %1739 }
 0x389   : > { %v1261_v59 = vmul.f32 %v1740_v37, %v1258_v11 }
 0x38b   : > { %1264 = vperm.xlu0 %1732, %v1261_v59  }
 0x40a   : > { %v1265_v12 = vpop.permute.xlu0 %1264 }
 0x40b   : > { %v1267_v13 = vmul.f32 %v1265_v12, %v1219_v30  ;;  %v1268_v14 = vmul.f32 %v1265_v12, %v1220_v22  ;;  %v1269_v17 = vmul.f32 %v1265_v12, %v1221_v35  ;;  %v1270_v20 = vmul.f32 %v1265_v12, %v1222_v36 }
 0x40c   : > { %v1271_v21 = vmul.f32 %v1265_v12, %v1223_v3  ;;  %v1272_v56 = vmul.f32 %v1265_v12, %v1224_v15  ;;  %v1273_v19 = vmul.f32 %v1265_v12, %v1225_v50  ;;  %v1274_v28 = vmul.f32 %v1265_v12, %v1226_v57 }
 0x40d   : > { %v1275_v61 = vmul.f32 %v1265_v12, %v1227_v53  ;;  %v1282_v23 = vadd.f32 %v1280_v4, %v1267_v13  ;;  %v1283_v48 = vadd.f32 %v1280_v4, %v1268_v14  ;;  %v1284_v58 = vadd.f32 %v1280_v4, %v1269_v17 }
 0x40e   : > { %v1285_v54 = vadd.f32 %v1280_v4, %v1270_v20  ;;  %v1286_v46 = vadd.f32 %v1280_v4, %v1271_v21  ;;  %v1287_v29 = vadd.f32 %v1280_v4, %v1272_v56  ;;  %v1288_v31 = vadd.f32 %v1280_v4, %v1273_v19 }
 0x40f   : > { %v1289_v33 = vadd.f32 %v1280_v4, %v1274_v28  ;;  %v1290_v25 = vadd.f32 %v1280_v4, %v1275_v61  ;;  %v1291_v16 = vsub.f32 0.0, %v1282_v23  ;;  %v1292_v38 = vsub.f32 0.0, %v1283_v48 }
 0x410   : > { %v1293_v30 = vsub.f32 0.0, %v1284_v58  ;;  %v1294_v22 = vsub.f32 0.0, %v1285_v54  ;;  %v1295_v35 = vsub.f32 0.0, %v1286_v46  ;;  %v1296_v36 = vsub.f32 0.0, %v1287_v29 }
 0x411   : > { %v1297_v3 = vsub.f32 0.0, %v1288_v31  ;;  %v1298_v39 = vsub.f32 0.0, %v1289_v33  ;;  %v1300_v24 = vmul.f32 1.442695, %v1291_v16  ;;  %v1302_v15 = vmul.f32 1.442695, %v1292_v38 }
 0x412   : > { %v1304_v62 = vmul.f32 1.442695, %v1293_v30  ;;  %v1306_v47 = vmul.f32 1.442695, %v1294_v22  ;;  %v1299_v49 = vsub.f32 0.0, %v1290_v25 }
 0x413   : > { %1741 = vpow2.f32 %v1300_v24  ;;  %v1308_v50 = vmul.f32 1.442695, %v1295_v35  ;;  %v1310_v60 = vmul.f32 1.442695, %v1296_v36  ;;  %v1312_v51 = vmul.f32 1.442695, %v1297_v3 }
 0x414   : > { %1743 = vpow2.f32 %v1302_v15  ;;  %v1314_v52 = vmul.f32 1.442695, %v1298_v39  ;;  %v1316_v53 = vmul.f32 1.442695, %v1299_v49 }
 0x415   : > { %1745 = vpow2.f32 %v1304_v62 }
 0x416   : > { %1747 = vpow2.f32 %v1306_v47 }
 0x417   : > { %1749 = vpow2.f32 %v1308_v50 }
 0x418   : > { %1751 = vpow2.f32 %v1310_v60 }
 0x419   : > { %1753 = vpow2.f32 %v1312_v51 }
 0x41a   : > { %1755 = vpow2.f32 %v1314_v52 }
 0x41b   : > { %1757 = vpow2.f32 %v1316_v53 }
 0x41d   : > { %v1742_v57 = vpop.eup %1741 }
 0x41e   : > { %v1744_v0 = vpop.eup %1743  ;;  %v1318_v40 = vadd.f32 1.0, %v1742_v57 }
 0x41f   : > { %v1746_v44 = vpop.eup %1745  ;;  %v1319_v45 = vadd.f32 1.0, %v1744_v0 }
 0x420   : > { %v1748_v63 = vpop.eup %1747  ;;  %v1320_v1 = vadd.f32 1.0, %v1746_v44  ;;  %1759 = vrcp.f32 %v1318_v40 }
 0x421   : > { %v1750_v10 = vpop.eup %1749  ;;  %v1321_v41 = vadd.f32 1.0, %v1748_v63  ;;  %1761 = vrcp.f32 %v1319_v45 }
 0x422   : > { %v1752_v43 = vpop.eup %1751  ;;  %v1322_v55 = vadd.f32 1.0, %v1750_v10  ;;  %1763 = vrcp.f32 %v1320_v1 }
 0x423   : > { %v1754_v34 = vpop.eup %1753  ;;  %v1323_v27 = vadd.f32 1.0, %v1752_v43  ;;  %1765 = vrcp.f32 %v1321_v41 }
 0x424   : > { %v1756_v32 = vpop.eup %1755  ;;  %v1324_v5 = vadd.f32 1.0, %v1754_v34  ;;  %1767 = vrcp.f32 %v1322_v55 }
 0x425   : > { %v1758_v6 = vpop.eup %1757  ;;  %v1325_v18 = vadd.f32 1.0, %v1756_v32  ;;  %1769 = vrcp.f32 %v1323_v27 }
 0x426   : > { %v1326_v2 = vadd.f32 1.0, %v1758_v6  ;;  %1771 = vrcp.f32 %v1324_v5 }
 0x427   : > { %1773 = vrcp.f32 %v1325_v18 }
 0x428   : > { %1775 = vrcp.f32 %v1326_v2 }
 0x42a   : > { %v1760_v42 = vpop.eup %1759 }
 0x42b   : > { %v1762_v8 = vpop.eup %1761  ;;  %v1328_v7 = vmul.f32 12.0, %v1760_v42 }
 0x42c   : > { %v1764_v9 = vpop.eup %1763  ;;  %v1330_v26 = vmul.f32 12.0, %v1762_v8 }
 0x42d   : > { %v1766_v11 = vpop.eup %1765  ;;  %v1332_v37 = vmul.f32 12.0, %v1764_v9  ;;  %v1345_v59 = vmul.f32 1.442695, %v1328_v7 }
 0x42e   : > { %v1768_v12 = vpop.eup %1767  ;;  %v1334_v4 = vmul.f32 12.0, %v1766_v11  ;;  %v1347_v13 = vmul.f32 1.442695, %v1330_v26 }
 0x42f   : > { %v1770_v14 = vpop.eup %1769  ;;  %v1336_v17 = vmul.f32 12.0, %v1768_v12  ;;  %1777 = vpow2.f32 %v1345_v59  ;;  %v1349_v20 = vmul.f32 1.442695, %v1332_v37 }
 0x430   : > { %v1772_v21 = vpop.eup %1771  ;;  %v1338_v56 = vmul.f32 12.0, %v1770_v14  ;;  %1779 = vpow2.f32 %v1347_v13  ;;  %v1351_v19 = vmul.f32 1.442695, %v1334_v4 }
 0x431   : > { %v1774_v28 = vpop.eup %1773  ;;  %v1340_v61 = vmul.f32 12.0, %v1772_v21  ;;  %1781 = vpow2.f32 %v1349_v20  ;;  %v1353_v23 = vmul.f32 1.442695, %v1336_v17 }
 0x432   : > { %v1776_v48 = vpop.eup %1775  ;;  %v1342_v58 = vmul.f32 12.0, %v1774_v28  ;;  %1783 = vpow2.f32 %v1351_v19  ;;  %v1355_v54 = vmul.f32 1.442695, %v1338_v56 }
 0x433   : > { %v1344_v46 = vmul.f32 12.0, %v1776_v48  ;;  %1785 = vpow2.f32 %v1353_v23  ;;  %v1357_v29 = vmul.f32 1.442695, %v1340_v61 }
 0x434   : > { %1787 = vpow2.f32 %v1355_v54  ;;  %v1359_v31 = vmul.f32 1.442695, %v1342_v58 }
 0x435   : > { %1789 = vpow2.f32 %v1357_v29  ;;  %v1361_v33 = vmul.f32 1.442695, %v1344_v46 }
 0x436   : > { %1791 = vpow2.f32 %v1359_v31 }
 0x437   : > { %1793 = vpow2.f32 %v1361_v33 }
 0x439   : > { %v1778_v25 = vpop.eup %1777 }
 0x43a   : > { %v1780_v16 = vpop.eup %1779 }
 0x43b   : > { %v1782_v38 = vpop.eup %1781  ;;  %v1604_v30 = vpack.c.bf16 %v1780_v16, %v1778_v25 }
 0x43c   : > { %v1784_v22 = vpop.eup %1783 }
 0x43d   : > { %v1786_v35 = vpop.eup %1785  ;;  %v1605_v36 = vpack.c.bf16 %v1784_v22, %v1782_v38  ;;  %1400 = vst [vmem:[%s290_s11] sm:$0xff] %v1604_v30 }
 0x43e   : > { %v1788_v3 = vpop.eup %1787 }
 0x43f   : > { %v1790_v39 = vpop.eup %1789  ;;  %v1606_v24 = vpack.c.bf16 %v1788_v3, %v1786_v35  ;;  %1401 = vst [vmem:[%s290_s11 + $0x8] sm:$0xff] %v1605_v36 }
 0x440   : > { %v1792_v15 = vpop.eup %1791 }
 0x441   : > { %v1794_v62 = vpop.eup %1793  ;;  %v1607_v47 = vpack.c.bf16 %v1792_v15, %v1790_v39  ;;  %1402 = vst [vmem:[%s290_s11 + $0x10] sm:$0xff] %v1606_v24 }
 0x442   : > { %v1608_v49 = vpack.c.bf16 %v1794_v62, %v1794_v62 }
 0x443   : > { %1403 = vst [vmem:[%s290_s11 + $0x18] sm:$0xff] %v1607_v47 }
 0x444   : > { %1404 = vst.msk [vmem:[%s290_s11 + $0x20] sm:$0xf] %vm301_vm0, %v1608_v49 }
 0x445   : > { %1950 = shalt.err (!%p1947_p0)
}
 0x446   : > { %s1951_s26 = scalar_lea.hbm %s2634_s6, 576  ;;  %s1955_s23 = scalar_lea.hbm %s2684_s5, 1152 }
 0x447   : > { %p1952_p2 = scmp.ne.s32.totalorder %s2634_s6, %s1951_s26  ;;  %p1956_p4 = scmp.lt.u32.totalorder %s2634_s6, %s2684_s5 }
 0x448   : > { %p1957_p11 = scmp.lt.u32.totalorder %s1955_s23, %s1951_s26  ;;  %p1959_p5 = scmp.lt.u32.totalorder %s1951_s26, %s2634_s6 }
 0x449   : > { %p1953_p8 = pnand %p1952_p2, %p2701_p6 }
 0x44a   : > { %p1958_p1 = por %p1957_p11, %p1956_p4 }
 0x44b   : > { %p1954_p10 = pneg %p1953_p8 }
 0x44c   : > { %p1960_p7 = por %p1959_p5, %p1958_p1 }
 0x44e   : > { %p1961_p9 = pnand %p1960_p7, %p1954_p10 }
 0x450   : > { %1964 = shalt.err (!%p1961_p9)
}
 0x451   : > { %1652 = dma.vmem_to_hbm [thread:$0]  (%p2701_p6), %s2636_s17, 576, %s2634_s6, %s1406_s24  }
 0x452 PF: > { %s1432_s11 = sand.u32 1, %s1999_s18   ;;  %p2702_p12 = scmp.ne.s32.totalorder %s2694_s10, 0 }
 0x453   : > { %p2703_p3 = scmp.ge.s32.totalorder %s2011_s21, 2  ;;  %s1433_s15 = scalar_lea.sflag [#allocation5], %s1432_s11 }
 0x455   : > { %p1672_p13 = pnand %p2703_p3, %p2702_p12 }
 0x457   : > { %1994 = dma.done.wait (!%p1672_p13), %s1433_s15, 576  }
 0x458   : > { %1996 = vsyncadd (!%p1672_p13), %s1433_s15, 4294966720  ;;  %p20_p0 = scmp.ge.s32.totalorder %s2203_s30, 4   ;;  %s2704_s18 = smov %s2003_s19 }
 0x459   : > { %s2705_s19 = smov %s2007_s20  ;;  %s2706_s20 = smov %s2214_s27 }
 0x45a   : > { %s2707_s21 = smov %s2203_s30  ;;  %22 = sbr.rel (!%p20_p0) target bundleno = 7 (0x7), region = 101 }
 0x461   :  { %1438 = vsyncpa [#allocation4], 1 }
 0x462   :  { %1440 = vsyncpa [#allocation4 + $0x1], 1 }
 0x463   :  { %1441 = vsyncpa [#allocation7], 1 }
 0x464   :  { %1442 = vsyncpa [#allocation10], 1 }
 0x465   :  { %1443 = vsyncpa [#allocation5], 1 }
 0x466   :  { %1445 = vsyncpa [#allocation5 + $0x1], 1 }

// kernel: _lambda_.10
= control target key start
LH: loop header
LB: loop body
LE: loop exit
PB: predicated region body
PF: predicated region fallthrough
CT: control target
= control target key end

     0   :  { %10 = vsyncpa [#allocation4], 0  ;;  %s1683_s0 = inlined_call_operand.hbm [shape: bf16[2,8,342], index: 0, kind: input, shape index: {}]   ;;  %s1684_s1 = inlined_call_operand.hbm [shape: bf16[16,72], index: 1, kind: input, shape index: {}]   ;;  %s1685_s2 = inlined_call_operand.hbm [shape: f32[16,1], index: 2, kind: input, shape index: {}]   ;;  %s1686_s3 = inlined_call_operand.hbm [shape: f32[16,1], index: 3, kind: input, shape index: {}]   ;;  %s1687_s4 = inlined_call_operand.hbm [shape: f32[1,288], index: 4, kind: input, shape index: {}]   ;;  %s1688_s5 = inlined_call_operand.hbm [shape: bf16[2,16,288], index: 5, kind: output, shape index: {}]  }
   0x1   :  { %12 = vsyncpa [#allocation4 + $0x1], 0 }
   0x2   :  { %13 = vsyncpa [#allocation7], 0 }
   0x3   :  { %14 = vsyncpa [#allocation10], 0 }
   0x4   :  { %15 = vsyncpa [#allocation5], 0 }
   0x5   :  { %17 = vsyncpa [#allocation5 + $0x1], 0  ;;  %s1353_s18 = smov 0   ;;  %s1355_s19 = smov 0  }
   0x6   :  { %s1357_s20 = smov 0   ;;  %s1359_s21 = smov 0  }
   0x7 LB: > { %s1300_s22 = smov [#allocation6]   ;;  %s1374_s24 = sadd.s32 4294967295, %s1298_s21   ;;  %s1298_s21 = sphi %s1359_s21, %s1711_s21   ;;  %s1294_s20 = sphi %s1357_s20, %s1710_s20   ;;  %s1290_s19 = sphi %s1355_s19, %s1709_s19   ;;  %s1286_s18 = sphi %s1353_s18, %s1708_s18  }
   0x8   : > { %s176_s23 = sshll.u32 %s1300_s22, 4  ;;  %p899_p0 = scmp.ge.s32.totalorder %s1298_s21, 1  ;;  %s1379_s23 = int_to_ptr.vmem [resolvable:$true] %s176_s23 }
   0x9   : > { %p1689_p1 = scmp.eq.s32.totalorder %s1374_s24, 0  ;;  %p164_p2 = scmp.lt.s32.totalorder %s1298_s21, 3 }
   0xa   : > { %s1301_s27 = smov [#allocation9]   ;;  %s1302_s29 = smov [#allocation8]  }
   0xb   : > { %p1381_p3 = pnand %p899_p0, %p164_p2  ;;  %s202_s28 = sshll.u32 %s1301_s27, 4  ;;  %s1394_s28 = int_to_ptr.vmem [resolvable:$true] %s202_s28 }
   0xc   : > { %s1396_s30 = sshll.u32 %s1302_s29, 4  ;;  %s1082_s8 = scalar_lea.hbm %s1684_s1, 128  ;;  %s190_s30 = int_to_ptr.vmem [resolvable:$true] %s1396_s30 }
   0xd   : > { %s1692_s25 = scalar_select %p1381_p3, 1, 0 }
   0xe   : > { %p986_p5 = pneg %p1381_p3  ;;  %p1083_p7 = scmp.ne.s32.totalorder %s1684_s1, %s1082_s8 }
   0xf   : > { %p1089_p11 = scmp.lt.u32.totalorder %s1082_s8, %s1684_s1 }
  0x10   : > { %p1390_p6 = pnand %p986_p5, %p1689_p1 }
  0x12   : > { %p1406_p8 = pneg %p1390_p6 }
  0x14   : > { %p1085_p9 = pnand %p1406_p8, %p1083_p7 }
  0x16   : > { %p1086_p10 = pneg %p1085_p9 }
  0x18   : > { %p1091_p12 = pnand %p1089_p11, %p1086_p10 }
  0x1a   : > { %1094 = shalt.err (!%p1091_p12)
}
  0x1b   : > { %s1095_s14 = scalar_lea.vmem %s1379_s23, 128  ;;  %p1103_p5 = scmp.lt.s32.totalorder %s1379_s23, %s1379_s23 }
  0x1c   : > { %p1096_p13 = scmp.ne.s32.totalorder %s1379_s23, %s1095_s14  ;;  %p1104_p4 = scmp.lt.s32.totalorder %s1095_s14, %s1095_s14 }
  0x1e   : > { %p1098_p0 = pnand %p1096_p13, %p1406_p8  ;;  %p1105_p7 = por %p1104_p4, %p1103_p5 }
  0x20   : > { %p1099_p2 = pneg %p1098_p0 }
  0x22   : > { %p1106_p9 = pnand %p1105_p7, %p1099_p2 }
  0x24   : > { %1109 = shalt.err (!%p1106_p9)
}
  0x25   : > { %s1303_s15 = smov 64   ;;  %s1304_s16 = smov 4  }
  0x26   : > { %989 = dma.hbm_to_vmem [thread:$0]  (!%p1390_p6), %s1684_s1, 128, %s1379_s23, [#allocation7], %s1303_s15, %s1303_s15, %s1304_s16  }
  0x27   : > { %s1110_s6 = scalar_lea.hbm %s1686_s3, 256 }
  0x28   : > { %p1111_p4 = scmp.ne.s32.totalorder %s1686_s3, %s1110_s6  ;;  %p1117_p12 = scmp.lt.u32.totalorder %s1110_s6, %s1686_s3 }
  0x2a   : > { %p1113_p10 = pnand %p1111_p4, %p1406_p8 }
  0x2c   : > { %p1114_p11 = pneg %p1113_p10 }
  0x2e   : > { %p1119_p13 = pnand %p1117_p12, %p1114_p11 }
  0x30   : > { %1122 = shalt.err (!%p1119_p13)
}
  0x31   : > { %s1123_s23 = scalar_lea.vmem %s1394_s28, 256  ;;  %p1131_p7 = scmp.lt.s32.totalorder %s1394_s28, %s1394_s28 }
  0x32   : > { %p1124_p0 = scmp.ne.s32.totalorder %s1394_s28, %s1123_s23  ;;  %p1132_p9 = scmp.lt.s32.totalorder %s1123_s23, %s1123_s23 }
  0x34   : > { %p1126_p2 = pnand %p1124_p0, %p1406_p8  ;;  %p1133_p4 = por %p1132_p9, %p1131_p7 }
  0x36   : > { %p1127_p5 = pneg %p1126_p2 }
  0x38   : > { %p1134_p10 = pnand %p1133_p4, %p1127_p5 }
  0x3a   : > { %1137 = shalt.err (!%p1134_p10)
}
  0x3b   : > { %s1305_s12 = smov 128   ;;  %s1306_s13 = smov 8  }
  0x3c   : > { %995 = dma.hbm_to_vmem [thread:$0]  (!%p1390_p6), %s1686_s3, 256, %s1394_s28, [#allocation10], %s1305_s12, %s1305_s12, %s1306_s13  }
  0x3d   : > { %s1138_s22 = scalar_lea.hbm %s1685_s2, 256 }
  0x3e   : > { %p1139_p11 = scmp.ne.s32.totalorder %s1685_s2, %s1138_s22  ;;  %p1145_p0 = scmp.lt.u32.totalorder %s1138_s22, %s1685_s2 }
  0x40   : > { %p1141_p12 = pnand %p1139_p11, %p1406_p8 }
  0x42   : > { %p1142_p13 = pneg %p1141_p12 }
  0x44   : > { %p1147_p2 = pnand %p1145_p0, %p1142_p13 }
  0x46   : > { %1150 = shalt.err (!%p1147_p2)
}
  0x47   : > { %s1151_s8 = scalar_lea.vmem %s190_s30, 256  ;;  %p1159_p4 = scmp.lt.s32.totalorder %s190_s30, %s190_s30 }
  0x48   : > { %p1152_p5 = scmp.ne.s32.totalorder %s190_s30, %s1151_s8  ;;  %p1160_p10 = scmp.lt.s32.totalorder %s1151_s8, %s1151_s8 }
  0x4a   : > { %p1154_p7 = pnand %p1152_p5, %p1406_p8  ;;  %p1161_p1 = por %p1160_p10, %p1159_p4 }
  0x4c   : > { %p1155_p9 = pneg %p1154_p7 }
  0x4e   : > { %p1162_p3 = pnand %p1161_p1, %p1155_p9 }
  0x50   : > { %1165 = shalt.err (!%p1162_p3)
}
  0x51   : > { %992 = dma.hbm_to_vmem [thread:$0]  (!%p1390_p6), %s1685_s2, 256, %s190_s30, [#allocation7], %s1305_s12, %s1305_s12, %s1306_s13  }
  0x52   : > { %s1307_s10 = smov [#allocation11]   ;;  %s1166_s16 = scalar_lea.hbm %s1687_s4, 48 }
  0x53   : > { %s216_s23 = sshll.u32 %s1307_s10, 4  ;;  %p1167_p11 = scmp.ne.s32.totalorder %s1687_s4, %s1166_s16  ;;  %s217_s23 = int_to_ptr.vmem [resolvable:$true] %s216_s23 }
  0x54   : > { %p1173_p12 = scmp.lt.u32.totalorder %s1166_s16, %s1687_s4 }
  0x55   : > { %p1169_p1 = pnand %p1167_p11, %p1406_p8 }
  0x57   : > { %p1170_p3 = pneg %p1169_p1 }
  0x59   : > { %p1175_p13 = pnand %p1173_p12, %p1170_p3 }
  0x5b   : > { %1178 = shalt.err (!%p1175_p13)
}
  0x5c   : > { %s1179_s30 = scalar_lea.vmem %s217_s23, 48  ;;  %s1186_s12 = scalar_lea.vmem %s217_s23, 64 }
  0x5d   : > { %p1180_p0 = scmp.ne.s32.totalorder %s217_s23, %s1179_s30  ;;  %p1187_p7 = scmp.lt.s32.totalorder %s217_s23, %s217_s23 }
  0x5e   : > { %p1188_p9 = scmp.lt.s32.totalorder %s1186_s12, %s1179_s30 }
  0x5f   : > { %p1182_p2 = pnand %p1180_p0, %p1406_p8 }
  0x60   : > { %p1189_p4 = por %p1188_p9, %p1187_p7 }
  0x61   : > { %p1183_p5 = pneg %p1182_p2 }
  0x63   : > { %p1190_p10 = pnand %p1189_p4, %p1183_p5 }
  0x65   : > { %1193 = shalt.err (!%p1190_p10)
}
  0x66   : > { %998 = dma.hbm_to_vmem [thread:$0]  (!%p1390_p6), %s1687_s4, 48, %s217_s23, [#allocation10]  }
  0x67   : > { %s898_s11 = sadd.s32 4294967294, %s1298_s21   ;;  %s1489_s26 = sadd.s32 1, %s1298_s21  }
  0x68   : > { %s27_s7 = ssub.s32 %s1298_s21, %s1489_s26  ;;  %s30_s8 = sadd.s32 1, %s1294_s20 }
  0x69   : > { %p28_p8 = scmp.eq.s32.totalorder %s27_s7, 0  ;;  %p37_p11 = scmp.ne.s32.totalorder %s1294_s20, %s1290_s19 }
  0x6a   : > { %p38_p1 = scmp.eq.s32.totalorder %s1298_s21, 0  ;;  %p43_p3 = scmp.ne.s32.totalorder %s1290_s19, %s1286_s18 }
  0x6b   : > { %s1500_s28 = scalar_select %p28_p8, %s1294_s20, %s30_s8  }
  0x6c   : > { %p39_p12 = por %p38_p1, %p37_p11  ;;  %p1695_p13 = scmp.eq.s32.totalorder %s1374_s24, 0 }
  0x6d   : > { %p151_p6 = scmp.eq.s32.totalorder %s1374_s24, 1  ;;  %p157_p2 = scmp.eq.s32.totalorder %s898_s11, 1 }
  0x6e   : > { %p1504_p0 = por %p1695_p13, %p43_p3  ;;  %p1011_p5 = scmp.lt.s32.totalorder %s1298_s21, 2 }
  0x6f   : > { %s227_s10 = sand.u32 1, %s1294_s20   ;;  %p1511_p7 = por %p151_p6, %p37_p11 }
  0x70   : > { %p1515_p9 = por %p157_p2, %p43_p3  ;;  %s961_s15 = smul.u32 12, %s227_s10 }
  0x71   : > { %s1697_s23 = scalar_select %p1511_p7, 1, 0 }
  0x72   : > { %s1698_s14 = scalar_select %p1515_p9, 1, 0 }
  0x73   : > { %s962_s16 = smul.u32 192, %s1298_s21  ;;  %p1520_p4 = pnand %p1011_p5, %p39_p12 }
  0x74   : > { %s231_s30 = scalar_lea.vmem [#allocation3], %s961_s15  ;;  %s228_s13 = scalar_lea.sflag [#allocation4], %s227_s10 }
  0x75   : > { %s1527_s29 = scalar_lea.hbm %s1683_s0, %s962_s16  ;;  %s239_s12 = sshll.u32 %s231_s30, 4  ;;  %s1529_s12 = int_to_ptr.vmem [resolvable:$true] %s239_s12 }
  0x76   : > { %s1194_s6 = scalar_lea.hbm %s1527_s29, 192  ;;  %p1196_p8 = pneg %p1520_p4 }
  0x77   : > { %p1195_p10 = scmp.ne.s32.totalorder %s1527_s29, %s1194_s6  ;;  %s1199_s8 = scalar_lea.hbm %s1683_s0, 384 }
  0x78   : > { %p1200_p3 = scmp.lt.u32.totalorder %s1527_s29, %s1683_s0  ;;  %p1201_p12 = scmp.lt.u32.totalorder %s1199_s8, %s1194_s6 }
  0x79   : > { %p1197_p11 = pnand %p1196_p8, %p1195_p10  ;;  %p1203_p6 = scmp.lt.u32.totalorder %s1194_s6, %s1527_s29 }
  0x7a   : > { %p1202_p13 = por %p1201_p12, %p1200_p3 }
  0x7b   : > { %p1198_p1 = pneg %p1197_p11 }
  0x7c   : > { %p1204_p2 = por %p1203_p6, %p1202_p13 }
  0x7e   : > { %p1205_p5 = pnand %p1204_p2, %p1198_p1 }
  0x80   : > { %1208 = shalt.err (!%p1205_p5)
}
  0x81   : > { %s1209_s10 = scalar_lea.vmem %s1529_s12, 192  ;;  %s1308_s15 = smov [#allocation3]  }
  0x82   : > { %p1210_p10 = scmp.ne.s32.totalorder %s1529_s12, %s1209_s10  ;;  %s1214_s27 = sshll.u32 %s1308_s15, 4  ;;  %s1215_s27 = int_to_ptr.vmem [resolvable:$false] %s1214_s27 }
  0x83   : > { %s1216_s30 = scalar_lea.vmem %s1215_s27, 384  ;;  %p1217_p7 = scmp.lt.s32.totalorder %s1529_s12, %s1215_s27 }
  0x84   : > { %p1212_p11 = pnand %p1210_p10, %p1196_p8  ;;  %p1218_p3 = scmp.lt.s32.totalorder %s1216_s30, %s1209_s10 }
  0x86   : > { %p1213_p9 = pneg %p1212_p11  ;;  %p1219_p12 = por %p1218_p3, %p1217_p7 }
  0x88   : > { %p1220_p13 = pnand %p1219_p12, %p1213_p9 }
  0x8a   : > { %1223 = shalt.err (!%p1220_p13)
}
  0x8b   : > { %1002 = dma.hbm_to_vmem [thread:$0]  (!%p1520_p4), %s1527_s29, 192, %s1529_s12, %s228_s13  }
  0x8c   : > { %p1700_p1 = scmp.ne.s32.totalorder %s1692_s25, 0 }
  0x8d   : > { %s1559_s6 = sand.u32 (!%p1700_p1), 1, %s1290_s19  }
  0x8e   : > { %248 = sbr.rel (%p1700_p1) target bundleno = 1001 (0x3e9), region = 40  ;;  %s251_s7 = scalar_lea.sflag (!%p1700_p1), [#allocation4], %s1559_s6 }
  0x8f   : > { %s963_s11 = smul.u32 (!%p1700_p1), 12, %s1559_s6 }
  0x91   : > { %s1563_s8 = scalar_lea.vmem (!%p1700_p1), [#allocation3], %s963_s11 }
  0x95   : > { %1269 = dma.done.wait (%p1504_p0), %s251_s7, 192  }
  0x96   : > { %1271 = vsyncadd (%p1504_p0), %s251_s7, 4294967104  ;;  %p1701_p7 = scmp.eq.s32.totalorder %s1374_s24, 0 }
  0x98   : > { %1273 = dma.done.wait (%p1701_p7), [#allocation7], 384   ;;  %p1702_p9 = pmov %p1701_p7 }
  0x99   : > { %p1703_p4 = pmov %p1701_p7 }
  0x9a   : > { %1275 = vsyncadd (%p1702_p9), [#allocation7], 4294966912 }
  0x9b   : > { %1277 = dma.done.wait (%p1703_p4), [#allocation10], 304   ;;  %p1704_p8 = pmov %p1703_p4 }
  0x9c   : > { %v1578_v0 = vld [vmem:[%s1563_s8] sm:$0xff]  ;;  %v1309_v1 = vmov 0.0   ;;  %s1310_s25 = smov 126   ;;  %s1311_s9 = smov 127   ;;  %vm301_vm0 = vcmask 257024   ;;  %v1317_v11 = vmov 0  }
  0x9d   : > { %1279 = vsyncadd (%p1704_p8), [#allocation10], 4294966992  ;;  %947 = vmatprep.subr.bf16.mxu1 %v1309_v1  ;;  %325 = vrot.lane.b32.xlu1 %v1578_v0, %s1310_s25  ;;  %v322_v2 = vld [vmem:[%s1563_s8 + $0x8] sm:$0xf]  ;;  %s1312_s17 = smov 110   ;;  %s1313_s29 = smov 109  }
  0x9e   : > { %307 = vrot.lane.b32.xlu0 %v1578_v0, %s1311_s9  ;;  %v304_v3 = vld [vmem:[%s1563_s8 + $0x8] sm:$0xf]  ;;  %s1314_s12 = smov 108   ;;  %s1315_s13 = smov 92   ;;  %583 = vmatprep.mubr.bf16.mxu0 %v1317_v11  ;;  %vm1318_vm1 = vmmov 0   ;;  %vm313_vm2 = vcmask 1043456  }
  0x9f   : > { %v299_v4 = vld [vmem:[%s1563_s8 + $0x8] sm:$0xf]  ;;  %s1316_s16 = smov 91   ;;  %1070 = vset.pattern.permute.xlu1 %v1317_v11  ;;  %957 = vmatprep.mubr.msk.bf16.mxu1 %vm1318_vm1, %v1309_v1  ;;  %s1319_s22 = smov 90   ;;  %vm332_vm3 = vcmask 1031168   ;;  %vm315_vm4 = vcmask 1039360  }
  0xa0   : > { %302 = vst.msk [vmem:[#allocation2 + $0x8] sm:$0xf] %vm301_vm0, %v299_v4  ;;  %v339_v5 = vld [vmem:[%s1563_s8 + $0x8] sm:$0xf]  ;;  %1071 = vset.pattern.permute.xlu0 %v1317_v11  ;;  %vm349_vm5 = vcmask 900096   ;;  %vm366_vm6 = vcmask 891904  }
  0xa1   : > { %327 = vrot.lane.b32.xlu1 %v322_v2, %s1310_s25  ;;  %v356_v6 = vld [vmem:[%s1563_s8 + $0x8] sm:$0xf]  ;;  %vm383_vm7 = vcmask 883712   ;;  %vm400_vm8 = vcmask 752640   ;;  %vm417_vm9 = vcmask 744448   ;;  %vm434_vm10 = vcmask 736256  }
  0xa2   : > { %309 = vrot.lane.b32.xlu0 %v304_v3, %s1311_s9  ;;  %v373_v7 = vld [vmem:[%s1563_s8 + $0x8] sm:$0xf]  ;;  %vm537_vm11 = vcmask 588800   ;;  %vm659_vm12 = vcmask 261120   ;;  %s964_s10 = smul.u32 24, %s1559_s6  ;;  %p1705_p6 = scmp.ne.s32.totalorder %s1697_s23, 0 }
  0xa3   : > { %v390_v8 = vld [vmem:[%s1563_s8 + $0x8] sm:$0xf]  ;;  %s965_s30 = smul.u32 384, %s1374_s24  ;;  %s1320_s9 = smov [#allocation12]  }
  0xa4   : > { %v407_v9 = vld [vmem:[%s1563_s8 + $0x8] sm:$0xf]  ;;  %s296_s15 = scalar_lea.vmem [#allocation12], %s964_s10 }
  0xa5   : > { %344 = vrot.lane.b32.xlu1 %v339_v5, %s1312_s17  ;;  %v424_v10 = vld [vmem:[%s1563_s8 + $0x8] sm:$0xf]  ;;  %s787_s27 = sshll.u32 %s296_s15, 4  ;;  %s1638_s24 = scalar_lea.hbm %s1688_s5, %s965_s30  ;;  %s1632_s27 = int_to_ptr.vmem [resolvable:$true] %s787_s27 }
  0xa6   : > { %342 = vrot.lane.b32.xlu0 %v1578_v0, %s1312_s17  ;;  %s774_s8 = scalar_lea.sflag [#allocation5], %s1559_s6  ;;  %s1224_s25 = scalar_lea.vmem %s1632_s27, 384 }
  0xa7   : > { %p1225_p0 = scmp.ne.s32.totalorder %s1632_s27, %s1224_s25  ;;  %s1228_s17 = sshll.u32 %s1320_s9, 4  ;;  %s1229_s17 = int_to_ptr.vmem [resolvable:$false] %s1228_s17 }
  0xa8   : > { %p1231_p10 = scmp.lt.s32.totalorder %s1632_s27, %s1229_s17 }
  0xa9   : > { %361 = vrot.lane.b32.xlu1 %v356_v6, %s1313_s29  ;;  %p1226_p2 = pnand %p1225_p0, %p1705_p6 }
  0xaa   : > { %359 = vrot.lane.b32.xlu0 %v1578_v0, %s1313_s29  ;;  %s1230_s29 = scalar_lea.vmem %s1229_s17, 768 }
  0xab   : > { %p1227_p5 = pneg %p1226_p2  ;;  %p1232_p11 = scmp.lt.s32.totalorder %s1230_s29, %s1224_s25 }
  0xad   : > { %378 = vrot.lane.b32.xlu1 %v373_v7, %s1314_s12  ;;  %p1233_p3 = por %p1232_p11, %p1231_p10 }
  0xae   : > { %376 = vrot.lane.b32.xlu0 %v1578_v0, %s1314_s12 }
  0xaf   : > { %p1234_p12 = pnand %p1233_p3, %p1227_p5 }
  0xb1   : > { %395 = vrot.lane.b32.xlu1 %v390_v8, %s1315_s13 }
  0xb2   : > { %393 = vrot.lane.b32.xlu0 %v1578_v0, %s1315_s13 }
  0xb5   : > { %412 = vrot.lane.b32.xlu1 %v407_v9, %s1316_s16 }
  0xb6   : > { %410 = vrot.lane.b32.xlu0 %v1578_v0, %s1316_s16 }
  0xb9   : > { %429 = vrot.lane.b32.xlu1 %v424_v10, %s1319_s22 }
  0xba   : > { %427 = vrot.lane.b32.xlu0 %v1578_v0, %s1319_s22 }
 0x10f   : > { %v326_v12 = vpop.permute.xlu1 %325 }
 0x110   : > { %v308_v13 = vpop.permute.xlu0 %307  ;;  %v329_v16 = vrot.slane %v326_v12, 4 }
 0x111   : > { %v311_v17 = vrot.slane %v308_v13, 4 }
 0x113   : > { %v328_v14 = vpop.permute.xlu1 %327 }
 0x114   : > { %v310_v15 = vpop.permute.xlu0 %309  ;;  %v330_v18 = vrot.slane %v328_v14, 4  ;;  %337 = vst.msk [vmem:[#allocation2 + $0x20] sm:$0xf] %vm301_vm0, %v328_v14 }
 0x115   : > { %v312_v19 = vrot.slane %v310_v15, 4  ;;  %320 = vst.msk [vmem:[#allocation2 + $0x14] sm:$0xf] %vm301_vm0, %v310_v15  ;;  %v637_v15 = vlaneseq }
 0x116   : > { %v331_v20 = vsel %vm313_vm2, %v329_v16, %v330_v18  ;;  %v635_v18 = vld [vmem:[#allocation11] sm:$0x7] }
 0x117   : > { %v314_v21 = vsel %vm313_vm2, %v311_v17, %v312_v19  ;;  %v333_v22 = vsel %vm332_vm3, %v326_v12, %v331_v20  ;;  %v345_v24 = vpop.permute.xlu1 %344  ;;  %v1077_v12 = vld [vmem:[#allocation6] sm:$0xff]   ;;  %v638_v16 = vshrl.u32 %v637_v15, 7 }
 0x118   : > { %v316_v23 = vsel %vm315_vm4, %v308_v13, %v314_v21  ;;  %v343_v25 = vpop.permute.xlu0 %342  ;;  %v347_v26 = vrot.slane %v345_v24, 4  ;;  %354 = vst.msk [vmem:[#allocation2 + $0x2c] sm:$0xf] %vm301_vm0, %v345_v24 }
 0x119   : > { %v346_v27 = vrot.slane %v343_v25, 4  ;;  %v913_v28 = vcombine.high %v1578_v0, %v316_v23  ;;  %v912_v29 = vcombine.low %v1578_v0, %v316_v23  ;;  %v639_v17 = vsub.s32 0, %v638_v16 }
 0x11a   : > { %v643_v19 = vsub.s32 1, %v638_v16  ;;  %v647_v20 = vsub.s32 2, %v638_v16 }
 0x11b   : > { %v348_v30 = vsel %vm313_vm2, %v346_v27, %v347_v26  ;;  %551 = vmatprep.subr.bf16.mxu0 %v913_v28  ;;  %v362_v32 = vpop.permute.xlu1 %361 }
 0x11c   : > { %v350_v31 = vsel %vm349_vm5, %v343_v25, %v348_v30  ;;  %v360_v33 = vpop.permute.xlu0 %359  ;;  %v1072_v34 = vld [vmem:[#allocation2 + $0x8] ss:$12 sps:$4 sm:$0xff]   ;;  %552 = vmatpush1.bf16.msra.mxu0 %v912_v29  ;;  %v364_v35 = vrot.slane %v362_v32, 4  ;;  %371 = vst.msk [vmem:[#allocation2 + $0x38] sm:$0xf] %vm301_vm0, %v362_v32  ;;  %v644_v21 = vrot.slane %v635_v18, %v643_v19  ;;  %v725_v19 = vld [vmem:[#allocation9] sm:$0xff] }
 0x11d   : > { %v363_v36 = vrot.slane %v360_v33, 4  ;;  %v916_v37 = vcombine.high %v333_v22, %v350_v31  ;;  %v915_v38 = vcombine.low %v333_v22, %v350_v31  ;;  %948 = vmatpush3.bf16.msra.mxu1 %v1072_v34  ;;  %v648_v22 = vrot.slane %v635_v18, %v647_v20 }
 0x11e   : > { %949 = vmatprep.subr.bf16.mxu1 %v1309_v1 }
 0x11f   : > { %v365_v39 = vsel %vm313_vm2, %v363_v36, %v364_v35  ;;  %553 = vmatprep.subr.bf16.mxu0 %v916_v37  ;;  %v379_v41 = vpop.permute.xlu1 %378  ;;  %v1073_v43 = vld [vmem:[#allocation2 + $0x20] ss:$12 sps:$4 sm:$0xff]  }
 0x120   : > { %v367_v40 = vsel %vm366_vm6, %v360_v33, %v365_v39  ;;  %v377_v42 = vpop.permute.xlu0 %376  ;;  %554 = vmatpush1.bf16.msra.mxu0 %v915_v38  ;;  %v381_v44 = vrot.slane %v379_v41, 4  ;;  %388 = vst.msk [vmem:[#allocation2 + $0x44] sm:$0xf] %vm301_vm0, %v379_v41 }
 0x121   : > { %v380_v45 = vrot.slane %v377_v42, 4  ;;  %950 = vmatpush3.bf16.msra.mxu1 %v1073_v43 }
 0x122   : > { %951 = vmatprep.subr.bf16.mxu1 %v1309_v1 }
 0x123   : > { %v382_v46 = vsel %vm313_vm2, %v380_v45, %v381_v44  ;;  %v396_v48 = vpop.permute.xlu1 %395 }
 0x124   : > { %v384_v47 = vsel %vm383_vm7, %v377_v42, %v382_v46  ;;  %v394_v49 = vpop.permute.xlu0 %393  ;;  %v398_v50 = vrot.slane %v396_v48, 4  ;;  %405 = vst.msk [vmem:[#allocation2 + $0x50] sm:$0xf] %vm301_vm0, %v396_v48 }
 0x125   : > { %v397_v51 = vrot.slane %v394_v49, 4  ;;  %v919_v52 = vcombine.high %v367_v40, %v384_v47  ;;  %v918_v53 = vcombine.low %v367_v40, %v384_v47 }
 0x127   : > { %v399_v54 = vsel %vm313_vm2, %v397_v51, %v398_v50  ;;  %555 = vmatprep.subr.bf16.mxu0 %v919_v52  ;;  %v413_v56 = vpop.permute.xlu1 %412  ;;  %v1074_v58 = vld [vmem:[#allocation2 + $0x38] ss:$12 sps:$4 sm:$0xff]  }
 0x128   : > { %v401_v55 = vsel %vm400_vm8, %v394_v49, %v399_v54  ;;  %v411_v57 = vpop.permute.xlu0 %410  ;;  %556 = vmatpush1.bf16.msra.mxu0 %v918_v53  ;;  %v415_v59 = vrot.slane %v413_v56, 4  ;;  %422 = vst.msk [vmem:[#allocation2 + $0x5c] sm:$0xf] %vm301_vm0, %v413_v56  ;;  %952 = vmatpush3.bf16.msra.mxu1 %v1074_v58 }
 0x129   : > { %v414_v60 = vrot.slane %v411_v57, 4  ;;  %953 = vmatprep.subr.bf16.mxu1 %v1309_v1 }
 0x12b   : > { %v416_v61 = vsel %vm313_vm2, %v414_v60, %v415_v59  ;;  %v430_v63 = vpop.permute.xlu1 %429 }
 0x12c   : > { %v418_v62 = vsel %vm417_vm9, %v411_v57, %v416_v61  ;;  %v428_v0 = vpop.permute.xlu0 %427  ;;  %v432_v2 = vrot.slane %v430_v63, 4  ;;  %439 = vst.msk [vmem:[#allocation2 + $0x68] sm:$0xf] %vm301_vm0, %v430_v63 }
 0x12d   : > { %v431_v3 = vrot.slane %v428_v0, 4  ;;  %v922_v4 = vcombine.high %v401_v55, %v418_v62  ;;  %v921_v5 = vcombine.low %v401_v55, %v418_v62 }
 0x12f   : > { %v433_v6 = vsel %vm313_vm2, %v431_v3, %v432_v2  ;;  %557 = vmatprep.subr.bf16.mxu0 %v922_v4  ;;  %v1075_v8 = vld [vmem:[#allocation2 + $0x50] ss:$12 sps:$4 sm:$0xff]  }
 0x130   : > { %v435_v7 = vsel %vm434_vm10, %v428_v0, %v433_v6  ;;  %558 = vmatpush1.bf16.msra.mxu0 %v921_v5  ;;  %954 = vmatpush3.bf16.msra.mxu1 %v1075_v8 }
 0x131   : > { %v925_v9 = vcombine.high %v435_v7, %v435_v7  ;;  %v924_v10 = vcombine.low %v435_v7, %v435_v7  ;;  %955 = vmatprep.subr.bf16.mxu1 %v1309_v1  ;;  %v640_v1 = vrot.slane %v635_v18, %v639_v17  ;;  %v702_v17 = vld [vmem:[#allocation8 + $0x8] sm:$0xff] }
 0x133   : > { %927 = vmatprep.subr.msk.bf16.mxu0 %vm313_vm2, %v925_v9  ;;  %v543_v11 = vsel %vm313_vm2, %v924_v10, 0  ;;  %v1076_v13 = vld [vmem:[#allocation2 + $0x68] ss:$0 sps:$4 sm:$0xff]  }
 0x134   : > { %560 = vmatpush1.bf16.msra.mxu0 %v543_v11  ;;  %v549_v14 = vsel %vm313_vm2, %v1076_v13, 0 }
 0x135   : > { %956 = vmatpush3.bf16.msra.mxu1 %v549_v14  ;;  %v701_v14 = vld [vmem:[#allocation8] sm:$0xff] }
 0x137   : > { %928 = vmatmul.mubr.msk.bf16.vlgmr.msra.gmra.mrb[0].mxu0 %vm537_vm11, %v1077_v12 }
 0x138   : > { %958 = vmatmul.mubr.msk.bf16.vlgmr.msra.gmra.mrb[0].mxu1 %vm537_vm11, %v1077_v12 }
 0x20a   : > { %v585_v23 = vpop.f32.mrb[0].mxu0 }
 0x20b   : > { %v652_v24 = vmul.f32 %v640_v1, %v585_v23  ;;  %v587_v25 = vpop.f32.mrb[1].mxu0  ;;  %v628_v28 = vpop.f32.mrb[0].mxu1 }
 0x20c   : > { %v653_v26 = vmul.f32 %v644_v21, %v587_v25  ;;  %v589_v27 = vpop.f32.mrb[2].mxu0  ;;  %v654_v31 = vmul.f32 %v648_v22, %v628_v28  ;;  %v959_v32 = vpop.f32.mrb[1].mxu1 }
 0x20d   : > { %v655_v29 = vmul.f32 %v640_v1, %v589_v27  ;;  %v591_v30 = vpop.f32.mrb[3].mxu0  ;;  %v631_v35 = vpop.f32.mrb[2].mxu1 }
 0x20e   : > { %v656_v33 = vmul.f32 %v644_v21, %v591_v30  ;;  %v658_v34 = vadd.f32 %v653_v26, %v652_v24  ;;  %v657_v36 = vmul.f32 %v648_v22, %v631_v35  ;;  %v960_v37 = vpop.f32.mrb[3].mxu1  ;;  %v660_v39 = vsel %vm659_vm12, %v654_v31, 0.0 }
 0x210   : > { %v664_v38 = vadd.f32 %v656_v33, %v655_v29  ;;  %v661_v40 = vadd.f32 %v660_v39, %v658_v34  ;;  %v665_v41 = vsel %vm659_vm12, %v657_v36, 0.0 }
 0x212   : > { %662 = vadd.xlane.f32.xlu0 %v661_v40  ;;  %v666_v42 = vadd.f32 %v665_v41, %v664_v38 }
 0x214   : > { %667 = vadd.xlane.f32.xlu1 %v666_v42 }
 0x29f   : > { %v663_v43 = vpop.xlane.xlu0 %662 }
 0x2a0   : > { %v669_v44 = vmul.f32 0.00390625, %v663_v43 }
 0x2a1   : > { %v668_v45 = vpop.xlane.xlu1 %667 }
 0x2a2   : > { %v671_v46 = vsub.f32 %v585_v23, %v669_v44  ;;  %v672_v47 = vsub.f32 %v587_v25, %v669_v44  ;;  %v673_v48 = vsub.f32 %v628_v28, %v669_v44  ;;  %v670_v49 = vmul.f32 0.00390625, %v668_v45 }
 0x2a4   : > { %v674_v50 = vsub.f32 %v589_v27, %v670_v49  ;;  %v675_v51 = vsub.f32 %v591_v30, %v670_v49  ;;  %v676_v52 = vsub.f32 %v631_v35, %v670_v49  ;;  %v677_v53 = vmul.f32 %v671_v46, %v640_v1 }
 0x2a5   : > { %v678_v54 = vmul.f32 %v672_v47, %v644_v21  ;;  %v679_v55 = vmul.f32 %v673_v48, %v648_v22 }
 0x2a6   : > { %v683_v56 = vmul.f32 %v677_v53, %v677_v53  ;;  %v680_v57 = vmul.f32 %v674_v50, %v640_v1  ;;  %v681_v58 = vmul.f32 %v675_v51, %v644_v21  ;;  %v682_v59 = vmul.f32 %v676_v52, %v648_v22  ;;  %v726_v1 = vld [vmem:[#allocation9 + $0x8] sm:$0xff] }
 0x2a7   : > { %v684_v60 = vmul.f32 %v678_v54, %v678_v54  ;;  %v685_v61 = vmul.f32 %v679_v55, %v679_v55 }
 0x2a8   : > { %v686_v62 = vmul.f32 %v680_v57, %v680_v57  ;;  %v687_v63 = vmul.f32 %v681_v58, %v681_v58  ;;  %v688_v0 = vmul.f32 %v682_v59, %v682_v59 }
 0x2a9   : > { %v689_v2 = vadd.f32 %v684_v60, %v683_v56  ;;  %v690_v3 = vsel %vm659_vm12, %v685_v61, 0.0 }
 0x2aa   : > { %v694_v5 = vadd.f32 %v687_v63, %v686_v62  ;;  %v695_v6 = vsel %vm659_vm12, %v688_v0, 0.0 }
 0x2ab   : > { %v691_v4 = vadd.f32 %v690_v3, %v689_v2 }
 0x2ac   : > { %v696_v7 = vadd.f32 %v695_v6, %v694_v5 }
 0x2ad   : > { %692 = vadd.xlane.f32.xlu0 %v691_v4 }
 0x2b1   : > { %697 = vadd.xlane.f32.xlu0 %v696_v7 }
 0x33a   : > { %v693_v8 = vpop.xlane.xlu0 %692 }
 0x33b   : > { %v699_v9 = vmul.f32 0.00390625, %v693_v8 }
 0x33d   : > { %v703_v10 = vadd.f32 1e-05, %v699_v9 }
 0x33e   : > { %v698_v11 = vpop.xlane.xlu0 %697 }
 0x33f   : > { %1078 = vrsqrt.f32 %v703_v10  ;;  %v700_v12 = vmul.f32 0.00390625, %v698_v11 }
 0x341   : > { %v704_v13 = vadd.f32 1e-05, %v700_v12 }
 0x343   : > { %1080 = vrsqrt.f32 %v704_v13 }
 0x349   : > { %v1079_v15 = vpop.eup %1078 }
 0x34a   : > { %v707_v16 = vmul.f32 %v1079_v15, %v701_v14 }
 0x34c   : > { %711 = vperm.xlu1 %1070, %v707_v16  }
 0x34d   : > { %v1081_v18 = vpop.eup %1080 }
 0x34e   : > { %v708_v20 = vmul.f32 %v1081_v18, %v702_v17 }
 0x350   : > { %729 = vperm.xlu1 %1070, %v725_v19   ;;  %716 = vperm.xlu0 %1071, %v708_v20  }
 0x354   : > { %734 = vperm.xlu1 %1070, %v726_v1  }
 0x3cb   : > { %v712_v21 = vpop.permute.xlu1 %711 }
 0x3cc   : > { %v719_v22 = vmul.f32 %v712_v21, %v671_v46  ;;  %v720_v23 = vmul.f32 %v712_v21, %v672_v47  ;;  %v721_v24 = vmul.f32 %v712_v21, %v673_v48 }
 0x3cf   : > { %v717_v25 = vpop.permute.xlu0 %716  ;;  %v730_v26 = vpop.permute.xlu1 %729 }
 0x3d0   : > { %v737_v27 = vadd.f32 %v730_v26, %v719_v22  ;;  %v738_v28 = vadd.f32 %v730_v26, %v720_v23  ;;  %v739_v29 = vadd.f32 %v730_v26, %v721_v24  ;;  %v722_v30 = vmul.f32 %v717_v25, %v674_v50 }
 0x3d1   : > { %v723_v31 = vmul.f32 %v717_v25, %v675_v51  ;;  %v724_v32 = vmul.f32 %v717_v25, %v676_v52 }
 0x3d2   : > { %v743_v33 = vmax.f32 %v737_v27, 0.0  ;;  %v744_v34 = vmax.f32 %v738_v28, 0.0  ;;  %v745_v35 = vmax.f32 %v739_v29, 0.0 }
 0x3d3   : > { %v735_v36 = vpop.permute.xlu1 %734 }
 0x3d4   : > { %v740_v37 = vadd.f32 %v735_v36, %v722_v30  ;;  %v741_v38 = vadd.f32 %v735_v36, %v723_v31  ;;  %v742_v39 = vadd.f32 %v735_v36, %v724_v32  ;;  %v937_v40 = vpack.c.bf16 %v744_v34, %v743_v33 }
 0x3d5   : > { %v938_v41 = vpack.c.bf16 %v745_v35, %v745_v35 }
 0x3d6   : > { %v746_v42 = vmax.f32 %v740_v37, 0.0  ;;  %v747_v43 = vmax.f32 %v741_v38, 0.0  ;;  %v748_v44 = vmax.f32 %v742_v39, 0.0  ;;  %769 = vst [vmem:[%s296_s15] sm:$0xff] %v937_v40 }
 0x3d7   : > { %770 = vst.msk [vmem:[%s296_s15 + $0x8] sm:$0xf] %vm301_vm0, %v938_v41 }
 0x3d8   : > { %v939_v45 = vpack.c.bf16 %v747_v43, %v746_v42  ;;  %v940_v46 = vpack.c.bf16 %v748_v44, %v748_v44 }
 0x3da   : > { %771 = vst [vmem:[%s296_s15 + $0xc] sm:$0xff] %v939_v45  ;;  %772 = vst.msk [vmem:[%s296_s15 + $0x14] sm:$0xf] %vm301_vm0, %v940_v46 }
 0x3db   : > { %1237 = shalt.err (!%p1234_p12)
}
 0x3dc   : > { %s1238_s12 = scalar_lea.hbm %s1638_s24, 384  ;;  %s1242_s22 = scalar_lea.hbm %s1688_s5, 768 }
 0x3dd   : > { %p1239_p13 = scmp.ne.s32.totalorder %s1638_s24, %s1238_s12  ;;  %p1243_p9 = scmp.lt.u32.totalorder %s1638_s24, %s1688_s5 }
 0x3de   : > { %p1244_p4 = scmp.lt.u32.totalorder %s1242_s22, %s1238_s12  ;;  %p1246_p0 = scmp.lt.u32.totalorder %s1238_s12, %s1638_s24 }
 0x3df   : > { %p1240_p1 = pnand %p1239_p13, %p1705_p6 }
 0x3e0   : > { %p1245_p8 = por %p1244_p4, %p1243_p9 }
 0x3e1   : > { %p1241_p7 = pneg %p1240_p1 }
 0x3e2   : > { %p1247_p2 = por %p1246_p0, %p1245_p8 }
 0x3e4   : > { %p1248_p5 = pnand %p1247_p2, %p1241_p7 }
 0x3e6   : > { %1251 = shalt.err (!%p1248_p5)
}
 0x3e7   : > { %s1321_s30 = smov 192   ;;  %s1322_s11 = smov 12  }
 0x3e8   : > { %984 = dma.vmem_to_hbm [thread:$0]  (%p1705_p6), %s1632_s27, 384, %s1638_s24, %s774_s8, %s1321_s30, %s1321_s30, %s1322_s11  }
 0x3e9 PF: > { %s802_s7 = sand.u32 1, %s1286_s18   ;;  %p1706_p10 = scmp.ne.s32.totalorder %s1698_s14, 0 }
 0x3ea   : > { %p1707_p11 = scmp.ge.s32.totalorder %s1298_s21, 2  ;;  %s803_s25 = scalar_lea.sflag [#allocation5], %s802_s7 }
 0x3ec   : > { %p1004_p3 = pnand %p1707_p11, %p1706_p10 }
 0x3ee   : > { %1281 = dma.done.wait (!%p1004_p3), %s803_s25, 384  }
 0x3ef   : > { %1283 = vsyncadd (!%p1004_p3), %s803_s25, 4294966912  ;;  %p20_p12 = scmp.ge.s32.totalorder %s1489_s26, 4   ;;  %s1708_s18 = smov %s1290_s19 }
 0x3f0   : > { %s1709_s19 = smov %s1294_s20  ;;  %s1710_s20 = smov %s1500_s28 }
 0x3f1   : > { %s1711_s21 = smov %s1489_s26  ;;  %22 = sbr.rel (!%p20_p12) target bundleno = 7 (0x7), region = 101 }
 0x3f8   :  { %808 = vsyncpa [#allocation4], 1 }
 0x3f9   :  { %810 = vsyncpa [#allocation4 + $0x1], 1 }
 0x3fa   :  { %811 = vsyncpa [#allocation7], 1 }
 0x3fb   :  { %812 = vsyncpa [#allocation10], 1 }
 0x3fc   :  { %813 = vsyncpa [#allocation5], 1 }
 0x3fd   :  { %815 = vsyncpa [#allocation5 + $0x1], 1 }

// kernel: _lambda_.11
= control target key start
LH: loop header
LB: loop body
LE: loop exit
PB: predicated region body
PF: predicated region fallthrough
CT: control target
= control target key end

     0   :  { %10 = vsyncpa [#allocation4], 0  ;;  %s1827_s0 = inlined_call_operand.hbm [shape: bf16[2,16,342], index: 0, kind: input, shape index: {}]   ;;  %s1828_s1 = inlined_call_operand.hbm [shape: bf16[16,144], index: 1, kind: input, shape index: {}]   ;;  %s1829_s2 = inlined_call_operand.hbm [shape: f32[16,1], index: 2, kind: input, shape index: {}]   ;;  %s1830_s3 = inlined_call_operand.hbm [shape: f32[16,1], index: 3, kind: input, shape index: {}]   ;;  %s1831_s4 = inlined_call_operand.hbm [shape: f32[1,288], index: 4, kind: input, shape index: {}]   ;;  %s1832_s5 = inlined_call_operand.hbm [shape: bf16[2,16,288], index: 5, kind: output, shape index: {}]  }
   0x1   :  { %12 = vsyncpa [#allocation4 + $0x1], 0 }
   0x2   :  { %13 = vsyncpa [#allocation7], 0 }
   0x3   :  { %14 = vsyncpa [#allocation10], 0 }
   0x4   :  { %15 = vsyncpa [#allocation5], 0 }
   0x5   :  { %17 = vsyncpa [#allocation5 + $0x1], 0  ;;  %s1498_s18 = smov 0   ;;  %s1500_s19 = smov 0  }
   0x6   :  { %s1502_s20 = smov 0   ;;  %s1504_s21 = smov 0  }
   0x7 LB: > { %s1519_s22 = sadd.s32 4294967295, %s1445_s21   ;;  %s1011_s23 = sadd.s32 4294967294, %s1445_s21   ;;  %s1445_s21 = sphi %s1504_s21, %s1855_s21   ;;  %s1441_s20 = sphi %s1502_s20, %s1854_s20   ;;  %s1437_s19 = sphi %s1500_s19, %s1853_s19   ;;  %s1433_s18 = sphi %s1498_s18, %s1852_s18  }
   0x8   : > { %p43_p0 = scmp.ne.s32.totalorder %s1437_s19, %s1433_s18  ;;  %p1833_p1 = scmp.eq.s32.totalorder %s1519_s22, 0 }
   0x9   : > { %p157_p3 = scmp.eq.s32.totalorder %s1011_s23, 1  ;;  %p1012_p5 = scmp.ge.s32.totalorder %s1445_s21, 1 }
   0xa   : > { %p1528_p4 = por %p1833_p1, %p43_p0  ;;  %p164_p7 = scmp.lt.s32.totalorder %s1445_s21, 3 }
   0xb   : > { %p1533_p6 = por %p157_p3, %p43_p0  ;;  %s1447_s27 = smov [#allocation6]  }
   0xc   : > { %s1836_s24 = scalar_select %p1528_p4, 1, 0 }
   0xd   : > { %s1837_s25 = scalar_select %p1533_p6, 1, 0 }
   0xe   : > { %p1538_p8 = pnand %p1012_p5, %p164_p7  ;;  %s176_s28 = sshll.u32 %s1447_s27, 4  ;;  %s1542_s28 = int_to_ptr.vmem [resolvable:$true] %s176_s28 }
   0xf   : > { %s1448_s30 = smov [#allocation9]   ;;  %s1449_s7 = smov [#allocation8]  }
  0x10   : > { %s1838_s26 = scalar_select %p1538_p8, 1, 0 }
  0x11   : > { %p1090_p9 = pneg %p1538_p8  ;;  %s202_s6 = sshll.u32 %s1448_s30, 4  ;;  %s1553_s6 = int_to_ptr.vmem [resolvable:$true] %s202_s6 }
  0x12   : > { %s1555_s8 = sshll.u32 %s1449_s7, 4  ;;  %s1229_s11 = scalar_lea.hbm %s1828_s1, 256  ;;  %s190_s8 = int_to_ptr.vmem [resolvable:$true] %s1555_s8 }
  0x13   : > { %p1549_p11 = pnand %p1090_p9, %p1833_p1  ;;  %p1230_p12 = scmp.ne.s32.totalorder %s1828_s1, %s1229_s11 }
  0x14   : > { %p1236_p5 = scmp.lt.u32.totalorder %s1229_s11, %s1828_s1 }
  0x15   : > { %p1565_p13 = pneg %p1549_p11 }
  0x17   : > { %p1232_p0 = pnand %p1565_p13, %p1230_p12 }
  0x19   : > { %p1233_p3 = pneg %p1232_p0 }
  0x1b   : > { %p1238_p7 = pnand %p1236_p5, %p1233_p3 }
  0x1d   : > { %1241 = shalt.err (!%p1238_p7)
}
  0x1e   : > { %s1242_s17 = scalar_lea.vmem %s1542_s28, 256  ;;  %p1250_p2 = scmp.lt.s32.totalorder %s1542_s28, %s1542_s28 }
  0x1f   : > { %p1243_p9 = scmp.ne.s32.totalorder %s1542_s28, %s1242_s17  ;;  %p1251_p6 = scmp.lt.s32.totalorder %s1242_s17, %s1242_s17 }
  0x21   : > { %p1245_p10 = pnand %p1243_p9, %p1565_p13  ;;  %p1252_p12 = por %p1251_p6, %p1250_p2 }
  0x23   : > { %p1246_p1 = pneg %p1245_p10 }
  0x25   : > { %p1253_p0 = pnand %p1252_p12, %p1246_p1 }
  0x27   : > { %1256 = shalt.err (!%p1253_p0)
}
  0x28   : > { %s1450_s23 = smov 128   ;;  %s1451_s27 = smov 8  }
  0x29   : > { %1093 = dma.hbm_to_vmem [thread:$0]  (!%p1549_p11), %s1828_s1, 256, %s1542_s28, [#allocation7], %s1450_s23, %s1450_s23, %s1451_s27  }
  0x2a   : > { %s1257_s11 = scalar_lea.hbm %s1830_s3, 256 }
  0x2b   : > { %p1258_p1 = scmp.ne.s32.totalorder %s1830_s3, %s1257_s11  ;;  %p1264_p10 = scmp.lt.u32.totalorder %s1257_s11, %s1830_s3 }
  0x2d   : > { %p1260_p2 = pnand %p1258_p1, %p1565_p13 }
  0x2f   : > { %p1261_p6 = pneg %p1260_p2 }
  0x31   : > { %p1266_p3 = pnand %p1264_p10, %p1261_p6 }
  0x33   : > { %1269 = shalt.err (!%p1266_p3)
}
  0x34   : > { %s1270_s28 = scalar_lea.vmem %s1553_s6, 256  ;;  %p1278_p12 = scmp.lt.s32.totalorder %s1553_s6, %s1553_s6 }
  0x35   : > { %p1271_p5 = scmp.ne.s32.totalorder %s1553_s6, %s1270_s28  ;;  %p1279_p0 = scmp.lt.s32.totalorder %s1270_s28, %s1270_s28 }
  0x37   : > { %p1273_p7 = pnand %p1271_p5, %p1565_p13  ;;  %p1280_p1 = por %p1279_p0, %p1278_p12 }
  0x39   : > { %p1274_p9 = pneg %p1273_p7 }
  0x3b   : > { %p1281_p2 = pnand %p1280_p1, %p1274_p9 }
  0x3d   : > { %1284 = shalt.err (!%p1281_p2)
}
  0x3e   : > { %1099 = dma.hbm_to_vmem [thread:$0]  (!%p1549_p11), %s1830_s3, 256, %s1553_s6, [#allocation10], %s1450_s23, %s1450_s23, %s1451_s27  }
  0x3f   : > { %s1285_s10 = scalar_lea.hbm %s1829_s2, 256 }
  0x40   : > { %p1286_p6 = scmp.ne.s32.totalorder %s1829_s2, %s1285_s10  ;;  %p1292_p5 = scmp.lt.u32.totalorder %s1285_s10, %s1829_s2 }
  0x42   : > { %p1288_p10 = pnand %p1286_p6, %p1565_p13 }
  0x44   : > { %p1289_p3 = pneg %p1288_p10 }
  0x46   : > { %p1294_p7 = pnand %p1292_p5, %p1289_p3 }
  0x48   : > { %1297 = shalt.err (!%p1294_p7)
}
  0x49   : > { %s1298_s16 = scalar_lea.vmem %s190_s8, 256  ;;  %p1306_p1 = scmp.lt.s32.totalorder %s190_s8, %s190_s8 }
  0x4a   : > { %p1299_p9 = scmp.ne.s32.totalorder %s190_s8, %s1298_s16  ;;  %p1307_p2 = scmp.lt.s32.totalorder %s1298_s16, %s1298_s16 }
  0x4c   : > { %p1301_p12 = pnand %p1299_p9, %p1565_p13  ;;  %p1308_p4 = por %p1307_p2, %p1306_p1 }
  0x4e   : > { %p1302_p0 = pneg %p1301_p12 }
  0x50   : > { %p1309_p8 = pnand %p1308_p4, %p1302_p0 }
  0x52   : > { %1312 = shalt.err (!%p1309_p8)
}
  0x53   : > { %1096 = dma.hbm_to_vmem [thread:$0]  (!%p1549_p11), %s1829_s2, 256, %s190_s8, [#allocation7], %s1450_s23, %s1450_s23, %s1451_s27  }
  0x54   : > { %s1452_s17 = smov [#allocation11]   ;;  %s1313_s10 = scalar_lea.hbm %s1831_s4, 48 }
  0x55   : > { %s216_s30 = sshll.u32 %s1452_s17, 4  ;;  %p1314_p4 = scmp.ne.s32.totalorder %s1831_s4, %s1313_s10  ;;  %s217_s30 = int_to_ptr.vmem [resolvable:$true] %s216_s30 }
  0x56   : > { %p1320_p10 = scmp.lt.u32.totalorder %s1313_s10, %s1831_s4 }
  0x57   : > { %p1316_p8 = pnand %p1314_p4, %p1565_p13 }
  0x59   : > { %p1317_p6 = pneg %p1316_p8 }
  0x5b   : > { %p1322_p3 = pnand %p1320_p10, %p1317_p6 }
  0x5d   : > { %1325 = shalt.err (!%p1322_p3)
}
  0x5e   : > { %s1326_s8 = scalar_lea.vmem %s217_s30, 48  ;;  %s1333_s23 = scalar_lea.vmem %s217_s30, 64 }
  0x5f   : > { %p1327_p5 = scmp.ne.s32.totalorder %s217_s30, %s1326_s8  ;;  %p1334_p12 = scmp.lt.s32.totalorder %s217_s30, %s217_s30 }
  0x60   : > { %p1335_p0 = scmp.lt.s32.totalorder %s1333_s23, %s1326_s8 }
  0x61   : > { %p1329_p7 = pnand %p1327_p5, %p1565_p13 }
  0x62   : > { %p1336_p1 = por %p1335_p0, %p1334_p12 }
  0x63   : > { %p1330_p9 = pneg %p1329_p7 }
  0x65   : > { %p1337_p2 = pnand %p1336_p1, %p1330_p9 }
  0x67   : > { %1340 = shalt.err (!%p1337_p2)
}
  0x68   : > { %1102 = dma.hbm_to_vmem [thread:$0]  (!%p1549_p11), %s1831_s4, 48, %s217_s30, [#allocation10]  }
  0x69   : > { %s1656_s14 = sadd.s32 1, %s1445_s21   ;;  %s30_s6 = sadd.s32 1, %s1441_s20 }
  0x6a   : > { %s27_s29 = ssub.s32 %s1445_s21, %s1656_s14  ;;  %p37_p13 = scmp.ne.s32.totalorder %s1441_s20, %s1437_s19 }
  0x6b   : > { %p28_p4 = scmp.eq.s32.totalorder %s27_s29, 0  ;;  %p38_p8 = scmp.eq.s32.totalorder %s1445_s21, 0 }
  0x6c   : > { %p1841_p6 = scmp.eq.s32.totalorder %s1519_s22, 1  ;;  %p1115_p3 = scmp.lt.s32.totalorder %s1445_s21, 2 }
  0x6d   : > { %s1672_s17 = scalar_select %p28_p4, %s1441_s20, %s30_s6  }
  0x6e   : > { %p1666_p10 = por %p1841_p6, %p37_p13  ;;  %p39_p5 = por %p38_p8, %p37_p13 }
  0x6f   : > { %s227_s7 = sand.u32 1, %s1441_s20   ;;  %s1067_s30 = smul.u32 384, %s1445_s21 }
  0x70   : > { %s1066_s9 = smul.u32 24, %s227_s7  ;;  %p1676_p11 = pnand %p1115_p3, %p39_p5 }
  0x71   : > { %s1683_s13 = scalar_lea.hbm %s1827_s0, %s1067_s30  ;;  %s1687_s23 = scalar_lea.sflag [#allocation4], %s227_s7 }
  0x72   : > { %s231_s15 = scalar_lea.vmem [#allocation3], %s1066_s9  ;;  %s1341_s27 = scalar_lea.hbm %s1683_s13, 384 }
  0x73   : > { %s238_s8 = sshll.u32 %s231_s15, 4  ;;  %p1342_p7 = scmp.ne.s32.totalorder %s1683_s13, %s1341_s27  ;;  %s1685_s8 = int_to_ptr.vmem [resolvable:$true] %s238_s8 }
  0x74   : > { %p1343_p9 = pneg %p1676_p11  ;;  %s1346_s29 = scalar_lea.hbm %s1827_s0, 768 }
  0x75   : > { %p1347_p1 = scmp.lt.u32.totalorder %s1683_s13, %s1827_s0  ;;  %p1348_p2 = scmp.lt.u32.totalorder %s1346_s29, %s1341_s27 }
  0x76   : > { %p1344_p12 = pnand %p1343_p9, %p1342_p7  ;;  %p1350_p4 = scmp.lt.u32.totalorder %s1341_s27, %s1683_s13 }
  0x77   : > { %p1349_p13 = por %p1348_p2, %p1347_p1 }
  0x78   : > { %p1345_p0 = pneg %p1344_p12 }
  0x79   : > { %p1351_p8 = por %p1350_p4, %p1349_p13 }
  0x7b   : > { %p1352_p6 = pnand %p1351_p8, %p1345_p0 }
  0x7d   : > { %1355 = shalt.err (!%p1352_p6)
}
  0x7e   : > { %s1356_s7 = scalar_lea.vmem %s1685_s8, 384  ;;  %s1453_s9 = smov [#allocation3]  }
  0x7f   : > { %p1357_p3 = scmp.ne.s32.totalorder %s1685_s8, %s1356_s7  ;;  %s1361_s12 = sshll.u32 %s1453_s9, 4  ;;  %s1362_s12 = int_to_ptr.vmem [resolvable:$false] %s1361_s12 }
  0x80   : > { %s1363_s15 = scalar_lea.vmem %s1362_s12, 768  ;;  %p1364_p12 = scmp.lt.s32.totalorder %s1685_s8, %s1362_s12 }
  0x81   : > { %p1359_p5 = pnand %p1357_p3, %p1343_p9  ;;  %p1365_p1 = scmp.lt.s32.totalorder %s1363_s15, %s1356_s7 }
  0x83   : > { %p1360_p7 = pneg %p1359_p5  ;;  %p1366_p2 = por %p1365_p1, %p1364_p12 }
  0x85   : > { %p1367_p13 = pnand %p1366_p2, %p1360_p7 }
  0x87   : > { %1370 = shalt.err (!%p1367_p13)
}
  0x88   : > { %s1454_s27 = smov 192   ;;  %s1455_s16 = smov 12  }
  0x89   : > { %1106 = dma.hbm_to_vmem [thread:$0]  (!%p1676_p11), %s1683_s13, 384, %s1685_s8, %s1687_s23, %s1454_s27, %s1454_s27, %s1455_s16  }
  0x8a   : > { %p1844_p9 = scmp.ne.s32.totalorder %s1838_s26, 0 }
  0x8b   : > { %s1718_s6 = sand.u32 (!%p1844_p9), 1, %s1437_s19   ;;  %p1845_p0 = scmp.ne.s32.totalorder (!%p1844_p9), %s1836_s24, 0 }
  0x8c   : > { %250 = sbr.rel (%p1844_p9) target bundleno = 1059 (0x423), region = 40  ;;  %s253_s30 = scalar_lea.sflag (!%p1844_p9), [#allocation4], %s1718_s6 }
  0x8d   : > { %s1068_s29 = smul.u32 (!%p1844_p9), 24, %s1718_s6 }
  0x8f   : > { %s1724_s11 = scalar_lea.vmem (!%p1844_p9), [#allocation3], %s1068_s29 }
  0x93   : > { %1416 = dma.done.wait (%p1845_p0), %s253_s30, 384  }
  0x94   : > { %1418 = vsyncadd (%p1845_p0), %s253_s30, 4294966912  ;;  %p1846_p11 = scmp.eq.s32.totalorder %s1519_s22, 0 }
  0x96   : > { %1420 = dma.done.wait (%p1846_p11), [#allocation7], 512   ;;  %p1847_p4 = pmov %p1846_p11 }
  0x98   : > { %1422 = vsyncadd (%p1847_p4), [#allocation7], 4294966784  ;;  %p1848_p8 = pmov %p1847_p4 }
  0x99   : > { %p1849_p6 = pmov %p1847_p4 }
  0x9a   : > { %1424 = dma.done.wait (%p1848_p8), [#allocation10], 304  }
  0x9b   : > { %1426 = vsyncadd (%p1849_p6), [#allocation10], 4294966992  ;;  %v1456_v0 = vmov 0   ;;  %v1174_v1 = vld [vmem:[%s1724_s11 + $0x4] ss:$12 sps:$4 sm:$0xff]   ;;  %s1457_s24 = smov 127   ;;  %v708_v63 = vlaneseq }
  0x9c   : > { %665 = vmatprep.subr.bf16.mxu1 %v1456_v0  ;;  %1172 = vset.pattern.permute.xlu1 %v1456_v0  ;;  %v1176_v2 = vld [vmem:[%s1724_s11] ss:$12 sps:$4 sm:$0xff]   ;;  %v1177_v3 = vld [vmem:[%s1724_s11 + $0x8] ss:$12 sps:$4 sm:$0xff]   ;;  %s1458_s26 = smov 126   ;;  %vm322_vm0 = vcmask 261120  }
  0x9d   : > { %1173 = vset.pattern.permute.xlu0 %v1456_v0  ;;  %622 = vmatprep.subr.bf16.mxu0 %v1174_v1  ;;  %v1178_v4 = vld [vmem:[%s1724_s11 + $0x8] ss:$12 sps:$4 sm:$0xff]   ;;  %s1459_s10 = smov 110   ;;  %s1460_s13 = smov 109   ;;  %vm618_vm1 = vcmask 130048   ;;  %vm347_vm2 = vcmask 1039360  }
  0x9e   : > { %343 = vrot.lane.b32.xlu0 %v1174_v1, %s1457_s24  ;;  %341 = vrot.lane.b32.xlu1 %v1176_v2, %s1457_s24  ;;  %v1185_v5 = vld [vmem:[%s1724_s11 + $0x8] ss:$12 sps:$4 sm:$0xff]   ;;  %s1461_s8 = smov 108   ;;  %s1462_s23 = smov 92   ;;  %vm379_vm3 = vcmask 1031168   ;;  %vm411_vm4 = vcmask 900096  }
  0x9f   : > { %623 = vmatpush1.bf16.msra.mxu0 %v1176_v2  ;;  %v1179_v6 = vld [vmem:[%s1724_s11 + $0x8] ss:$12 sps:$4 sm:$0xff]   ;;  %323 = vst.msk [vmem:[#allocation2 + $0x10] sm:$0xff] %vm322_vm0, %v1185_v5  ;;  %s1463_s7 = smov 91   ;;  %s1464_s9 = smov 90   ;;  %vm443_vm5 = vcmask 891904  }
  0xa0   : > { %v1180_v7 = vld [vmem:[%s1724_s11 + $0x8] ss:$12 sps:$4 sm:$0xff]   ;;  %vm475_vm6 = vcmask 883712   ;;  %vm507_vm7 = vcmask 752640   ;;  %vm539_vm8 = vcmask 744448   ;;  %vm571_vm9 = vcmask 736256  }
  0xa1   : > { %v1181_v9 = vld [vmem:[%s1724_s11 + $0x8] ss:$12 sps:$4 sm:$0xff]   ;;  %v1186_v61 = vld [vmem:[#allocation6] ss:$8 sps:$4 sm:$0xff]   ;;  %vm882_vm10 = vcmask 257024   ;;  %s1069_s12 = smul.u32 384, %s1519_s22 }
  0xa2   : > { %345 = vrot.lane.b32.xlu0 %v1177_v3, %s1457_s24  ;;  %375 = vrot.lane.b32.xlu1 %v1174_v1, %s1458_s26  ;;  %v1182_v10 = vld [vmem:[%s1724_s11 + $0x8] ss:$12 sps:$4 sm:$0xff]   ;;  %s298_s15 = scalar_lea.vmem [#allocation12], %s1068_s29  ;;  %s887_s22 = scalar_lea.sflag [#allocation5], %s1718_s6 }
  0xa3   : > { %v1183_v11 = vld [vmem:[%s1724_s11 + $0x8] ss:$12 sps:$4 sm:$0xff]   ;;  %s900_s27 = sshll.u32 %s298_s15, 4  ;;  %s1465_s24 = smov [#allocation12]   ;;  %s1782_s27 = int_to_ptr.vmem [resolvable:$true] %s900_s27 }
  0xa4   : > { %v1188_v12 = vld [vmem:[#allocation6 + $0x4] ss:$8 sps:$4 sm:$0xff]   ;;  %v706_v3 = vld [vmem:[#allocation11] sm:$0x7]  ;;  %s1371_s29 = scalar_lea.vmem %s1782_s27, 384 }
  0xa5   : > { %1054 = vmatprep.mubr.msk.bf16.mxu1 %vm618_vm1, %v1188_v12  ;;  %1053 = vmatprep.mubr.msk.bf16.mxu0 %vm618_vm1, %v1188_v12  ;;  %v1184_v13 = vld [vmem:[%s1724_s11 + $0x8] ss:$12 sps:$4 sm:$0xff]   ;;  %s1780_s11 = scalar_lea.hbm %s1832_s5, %s1069_s12  ;;  %p1372_p3 = scmp.ne.s32.totalorder %s1782_s27, %s1371_s29 }
  0xa6   : > { %377 = vrot.lane.b32.xlu0 %v1178_v4, %s1458_s26  ;;  %373 = vrot.lane.b32.xlu1 %v1176_v2, %s1458_s26  ;;  %v584_v8 = vld [vmem:[#allocation2 + $0x10] sm:$0xff]  ;;  %s1375_s26 = sshll.u32 %s1465_s24, 4  ;;  %s1376_s26 = int_to_ptr.vmem [resolvable:$false] %s1375_s26 }
  0xa7   : > { %666 = vmatpush1.bf16.msra.mxu1 %v584_v8  ;;  %p1373_p5 = pnand %p1372_p3, %p1666_p10  ;;  %p1378_p12 = scmp.lt.s32.totalorder %s1782_s27, %s1376_s26 }
  0xa8   : > { %667 = vmatprep.subr.bf16.mxu1 %v1456_v0 }
  0xa9   : > { %p1374_p7 = pneg %p1373_p5 }
  0xaa   : > { %407 = vrot.lane.b32.xlu0 %v1174_v1, %s1459_s10  ;;  %409 = vrot.lane.b32.xlu1 %v1179_v6, %s1459_s10 }
  0xae   : > { %405 = vrot.lane.b32.xlu0 %v1176_v2, %s1459_s10  ;;  %439 = vrot.lane.b32.xlu1 %v1174_v1, %s1460_s13  ;;  %s1377_s10 = scalar_lea.vmem %s1376_s26, 768 }
  0xaf   : > { %p1379_p1 = scmp.lt.s32.totalorder %s1377_s10, %s1371_s29 }
  0xb1   : > { %p1380_p2 = por %p1379_p1, %p1378_p12 }
  0xb2   : > { %441 = vrot.lane.b32.xlu0 %v1180_v7, %s1460_s13  ;;  %437 = vrot.lane.b32.xlu1 %v1176_v2, %s1460_s13 }
  0xb3   : > { %p1381_p13 = pnand %p1380_p2, %p1374_p7 }
  0xb6   : > { %471 = vrot.lane.b32.xlu0 %v1174_v1, %s1461_s8  ;;  %473 = vrot.lane.b32.xlu1 %v1181_v9, %s1461_s8 }
  0xba   : > { %469 = vrot.lane.b32.xlu0 %v1176_v2, %s1461_s8  ;;  %503 = vrot.lane.b32.xlu1 %v1174_v1, %s1462_s23 }
  0xbe   : > { %505 = vrot.lane.b32.xlu0 %v1182_v10, %s1462_s23  ;;  %501 = vrot.lane.b32.xlu1 %v1176_v2, %s1462_s23 }
  0xc2   : > { %535 = vrot.lane.b32.xlu0 %v1174_v1, %s1463_s7  ;;  %537 = vrot.lane.b32.xlu1 %v1183_v11, %s1463_s7 }
  0xc6   : > { %533 = vrot.lane.b32.xlu0 %v1176_v2, %s1463_s7  ;;  %567 = vrot.lane.b32.xlu1 %v1174_v1, %s1464_s9  ;;  %v709_v1 = vshrl.u32 %v708_v63, 7 }
  0xc8   : > { %v714_v4 = vsub.s32 1, %v709_v1  ;;  %v718_v7 = vsub.s32 2, %v709_v1 }
  0xca   : > { %569 = vrot.lane.b32.xlu0 %v1184_v13, %s1464_s9  ;;  %565 = vrot.lane.b32.xlu1 %v1176_v2, %s1464_s9  ;;  %v710_v2 = vsub.s32 0, %v709_v1  ;;  %v715_v6 = vrot.slane %v706_v3, %v714_v4  ;;  %v719_v13 = vrot.slane %v706_v3, %v718_v7  ;;  %v795_v4 = vld [vmem:[#allocation9] sm:$0xff] }
  0xcc   : > { %v711_v5 = vrot.slane %v706_v3, %v710_v2  ;;  %v772_v2 = vld [vmem:[#allocation8 + $0x8] sm:$0xff] }
 0x110   : > { %v344_v14 = vpop.permute.xlu0 %343  ;;  %v342_v15 = vpop.permute.xlu1 %341 }
 0x111   : > { %v348_v16 = vsel %vm347_vm2, %v342_v15, %v344_v14 }
 0x114   : > { %v346_v17 = vpop.permute.xlu0 %345  ;;  %v376_v19 = vpop.permute.xlu1 %375 }
 0x115   : > { %v349_v18 = vsel %vm347_vm2, %v344_v14, %v346_v17  ;;  %355 = vst.msk [vmem:[#allocation2 + $0x28] sm:$0xff] %vm322_vm0, %v346_v17 }
 0x116   : > { %624 = vmatprep.subr.bf16.mxu0 %v349_v18 }
 0x117   : > { %625 = vmatpush1.bf16.msra.mxu0 %v348_v16 }
 0x118   : > { %v378_v20 = vpop.permute.xlu0 %377  ;;  %v374_v22 = vpop.permute.xlu1 %373 }
 0x119   : > { %v381_v21 = vsel %vm379_vm3, %v376_v19, %v378_v20  ;;  %387 = vst.msk [vmem:[#allocation2 + $0x40] sm:$0xff] %vm322_vm0, %v378_v20  ;;  %v380_v23 = vsel %vm379_vm3, %v374_v22, %v376_v19 }
 0x11a   : > { %626 = vmatprep.subr.bf16.mxu0 %v381_v21 }
 0x11b   : > { %627 = vmatpush1.bf16.msra.mxu0 %v380_v23 }
 0x11c   : > { %v408_v24 = vpop.permute.xlu0 %407  ;;  %v587_v25 = vld [vmem:[#allocation2 + $0x28] sm:$0xff]  ;;  %v410_v26 = vpop.permute.xlu1 %409 }
 0x11d   : > { %668 = vmatpush1.bf16.msra.mxu1 %v587_v25  ;;  %v413_v27 = vsel %vm411_vm4, %v408_v24, %v410_v26  ;;  %419 = vst.msk [vmem:[#allocation2 + $0x58] sm:$0xff] %vm322_vm0, %v410_v26 }
 0x11e   : > { %669 = vmatprep.subr.bf16.mxu1 %v1456_v0  ;;  %628 = vmatprep.subr.bf16.mxu0 %v413_v27 }
 0x120   : > { %v406_v28 = vpop.permute.xlu0 %405  ;;  %v590_v29 = vld [vmem:[#allocation2 + $0x40] sm:$0xff]  ;;  %v440_v31 = vpop.permute.xlu1 %439 }
 0x121   : > { %v412_v30 = vsel %vm411_vm4, %v406_v28, %v408_v24  ;;  %670 = vmatpush1.bf16.msra.mxu1 %v590_v29 }
 0x122   : > { %671 = vmatprep.subr.bf16.mxu1 %v1456_v0  ;;  %629 = vmatpush1.bf16.msra.mxu0 %v412_v30 }
 0x124   : > { %v442_v32 = vpop.permute.xlu0 %441  ;;  %v438_v34 = vpop.permute.xlu1 %437  ;;  %v593_v35 = vld [vmem:[#allocation2 + $0x58] sm:$0xff] }
 0x125   : > { %v445_v33 = vsel %vm443_vm5, %v440_v31, %v442_v32  ;;  %451 = vst.msk [vmem:[#allocation2 + $0x70] sm:$0xff] %vm322_vm0, %v442_v32  ;;  %v444_v36 = vsel %vm443_vm5, %v438_v34, %v440_v31  ;;  %672 = vmatpush1.bf16.msra.mxu1 %v593_v35 }
 0x126   : > { %630 = vmatprep.subr.bf16.mxu0 %v445_v33  ;;  %673 = vmatprep.subr.bf16.mxu1 %v1456_v0 }
 0x127   : > { %631 = vmatpush1.bf16.msra.mxu0 %v444_v36 }
 0x128   : > { %v472_v37 = vpop.permute.xlu0 %471  ;;  %v474_v38 = vpop.permute.xlu1 %473 }
 0x129   : > { %v477_v39 = vsel %vm475_vm6, %v472_v37, %v474_v38  ;;  %483 = vst.msk [vmem:[#allocation2 + $0x88] sm:$0xff] %vm322_vm0, %v474_v38 }
 0x12a   : > { %632 = vmatprep.subr.bf16.mxu0 %v477_v39 }
 0x12c   : > { %v470_v40 = vpop.permute.xlu0 %469  ;;  %v596_v41 = vld [vmem:[#allocation2 + $0x70] sm:$0xff]  ;;  %v504_v43 = vpop.permute.xlu1 %503 }
 0x12d   : > { %v476_v42 = vsel %vm475_vm6, %v470_v40, %v472_v37  ;;  %674 = vmatpush1.bf16.msra.mxu1 %v596_v41 }
 0x12e   : > { %675 = vmatprep.subr.bf16.mxu1 %v1456_v0  ;;  %633 = vmatpush1.bf16.msra.mxu0 %v476_v42 }
 0x130   : > { %v506_v44 = vpop.permute.xlu0 %505  ;;  %v502_v46 = vpop.permute.xlu1 %501  ;;  %v599_v47 = vld [vmem:[#allocation2 + $0x88] sm:$0xff] }
 0x131   : > { %v509_v45 = vsel %vm507_vm7, %v504_v43, %v506_v44  ;;  %515 = vst.msk [vmem:[#allocation2 + $0xa0] sm:$0xff] %vm322_vm0, %v506_v44  ;;  %v508_v48 = vsel %vm507_vm7, %v502_v46, %v504_v43  ;;  %676 = vmatpush1.bf16.msra.mxu1 %v599_v47 }
 0x132   : > { %634 = vmatprep.subr.bf16.mxu0 %v509_v45  ;;  %677 = vmatprep.subr.bf16.mxu1 %v1456_v0 }
 0x133   : > { %635 = vmatpush1.bf16.msra.mxu0 %v508_v48 }
 0x134   : > { %v536_v49 = vpop.permute.xlu0 %535  ;;  %v538_v50 = vpop.permute.xlu1 %537 }
 0x135   : > { %v541_v51 = vsel %vm539_vm8, %v536_v49, %v538_v50  ;;  %547 = vst.msk [vmem:[#allocation2 + $0xb8] sm:$0xff] %vm322_vm0, %v538_v50 }
 0x136   : > { %636 = vmatprep.subr.bf16.mxu0 %v541_v51 }
 0x138   : > { %v534_v52 = vpop.permute.xlu0 %533  ;;  %v602_v53 = vld [vmem:[#allocation2 + $0xa0] sm:$0xff]  ;;  %v568_v55 = vpop.permute.xlu1 %567 }
 0x139   : > { %v540_v54 = vsel %vm539_vm8, %v534_v52, %v536_v49  ;;  %678 = vmatpush1.bf16.msra.mxu1 %v602_v53 }
 0x13a   : > { %679 = vmatprep.subr.bf16.mxu1 %v1456_v0  ;;  %637 = vmatpush1.bf16.msra.mxu0 %v540_v54 }
 0x13c   : > { %v570_v56 = vpop.permute.xlu0 %569  ;;  %v566_v58 = vpop.permute.xlu1 %565  ;;  %v605_v59 = vld [vmem:[#allocation2 + $0xb8] sm:$0xff] }
 0x13d   : > { %v573_v57 = vsel %vm571_vm9, %v568_v55, %v570_v56  ;;  %579 = vst.msk [vmem:[#allocation2 + $0xd0] sm:$0xff] %vm322_vm0, %v570_v56  ;;  %v572_v60 = vsel %vm571_vm9, %v566_v58, %v568_v55  ;;  %680 = vmatpush1.bf16.msra.mxu1 %v605_v59 }
 0x13e   : > { %638 = vmatprep.subr.bf16.mxu0 %v573_v57  ;;  %681 = vmatprep.subr.bf16.mxu1 %v1456_v0 }
 0x13f   : > { %639 = vmatpush1.bf16.msra.mxu0 %v572_v60 }
 0x142   : > { %655 = vmatmul.mubr.bf16.vlgmr.msra.gmra.mrb[0].mxu0 %v1186_v61 }
 0x144   : > { %v608_v62 = vld [vmem:[#allocation2 + $0xd0] sm:$0xff] }
 0x145   : > { %682 = vmatpush1.bf16.msra.mxu1 %v608_v62  ;;  %v771_v62 = vld [vmem:[#allocation8] sm:$0xff] }
 0x148   : > { %698 = vmatmul.mubr.bf16.vlgmr.msra.gmra.mrb[0].mxu1 %v1186_v61 }
 0x215   : > { %v656_v8 = vpop.f32.mrb[0].mxu0 }
 0x216   : > { %v723_v9 = vmul.f32 %v711_v5, %v656_v8  ;;  %v658_v10 = vpop.f32.mrb[1].mxu0 }
 0x217   : > { %v724_v11 = vmul.f32 %v715_v6, %v658_v10  ;;  %v660_v12 = vpop.f32.mrb[2].mxu0 }
 0x218   : > { %v726_v0 = vmul.f32 %v711_v5, %v660_v12  ;;  %v662_v14 = vpop.f32.mrb[3].mxu0 }
 0x219   : > { %v727_v15 = vmul.f32 %v715_v6, %v662_v14  ;;  %v729_v16 = vadd.f32 %v724_v11, %v723_v9 }
 0x21b   : > { %v699_v17 = vpop.f32.mrb[0].mxu1  ;;  %v734_v18 = vadd.f32 %v727_v15, %v726_v0 }
 0x21c   : > { %v725_v19 = vmul.f32 %v719_v13, %v699_v17  ;;  %v701_v20 = vpop.f32.mrb[1].mxu1 }
 0x21d   : > { %v702_v21 = vpop.f32.mrb[2].mxu1 }
 0x21e   : > { %v728_v22 = vmul.f32 %v719_v13, %v702_v21  ;;  %v704_v23 = vpop.f32.mrb[3].mxu1  ;;  %v730_v24 = vsel %vm322_vm0, %v725_v19, 0.0 }
 0x21f   : > { %v731_v25 = vadd.f32 %v730_v24, %v729_v16 }
 0x220   : > { %v735_v26 = vsel %vm322_vm0, %v728_v22, 0.0 }
 0x221   : > { %732 = vadd.xlane.f32.xlu0 %v731_v25  ;;  %v736_v27 = vadd.f32 %v735_v26, %v734_v18 }
 0x223   : > { %737 = vadd.xlane.f32.xlu1 %v736_v27 }
 0x2ae   : > { %v733_v28 = vpop.xlane.xlu0 %732 }
 0x2af   : > { %v739_v29 = vmul.f32 0.00390625, %v733_v28 }
 0x2b0   : > { %v738_v30 = vpop.xlane.xlu1 %737 }
 0x2b1   : > { %v741_v31 = vsub.f32 %v656_v8, %v739_v29  ;;  %v742_v32 = vsub.f32 %v658_v10, %v739_v29  ;;  %v743_v33 = vsub.f32 %v699_v17, %v739_v29  ;;  %v740_v34 = vmul.f32 0.00390625, %v738_v30 }
 0x2b3   : > { %v744_v35 = vsub.f32 %v660_v12, %v740_v34  ;;  %v745_v36 = vsub.f32 %v662_v14, %v740_v34  ;;  %v746_v37 = vsub.f32 %v702_v21, %v740_v34  ;;  %v747_v38 = vmul.f32 %v741_v31, %v711_v5 }
 0x2b4   : > { %v748_v39 = vmul.f32 %v742_v32, %v715_v6  ;;  %v749_v40 = vmul.f32 %v743_v33, %v719_v13 }
 0x2b5   : > { %v753_v41 = vmul.f32 %v747_v38, %v747_v38  ;;  %v750_v42 = vmul.f32 %v744_v35, %v711_v5  ;;  %v751_v43 = vmul.f32 %v745_v36, %v715_v6  ;;  %v752_v44 = vmul.f32 %v746_v37, %v719_v13  ;;  %v796_v6 = vld [vmem:[#allocation9 + $0x8] sm:$0xff] }
 0x2b6   : > { %v754_v45 = vmul.f32 %v748_v39, %v748_v39  ;;  %v755_v46 = vmul.f32 %v749_v40, %v749_v40 }
 0x2b7   : > { %v756_v47 = vmul.f32 %v750_v42, %v750_v42  ;;  %v757_v48 = vmul.f32 %v751_v43, %v751_v43  ;;  %v758_v49 = vmul.f32 %v752_v44, %v752_v44 }
 0x2b8   : > { %v759_v50 = vadd.f32 %v754_v45, %v753_v41  ;;  %v760_v51 = vsel %vm322_vm0, %v755_v46, 0.0 }
 0x2b9   : > { %v764_v53 = vadd.f32 %v757_v48, %v756_v47  ;;  %v765_v54 = vsel %vm322_vm0, %v758_v49, 0.0 }
 0x2ba   : > { %v761_v52 = vadd.f32 %v760_v51, %v759_v50 }
 0x2bb   : > { %v766_v55 = vadd.f32 %v765_v54, %v764_v53 }
 0x2bc   : > { %762 = vadd.xlane.f32.xlu0 %v761_v52 }
 0x2c0   : > { %767 = vadd.xlane.f32.xlu0 %v766_v55 }
 0x349   : > { %v763_v56 = vpop.xlane.xlu0 %762 }
 0x34a   : > { %v769_v57 = vmul.f32 0.00390625, %v763_v56 }
 0x34c   : > { %v773_v58 = vadd.f32 1e-05, %v769_v57 }
 0x34d   : > { %v768_v59 = vpop.xlane.xlu0 %767 }
 0x34e   : > { %1189 = vrsqrt.f32 %v773_v58  ;;  %v770_v60 = vmul.f32 0.00390625, %v768_v59 }
 0x350   : > { %v774_v61 = vadd.f32 1e-05, %v770_v60 }
 0x352   : > { %1191 = vrsqrt.f32 %v774_v61 }
 0x358   : > { %v1190_v63 = vpop.eup %1189 }
 0x359   : > { %v777_v1 = vmul.f32 %v1190_v63, %v771_v62 }
 0x35b   : > { %781 = vperm.xlu1 %1172, %v777_v1  }
 0x35c   : > { %v1192_v3 = vpop.eup %1191 }
 0x35d   : > { %v778_v5 = vmul.f32 %v1192_v3, %v772_v2 }
 0x35f   : > { %799 = vperm.xlu1 %1172, %v795_v4   ;;  %786 = vperm.xlu0 %1173, %v778_v5  }
 0x363   : > { %804 = vperm.xlu1 %1172, %v796_v6  }
 0x3da   : > { %v782_v7 = vpop.permute.xlu1 %781 }
 0x3db   : > { %v789_v8 = vmul.f32 %v782_v7, %v741_v31  ;;  %v790_v9 = vmul.f32 %v782_v7, %v742_v32  ;;  %v791_v10 = vmul.f32 %v782_v7, %v743_v33 }
 0x3de   : > { %v787_v11 = vpop.permute.xlu0 %786  ;;  %v800_v12 = vpop.permute.xlu1 %799 }
 0x3df   : > { %v807_v13 = vadd.f32 %v800_v12, %v789_v8  ;;  %v808_v0 = vadd.f32 %v800_v12, %v790_v9  ;;  %v809_v14 = vadd.f32 %v800_v12, %v791_v10  ;;  %v792_v15 = vmul.f32 %v787_v11, %v744_v35 }
 0x3e0   : > { %v793_v16 = vmul.f32 %v787_v11, %v745_v36  ;;  %v794_v17 = vmul.f32 %v787_v11, %v746_v37 }
 0x3e1   : > { %v813_v18 = vsub.f32 0.0, %v807_v13  ;;  %v814_v19 = vsub.f32 0.0, %v808_v0  ;;  %v815_v20 = vsub.f32 0.0, %v809_v14 }
 0x3e2   : > { %v805_v21 = vpop.permute.xlu1 %804 }
 0x3e3   : > { %v819_v22 = vmul.f32 1.442695, %v813_v18  ;;  %v810_v23 = vadd.f32 %v805_v21, %v792_v15  ;;  %v811_v24 = vadd.f32 %v805_v21, %v793_v16  ;;  %v812_v25 = vadd.f32 %v805_v21, %v794_v17 }
 0x3e4   : > { %v821_v26 = vmul.f32 1.442695, %v814_v19  ;;  %v823_v27 = vmul.f32 1.442695, %v815_v20 }
 0x3e5   : > { %1193 = vpow2.f32 %v819_v22  ;;  %v816_v28 = vsub.f32 0.0, %v810_v23  ;;  %v817_v29 = vsub.f32 0.0, %v811_v24  ;;  %v818_v30 = vsub.f32 0.0, %v812_v25 }
 0x3e6   : > { %1195 = vpow2.f32 %v821_v26 }
 0x3e7   : > { %1197 = vpow2.f32 %v823_v27  ;;  %v825_v31 = vmul.f32 1.442695, %v816_v28  ;;  %v827_v32 = vmul.f32 1.442695, %v817_v29  ;;  %v829_v33 = vmul.f32 1.442695, %v818_v30 }
 0x3e9   : > { %1199 = vpow2.f32 %v825_v31 }
 0x3ea   : > { %1201 = vpow2.f32 %v827_v32 }
 0x3eb   : > { %1203 = vpow2.f32 %v829_v33 }
 0x3ef   : > { %v1194_v34 = vpop.eup %1193 }
 0x3f0   : > { %v1196_v35 = vpop.eup %1195  ;;  %v831_v36 = vadd.f32 1.0, %v1194_v34 }
 0x3f1   : > { %v1198_v37 = vpop.eup %1197  ;;  %v832_v38 = vadd.f32 1.0, %v1196_v35 }
 0x3f2   : > { %v833_v39 = vadd.f32 1.0, %v1198_v37  ;;  %1205 = vrcp.f32 %v831_v36 }
 0x3f3   : > { %v1200_v40 = vpop.eup %1199  ;;  %1207 = vrcp.f32 %v832_v38 }
 0x3f4   : > { %v1202_v41 = vpop.eup %1201  ;;  %1209 = vrcp.f32 %v833_v39  ;;  %v834_v42 = vadd.f32 1.0, %v1200_v40 }
 0x3f5   : > { %v1204_v43 = vpop.eup %1203  ;;  %v835_v44 = vadd.f32 1.0, %v1202_v41 }
 0x3f6   : > { %v836_v45 = vadd.f32 1.0, %v1204_v43  ;;  %1211 = vrcp.f32 %v834_v42 }
 0x3f7   : > { %1213 = vrcp.f32 %v835_v44 }
 0x3f8   : > { %1215 = vrcp.f32 %v836_v45 }
 0x3fc   : > { %v1206_v46 = vpop.eup %1205 }
 0x3fd   : > { %v1208_v47 = vpop.eup %1207  ;;  %v838_v48 = vmul.f32 12.0, %v1206_v46 }
 0x3fe   : > { %v1210_v49 = vpop.eup %1209  ;;  %v840_v50 = vmul.f32 12.0, %v1208_v47 }
 0x3ff   : > { %v842_v51 = vmul.f32 12.0, %v1210_v49  ;;  %v849_v52 = vmul.f32 1.442695, %v838_v48 }
 0x400   : > { %v1212_v53 = vpop.eup %1211  ;;  %v851_v54 = vmul.f32 1.442695, %v840_v50 }
 0x401   : > { %v1214_v55 = vpop.eup %1213  ;;  %1217 = vpow2.f32 %v849_v52  ;;  %v853_v56 = vmul.f32 1.442695, %v842_v51  ;;  %v844_v57 = vmul.f32 12.0, %v1212_v53 }
 0x402   : > { %v1216_v58 = vpop.eup %1215  ;;  %1219 = vpow2.f32 %v851_v54  ;;  %v846_v59 = vmul.f32 12.0, %v1214_v55 }
 0x403   : > { %1221 = vpow2.f32 %v853_v56  ;;  %v848_v60 = vmul.f32 12.0, %v1216_v58  ;;  %v855_v61 = vmul.f32 1.442695, %v844_v57 }
 0x404   : > { %v857_v62 = vmul.f32 1.442695, %v846_v59 }
 0x405   : > { %1223 = vpow2.f32 %v855_v61  ;;  %v859_v63 = vmul.f32 1.442695, %v848_v60 }
 0x406   : > { %1225 = vpow2.f32 %v857_v62 }
 0x407   : > { %1227 = vpow2.f32 %v859_v63 }
 0x40b   : > { %v1218_v1 = vpop.eup %1217 }
 0x40c   : > { %v1220_v2 = vpop.eup %1219 }
 0x40d   : > { %v1222_v3 = vpop.eup %1221  ;;  %v1062_v4 = vpack.c.bf16 %v1220_v2, %v1218_v1 }
 0x40e   : > { %v1063_v5 = vpack.c.bf16 %v1222_v3, %v1222_v3 }
 0x40f   : > { %v1224_v6 = vpop.eup %1223  ;;  %881 = vst [vmem:[%s298_s15] sm:$0xff] %v1062_v4 }
 0x410   : > { %v1226_v7 = vpop.eup %1225  ;;  %883 = vst.msk [vmem:[%s298_s15 + $0x8] sm:$0xf] %vm882_vm10, %v1063_v5 }
 0x411   : > { %v1228_v8 = vpop.eup %1227  ;;  %v1064_v9 = vpack.c.bf16 %v1226_v7, %v1224_v6 }
 0x412   : > { %v1065_v10 = vpack.c.bf16 %v1228_v8, %v1228_v8 }
 0x413   : > { %884 = vst [vmem:[%s298_s15 + $0xc] sm:$0xff] %v1064_v9 }
 0x414   : > { %885 = vst.msk [vmem:[%s298_s15 + $0x14] sm:$0xf] %vm882_vm10, %v1065_v10 }
 0x415   : > { %1384 = shalt.err (!%p1381_p13)
}
 0x416   : > { %s1385_s13 = scalar_lea.hbm %s1780_s11, 384  ;;  %s1389_s7 = scalar_lea.hbm %s1832_s5, 768 }
 0x417   : > { %p1386_p9 = scmp.ne.s32.totalorder %s1780_s11, %s1385_s13  ;;  %p1390_p4 = scmp.lt.u32.totalorder %s1780_s11, %s1832_s5 }
 0x418   : > { %p1391_p8 = scmp.lt.u32.totalorder %s1389_s7, %s1385_s13  ;;  %p1393_p3 = scmp.lt.u32.totalorder %s1385_s13, %s1780_s11 }
 0x419   : > { %p1387_p0 = pnand %p1386_p9, %p1666_p10 }
 0x41a   : > { %p1392_p6 = por %p1391_p8, %p1390_p4 }
 0x41b   : > { %p1388_p11 = pneg %p1387_p0 }
 0x41c   : > { %p1394_p5 = por %p1393_p3, %p1392_p6 }
 0x41e   : > { %p1395_p7 = pnand %p1394_p5, %p1388_p11 }
 0x420   : > { %1398 = shalt.err (!%p1395_p7)
}
 0x421   : > { %s1466_s15 = smov 192   ;;  %s1467_s16 = smov 12  }
 0x422   : > { %1088 = dma.vmem_to_hbm [thread:$0]  (%p1666_p10), %s1782_s27, 384, %s1780_s11, %s887_s22, %s1466_s15, %s1466_s15, %s1467_s16  }
 0x423 PF: > { %s915_s30 = sand.u32 1, %s1433_s18   ;;  %p1850_p12 = scmp.ne.s32.totalorder %s1837_s25, 0 }
 0x424   : > { %p1851_p1 = scmp.ge.s32.totalorder %s1445_s21, 2  ;;  %s916_s29 = scalar_lea.sflag [#allocation5], %s915_s30 }
 0x426   : > { %p1108_p2 = pnand %p1851_p1, %p1850_p12 }
 0x428   : > { %1428 = dma.done.wait (!%p1108_p2), %s916_s29, 384  }
 0x429   : > { %1430 = vsyncadd (!%p1108_p2), %s916_s29, 4294966912  ;;  %p20_p13 = scmp.ge.s32.totalorder %s1656_s14, 4   ;;  %s1852_s18 = smov %s1437_s19 }
 0x42a   : > { %s1853_s19 = smov %s1441_s20  ;;  %s1854_s20 = smov %s1672_s17 }
 0x42b   : > { %s1855_s21 = smov %s1656_s14  ;;  %22 = sbr.rel (!%p20_p13) target bundleno = 7 (0x7), region = 101 }
 0x432   :  { %921 = vsyncpa [#allocation4], 1 }
 0x433   :  { %923 = vsyncpa [#allocation4 + $0x1], 1 }
 0x434   :  { %924 = vsyncpa [#allocation7], 1 }
 0x435   :  { %925 = vsyncpa [#allocation10], 1 }
 0x436   :  { %926 = vsyncpa [#allocation5], 1 }
 0x437   :  { %928 = vsyncpa [#allocation5 + $0x1], 1 }

// kernel: _lambda_.12
= control target key start
LH: loop header
LB: loop body
LE: loop exit
PB: predicated region body
PF: predicated region fallthrough
CT: control target
= control target key end

     0   :  { %7 = vsyncpa [#allocation3], 0  ;;  %s1790_s0 = inlined_call_operand.hbm [shape: bf16[2,16,342], index: 0, kind: input, shape index: {}]   ;;  %s1791_s1 = inlined_call_operand.hbm [shape: bf16[2,16,342], index: 1, kind: input, shape index: {}]   ;;  %s1792_s2 = inlined_call_operand.hbm [shape: bf16[2,16,288], index: 2, kind: output, shape index: {}]  }
   0x1   :  { %9 = vsyncpa [#allocation3 + $0x1], 0 }
   0x2   :  { %10 = vsyncpa [#allocation6], 0 }
   0x3   :  { %12 = vsyncpa [#allocation6 + $0x1], 0 }
   0x4   :  { %13 = vsyncpa [#allocation4], 0 }
   0x5   :  { %15 = vsyncpa [#allocation4 + $0x1], 0  ;;  %s1229_s9 = smov 0   ;;  %s1231_s10 = smov 0  }
   0x6   :  { %s1233_s11 = smov 0   ;;  %s1235_s12 = smov 0  }
   0x7 LB: > { %s1250_s13 = sadd.s32 4294967295, %s1197_s12   ;;  %s849_s14 = sadd.s32 4294967294, %s1197_s12   ;;  %s1197_s12 = sphi %s1235_s12, %s1807_s12   ;;  %s1193_s11 = sphi %s1233_s11, %s1806_s11   ;;  %s1189_s10 = sphi %s1231_s10, %s1805_s10   ;;  %s1185_s9 = sphi %s1229_s9, %s1804_s9  }
   0x8   : > { %s1254_s15 = sadd.s32 1, %s1197_s12   ;;  %s28_s16 = sadd.s32 1, %s1193_s11 }
   0x9   : > { %s25_s17 = ssub.s32 %s1197_s12, %s1254_s15  ;;  %p35_p0 = scmp.ne.s32.totalorder %s1193_s11, %s1189_s10 }
   0xa   : > { %p26_p1 = scmp.eq.s32.totalorder %s25_s17, 0  ;;  %p36_p2 = scmp.eq.s32.totalorder %s1197_s12, 0 }
   0xb   : > { %p41_p3 = scmp.ne.s32.totalorder %s1189_s10, %s1185_s9  ;;  %p42_p4 = scmp.eq.s32.totalorder %s1250_s13, 0 }
   0xc   : > { %s1266_s18 = scalar_select %p26_p1, %s1193_s11, %s28_s16  }
   0xd   : > { %p37_p5 = por %p36_p2, %p35_p0  ;;  %p1268_p6 = por %p42_p4, %p41_p3 }
   0xe   : > { %p91_p7 = scmp.eq.s32.totalorder %s1250_s13, 1  ;;  %p97_p8 = scmp.eq.s32.totalorder %s849_s14, 1 }
   0xf   : > { %s1795_s19 = scalar_select %p1268_p6, 1, 0 }
  0x10   : > { %p889_p10 = scmp.lt.s32.totalorder %s1197_s12, 2  ;;  %p1275_p11 = por %p91_p7, %p35_p0 }
  0x11   : > { %p1279_p12 = por %p97_p8, %p41_p3  ;;  %s1284_s22 = sand.u32 1, %s1193_s11  }
  0x12   : > { %s1796_s20 = scalar_select %p1275_p11, 1, 0 }
  0x13   : > { %s1797_s21 = scalar_select %p1279_p12, 1, 0 }
  0x14   : > { %s867_s23 = smul.u32 384, %s1197_s12  ;;  %p1295_p13 = pnand %p889_p10, %p37_p5 }
  0x15   : > { %s866_s24 = smul.u32 24, %s1284_s22  ;;  %s118_s3 = scalar_lea.sflag [#allocation3], %s1284_s22 }
  0x16   : > { %s1293_s27 = scalar_lea.hbm %s1790_s0, %s867_s23  ;;  %p1069_p1 = pneg %p1295_p13 }
  0x17   : > { %s121_s29 = scalar_lea.vmem [#allocation2], %s866_s24  ;;  %s1067_s4 = scalar_lea.hbm %s1293_s27, 384 }
  0x18   : > { %s128_s30 = sshll.u32 %s121_s29, 4  ;;  %p1068_p0 = scmp.ne.s32.totalorder %s1293_s27, %s1067_s4  ;;  %s1301_s30 = int_to_ptr.vmem [resolvable:$true] %s128_s30 }
  0x19   : > { %s1072_s7 = scalar_lea.hbm %s1790_s0, 768  ;;  %p1073_p4 = scmp.lt.u32.totalorder %s1293_s27, %s1790_s0 }
  0x1a   : > { %p1070_p2 = pnand %p1069_p1, %p1068_p0  ;;  %p1074_p5 = scmp.lt.u32.totalorder %s1072_s7, %s1067_s4 }
  0x1b   : > { %p1076_p8 = scmp.lt.u32.totalorder %s1067_s4, %s1293_s27 }
  0x1c   : > { %p1071_p3 = pneg %p1070_p2  ;;  %p1075_p7 = por %p1074_p5, %p1073_p4 }
  0x1e   : > { %p1077_p10 = por %p1076_p8, %p1075_p7 }
  0x20   : > { %p1078_p9 = pnand %p1077_p10, %p1071_p3 }
  0x22   : > { %1081 = shalt.err (!%p1078_p9)
}
  0x23   : > { %s1082_s16 = scalar_lea.vmem %s1301_s30, 384  ;;  %s1199_s17 = smov [#allocation2]  }
  0x24   : > { %p1083_p0 = scmp.ne.s32.totalorder %s1301_s30, %s1082_s16  ;;  %s1087_s25 = sshll.u32 %s1199_s17, 4  ;;  %s1088_s25 = int_to_ptr.vmem [resolvable:$false] %s1087_s25 }
  0x25   : > { %s1089_s26 = scalar_lea.vmem %s1088_s25, 768  ;;  %p1090_p11 = scmp.lt.s32.totalorder %s1301_s30, %s1088_s25 }
  0x26   : > { %p1085_p2 = pnand %p1083_p0, %p1069_p1  ;;  %p1091_p4 = scmp.lt.s32.totalorder %s1089_s26, %s1082_s16 }
  0x28   : > { %p1086_p12 = pneg %p1085_p2  ;;  %p1092_p5 = por %p1091_p4, %p1090_p11 }
  0x2a   : > { %p1093_p7 = pnand %p1092_p5, %p1086_p12 }
  0x2c   : > { %1096 = shalt.err (!%p1093_p7)
}
  0x2d   : > { %s1200_s29 = smov 192   ;;  %s1201_s4 = smov 12  }
  0x2e   : > { %881 = dma.hbm_to_vmem [thread:$0]  (!%p1295_p13), %s1293_s27, 384, %s1301_s30, %s118_s3, %s1200_s29, %s1200_s29, %s1201_s4  }
  0x2f   : > { %p854_p9 = scmp.ge.s32.totalorder %s1197_s12, 1  ;;  %p157_p11 = scmp.lt.s32.totalorder %s1197_s12, 3 }
  0x30   : > { %s1345_s8 = scalar_lea.hbm %s1791_s1, %s867_s23  ;;  %s142_s14 = scalar_lea.vmem [#allocation5], %s866_s24 }
  0x31   : > { %p1336_p12 = pnand %p854_p9, %p157_p11  ;;  %s149_s16 = sshll.u32 %s142_s14, 4  ;;  %s1349_s16 = int_to_ptr.vmem [resolvable:$true] %s149_s16 }
  0x32   : > { %s139_s27 = scalar_lea.sflag [#allocation6], %s1284_s22  ;;  %s1097_s30 = scalar_lea.hbm %s1345_s8, 384 }
  0x33   : > { %p1098_p3 = scmp.ne.s32.totalorder %s1345_s8, %s1097_s30  ;;  %s1102_s23 = scalar_lea.hbm %s1791_s1, 768 }
  0x34   : > { %p1103_p0 = scmp.lt.u32.totalorder %s1345_s8, %s1791_s1  ;;  %p1104_p2 = scmp.lt.u32.totalorder %s1102_s23, %s1097_s30 }
  0x35   : > { %p1100_p8 = pnand %p1098_p3, %p1069_p1  ;;  %p1106_p5 = scmp.lt.u32.totalorder %s1097_s30, %s1345_s8 }
  0x36   : > { %p1105_p4 = por %p1104_p2, %p1103_p0 }
  0x37   : > { %p1101_p10 = pneg %p1100_p8 }
  0x38   : > { %p1107_p7 = por %p1106_p5, %p1105_p4 }
  0x3a   : > { %p1108_p9 = pnand %p1107_p7, %p1101_p10 }
  0x3c   : > { %1111 = shalt.err (!%p1108_p9)
}
  0x3d   : > { %s1112_s24 = scalar_lea.vmem %s1349_s16, 384  ;;  %s1202_s6 = smov [#allocation5]  }
  0x3e   : > { %p1113_p11 = scmp.ne.s32.totalorder %s1349_s16, %s1112_s24  ;;  %s1117_s7 = sshll.u32 %s1202_s6, 4  ;;  %s1118_s7 = int_to_ptr.vmem [resolvable:$false] %s1117_s7 }
  0x3f   : > { %s1119_s14 = scalar_lea.vmem %s1118_s7, 768  ;;  %p1120_p6 = scmp.lt.s32.totalorder %s1349_s16, %s1118_s7 }
  0x40   : > { %p1115_p3 = pnand %p1113_p11, %p1069_p1  ;;  %p1121_p0 = scmp.lt.s32.totalorder %s1119_s14, %s1112_s24 }
  0x42   : > { %p1116_p8 = pneg %p1115_p3  ;;  %p1122_p2 = por %p1121_p0, %p1120_p6 }
  0x44   : > { %p1123_p4 = pnand %p1122_p2, %p1116_p8 }
  0x46   : > { %1126 = shalt.err (!%p1123_p4)
}
  0x47   : > { %884 = dma.hbm_to_vmem [thread:$0]  (!%p1295_p13), %s1345_s8, 384, %s1349_s16, %s139_s27, %s1200_s29, %s1200_s29, %s1201_s4  }
  0x48   : > { %161 = sbr.rel (%p1336_p12) target bundleno = 365 (0x16d), region = 28  ;;  %s1383_s30 = sand.u32 (!%p1336_p12), 1, %s1189_s10  }
  0x49   : > { %s1386_s3 = smul.u32 (!%p1336_p12), 24, %s1383_s30  ;;  %s164_s28 = scalar_lea.sflag (!%p1336_p12), [#allocation3], %s1383_s30 }
  0x4a   : > { %p1800_p6 = scmp.ne.s32.totalorder (!%p1336_p12), %s1795_s19, 0 }
  0x4b   : > { %s167_s17 = scalar_lea.vmem (!%p1336_p12), [#allocation2], %s1386_s3 }
  0x4f   : > { %1172 = dma.done.wait (%p1800_p6), %s164_s28, 384  }
  0x50   : > { %1174 = vsyncadd (%p1800_p6), %s164_s28, 4294966912  ;;  %s173_s22 = scalar_lea.sflag [#allocation6], %s1383_s30  ;;  %s176_s29 = scalar_lea.vmem [#allocation5], %s1386_s3 }
  0x51   : > { %1176 = dma.done.wait (%p1800_p6), %s173_s22, 384  }
  0x52   : > { %1178 = vsyncadd (%p1800_p6), %s173_s22, 4294966912  ;;  %v213_v0 = vld [vmem:[%s176_s29 + $0x8] ss:$12 sps:$4 sm:$0xff]   ;;  %v214_v1 = vld [vmem:[%s176_s29 + $0xc] sm:$0xff]  ;;  %s1203_s19 = smov 127   ;;  %s1204_s4 = smov 126  }
  0x53   : > { %v212_v2 = vld [vmem:[%s176_s29] sm:$0xff]  ;;  %v1400_v3 = vunpack.c.l.bf16 %v213_v0  ;;  %v1402_v4 = vunpack.c.l.bf16 %v214_v1  ;;  %v202_v7 = vld [vmem:[%s167_s17] sm:$0xff]  ;;  %v1428_v20 = vunpack.c.h.bf16 %v213_v0  ;;  %v1430_v21 = vunpack.c.h.bf16 %v214_v1  ;;  %s1205_s5 = smov 110   ;;  %s1206_s8 = smov 109  }
  0x54   : > { %v1404_v5 = vunpack.c.l.bf16 %v212_v2  ;;  %v203_v6 = vld [vmem:[%s167_s17 + $0x8] ss:$12 sps:$4 sm:$0xff]   ;;  %v1406_v8 = vunpack.c.h.bf16 %v212_v2  ;;  %v206_v10 = vunpack.c.l.bf16 %v202_v7  ;;  %v204_v11 = vld [vmem:[%s167_s17 + $0xc] sm:$0xff]  ;;  %v207_v17 = vunpack.c.h.bf16 %v202_v7  ;;  %s1207_s16 = smov 108   ;;  %s1208_s27 = smov 92  }
  0x55   : > { %v208_v9 = vunpack.c.l.bf16 %v203_v6  ;;  %v1410_v12 = vpack.i.bf16 %v1402_v4, %v1400_v3  ;;  %v209_v15 = vunpack.c.l.bf16 %v204_v11  ;;  %v211_v19 = vunpack.c.h.bf16 %v203_v6  ;;  %s1209_s23 = smov 91   ;;  %s1210_s25 = smov 90  }
  0x56   : > { %v1414_v13 = vpack.i.bf16 %v1406_v8, %v1404_v5  ;;  %v1422_v16 = vmul.f32 %v1404_v5, %v206_v10  ;;  %v1434_v22 = vmul.f32 %v1406_v8, %v207_v17  ;;  %v210_v23 = vunpack.c.h.bf16 %v204_v11  ;;  %s201_s26 = scalar_lea.vmem [#allocation7], %s1386_s3  ;;  %s871_s6 = smul.u32 384, %s1250_s13 }
  0x57   : > { %941 = vrot.lane.b32.xlu1 %v1410_v12, %s1203_s19  ;;  %v1418_v14 = vmul.f32 %v1400_v3, %v208_v9  ;;  %v1426_v18 = vmul.f32 %v1402_v4, %v209_v15  ;;  %v1438_v24 = vmul.f32 %v1428_v20, %v211_v19  ;;  %v945_v26 = vpack.i.bf16 %v1428_v20, %v1430_v21  ;;  %s753_s24 = sshll.u32 %s201_s26, 4  ;;  %s740_s13 = scalar_lea.sflag [#allocation4], %s1383_s30  ;;  %s1740_s24 = int_to_ptr.vmem [resolvable:$true] %s753_s24 }
  0x58   : > { %936 = vrot.lane.b32.xlu0 %v1414_v13, %s1203_s19  ;;  %v1442_v25 = vmul.f32 %v1430_v21, %v210_v23  ;;  %vm246_vm0 = vcmask 1039360   ;;  %vm309_vm1 = vcmask 1031168   ;;  %vm366_vm2 = vcmask 900096   ;;  %s1746_s3 = scalar_lea.hbm %s1792_s2, %s871_s6  ;;  %s1127_s28 = scalar_lea.vmem %s1740_s24, 384 }
  0x59   : > { %vm423_vm3 = vcmask 891904   ;;  %vm480_vm4 = vcmask 883712   ;;  %vm537_vm5 = vcmask 752640   ;;  %vm594_vm6 = vcmask 744448   ;;  %p1128_p13 = scmp.ne.s32.totalorder %s1740_s24, %s1127_s28  ;;  %p1801_p1 = scmp.ne.s32.totalorder %s1796_s20, 0 }
  0x5a   : > { %vm651_vm7 = vcmask 736256   ;;  %vm735_vm8 = vcmask 257024   ;;  %s1211_s17 = smov [#allocation7]  }
  0x5b   : > { %238 = vrot.lane.b32.xlu1 %v1418_v14, %s1203_s19  ;;  %p1129_p12 = pnand %p1128_p13, %p1801_p1  ;;  %s1131_s22 = sshll.u32 %s1211_s17, 4  ;;  %s1132_s22 = int_to_ptr.vmem [resolvable:$false] %s1131_s22 }
  0x5c   : > { %234 = vrot.lane.b32.xlu0 %v1422_v16, %s1203_s19  ;;  %s1133_s29 = scalar_lea.vmem %s1132_s22, 768  ;;  %p1134_p5 = scmp.lt.s32.totalorder %s1740_s24, %s1132_s22 }
  0x5d   : > { %p1130_p10 = pneg %p1129_p12  ;;  %p1135_p7 = scmp.lt.s32.totalorder %s1133_s29, %s1127_s28 }
  0x5f   : > { %240 = vrot.lane.b32.xlu1 %v1426_v18, %s1203_s19  ;;  %p1136_p9 = por %p1135_p7, %p1134_p5 }
  0x60   : > { %236 = vrot.lane.b32.xlu0 %v1434_v22, %s1203_s19 }
  0x61   : > { %p1137_p11 = pnand %p1136_p9, %p1130_p10 }
  0x63   : > { %244 = vrot.lane.b32.xlu1 %v1438_v24, %s1203_s19 }
  0x64   : > { %242 = vrot.lane.b32.xlu0 %v1442_v25, %s1203_s19 }
  0x67   : > { %297 = vrot.lane.b32.xlu1 %v1422_v16, %s1204_s4 }
  0x68   : > { %946 = vrot.lane.b32.xlu0 %v945_v26, %s1203_s19 }
  0x6b   : > { %301 = vrot.lane.b32.xlu1 %v1418_v14, %s1204_s4 }
  0x6c   : > { %299 = vrot.lane.b32.xlu0 %v1434_v22, %s1204_s4 }
  0x6f   : > { %305 = vrot.lane.b32.xlu1 %v1442_v25, %s1204_s4 }
  0x70   : > { %303 = vrot.lane.b32.xlu0 %v1426_v18, %s1204_s4 }
  0x73   : > { %951 = vrot.lane.b32.xlu1 %v1414_v13, %s1204_s4 }
  0x74   : > { %307 = vrot.lane.b32.xlu0 %v1438_v24, %s1204_s4 }
  0x77   : > { %961 = vrot.lane.b32.xlu1 %v945_v26, %s1204_s4 }
  0x78   : > { %956 = vrot.lane.b32.xlu0 %v1410_v12, %s1204_s4 }
  0x7b   : > { %356 = vrot.lane.b32.xlu1 %v1434_v22, %s1205_s5 }
  0x7c   : > { %354 = vrot.lane.b32.xlu0 %v1422_v16, %s1205_s5 }
  0x7f   : > { %360 = vrot.lane.b32.xlu1 %v1426_v18, %s1205_s5 }
  0x80   : > { %358 = vrot.lane.b32.xlu0 %v1418_v14, %s1205_s5 }
  0x83   : > { %364 = vrot.lane.b32.xlu1 %v1438_v24, %s1205_s5 }
  0x84   : > { %362 = vrot.lane.b32.xlu0 %v1442_v25, %s1205_s5 }
  0x87   : > { %971 = vrot.lane.b32.xlu1 %v1410_v12, %s1205_s5 }
  0x88   : > { %966 = vrot.lane.b32.xlu0 %v1414_v13, %s1205_s5 }
  0x8b   : > { %411 = vrot.lane.b32.xlu1 %v1422_v16, %s1206_s8 }
  0x8c   : > { %976 = vrot.lane.b32.xlu0 %v945_v26, %s1205_s5 }
  0x8f   : > { %415 = vrot.lane.b32.xlu1 %v1418_v14, %s1206_s8 }
  0x90   : > { %413 = vrot.lane.b32.xlu0 %v1434_v22, %s1206_s8 }
  0x93   : > { %419 = vrot.lane.b32.xlu1 %v1442_v25, %s1206_s8 }
  0x94   : > { %417 = vrot.lane.b32.xlu0 %v1426_v18, %s1206_s8 }
  0x97   : > { %981 = vrot.lane.b32.xlu1 %v1414_v13, %s1206_s8 }
  0x98   : > { %421 = vrot.lane.b32.xlu0 %v1438_v24, %s1206_s8 }
  0x9b   : > { %991 = vrot.lane.b32.xlu1 %v945_v26, %s1206_s8 }
  0x9c   : > { %986 = vrot.lane.b32.xlu0 %v1410_v12, %s1206_s8 }
  0x9f   : > { %470 = vrot.lane.b32.xlu1 %v1434_v22, %s1207_s16 }
  0xa0   : > { %468 = vrot.lane.b32.xlu0 %v1422_v16, %s1207_s16 }
  0xa3   : > { %474 = vrot.lane.b32.xlu1 %v1426_v18, %s1207_s16 }
  0xa4   : > { %472 = vrot.lane.b32.xlu0 %v1418_v14, %s1207_s16 }
  0xa7   : > { %478 = vrot.lane.b32.xlu1 %v1438_v24, %s1207_s16 }
  0xa8   : > { %476 = vrot.lane.b32.xlu0 %v1442_v25, %s1207_s16 }
  0xab   : > { %1001 = vrot.lane.b32.xlu1 %v1410_v12, %s1207_s16 }
  0xac   : > { %996 = vrot.lane.b32.xlu0 %v1414_v13, %s1207_s16 }
  0xaf   : > { %1011 = vrot.lane.b32.xlu1 %v1414_v13, %s1208_s27 }
  0xb0   : > { %1006 = vrot.lane.b32.xlu0 %v945_v26, %s1207_s16 }
  0xb3   : > { %1021 = vrot.lane.b32.xlu1 %v945_v26, %s1208_s27 }
  0xb4   : > { %1016 = vrot.lane.b32.xlu0 %v1410_v12, %s1208_s27 }
  0xb7   : > { %1031 = vrot.lane.b32.xlu1 %v1410_v12, %s1209_s23 }
  0xb8   : > { %1026 = vrot.lane.b32.xlu0 %v1414_v13, %s1209_s23 }
  0xbb   : > { %1041 = vrot.lane.b32.xlu1 %v1414_v13, %s1210_s25 }
  0xbc   : > { %1036 = vrot.lane.b32.xlu0 %v945_v26, %s1209_s23 }
  0xbf   : > { %1051 = vrot.lane.b32.xlu1 %v945_v26, %s1210_s25 }
  0xc0   : > { %1046 = vrot.lane.b32.xlu0 %v1410_v12, %s1210_s25 }
  0xc3   : > { %527 = vrot.lane.b32.xlu1 %v1434_v22, %s1208_s27 }
  0xc4   : > { %525 = vrot.lane.b32.xlu0 %v1422_v16, %s1208_s27 }
  0xc7   : > { %531 = vrot.lane.b32.xlu1 %v1426_v18, %s1208_s27 }
  0xc8   : > { %529 = vrot.lane.b32.xlu0 %v1418_v14, %s1208_s27 }
  0xc9   : > { %v1496_v27 = vpop.permute.xlu1 %941 }
  0xca   : > { %v943_v28 = vunpack.i.l.bf16 %v1496_v27  ;;  %v937_v29 = vpop.permute.xlu0 %936  ;;  %v944_v44 = vunpack.i.h.bf16 %v1496_v27 }
  0xcb   : > { %v939_v30 = vunpack.i.h.bf16 %v937_v29  ;;  %535 = vrot.lane.b32.xlu1 %v1438_v24, %s1208_s27  ;;  %v938_v55 = vunpack.i.l.bf16 %v937_v29 }
  0xcc   : > { %533 = vrot.lane.b32.xlu0 %v1442_v25, %s1208_s27 }
  0xcd   : > { %v1504_v31 = vsel %vm246_vm0, %v939_v30, %v943_v28  ;;  %v239_v32 = vpop.permute.xlu1 %238  ;;  %v281_v62 = vsel %vm246_vm0, %v938_v55, %v939_v30 }
  0xce   : > { %v235_v33 = vpop.permute.xlu0 %234  ;;  %v259_v46 = vadd.f32 %v239_v32, %v1418_v14  ;;  %v291_v11 = vadd.f32 %v281_v62, %v1404_v5  ;;  %v293_v5 = vadd.f32 %v943_v28, %v1400_v3  ;;  %v292_v30 = vadd.f32 %v1504_v31, %v1406_v8 }
  0xcf   : > { %584 = vrot.lane.b32.xlu1 %v1434_v22, %s1209_s23 }
  0xd0   : > { %582 = vrot.lane.b32.xlu0 %v1422_v16, %s1209_s23 }
  0xd1   : > { %v241_v34 = vpop.permute.xlu1 %240 }
  0xd2   : > { %v237_v35 = vpop.permute.xlu0 %236 }
  0xd3   : > { %v247_v36 = vsel %vm246_vm0, %v235_v33, %v237_v35  ;;  %v248_v37 = vsel %vm246_vm0, %v237_v35, %v239_v32  ;;  %588 = vrot.lane.b32.xlu1 %v1426_v18, %s1209_s23 }
  0xd4   : > { %586 = vrot.lane.b32.xlu0 %v1418_v14, %s1209_s23  ;;  %v257_v49 = vadd.f32 %v247_v36, %v1422_v16  ;;  %v258_v50 = vadd.f32 %v248_v37, %v1434_v22 }
  0xd5   : > { %v245_v38 = vpop.permute.xlu1 %244 }
  0xd6   : > { %v243_v39 = vpop.permute.xlu0 %242  ;;  %v262_v1 = vadd.f32 %v245_v38, %v1438_v24 }
  0xd7   : > { %v249_v40 = vsel %vm246_vm0, %v241_v34, %v243_v39  ;;  %v250_v41 = vsel %vm246_vm0, %v243_v39, %v245_v38  ;;  %592 = vrot.lane.b32.xlu1 %v1438_v24, %s1209_s23 }
  0xd8   : > { %590 = vrot.lane.b32.xlu0 %v1442_v25, %s1209_s23  ;;  %v260_v59 = vadd.f32 %v249_v40, %v1426_v18  ;;  %v261_v6 = vadd.f32 %v250_v41, %v1442_v25 }
  0xd9   : > { %v298_v42 = vpop.permute.xlu1 %297 }
  0xda   : > { %v947_v43 = vpop.permute.xlu0 %946 }
  0xdb   : > { %v948_v45 = vunpack.i.l.bf16 %v947_v43  ;;  %641 = vrot.lane.b32.xlu1 %v1434_v22, %s1210_s25  ;;  %v949_v63 = vunpack.i.h.bf16 %v947_v43 }
  0xdc   : > { %639 = vrot.lane.b32.xlu0 %v1422_v16, %s1210_s25 }
  0xdd   : > { %v283_v47 = vsel %vm246_vm0, %v944_v44, %v948_v45  ;;  %v302_v48 = vpop.permute.xlu1 %301  ;;  %v296_v19 = vadd.f32 %v949_v63, %v1428_v20 }
  0xde   : > { %v322_v51 = vadd.f32 %v302_v48, %v259_v46  ;;  %v300_v52 = vpop.permute.xlu0 %299  ;;  %v294_v32 = vadd.f32 %v283_v47, %v1402_v4 }
  0xdf   : > { %v310_v53 = vsel %vm309_vm1, %v298_v42, %v300_v52  ;;  %v311_v54 = vsel %vm309_vm1, %v300_v52, %v302_v48  ;;  %645 = vrot.lane.b32.xlu1 %v1426_v18, %s1210_s25 }
  0xe0   : > { %v320_v56 = vadd.f32 %v310_v53, %v257_v49  ;;  %v321_v57 = vadd.f32 %v311_v54, %v258_v50  ;;  %643 = vrot.lane.b32.xlu0 %v1418_v14, %s1210_s25  ;;  %v284_v14 = vsel %vm246_vm0, %v948_v45, %v949_v63 }
  0xe1   : > { %v306_v58 = vpop.permute.xlu1 %305 }
  0xe2   : > { %v304_v60 = vpop.permute.xlu0 %303 }
  0xe3   : > { %v312_v61 = vsel %vm309_vm1, %v304_v60, %v306_v58  ;;  %649 = vrot.lane.b32.xlu1 %v1438_v24, %s1210_s25 }
  0xe4   : > { %v323_v0 = vadd.f32 %v312_v61, %v260_v59  ;;  %647 = vrot.lane.b32.xlu0 %v1442_v25, %s1210_s25  ;;  %v295_v25 = vadd.f32 %v284_v14, %v1430_v21 }
  0xe5   : > { %v952_v2 = vpop.permute.xlu1 %951 }
  0xe6   : > { %v954_v7 = vunpack.i.h.bf16 %v952_v2  ;;  %v953_v9 = vunpack.i.l.bf16 %v952_v2  ;;  %v308_v10 = vpop.permute.xlu0 %307 }
  0xe7   : > { %v313_v12 = vsel %vm309_vm1, %v306_v58, %v308_v10  ;;  %v325_v13 = vadd.f32 %v308_v10, %v262_v1 }
  0xe8   : > { %v338_v15 = vsel %vm309_vm1, %v953_v9, %v954_v7  ;;  %v324_v16 = vadd.f32 %v313_v12, %v261_v6 }
  0xe9   : > { %v1550_v17 = vadd.f32 %v338_v15, %v291_v11  ;;  %v962_v18 = vpop.permute.xlu1 %961 }
  0xea   : > { %v964_v22 = vunpack.i.h.bf16 %v962_v18  ;;  %v963_v23 = vunpack.i.l.bf16 %v962_v18  ;;  %v957_v24 = vpop.permute.xlu0 %956 }
  0xeb   : > { %v959_v26 = vunpack.i.h.bf16 %v957_v24  ;;  %v958_v29 = vunpack.i.l.bf16 %v957_v24 }
  0xec   : > { %v341_v33 = vsel %vm309_vm1, %v963_v23, %v964_v22  ;;  %v1561_v20 = vadd.f32 %v964_v22, %v296_v19 }
  0xed   : > { %v1563_v34 = vadd.f32 %v341_v33, %v295_v25  ;;  %v340_v35 = vsel %vm309_vm1, %v959_v26, %v963_v23  ;;  %v339_v27 = vsel %vm309_vm1, %v954_v7, %v958_v29  ;;  %v350_v3 = vadd.f32 %v958_v29, %v293_v5  ;;  %v357_v28 = vpop.permute.xlu1 %356 }
  0xee   : > { %v349_v21 = vadd.f32 %v339_v27, %v292_v30  ;;  %v351_v36 = vadd.f32 %v340_v35, %v294_v32  ;;  %v355_v37 = vpop.permute.xlu0 %354 }
  0xef   : > { %v367_v38 = vsel %vm366_vm2, %v355_v37, %v357_v28 }
  0xf0   : > { %v377_v8 = vadd.f32 %v367_v38, %v320_v56 }
  0xf1   : > { %v361_v31 = vpop.permute.xlu1 %360 }
  0xf2   : > { %v359_v4 = vpop.permute.xlu0 %358 }
  0xf3   : > { %v368_v39 = vsel %vm366_vm2, %v357_v28, %v359_v4  ;;  %v379_v40 = vadd.f32 %v359_v4, %v322_v51 }
  0xf4   : > { %v378_v41 = vadd.f32 %v368_v39, %v321_v57 }
  0xf5   : > { %v365_v42 = vpop.permute.xlu1 %364 }
  0xf6   : > { %v382_v43 = vadd.f32 %v365_v42, %v325_v13  ;;  %v363_v44 = vpop.permute.xlu0 %362 }
  0xf7   : > { %v369_v45 = vsel %vm366_vm2, %v361_v31, %v363_v44  ;;  %v370_v46 = vsel %vm366_vm2, %v363_v44, %v365_v42 }
  0xf8   : > { %v380_v47 = vadd.f32 %v369_v45, %v323_v0  ;;  %v381_v48 = vadd.f32 %v370_v46, %v324_v16 }
  0xf9   : > { %v972_v49 = vpop.permute.xlu1 %971 }
  0xfa   : > { %v973_v50 = vunpack.i.l.bf16 %v972_v49  ;;  %v967_v52 = vpop.permute.xlu0 %966  ;;  %v974_v58 = vunpack.i.h.bf16 %v972_v49 }
  0xfb   : > { %v969_v53 = vunpack.i.h.bf16 %v967_v52 }
  0xfc   : > { %v1571_v54 = vadd.f32 %v973_v50, %v350_v3 }
  0xfd   : > { %v396_v55 = vsel %vm366_vm2, %v969_v53, %v973_v50  ;;  %v412_v56 = vpop.permute.xlu1 %411 }
  0xfe   : > { %v1574_v51 = vadd.f32 %v396_v55, %v349_v21  ;;  %v1576_v57 = vpop.permute.xlu0 %976  ;;  %v968_v21 = vunpack.i.l.bf16 %v967_v52 }
  0xff   : > { %v978_v59 = vunpack.i.l.bf16 %v1576_v57  ;;  %v979_v37 = vunpack.i.h.bf16 %v1576_v57 }
 0x100   : > { %v395_v4 = vsel %vm366_vm2, %v968_v21, %v969_v53 }
 0x101   : > { %v397_v60 = vsel %vm366_vm2, %v974_v58, %v978_v59  ;;  %v416_v61 = vpop.permute.xlu1 %415  ;;  %v398_v42 = vsel %vm366_vm2, %v978_v59, %v979_v37  ;;  %v405_v46 = vadd.f32 %v395_v4, %v1550_v17  ;;  %v410_v55 = vadd.f32 %v979_v37, %v1561_v20 }
 0x102   : > { %v1580_v62 = vadd.f32 %v397_v60, %v351_v36  ;;  %v1582_v63 = vadd.f32 %v416_v61, %v379_v40  ;;  %v414_v0 = vpop.permute.xlu0 %413  ;;  %v409_v53 = vadd.f32 %v398_v42, %v1563_v34 }
 0x103   : > { %v424_v1 = vsel %vm423_vm3, %v412_v56, %v414_v0  ;;  %v425_v2 = vsel %vm423_vm3, %v414_v0, %v416_v61 }
 0x104   : > { %v1586_v6 = vadd.f32 %v424_v1, %v377_v8  ;;  %v1588_v7 = vadd.f32 %v425_v2, %v378_v41 }
 0x105   : > { %v420_v9 = vpop.permute.xlu1 %419 }
 0x106   : > { %v418_v10 = vpop.permute.xlu0 %417 }
 0x107   : > { %v426_v11 = vsel %vm423_vm3, %v418_v10, %v420_v9 }
 0x108   : > { %v1591_v12 = vadd.f32 %v426_v11, %v380_v47 }
 0x109   : > { %v982_v13 = vpop.permute.xlu1 %981 }
 0x10a   : > { %v422_v14 = vpop.permute.xlu0 %421  ;;  %v984_v38 = vunpack.i.h.bf16 %v982_v13  ;;  %v983_v8 = vunpack.i.l.bf16 %v982_v13 }
 0x10b   : > { %v427_v15 = vsel %vm423_vm3, %v420_v9, %v422_v14  ;;  %v1594_v16 = vadd.f32 %v422_v14, %v382_v43 }
 0x10c   : > { %v1596_v18 = vadd.f32 %v427_v15, %v381_v48  ;;  %v452_v43 = vsel %vm423_vm3, %v983_v8, %v984_v38 }
 0x10d   : > { %v992_v19 = vpop.permute.xlu1 %991  ;;  %v462_v56 = vadd.f32 %v452_v43, %v405_v46 }
 0x10e   : > { %v987_v22 = vpop.permute.xlu0 %986  ;;  %v994_v39 = vunpack.i.h.bf16 %v992_v19  ;;  %v993_v40 = vunpack.i.l.bf16 %v992_v19 }
 0x10f   : > { %v989_v44 = vunpack.i.h.bf16 %v987_v22  ;;  %v988_v45 = vunpack.i.l.bf16 %v987_v22 }
 0x110   : > { %v455_v48 = vsel %vm423_vm3, %v993_v40, %v994_v39  ;;  %v467_v0 = vadd.f32 %v994_v39, %v410_v55 }
 0x111   : > { %v1598_v23 = vpop.permute.xlu1 %470  ;;  %v454_v17 = vsel %vm423_vm3, %v989_v44, %v993_v40  ;;  %v453_v58 = vsel %vm423_vm3, %v984_v38, %v988_v45  ;;  %v466_v61 = vadd.f32 %v455_v48, %v409_v53  ;;  %v464_v20 = vadd.f32 %v988_v45, %v1571_v54 }
 0x112   : > { %v1600_v24 = vpop.permute.xlu0 %468  ;;  %v463_v14 = vadd.f32 %v453_v58, %v1574_v51  ;;  %v465_v15 = vadd.f32 %v454_v17, %v1580_v62 }
 0x115   : > { %v1602_v5 = vpop.permute.xlu1 %474 }
 0x116   : > { %v1604_v25 = vpop.permute.xlu0 %472 }
 0x119   : > { %v1606_v26 = vpop.permute.xlu1 %478 }
 0x11a   : > { %v1608_v29 = vpop.permute.xlu0 %476 }
 0x11d   : > { %v1610_v30 = vpop.permute.xlu1 %1001 }
 0x11e   : > { %v997_v32 = vpop.permute.xlu0 %996  ;;  %v1003_v57 = vunpack.i.l.bf16 %v1610_v30  ;;  %v1004_v19 = vunpack.i.h.bf16 %v1610_v30 }
 0x11f   : > { %v999_v49 = vunpack.i.h.bf16 %v997_v32  ;;  %v998_v50 = vunpack.i.l.bf16 %v997_v32 }
 0x121   : > { %v1612_v33 = vpop.permute.xlu1 %1011  ;;  %v509_v9 = vsel %vm480_vm4, %v998_v50, %v999_v49  ;;  %v510_v22 = vsel %vm480_vm4, %v999_v49, %v1003_v57 }
 0x122   : > { %v1614_v35 = vpop.permute.xlu0 %1006  ;;  %v1014_v59 = vunpack.i.h.bf16 %v1612_v33  ;;  %v1013_v60 = vunpack.i.l.bf16 %v1612_v33  ;;  %v519_v21 = vadd.f32 %v509_v9, %v462_v56  ;;  %v520_v40 = vadd.f32 %v510_v22, %v463_v14 }
 0x123   : > { %v1009_v1 = vunpack.i.h.bf16 %v1614_v35  ;;  %v1008_v2 = vunpack.i.l.bf16 %v1614_v35 }
 0x124   : > { %v566_v32 = vsel %vm537_vm5, %v1013_v60, %v1014_v59 }
 0x125   : > { %v1616_v27 = vpop.permute.xlu1 %1021  ;;  %v512_v37 = vsel %vm480_vm4, %v1008_v2, %v1009_v1  ;;  %v576_v42 = vadd.f32 %v566_v32, %v519_v21  ;;  %v524_v43 = vadd.f32 %v1009_v1, %v467_v0 }
 0x126   : > { %v1618_v3 = vpop.permute.xlu0 %1016  ;;  %v1024_v51 = vunpack.i.h.bf16 %v1616_v27  ;;  %v1023_v30 = vunpack.i.l.bf16 %v1616_v27  ;;  %v523_v27 = vadd.f32 %v512_v37, %v466_v61 }
 0x127   : > { %v1018_v54 = vunpack.i.l.bf16 %v1618_v3  ;;  %v1019_v38 = vunpack.i.h.bf16 %v1618_v3 }
 0x128   : > { %v569_v55 = vsel %vm537_vm5, %v1023_v30, %v1024_v51  ;;  %v581_v9 = vadd.f32 %v1024_v51, %v524_v43 }
 0x129   : > { %v1620_v28 = vpop.permute.xlu1 %1031  ;;  %v567_v45 = vsel %vm537_vm5, %v1014_v59, %v1018_v54  ;;  %v568_v56 = vsel %vm537_vm5, %v1019_v38, %v1023_v30 }
 0x12a   : > { %v1622_v36 = vpop.permute.xlu0 %1026  ;;  %v1033_v8 = vunpack.i.l.bf16 %v1620_v28  ;;  %v577_v59 = vadd.f32 %v567_v45, %v520_v40  ;;  %v1034_v1 = vunpack.i.h.bf16 %v1620_v28 }
 0x12b   : > { %v1029_v10 = vunpack.i.h.bf16 %v1622_v36  ;;  %v1028_v11 = vunpack.i.l.bf16 %v1622_v36  ;;  %v511_v36 = vsel %vm480_vm4, %v1004_v19, %v1008_v2 }
 0x12c   : > { %v522_v44 = vadd.f32 %v511_v36, %v465_v15  ;;  %v580_v15 = vadd.f32 %v569_v55, %v523_v27 }
 0x12d   : > { %v1625_v31 = vpop.permute.xlu1 %1041  ;;  %v623_v4 = vsel %vm594_vm6, %v1028_v11, %v1029_v10  ;;  %v624_v17 = vsel %vm594_vm6, %v1029_v10, %v1033_v8 }
 0x12e   : > { %v1628_v41 = vpop.permute.xlu0 %1036  ;;  %v1044_v33 = vunpack.i.h.bf16 %v1625_v31  ;;  %v1043_v35 = vunpack.i.l.bf16 %v1625_v31  ;;  %v521_v31 = vadd.f32 %v1003_v57, %v464_v20  ;;  %v633_v49 = vadd.f32 %v623_v4, %v576_v42 }
 0x12f   : > { %v1039_v3 = vunpack.i.h.bf16 %v1628_v41  ;;  %v1038_v50 = vunpack.i.l.bf16 %v1628_v41  ;;  %v634_v11 = vadd.f32 %v624_v17, %v577_v59  ;;  %v579_v19 = vadd.f32 %v568_v56, %v522_v44 }
 0x130   : > { %v680_v46 = vsel %vm651_vm7, %v1043_v35, %v1044_v33  ;;  %v578_v57 = vadd.f32 %v1018_v54, %v521_v31  ;;  %v481_v4 = vsel %vm480_vm4, %v1600_v24, %v1598_v23  ;;  %v484_v56 = vsel %vm480_vm4, %v1608_v29, %v1606_v26 }
 0x131   : > { %v1633_v47 = vpop.permute.xlu1 %1051  ;;  %v690_v60 = vadd.f32 %v680_v46, %v633_v49  ;;  %v626_v14 = vsel %vm594_vm6, %v1038_v50, %v1039_v3  ;;  %v625_v22 = vsel %vm594_vm6, %v1034_v1, %v1038_v50  ;;  %v491_v45 = vadd.f32 %v481_v4, %v1586_v6 }
 0x132   : > { %v1636_v52 = vpop.permute.xlu0 %1046  ;;  %v1054_v61 = vunpack.i.h.bf16 %v1633_v47  ;;  %v1053_v0 = vunpack.i.l.bf16 %v1633_v47  ;;  %v635_v41 = vadd.f32 %v1033_v8, %v578_v57  ;;  %v638_v47 = vadd.f32 %v1039_v3, %v581_v9 }
 0x133   : > { %v1048_v48 = vunpack.i.l.bf16 %v1636_v52  ;;  %v1049_v2 = vunpack.i.h.bf16 %v1636_v52  ;;  %v696_v35 = vmax.f32 %v690_v60, 1e-06  ;;  %v637_v36 = vadd.f32 %v626_v14, %v580_v15 }
 0x134   : > { %v683_v28 = vsel %vm651_vm7, %v1053_v0, %v1054_v61  ;;  %v695_v37 = vadd.f32 %v1054_v61, %v638_v47  ;;  %v482_v46 = vsel %vm480_vm4, %v1598_v23, %v1604_v25  ;;  %v483_v23 = vsel %vm480_vm4, %v1602_v5, %v1608_v29 }
 0x135   : > { %v1647_v34 = vpop.permute.xlu1 %527  ;;  %v681_v20 = vsel %vm651_vm7, %v1044_v33, %v1048_v48  ;;  %v692_v32 = vadd.f32 %v1048_v48, %v635_v41  ;;  %v682_v52 = vsel %vm651_vm7, %v1049_v2, %v1053_v0  ;;  %v636_v33 = vadd.f32 %v625_v22, %v579_v19 }
 0x136   : > { %v1653_v13 = vpop.permute.xlu0 %525  ;;  %v691_v21 = vadd.f32 %v681_v20, %v634_v11  ;;  %v694_v30 = vadd.f32 %v683_v28, %v637_v36  ;;  %1055 = vrcp.f32 %v696_v35  ;;  %v701_v42 = vmax.f32 %v695_v37, 1e-06 }
 0x137   : > { %v698_v38 = vmax.f32 %v692_v32, 1e-06  ;;  %v693_v31 = vadd.f32 %v682_v52, %v636_v33  ;;  %v538_v43 = vsel %vm537_vm5, %v1653_v13, %v1647_v34  ;;  %v492_v50 = vadd.f32 %v482_v46, %v1588_v7 }
 0x138   : > { %v697_v40 = vmax.f32 %v691_v21, 1e-06  ;;  %v700_v48 = vmax.f32 %v694_v30, 1e-06  ;;  %v548_v3 = vadd.f32 %v538_v43, %v491_v45  ;;  %v493_v13 = vadd.f32 %v1604_v25, %v1582_v63 }
 0x139   : > { %v1666_v62 = vpop.permute.xlu1 %531  ;;  %1057 = vrcp.f32 %v698_v38  ;;  %v699_v49 = vmax.f32 %v693_v31, 1e-06  ;;  %v494_v61 = vadd.f32 %v483_v23, %v1591_v12  ;;  %v495_v41 = vadd.f32 %v484_v56, %v1596_v18 }
 0x13a   : > { %v1672_v39 = vpop.permute.xlu0 %529  ;;  %1059 = vrcp.f32 %v697_v40 }
 0x13b   : > { %1061 = vrcp.f32 %v701_v42  ;;  %v539_v6 = vsel %vm537_vm5, %v1647_v34, %v1672_v39  ;;  %v550_v63 = vadd.f32 %v1672_v39, %v493_v13  ;;  %v496_v34 = vadd.f32 %v1606_v26, %v1594_v16 }
 0x13c   : > { %1063 = vrcp.f32 %v700_v48  ;;  %v549_v59 = vadd.f32 %v539_v6, %v492_v50 }
 0x13d   : > { %v1679_v53 = vpop.permute.xlu1 %535  ;;  %1065 = vrcp.f32 %v699_v49 }
 0x13e   : > { %v1684_v58 = vpop.permute.xlu0 %533  ;;  %v553_v2 = vadd.f32 %v1679_v53, %v496_v34 }
 0x13f   : > { %v540_v29 = vsel %vm537_vm5, %v1666_v62, %v1684_v58  ;;  %v541_v39 = vsel %vm537_vm5, %v1684_v58, %v1679_v53 }
 0x140   : > { %v1056_v5 = vpop.eup %1055  ;;  %v552_v58 = vadd.f32 %v541_v39, %v495_v41 }
 0x141   : > { %v585_v10 = vpop.permute.xlu1 %584 }
 0x142   : > { %v583_v54 = vpop.permute.xlu0 %582 }
 0x143   : > { %v595_v24 = vsel %vm594_vm6, %v583_v54, %v585_v10  ;;  %v1058_v14 = vpop.eup %1057 }
 0x144   : > { %v605_v57 = vadd.f32 %v595_v24, %v548_v3  ;;  %v1060_v22 = vpop.eup %1059 }
 0x145   : > { %v589_v51 = vpop.permute.xlu1 %588  ;;  %v1062_v21 = vpop.eup %1061 }
 0x146   : > { %v587_v8 = vpop.permute.xlu0 %586  ;;  %v1064_v37 = vpop.eup %1063 }
 0x147   : > { %v596_v25 = vsel %vm594_vm6, %v585_v10, %v587_v8  ;;  %v607_v0 = vadd.f32 %v587_v8, %v550_v63  ;;  %v551_v10 = vadd.f32 %v540_v29, %v494_v61  ;;  %v1066_v4 = vpop.eup %1065 }
 0x148   : > { %v606_v16 = vadd.f32 %v596_v25, %v549_v59 }
 0x149   : > { %v593_v44 = vpop.permute.xlu1 %592 }
 0x14a   : > { %v591_v27 = vpop.permute.xlu0 %590  ;;  %v610_v15 = vadd.f32 %v593_v44, %v553_v2 }
 0x14b   : > { %v597_v9 = vsel %vm594_vm6, %v589_v51, %v591_v27  ;;  %v598_v12 = vsel %vm594_vm6, %v591_v27, %v593_v44 }
 0x14c   : > { %v608_v32 = vadd.f32 %v597_v9, %v551_v10  ;;  %v609_v54 = vadd.f32 %v598_v12, %v552_v58 }
 0x14d   : > { %v642_v55 = vpop.permute.xlu1 %641 }
 0x14e   : > { %v640_v7 = vpop.permute.xlu0 %639 }
 0x14f   : > { %v652_v17 = vsel %vm651_vm7, %v640_v7, %v642_v55 }
 0x150   : > { %v662_v60 = vadd.f32 %v652_v17, %v605_v57 }
 0x151   : > { %v646_v1 = vpop.permute.xlu1 %645 }
 0x152   : > { %v708_v26 = vmul.f32 %v1056_v5, %v662_v60  ;;  %v644_v20 = vpop.permute.xlu0 %643 }
 0x153   : > { %v653_v11 = vsel %vm651_vm7, %v642_v55, %v644_v20  ;;  %v664_v62 = vadd.f32 %v644_v20, %v607_v0 }
 0x154   : > { %v663_v19 = vadd.f32 %v653_v11, %v606_v16 }
 0x155   : > { %v710_v18 = vmul.f32 %v1058_v14, %v664_v62  ;;  %v650_v53 = vpop.permute.xlu1 %649 }
 0x156   : > { %v709_v35 = vmul.f32 %v1060_v22, %v663_v19  ;;  %v667_v47 = vadd.f32 %v650_v53, %v610_v15  ;;  %v648_v28 = vpop.permute.xlu0 %647 }
 0x157   : > { %v863_v36 = vpack.c.bf16 %v710_v18, %v710_v18  ;;  %v654_v52 = vsel %vm651_vm7, %v646_v1, %v648_v28  ;;  %v655_v33 = vsel %vm651_vm7, %v648_v28, %v650_v53 }
 0x158   : > { %v862_v51 = vpack.c.bf16 %v709_v35, %v708_v26  ;;  %v713_v30 = vmul.f32 %v1062_v21, %v667_v47  ;;  %v665_v38 = vadd.f32 %v654_v52, %v608_v32  ;;  %v666_v8 = vadd.f32 %v655_v33, %v609_v54 }
 0x159   : > { %736 = vst.msk [vmem:[%s201_s26 + $0x8] sm:$0xf] %vm735_vm8, %v863_v36 }
 0x15a   : > { %734 = vst [vmem:[%s201_s26] sm:$0xff] %v862_v51  ;;  %v865_v31 = vpack.c.bf16 %v713_v30, %v713_v30  ;;  %v711_v40 = vmul.f32 %v1066_v4, %v665_v38  ;;  %v712_v42 = vmul.f32 %v1064_v37, %v666_v8 }
 0x15c   : > { %738 = vst.msk [vmem:[%s201_s26 + $0x14] sm:$0xf] %vm735_vm8, %v865_v31  ;;  %v864_v43 = vpack.c.bf16 %v712_v42, %v711_v40 }
 0x15e   : > { %737 = vst [vmem:[%s201_s26 + $0xc] sm:$0xff] %v864_v43 }
 0x15f   : > { %1140 = shalt.err (!%p1137_p11)
}
 0x160   : > { %s1141_s19 = scalar_lea.hbm %s1746_s3, 384  ;;  %s1145_s8 = scalar_lea.hbm %s1792_s2, 768 }
 0x161   : > { %p1142_p3 = scmp.ne.s32.totalorder %s1746_s3, %s1141_s19  ;;  %p1146_p2 = scmp.lt.u32.totalorder %s1746_s3, %s1792_s2 }
 0x162   : > { %p1147_p4 = scmp.lt.u32.totalorder %s1145_s8, %s1141_s19  ;;  %p1149_p13 = scmp.lt.u32.totalorder %s1141_s19, %s1746_s3 }
 0x163   : > { %p1143_p8 = pnand %p1142_p3, %p1801_p1 }
 0x164   : > { %p1148_p6 = por %p1147_p4, %p1146_p2 }
 0x165   : > { %p1144_p0 = pneg %p1143_p8 }
 0x166   : > { %p1150_p12 = por %p1149_p13, %p1148_p6 }
 0x168   : > { %p1151_p10 = pnand %p1150_p12, %p1144_p0 }
 0x16a   : > { %1154 = shalt.err (!%p1151_p10)
}
 0x16b   : > { %s1212_s23 = smov 192   ;;  %s1213_s25 = smov 12  }
 0x16c   : > { %876 = dma.vmem_to_hbm [thread:$0]  (%p1801_p1), %s1740_s24, 384, %s1746_s3, %s740_s13, %s1212_s23, %s1212_s23, %s1213_s25  }
 0x16d PF: > { %s768_s26 = sand.u32 1, %s1185_s9   ;;  %p1802_p5 = scmp.ne.s32.totalorder %s1797_s21, 0 }
 0x16e   : > { %p1803_p7 = scmp.ge.s32.totalorder %s1197_s12, 2  ;;  %s769_s6 = scalar_lea.sflag [#allocation4], %s768_s26 }
 0x170   : > { %p886_p9 = pnand %p1803_p7, %p1802_p5 }
 0x172   : > { %1180 = dma.done.wait (!%p886_p9), %s769_s6, 384  }
 0x173   : > { %1182 = vsyncadd (!%p886_p9), %s769_s6, 4294966912  ;;  %p18_p11 = scmp.ge.s32.totalorder %s1254_s15, 4   ;;  %s1804_s9 = smov %s1189_s10 }
 0x174   : > { %s1805_s10 = smov %s1193_s11  ;;  %s1806_s11 = smov %s1266_s18 }
 0x175   : > { %s1807_s12 = smov %s1254_s15  ;;  %20 = sbr.rel (!%p18_p11) target bundleno = 7 (0x7), region = 86 }
 0x17c   :  { %774 = vsyncpa [#allocation3], 1 }
 0x17d   :  { %776 = vsyncpa [#allocation3 + $0x1], 1 }
 0x17e   :  { %777 = vsyncpa [#allocation6], 1 }
 0x17f   :  { %779 = vsyncpa [#allocation6 + $0x1], 1 }
 0x180   :  { %780 = vsyncpa [#allocation4], 1 }
 0x181   :  { %782 = vsyncpa [#allocation4 + $0x1], 1 }

// kernel: _lambda_.13
= control target key start
LH: loop header
LB: loop body
LE: loop exit
PB: predicated region body
PF: predicated region fallthrough
CT: control target
= control target key end

     0   :  { %10 = vsyncpa [#allocation4], 0  ;;  %s1571_s0 = inlined_call_operand.hbm [shape: bf16[2,16,110], index: 0, kind: input, shape index: {}]   ;;  %s1572_s1 = inlined_call_operand.hbm [shape: bf16[32,144], index: 1, kind: input, shape index: {}]   ;;  %s1573_s2 = inlined_call_operand.hbm [shape: f32[32,1], index: 2, kind: input, shape index: {}]   ;;  %s1574_s3 = inlined_call_operand.hbm [shape: f32[32,1], index: 3, kind: input, shape index: {}]   ;;  %s1575_s4 = inlined_call_operand.hbm [shape: f32[1,80], index: 4, kind: input, shape index: {}]   ;;  %s1576_s5 = inlined_call_operand.hbm [shape: bf16[2,32,80], index: 5, kind: output, shape index: {}]  }
   0x1   :  { %12 = vsyncpa [#allocation4 + $0x1], 0 }
   0x2   :  { %13 = vsyncpa [#allocation7], 0 }
   0x3   :  { %14 = vsyncpa [#allocation10], 0 }
   0x4   :  { %15 = vsyncpa [#allocation5], 0 }
   0x5   :  { %17 = vsyncpa [#allocation5 + $0x1], 0  ;;  %s1216_s18 = smov 0   ;;  %s1218_s19 = smov 0  }
   0x6   :  { %s1220_s20 = smov 0   ;;  %s1222_s21 = smov 0  }
   0x7 LB: > { %s1237_s22 = sadd.s32 4294967295, %s1163_s21   ;;  %s754_s23 = sadd.s32 4294967294, %s1163_s21   ;;  %s1163_s21 = sphi %s1222_s21, %s1599_s21   ;;  %s1159_s20 = sphi %s1220_s20, %s1598_s20   ;;  %s1155_s19 = sphi %s1218_s19, %s1597_s19   ;;  %s1151_s18 = sphi %s1216_s18, %s1596_s18  }
   0x8   : > { %p43_p0 = scmp.ne.s32.totalorder %s1155_s19, %s1151_s18  ;;  %p1577_p1 = scmp.eq.s32.totalorder %s1237_s22, 0 }
   0x9   : > { %p157_p3 = scmp.eq.s32.totalorder %s754_s23, 1  ;;  %p755_p5 = scmp.ge.s32.totalorder %s1163_s21, 1 }
   0xa   : > { %p1246_p4 = por %p1577_p1, %p43_p0  ;;  %p164_p7 = scmp.lt.s32.totalorder %s1163_s21, 3 }
   0xb   : > { %p1251_p6 = por %p157_p3, %p43_p0  ;;  %s1165_s27 = smov [#allocation6]  }
   0xc   : > { %s1580_s24 = scalar_select %p1246_p4, 1, 0 }
   0xd   : > { %s1581_s25 = scalar_select %p1251_p6, 1, 0 }
   0xe   : > { %p1256_p8 = pnand %p755_p5, %p164_p7  ;;  %s176_s28 = sshll.u32 %s1165_s27, 4  ;;  %s1260_s28 = int_to_ptr.vmem [resolvable:$true] %s176_s28 }
   0xf   : > { %s1166_s30 = smov [#allocation9]   ;;  %s1167_s7 = smov [#allocation8]  }
  0x10   : > { %s1582_s26 = scalar_select %p1256_p8, 1, 0 }
  0x11   : > { %p840_p9 = pneg %p1256_p8  ;;  %s202_s6 = sshll.u32 %s1166_s30, 4  ;;  %s1271_s6 = int_to_ptr.vmem [resolvable:$true] %s202_s6 }
  0x12   : > { %s1273_s8 = sshll.u32 %s1167_s7, 4  ;;  %s947_s11 = scalar_lea.hbm %s1572_s1, 512  ;;  %s190_s8 = int_to_ptr.vmem [resolvable:$true] %s1273_s8 }
  0x13   : > { %p1267_p11 = pnand %p840_p9, %p1577_p1  ;;  %p948_p12 = scmp.ne.s32.totalorder %s1572_s1, %s947_s11 }
  0x14   : > { %p954_p5 = scmp.lt.u32.totalorder %s947_s11, %s1572_s1 }
  0x15   : > { %p1283_p13 = pneg %p1267_p11 }
  0x17   : > { %p950_p0 = pnand %p1283_p13, %p948_p12 }
  0x19   : > { %p951_p3 = pneg %p950_p0 }
  0x1b   : > { %p956_p7 = pnand %p954_p5, %p951_p3 }
  0x1d   : > { %959 = shalt.err (!%p956_p7)
}
  0x1e   : > { %s960_s17 = scalar_lea.vmem %s1260_s28, 512  ;;  %p968_p2 = scmp.lt.s32.totalorder %s1260_s28, %s1260_s28 }
  0x1f   : > { %p961_p9 = scmp.ne.s32.totalorder %s1260_s28, %s960_s17  ;;  %p969_p6 = scmp.lt.s32.totalorder %s960_s17, %s960_s17 }
  0x21   : > { %p963_p10 = pnand %p961_p9, %p1283_p13  ;;  %p970_p12 = por %p969_p6, %p968_p2 }
  0x23   : > { %p964_p1 = pneg %p963_p10 }
  0x25   : > { %p971_p0 = pnand %p970_p12, %p964_p1 }
  0x27   : > { %974 = shalt.err (!%p971_p0)
}
  0x28   : > { %s1168_s23 = smov 128   ;;  %s1169_s27 = smov 8  }
  0x29   : > { %843 = dma.hbm_to_vmem [thread:$0]  (!%p1267_p11), %s1572_s1, 512, %s1260_s28, [#allocation7], %s1168_s23, %s1168_s23, %s1169_s27  }
  0x2a   : > { %s975_s11 = scalar_lea.hbm %s1574_s3, 512 }
  0x2b   : > { %p976_p1 = scmp.ne.s32.totalorder %s1574_s3, %s975_s11  ;;  %p982_p10 = scmp.lt.u32.totalorder %s975_s11, %s1574_s3 }
  0x2d   : > { %p978_p2 = pnand %p976_p1, %p1283_p13 }
  0x2f   : > { %p979_p6 = pneg %p978_p2 }
  0x31   : > { %p984_p3 = pnand %p982_p10, %p979_p6 }
  0x33   : > { %987 = shalt.err (!%p984_p3)
}
  0x34   : > { %s988_s28 = scalar_lea.vmem %s1271_s6, 512  ;;  %p996_p12 = scmp.lt.s32.totalorder %s1271_s6, %s1271_s6 }
  0x35   : > { %p989_p5 = scmp.ne.s32.totalorder %s1271_s6, %s988_s28  ;;  %p997_p0 = scmp.lt.s32.totalorder %s988_s28, %s988_s28 }
  0x37   : > { %p991_p7 = pnand %p989_p5, %p1283_p13  ;;  %p998_p1 = por %p997_p0, %p996_p12 }
  0x39   : > { %p992_p9 = pneg %p991_p7 }
  0x3b   : > { %p999_p2 = pnand %p998_p1, %p992_p9 }
  0x3d   : > { %1002 = shalt.err (!%p999_p2)
}
  0x3e   : > { %849 = dma.hbm_to_vmem [thread:$0]  (!%p1267_p11), %s1574_s3, 512, %s1271_s6, [#allocation10], %s1168_s23, %s1168_s23, %s1169_s27  }
  0x3f   : > { %s1003_s10 = scalar_lea.hbm %s1573_s2, 512 }
  0x40   : > { %p1004_p6 = scmp.ne.s32.totalorder %s1573_s2, %s1003_s10  ;;  %p1010_p5 = scmp.lt.u32.totalorder %s1003_s10, %s1573_s2 }
  0x42   : > { %p1006_p10 = pnand %p1004_p6, %p1283_p13 }
  0x44   : > { %p1007_p3 = pneg %p1006_p10 }
  0x46   : > { %p1012_p7 = pnand %p1010_p5, %p1007_p3 }
  0x48   : > { %1015 = shalt.err (!%p1012_p7)
}
  0x49   : > { %s1016_s16 = scalar_lea.vmem %s190_s8, 512  ;;  %p1024_p1 = scmp.lt.s32.totalorder %s190_s8, %s190_s8 }
  0x4a   : > { %p1017_p9 = scmp.ne.s32.totalorder %s190_s8, %s1016_s16  ;;  %p1025_p2 = scmp.lt.s32.totalorder %s1016_s16, %s1016_s16 }
  0x4c   : > { %p1019_p12 = pnand %p1017_p9, %p1283_p13  ;;  %p1026_p4 = por %p1025_p2, %p1024_p1 }
  0x4e   : > { %p1020_p0 = pneg %p1019_p12 }
  0x50   : > { %p1027_p8 = pnand %p1026_p4, %p1020_p0 }
  0x52   : > { %1030 = shalt.err (!%p1027_p8)
}
  0x53   : > { %846 = dma.hbm_to_vmem [thread:$0]  (!%p1267_p11), %s1573_s2, 512, %s190_s8, [#allocation7], %s1168_s23, %s1168_s23, %s1169_s27  }
  0x54   : > { %s1170_s17 = smov [#allocation11]   ;;  %s1031_s10 = scalar_lea.hbm %s1575_s4, 16 }
  0x55   : > { %s216_s30 = sshll.u32 %s1170_s17, 4  ;;  %p1032_p4 = scmp.ne.s32.totalorder %s1575_s4, %s1031_s10  ;;  %s217_s30 = int_to_ptr.vmem [resolvable:$true] %s216_s30 }
  0x56   : > { %p1038_p10 = scmp.lt.u32.totalorder %s1031_s10, %s1575_s4 }
  0x57   : > { %p1034_p8 = pnand %p1032_p4, %p1283_p13 }
  0x59   : > { %p1035_p6 = pneg %p1034_p8 }
  0x5b   : > { %p1040_p3 = pnand %p1038_p10, %p1035_p6 }
  0x5d   : > { %1043 = shalt.err (!%p1040_p3)
}
  0x5e   : > { %s1044_s8 = scalar_lea.vmem %s217_s30, 16  ;;  %s1051_s23 = scalar_lea.vmem %s217_s30, 32 }
  0x5f   : > { %p1045_p5 = scmp.ne.s32.totalorder %s217_s30, %s1044_s8  ;;  %p1052_p12 = scmp.lt.s32.totalorder %s217_s30, %s217_s30 }
  0x60   : > { %p1053_p0 = scmp.lt.s32.totalorder %s1051_s23, %s1044_s8 }
  0x61   : > { %p1047_p7 = pnand %p1045_p5, %p1283_p13 }
  0x62   : > { %p1054_p1 = por %p1053_p0, %p1052_p12 }
  0x63   : > { %p1048_p9 = pneg %p1047_p7 }
  0x65   : > { %p1055_p2 = pnand %p1054_p1, %p1048_p9 }
  0x67   : > { %1058 = shalt.err (!%p1055_p2)
}
  0x68   : > { %852 = dma.hbm_to_vmem [thread:$0]  (!%p1267_p11), %s1575_s4, 16, %s217_s30, [#allocation10]  }
  0x69   : > { %s1374_s14 = sadd.s32 1, %s1163_s21   ;;  %s30_s6 = sadd.s32 1, %s1159_s20 }
  0x6a   : > { %s27_s29 = ssub.s32 %s1163_s21, %s1374_s14  ;;  %p37_p13 = scmp.ne.s32.totalorder %s1159_s20, %s1155_s19 }
  0x6b   : > { %p28_p4 = scmp.eq.s32.totalorder %s27_s29, 0  ;;  %p38_p8 = scmp.eq.s32.totalorder %s1163_s21, 0 }
  0x6c   : > { %p1585_p6 = scmp.eq.s32.totalorder %s1237_s22, 1  ;;  %p865_p3 = scmp.lt.s32.totalorder %s1163_s21, 2 }
  0x6d   : > { %s1390_s17 = scalar_select %p28_p4, %s1159_s20, %s30_s6  }
  0x6e   : > { %p1384_p10 = por %p1585_p6, %p37_p13  ;;  %p39_p5 = por %p38_p8, %p37_p13 }
  0x6f   : > { %s227_s7 = sand.u32 1, %s1159_s20   ;;  %s796_s30 = sshll.u32 %s1163_s21, 7 }
  0x70   : > { %s761_s9 = sshll.u32 %s227_s7, 3  ;;  %s1397_s12 = scalar_lea.hbm %s1571_s0, %s796_s30 }
  0x71   : > { %s231_s13 = scalar_lea.vmem [#allocation3], %s761_s9  ;;  %p1401_p11 = pnand %p865_p3, %p39_p5 }
  0x72   : > { %s238_s15 = sshll.u32 %s231_s13, 4  ;;  %s1405_s23 = scalar_lea.sflag [#allocation4], %s227_s7  ;;  %s1399_s15 = int_to_ptr.vmem [resolvable:$true] %s238_s15 }
  0x73   : > { %s1059_s27 = scalar_lea.hbm %s1397_s12, 128  ;;  %p1061_p9 = pneg %p1401_p11 }
  0x74   : > { %p1060_p7 = scmp.ne.s32.totalorder %s1397_s12, %s1059_s27  ;;  %s1064_s29 = scalar_lea.hbm %s1571_s0, 256 }
  0x75   : > { %p1065_p1 = scmp.lt.u32.totalorder %s1397_s12, %s1571_s0  ;;  %p1066_p2 = scmp.lt.u32.totalorder %s1064_s29, %s1059_s27 }
  0x76   : > { %p1062_p12 = pnand %p1061_p9, %p1060_p7  ;;  %p1068_p4 = scmp.lt.u32.totalorder %s1059_s27, %s1397_s12 }
  0x77   : > { %p1067_p13 = por %p1066_p2, %p1065_p1 }
  0x78   : > { %p1063_p0 = pneg %p1062_p12 }
  0x79   : > { %p1069_p8 = por %p1068_p4, %p1067_p13 }
  0x7b   : > { %p1070_p6 = pnand %p1069_p8, %p1063_p0 }
  0x7d   : > { %1073 = shalt.err (!%p1070_p6)
}
  0x7e   : > { %s1074_s7 = scalar_lea.vmem %s1399_s15, 128  ;;  %s1171_s10 = smov [#allocation3]  }
  0x7f   : > { %p1075_p3 = scmp.ne.s32.totalorder %s1399_s15, %s1074_s7  ;;  %s1079_s11 = sshll.u32 %s1171_s10, 4  ;;  %s1080_s11 = int_to_ptr.vmem [resolvable:$false] %s1079_s11 }
  0x80   : > { %s1081_s13 = scalar_lea.vmem %s1080_s11, 256  ;;  %p1082_p12 = scmp.lt.s32.totalorder %s1399_s15, %s1080_s11 }
  0x81   : > { %p1077_p5 = pnand %p1075_p3, %p1061_p9  ;;  %p1083_p1 = scmp.lt.s32.totalorder %s1081_s13, %s1074_s7 }
  0x83   : > { %p1078_p7 = pneg %p1077_p5  ;;  %p1084_p2 = por %p1083_p1, %p1082_p12 }
  0x85   : > { %p1085_p13 = pnand %p1084_p2, %p1078_p7 }
  0x87   : > { %1088 = shalt.err (!%p1085_p13)
}
  0x88   : > { %s1172_s27 = smov 64   ;;  %s1173_s16 = smov 4  }
  0x89   : > { %856 = dma.hbm_to_vmem [thread:$0]  (!%p1401_p11), %s1397_s12, 128, %s1399_s15, %s1405_s23, %s1172_s27, %s1172_s27, %s1173_s16  }
  0x8a   : > { %p1588_p9 = scmp.ne.s32.totalorder %s1582_s26, 0 }
  0x8b   : > { %s1436_s6 = sand.u32 (!%p1588_p9), 1, %s1155_s19   ;;  %p1589_p0 = scmp.ne.s32.totalorder (!%p1588_p9), %s1580_s24, 0 }
  0x8c   : > { %250 = sbr.rel (%p1588_p9) target bundleno = 1008 (0x3f0), region = 40  ;;  %s765_s29 = sshll.u32 (!%p1588_p9), %s1436_s6, 3 }
  0x8d   : > { %s253_s9 = scalar_lea.sflag (!%p1588_p9), [#allocation4], %s1436_s6  ;;  %s1440_s30 = scalar_lea.vmem (!%p1588_p9), [#allocation3], %s765_s29 }
  0x93   : > { %1134 = dma.done.wait (%p1589_p0), %s253_s9, 128  }
  0x94   : > { %1136 = vsyncadd (%p1589_p0), %s253_s9, 4294967168  ;;  %p1590_p11 = scmp.eq.s32.totalorder %s1237_s22, 0 }
  0x96   : > { %1138 = dma.done.wait (%p1590_p11), [#allocation7], 1024   ;;  %p1591_p4 = pmov %p1590_p11 }
  0x98   : > { %1140 = vsyncadd (%p1591_p4), [#allocation7], 4294966272  ;;  %p1592_p8 = pmov %p1591_p4 }
  0x99   : > { %p1593_p6 = pmov %p1591_p4 }
  0x9a   : > { %1142 = dma.done.wait (%p1592_p8), [#allocation10], 528  }
  0x9b   : > { %1144 = vsyncadd (%p1593_p6), [#allocation10], 4294966768  ;;  %v1174_v0 = vmov 0   ;;  %v924_v1 = vld [vmem:[%s1440_s30] sm:$0xff]   ;;  %s1175_s24 = smov 127   ;;  %s1176_s26 = smov 118  }
  0x9c   : > { %436 = vmatprep.subr.bf16.mxu0 %v1174_v0  ;;  %802 = vmatprep.subr.bf16.mxu1 %v1174_v0  ;;  %v925_v2 = vld [vmem:[%s1440_s30] sm:$0xff]   ;;  %s1177_s12 = smov 126   ;;  %vm308_vm0 = vcmask 654336   ;;  %s1178_s15 = smov 117   ;;  %v935_v11 = vld [vmem:[#allocation6 + $0x4] ss:$8 sps:$4 sm:$0xff]  }
  0x9d   : > { %922 = vset.pattern.permute.xlu1 %v1174_v0  ;;  %923 = vset.pattern.permute.xlu0 %v1174_v0  ;;  %v926_v3 = vld [vmem:[%s1440_s30] sm:$0xff]   ;;  %s1179_s8 = smov 116   ;;  %s1180_s23 = smov 108   ;;  %vm429_vm1 = vcmask 130048   ;;  %v933_v29 = vld [vmem:[#allocation6] ss:$8 sps:$4 sm:$0xff]  }
  0x9e   : > { %317 = vrot.lane.b32.xlu0 %v924_v1, %s1175_s24  ;;  %339 = vrot.lane.b32.xlu1 %v926_v3, %s1176_s26  ;;  %v927_v4 = vld [vmem:[%s1440_s30] sm:$0xff]   ;;  %s1181_s7 = smov 107   ;;  %s1182_s10 = smov 106   ;;  %v786_v31 = vld [vmem:[#allocation11] ss:$0 sm:$0xff]  ;;  %vm624_vm2 = vcmask 650240  }
  0x9f   : > { %v928_v5 = vld [vmem:[%s1440_s30] sm:$0xff]   ;;  %784 = vmatprep.mubr.msk.bf16.mxu0 %vm429_vm1, %v935_v11  ;;  %s770_s11 = sshll.u32 %s1436_s6, 4  ;;  %s801_s16 = sshll.u32 %s1237_s22, 8 }
  0xa0   : > { %v929_v6 = vld [vmem:[%s1440_s30] sm:$0xff]   ;;  %s298_s13 = scalar_lea.vmem [#allocation12], %s770_s11  ;;  %s630_s24 = scalar_lea.sflag [#allocation5], %s1436_s6 }
  0xa1   : > { %v932_v7 = vld [vmem:[%s1440_s30] sm:$0xff]   ;;  %s643_s27 = sshll.u32 %s298_s13, 4  ;;  %s1183_s22 = smov [#allocation12]   ;;  %s1521_s27 = int_to_ptr.vmem [resolvable:$true] %s643_s27 }
  0xa2   : > { %328 = vrot.lane.b32.xlu0 %v925_v2, %s1177_s12  ;;  %350 = vrot.lane.b32.xlu1 %v927_v4, %s1178_s15  ;;  %v930_v8 = vld [vmem:[%s1440_s30] sm:$0xff]   ;;  %309 = vst.msk [vmem:[#allocation2] sm:$0xff] %vm308_vm0, %v932_v7  ;;  %s1089_s26 = scalar_lea.vmem %s1521_s27, 256  ;;  %s1093_s12 = sshll.u32 %s1183_s22, 4  ;;  %s1094_s12 = int_to_ptr.vmem [resolvable:$false] %s1093_s12 }
  0xa3   : > { %v931_v9 = vld [vmem:[%s1440_s30] sm:$0xff]   ;;  %s1526_s30 = scalar_lea.hbm %s1576_s5, %s801_s16  ;;  %p1090_p3 = scmp.ne.s32.totalorder %s1521_s27, %s1089_s26 }
  0xa4   : > { %v938_v12 = vld [vmem:[#allocation6 + $0x14] ss:$8 sps:$4 sm:$0xff]   ;;  %v936_v30 = vld [vmem:[#allocation6 + $0x10] ss:$8 sps:$4 sm:$0xff]   ;;  %s1095_s15 = scalar_lea.vmem %s1094_s12, 512  ;;  %p1096_p12 = scmp.lt.s32.totalorder %s1521_s27, %s1094_s12 }
  0xa5   : > { %785 = vmatprep.mubr.msk.bf16.mxu1 %vm429_vm1, %v938_v12  ;;  %p1091_p5 = pnand %p1090_p3, %p1384_p10  ;;  %p1097_p1 = scmp.lt.s32.totalorder %s1095_s15, %s1089_s26 }
  0xa6   : > { %361 = vrot.lane.b32.xlu0 %v928_v5, %s1179_s8  ;;  %372 = vrot.lane.b32.xlu1 %v929_v6, %s1180_s23 }
  0xa7   : > { %p1092_p7 = pneg %p1091_p5  ;;  %p1098_p2 = por %p1097_p1, %p1096_p12 }
  0xa9   : > { %v402_v10 = vld [vmem:[#allocation2] sm:$0xff]  ;;  %p1099_p13 = pnand %p1098_p2, %p1092_p7 }
  0xaa   : > { %383 = vrot.lane.b32.xlu0 %v930_v8, %s1181_s7  ;;  %394 = vrot.lane.b32.xlu1 %v931_v9, %s1182_s10 }
  0xab   : > { %437 = vmatpush1.bf16.msra.mxu0 %v402_v10  ;;  %811 = vmatpush1.bf16.msra.mxu1 %v402_v10 }
  0xac   : > { %438 = vmatprep.subr.bf16.mxu0 %v1174_v0  ;;  %803 = vmatprep.subr.bf16.mxu1 %v1174_v0 }
 0x110   : > { %v318_v13 = vpop.permute.xlu0 %317  ;;  %v340_v14 = vpop.permute.xlu1 %339 }
 0x111   : > { %320 = vst.msk [vmem:[#allocation2 + $0x8] sm:$0xff] %vm308_vm0, %v318_v13  ;;  %342 = vst.msk [vmem:[#allocation2 + $0x18] sm:$0xff] %vm308_vm0, %v340_v14 }
 0x114   : > { %v329_v15 = vpop.permute.xlu0 %328  ;;  %v351_v16 = vpop.permute.xlu1 %350 }
 0x115   : > { %331 = vst.msk [vmem:[#allocation2 + $0x10] sm:$0xff] %vm308_vm0, %v329_v15  ;;  %353 = vst.msk [vmem:[#allocation2 + $0x20] sm:$0xff] %vm308_vm0, %v351_v16 }
 0x118   : > { %v403_v17 = vld [vmem:[#allocation2 + $0x8] sm:$0xff]  ;;  %v362_v18 = vpop.permute.xlu0 %361  ;;  %v373_v19 = vpop.permute.xlu1 %372  ;;  %v405_v22 = vld [vmem:[#allocation2 + $0x18] sm:$0xff] }
 0x119   : > { %439 = vmatpush1.bf16.msra.mxu0 %v403_v17  ;;  %812 = vmatpush1.bf16.msra.mxu1 %v403_v17  ;;  %364 = vst.msk [vmem:[#allocation2 + $0x28] sm:$0xff] %vm308_vm0, %v362_v18  ;;  %375 = vst.msk [vmem:[#allocation2 + $0x30] sm:$0xff] %vm308_vm0, %v373_v19  ;;  %v540_v18 = vld [vmem:[#allocation8] sm:$0xff] }
 0x11a   : > { %440 = vmatprep.subr.bf16.mxu0 %v1174_v0  ;;  %804 = vmatprep.subr.bf16.mxu1 %v1174_v0 }
 0x11c   : > { %v404_v20 = vld [vmem:[#allocation2 + $0x10] sm:$0xff]  ;;  %v384_v21 = vpop.permute.xlu0 %383  ;;  %v395_v23 = vpop.permute.xlu1 %394  ;;  %v406_v24 = vld [vmem:[#allocation2 + $0x20] sm:$0xff] }
 0x11d   : > { %441 = vmatpush1.bf16.msra.mxu0 %v404_v20  ;;  %813 = vmatpush1.bf16.msra.mxu1 %v404_v20  ;;  %386 = vst.msk [vmem:[#allocation2 + $0x38] sm:$0xff] %vm308_vm0, %v384_v21  ;;  %397 = vst.msk [vmem:[#allocation2 + $0x40] sm:$0xff] %vm308_vm0, %v395_v23  ;;  %v541_v21 = vld [vmem:[#allocation8 + $0x8] sm:$0xff] }
 0x11e   : > { %442 = vmatprep.subr.bf16.mxu0 %v1174_v0  ;;  %805 = vmatprep.subr.bf16.mxu1 %v1174_v0 }
 0x120   : > { %v407_v25 = vld [vmem:[#allocation2 + $0x28] sm:$0xff]  ;;  %v408_v26 = vld [vmem:[#allocation2 + $0x30] sm:$0xff] }
 0x121   : > { %443 = vmatpush1.bf16.msra.mxu0 %v405_v22  ;;  %814 = vmatpush1.bf16.msra.mxu1 %v405_v22 }
 0x122   : > { %444 = vmatprep.subr.bf16.mxu0 %v1174_v0  ;;  %806 = vmatprep.subr.bf16.mxu1 %v1174_v0 }
 0x124   : > { %v409_v27 = vld [vmem:[#allocation2 + $0x38] sm:$0xff]  ;;  %v410_v28 = vld [vmem:[#allocation2 + $0x40] sm:$0xff] }
 0x125   : > { %445 = vmatpush1.bf16.msra.mxu0 %v406_v24  ;;  %815 = vmatpush1.bf16.msra.mxu1 %v406_v24  ;;  %v542_v24 = vld [vmem:[#allocation8 + $0x10] sm:$0xff] }
 0x126   : > { %446 = vmatprep.subr.bf16.mxu0 %v1174_v0  ;;  %807 = vmatprep.subr.bf16.mxu1 %v1174_v0 }
 0x129   : > { %447 = vmatpush1.bf16.msra.mxu0 %v407_v25  ;;  %816 = vmatpush1.bf16.msra.mxu1 %v407_v25 }
 0x12a   : > { %448 = vmatprep.subr.bf16.mxu0 %v1174_v0  ;;  %808 = vmatprep.subr.bf16.mxu1 %v1174_v0 }
 0x12d   : > { %449 = vmatpush1.bf16.msra.mxu0 %v408_v26  ;;  %817 = vmatpush1.bf16.msra.mxu1 %v408_v26 }
 0x12e   : > { %450 = vmatprep.subr.bf16.mxu0 %v1174_v0  ;;  %809 = vmatprep.subr.bf16.mxu1 %v1174_v0 }
 0x131   : > { %451 = vmatpush1.bf16.msra.mxu0 %v409_v27  ;;  %818 = vmatpush1.bf16.msra.mxu1 %v409_v27 }
 0x132   : > { %452 = vmatprep.subr.bf16.mxu0 %v1174_v0  ;;  %810 = vmatprep.subr.bf16.mxu1 %v1174_v0 }
 0x135   : > { %453 = vmatpush1.bf16.msra.mxu0 %v410_v28  ;;  %819 = vmatpush1.bf16.msra.mxu1 %v410_v28 }
 0x138   : > { %469 = vmatmul.mubr.bf16.vlgmr.msra.gmra.mrb[0].mxu0 %v933_v29  ;;  %477 = vmatmul.mubr.bf16.vlgmr.msra.gmra.mrb[0].mxu1 %v936_v30  ;;  %v580_v29 = vld [vmem:[#allocation9] sm:$0xff]  ;;  %v581_v30 = vld [vmem:[#allocation9 + $0x8] sm:$0xff] }
 0x20b   : > { %v470_v32 = vpop.f32.mrb[0].mxu0  ;;  %v478_v33 = vpop.f32.mrb[0].mxu1 }
 0x20c   : > { %v492_v34 = vmul.f32 %v786_v31, %v470_v32  ;;  %v472_v35 = vpop.f32.mrb[1].mxu0  ;;  %v494_v36 = vmul.f32 %v786_v31, %v478_v33  ;;  %v480_v37 = vpop.f32.mrb[1].mxu1 }
 0x20d   : > { %v473_v38 = vpop.f32.mrb[2].mxu0  ;;  %v481_v39 = vpop.f32.mrb[2].mxu1  ;;  %v583_v35 = vld [vmem:[#allocation9 + $0x18] sm:$0xff] }
 0x20e   : > { %v493_v40 = vmul.f32 %v786_v31, %v473_v38  ;;  %v475_v41 = vpop.f32.mrb[3].mxu0  ;;  %v483_v42 = vpop.f32.mrb[3].mxu1  ;;  %v496_v43 = vsel %vm308_vm0, %v492_v34, 0.0  ;;  %v502_v45 = vsel %vm308_vm0, %v494_v36, 0.0  ;;  %v495_v46 = vmul.f32 %v786_v31, %v481_v39 }
 0x20f   : > { %497 = vadd.xlane.f32.xlu0 %v496_v43 }
 0x210   : > { %v499_v44 = vsel %vm308_vm0, %v493_v40, 0.0  ;;  %v505_v47 = vsel %vm308_vm0, %v495_v46, 0.0 }
 0x211   : > { %500 = vadd.xlane.f32.xlu1 %v499_v44 }
 0x213   : > { %503 = vadd.xlane.f32.xlu0 %v502_v45 }
 0x217   : > { %506 = vadd.xlane.f32.xlu0 %v505_v47 }
 0x29c   : > { %v498_v48 = vpop.xlane.xlu0 %497 }
 0x29d   : > { %v508_v49 = vmul.f32 0.015625, %v498_v48 }
 0x29e   : > { %v501_v50 = vpop.xlane.xlu1 %500 }
 0x29f   : > { %v1496_v51 = vsub.f32 %v470_v32, %v508_v49  ;;  %v509_v52 = vmul.f32 0.015625, %v501_v50 }
 0x2a0   : > { %v504_v53 = vpop.xlane.xlu0 %503 }
 0x2a1   : > { %v1498_v54 = vsub.f32 %v473_v38, %v509_v52  ;;  %v510_v55 = vmul.f32 0.015625, %v504_v53  ;;  %v516_v56 = vmul.f32 %v786_v31, %v1496_v51 }
 0x2a3   : > { %v1501_v57 = vsub.f32 %v478_v33, %v510_v55  ;;  %v520_v58 = vmul.f32 %v516_v56, %v516_v56  ;;  %v517_v59 = vmul.f32 %v786_v31, %v1498_v54  ;;  %v543_v33 = vld [vmem:[#allocation8 + $0x18] sm:$0xff] }
 0x2a4   : > { %v507_v60 = vpop.xlane.xlu0 %506 }
 0x2a5   : > { %v511_v61 = vmul.f32 0.015625, %v507_v60  ;;  %v524_v62 = vsel %vm308_vm0, %v520_v58, 0.0  ;;  %v521_v63 = vmul.f32 %v517_v59, %v517_v59  ;;  %v518_v0 = vmul.f32 %v786_v31, %v1501_v57 }
 0x2a6   : > { %525 = vadd.xlane.f32.xlu1 %v524_v62 }
 0x2a7   : > { %v1506_v1 = vsub.f32 %v481_v39, %v511_v61  ;;  %v527_v2 = vsel %vm308_vm0, %v521_v63, 0.0  ;;  %v522_v3 = vmul.f32 %v518_v0, %v518_v0 }
 0x2a8   : > { %528 = vadd.xlane.f32.xlu0 %v527_v2 }
 0x2a9   : > { %v530_v4 = vsel %vm308_vm0, %v522_v3, 0.0  ;;  %v519_v5 = vmul.f32 %v786_v31, %v1506_v1  ;;  %v582_v31 = vld [vmem:[#allocation9 + $0x10] sm:$0xff] }
 0x2aa   : > { %531 = vadd.xlane.f32.xlu1 %v530_v4 }
 0x2ab   : > { %v523_v6 = vmul.f32 %v519_v5, %v519_v5 }
 0x2ad   : > { %v533_v7 = vsel %vm308_vm0, %v523_v6, 0.0 }
 0x2ae   : > { %534 = vadd.xlane.f32.xlu0 %v533_v7 }
 0x333   : > { %v526_v8 = vpop.xlane.xlu1 %525 }
 0x334   : > { %v536_v9 = vmul.f32 0.015625, %v526_v8 }
 0x335   : > { %v529_v10 = vpop.xlane.xlu0 %528 }
 0x336   : > { %v544_v11 = vadd.f32 1e-05, %v536_v9  ;;  %v537_v12 = vmul.f32 0.015625, %v529_v10 }
 0x337   : > { %v532_v13 = vpop.xlane.xlu1 %531 }
 0x338   : > { %939 = vrsqrt.f32 %v544_v11  ;;  %v545_v14 = vadd.f32 1e-05, %v537_v12  ;;  %v538_v15 = vmul.f32 0.015625, %v532_v13 }
 0x33a   : > { %941 = vrsqrt.f32 %v545_v14  ;;  %v546_v16 = vadd.f32 1e-05, %v538_v15 }
 0x33b   : > { %v535_v17 = vpop.xlane.xlu0 %534 }
 0x33c   : > { %943 = vrsqrt.f32 %v546_v16  ;;  %v539_v20 = vmul.f32 0.015625, %v535_v17 }
 0x33e   : > { %v547_v27 = vadd.f32 1e-05, %v539_v20 }
 0x340   : > { %945 = vrsqrt.f32 %v547_v27 }
 0x342   : > { %v940_v19 = vpop.eup %939 }
 0x343   : > { %v552_v22 = vmul.f32 %v940_v19, %v540_v18 }
 0x344   : > { %v942_v23 = vpop.eup %941 }
 0x345   : > { %558 = vperm.xlu1 %922, %v552_v22   ;;  %v553_v25 = vmul.f32 %v942_v23, %v541_v21 }
 0x346   : > { %v944_v26 = vpop.eup %943 }
 0x347   : > { %563 = vperm.xlu0 %923, %v553_v25   ;;  %v554_v28 = vmul.f32 %v944_v26, %v542_v24 }
 0x349   : > { %568 = vperm.xlu1 %922, %v554_v28  }
 0x34a   : > { %v946_v32 = vpop.eup %945 }
 0x34b   : > { %v555_v34 = vmul.f32 %v946_v32, %v543_v33 }
 0x34d   : > { %586 = vperm.xlu1 %922, %v580_v29  }
 0x351   : > { %591 = vperm.xlu1 %922, %v581_v30  }
 0x355   : > { %596 = vperm.xlu1 %922, %v582_v31  }
 0x359   : > { %573 = vperm.xlu1 %922, %v555_v34  }
 0x35d   : > { %601 = vperm.xlu1 %922, %v583_v35  }
 0x3c4   : > { %v559_v36 = vpop.permute.xlu1 %558 }
 0x3c5   : > { %v576_v38 = vmul.f32 %v559_v36, %v1496_v51 }
 0x3c6   : > { %v564_v39 = vpop.permute.xlu0 %563 }
 0x3c7   : > { %v577_v42 = vmul.f32 %v564_v39, %v1498_v54 }
 0x3c8   : > { %v569_v37 = vpop.permute.xlu1 %568 }
 0x3c9   : > { %v578_v46 = vmul.f32 %v569_v37, %v1501_v57 }
 0x3cc   : > { %v587_v40 = vpop.permute.xlu1 %586 }
 0x3cd   : > { %v604_v41 = vadd.f32 %v587_v40, %v576_v38 }
 0x3cf   : > { %v797_v43 = vpack.c.bf16 %v604_v41, %v604_v41 }
 0x3d0   : > { %v592_v44 = vpop.permute.xlu1 %591 }
 0x3d1   : > { %625 = vst.msk [vmem:[%s298_s13] sm:$0xf] %vm624_vm2, %v797_v43  ;;  %v605_v45 = vadd.f32 %v592_v44, %v577_v42 }
 0x3d3   : > { %v798_v47 = vpack.c.bf16 %v605_v45, %v605_v45 }
 0x3d4   : > { %v597_v48 = vpop.permute.xlu1 %596 }
 0x3d5   : > { %626 = vst.msk [vmem:[%s298_s13 + $0x4] sm:$0xf] %vm624_vm2, %v798_v47  ;;  %v606_v49 = vadd.f32 %v597_v48, %v578_v46 }
 0x3d7   : > { %v799_v50 = vpack.c.bf16 %v606_v49, %v606_v49 }
 0x3d8   : > { %v574_v51 = vpop.permute.xlu1 %573 }
 0x3d9   : > { %627 = vst.msk [vmem:[%s298_s13 + $0x8] sm:$0xf] %vm624_vm2, %v799_v50  ;;  %v579_v52 = vmul.f32 %v574_v51, %v1506_v1 }
 0x3dc   : > { %v602_v53 = vpop.permute.xlu1 %601 }
 0x3dd   : > { %v607_v54 = vadd.f32 %v602_v53, %v579_v52 }
 0x3df   : > { %v800_v55 = vpack.c.bf16 %v607_v54, %v607_v54 }
 0x3e1   : > { %628 = vst.msk [vmem:[%s298_s13 + $0xc] sm:$0xf] %vm624_vm2, %v800_v55 }
 0x3e2   : > { %1102 = shalt.err (!%p1099_p13)
}
 0x3e3   : > { %s1103_s8 = scalar_lea.hbm %s1526_s30, 256  ;;  %s1107_s10 = scalar_lea.hbm %s1576_s5, 512 }
 0x3e4   : > { %p1104_p9 = scmp.ne.s32.totalorder %s1526_s30, %s1103_s8  ;;  %p1108_p4 = scmp.lt.u32.totalorder %s1526_s30, %s1576_s5 }
 0x3e5   : > { %p1109_p8 = scmp.lt.u32.totalorder %s1107_s10, %s1103_s8  ;;  %p1111_p3 = scmp.lt.u32.totalorder %s1103_s8, %s1526_s30 }
 0x3e6   : > { %p1105_p0 = pnand %p1104_p9, %p1384_p10 }
 0x3e7   : > { %p1110_p6 = por %p1109_p8, %p1108_p4 }
 0x3e8   : > { %p1106_p11 = pneg %p1105_p0 }
 0x3e9   : > { %p1112_p5 = por %p1111_p3, %p1110_p6 }
 0x3eb   : > { %p1113_p7 = pnand %p1112_p5, %p1106_p11 }
 0x3ed   : > { %1116 = shalt.err (!%p1113_p7)
}
 0x3ee   : > { %s1184_s16 = smov 64   ;;  %s1185_s29 = smov 4  }
 0x3ef   : > { %838 = dma.vmem_to_hbm [thread:$0]  (%p1384_p10), %s1521_s27, 256, %s1526_s30, %s630_s24, %s1184_s16, %s1184_s16, %s1185_s29  }
 0x3f0 PF: > { %s658_s9 = sand.u32 1, %s1151_s18   ;;  %p1594_p12 = scmp.ne.s32.totalorder %s1581_s25, 0 }
 0x3f1   : > { %p1595_p1 = scmp.ge.s32.totalorder %s1163_s21, 2  ;;  %s659_s26 = scalar_lea.sflag [#allocation5], %s658_s9 }
 0x3f3   : > { %p858_p2 = pnand %p1595_p1, %p1594_p12 }
 0x3f5   : > { %1146 = dma.done.wait (!%p858_p2), %s659_s26, 256  }
 0x3f6   : > { %1148 = vsyncadd (!%p858_p2), %s659_s26, 4294967040  ;;  %p20_p13 = scmp.ge.s32.totalorder %s1374_s14, 4   ;;  %s1596_s18 = smov %s1155_s19 }
 0x3f7   : > { %s1597_s19 = smov %s1159_s20  ;;  %s1598_s20 = smov %s1390_s17 }
 0x3f8   : > { %s1599_s21 = smov %s1374_s14  ;;  %22 = sbr.rel (!%p20_p13) target bundleno = 7 (0x7), region = 101 }
 0x3ff   :  { %664 = vsyncpa [#allocation4], 1 }
 0x400   :  { %666 = vsyncpa [#allocation4 + $0x1], 1 }
 0x401   :  { %667 = vsyncpa [#allocation7], 1 }
 0x402   :  { %668 = vsyncpa [#allocation10], 1 }
 0x403   :  { %669 = vsyncpa [#allocation5], 1 }
 0x404   :  { %671 = vsyncpa [#allocation5 + $0x1], 1 }

</bundles_post_ra>
